<compile_context>
chip_gen: v7x
topology: tpu7x:2x2x1
jax: 0.10.0
libtpu: 0.0.40
codegen_flags: <defaults>
</compile_context>

<pallas_src>
import functools

import jax
import jax.numpy as jnp
from jax import lax
from jax.experimental import pallas as pl
from jax.experimental.pallas import tpu as pltpu

_VMEM_LIMIT = 32 * 1024 * 1024  # conservative: fits default scoped VMEM on v5e/v6e/v7x


def _pick_tile(dim, target, align):
    """Largest divisor of `dim` that is <= target and a multiple of `align`,
    else the full dim (full-extent block always satisfies the (8,128) rule)."""
    if dim <= target:
        return dim
    t = (target // align) * align
    while t >= align:
        if dim % t == 0:
            return t
        t -= align
    return dim


# ----------------------------- Pallas kernels -----------------------------

def _ln_linear_kernel(x_ref, g_ref, b_ref, w_ref, bias_ref, o_ref):
    # fused LayerNorm (f32) + matmul (bf16 x bf16 -> f32 acc) + bias.
    x = x_ref[...]                                        # (tm, H) f32
    mu = jnp.mean(x, axis=-1, keepdims=True)
    var = jnp.mean((x - mu) ** 2, axis=-1, keepdims=True)
    xn = (x - mu) * lax.rsqrt(var + 1e-5) * g_ref[...] + b_ref[...]
    acc = jnp.dot(xn.astype(jnp.bfloat16), w_ref[...],
                  preferred_element_type=jnp.float32)
    o_ref[...] = (acc + bias_ref[...]).astype(o_ref.dtype)


def _linear_residual_kernel(x_ref, w_ref, bias_ref, res_ref, o_ref):
    # attention output projection with the residual add fused into the epilogue.
    acc = jnp.dot(x_ref[...], w_ref[...], preferred_element_type=jnp.float32)
    o_ref[...] = acc + bias_ref[...] + res_ref[...]


def _ln_mlp_residual_kernel(x_ref, g_ref, b_ref, w1_ref, b1_ref, w2_ref, b2_ref,
                            o_ref):
    # fused LayerNorm + fc1 + gelu + fc2 + residual (all epilogue math in f32).
    x = x_ref[...]                                        # (tm, H) f32
    mu = jnp.mean(x, axis=-1, keepdims=True)
    var = jnp.mean((x - mu) ** 2, axis=-1, keepdims=True)
    xn = (x - mu) * lax.rsqrt(var + 1e-5) * g_ref[...] + b_ref[...]
    h = jnp.dot(xn.astype(jnp.bfloat16), w1_ref[...],
                preferred_element_type=jnp.float32) + b1_ref[...]
    h = jax.nn.gelu(h)   # tanh-approx gelu, matches GLM's gelu_impl
    y = jnp.dot(h.astype(jnp.bfloat16), w2_ref[...],
                preferred_element_type=jnp.float32) + b2_ref[...]
    o_ref[...] = y + x   # residual fused


def _layernorm_kernel(x_ref, g_ref, b_ref, o_ref):
    x = x_ref[...]
    mu = jnp.mean(x, axis=-1, keepdims=True)
    var = jnp.mean((x - mu) ** 2, axis=-1, keepdims=True)
    o_ref[...] = (x - mu) * lax.rsqrt(var + 1e-5) * g_ref[...] + b_ref[...]


def _flash_attn_kernel(q_ref, k_ref, v_ref, mask_ref, o_ref, m_sc, l_sc, acc_sc):
    # blocks: q (1,tq,HD) bf16, k/v (1,tkv,HD) bf16, mask (1,1,tq,tkv) f32,
    # out (1,tq,HD) bf16 written into a lane-dense (B,S,H) buffer.
    ki = pl.program_id(3)

    @pl.when(ki == 0)
    def _():
        m_sc[...] = jnp.full(m_sc.shape, -jnp.inf, m_sc.dtype)
        l_sc[...] = jnp.zeros(l_sc.shape, l_sc.dtype)
        acc_sc[...] = jnp.zeros(acc_sc.shape, acc_sc.dtype)

    q = q_ref[0]
    k = k_ref[0]
    v = v_ref[0]
    mask = mask_ref[0, 0]

    # q @ k^T via dot_general (no explicit K transpose), f32 accumulation.
    s = lax.dot_general(q, k, dimension_numbers=(((1,), (1,)), ((), ())),
                        preferred_element_type=jnp.float32)
    s = s * (1.0 / (q.shape[-1] ** 0.5))
    # GLM masking: scores * mask - 10000 * (1 - mask)
    s = s * mask - 10000.0 * (1.0 - mask)

    m_prev = m_sc[...]
    m_new = jnp.maximum(m_prev, s.max(axis=-1, keepdims=True))
    alpha = jnp.exp(m_prev - m_new)
    p = jnp.exp(s - m_new)
    l_sc[...] = alpha * l_sc[...] + p.sum(axis=-1, keepdims=True)
    acc_sc[...] = alpha * acc_sc[...] + jnp.dot(
        p.astype(jnp.bfloat16), v, preferred_element_type=jnp.float32)
    m_sc[...] = m_new

    @pl.when(ki == pl.num_programs(3) - 1)
    def _():
        o_ref[0] = (acc_sc[...] * pl.reciprocal(l_sc[...], approx=True)
                    ).astype(o_ref.dtype)


def _logits_kernel(x_ref, w_ref, o_ref, acc_ref):
    # x:(tm,tk) bf16, w:(tv,tk) bf16 -> o:(tm,tv) f32 = x @ w.T (K-accumulated)
    @pl.when(pl.program_id(2) == 0)
    def _():
        acc_ref[...] = jnp.zeros_like(acc_ref)

    acc_ref[...] += lax.dot_general(
        x_ref[...], w_ref[...],
        dimension_numbers=(((1,), (1,)), ((), ())),
        preferred_element_type=jnp.float32)

    @pl.when(pl.program_id(2) == pl.num_programs(2) - 1)
    def _():
        o_ref[...] = acc_ref[...]


# ----------------------------- kernel wrappers -----------------------------

def ln_linear(x2d, gamma, beta, w, bias):
    M, H = x2d.shape
    N = w.shape[1]
    tm = _pick_tile(M, 128, 16)
    tn = _pick_tile(N, 512, 128)
    return pl.pallas_call(
        _ln_linear_kernel,
        out_shape=jax.ShapeDtypeStruct((M, N), jnp.bfloat16),
        grid=(M // tm, N // tn),
        in_specs=[
            pl.BlockSpec((tm, H), lambda i, j: (i, 0)),
            pl.BlockSpec((1, H), lambda i, j: (0, 0)),
            pl.BlockSpec((1, H), lambda i, j: (0, 0)),
            pl.BlockSpec((H, tn), lambda i, j: (0, j)),
            pl.BlockSpec((1, tn), lambda i, j: (0, j)),
        ],
        out_specs=pl.BlockSpec((tm, tn), lambda i, j: (i, j)),
        compiler_params=pltpu.CompilerParams(
            dimension_semantics=("parallel", "parallel"),
            vmem_limit_bytes=_VMEM_LIMIT),
    )(x2d, gamma, beta, w, bias)


def linear_residual(x2d, w, bias, res2d):
    M, K = x2d.shape
    N = w.shape[1]
    tm = _pick_tile(M, 128, 16)
    tn = _pick_tile(N, 512, 128)
    return pl.pallas_call(
        _linear_residual_kernel,
        out_shape=jax.ShapeDtypeStruct((M, N), jnp.float32),
        grid=(M // tm, N // tn),
        in_specs=[
            pl.BlockSpec((tm, K), lambda i, j: (i, 0)),
            pl.BlockSpec((K, tn), lambda i, j: (0, j)),
            pl.BlockSpec((1, tn), lambda i, j: (0, j)),
            pl.BlockSpec((tm, tn), lambda i, j: (i, j)),
        ],
        out_specs=pl.BlockSpec((tm, tn), lambda i, j: (i, j)),
        compiler_params=pltpu.CompilerParams(
            dimension_semantics=("parallel", "parallel"),
            vmem_limit_bytes=_VMEM_LIMIT),
    )(x2d, w, bias, res2d)


def ln_mlp_residual(x2d, gamma, beta, w1, b1, w2, b2):
    M, H = x2d.shape
    FF = w1.shape[1]
    tm = _pick_tile(M, 128, 16)
    return pl.pallas_call(
        _ln_mlp_residual_kernel,
        out_shape=jax.ShapeDtypeStruct((M, H), jnp.float32),
        grid=(M // tm,),
        in_specs=[
            pl.BlockSpec((tm, H), lambda i: (i, 0)),
            pl.BlockSpec((1, H), lambda i: (0, 0)),
            pl.BlockSpec((1, H), lambda i: (0, 0)),
            pl.BlockSpec((H, FF), lambda i: (0, 0)),
            pl.BlockSpec((1, FF), lambda i: (0, 0)),
            pl.BlockSpec((FF, H), lambda i: (0, 0)),
            pl.BlockSpec((1, H), lambda i: (0, 0)),
        ],
        out_specs=pl.BlockSpec((tm, H), lambda i: (i, 0)),
        compiler_params=pltpu.CompilerParams(
            dimension_semantics=("parallel",),
            vmem_limit_bytes=_VMEM_LIMIT),
    )(x2d, gamma, beta, w1, b1, w2, b2)


def layernorm(x2d, g, b):
    M, H = x2d.shape
    tm = _pick_tile(M, 128, 16)
    return pl.pallas_call(
        _layernorm_kernel,
        out_shape=jax.ShapeDtypeStruct((M, H), jnp.float32),
        grid=(M // tm,),
        in_specs=[
            pl.BlockSpec((tm, H), lambda i: (i, 0)),
            pl.BlockSpec((1, H), lambda i: (0, 0)),
            pl.BlockSpec((1, H), lambda i: (0, 0)),
        ],
        out_specs=pl.BlockSpec((tm, H), lambda i: (i, 0)),
        compiler_params=pltpu.CompilerParams(
            dimension_semantics=("parallel",),
            vmem_limit_bytes=_VMEM_LIMIT),
    )(x2d, g, b)


def attention_core(qkv, mask, num_heads):
    """qkv: (B, S, 3H) bf16 fused projection; mask: (B, 1, S, S) f32.
    Returns context (B, S, H) bf16 (heads already merged, lane-dense)."""
    B, S, H3 = qkv.shape
    H = H3 // 3
    NH = num_heads
    HD = H // NH
    # TODO(synk): per-head BlockSpec slicing needs HD % 128 == 0; sub-128 head dims
    #             would need a (B,NH,S,HD) layout instead.
    assert HD % 128 == 0, "head_dim must be a multiple of 128 for this layout"
    tq = _pick_tile(S, 128, 16)
    tkv = _pick_tile(S, 128, 128)
    grid = (B, NH, S // tq, S // tkv)
    return pl.pallas_call(
        _flash_attn_kernel,
        out_shape=jax.ShapeDtypeStruct((B, S, H), jnp.bfloat16),
        grid=grid,
        in_specs=[
            # Q / K / V head-slices straight out of the fused QKV tensor.
            pl.BlockSpec((1, tq, HD), lambda b, h, qi, ki: (b, qi, h)),
            pl.BlockSpec((1, tkv, HD), lambda b, h, qi, ki: (b, ki, NH + h)),
            pl.BlockSpec((1, tkv, HD), lambda b, h, qi, ki: (b, ki, 2 * NH + h)),
            pl.BlockSpec((1, 1, tq, tkv), lambda b, h, qi, ki: (b, 0, qi, ki)),
        ],
        out_specs=pl.BlockSpec((1, tq, HD), lambda b, h, qi, ki: (b, qi, h)),
        scratch_shapes=[
            pltpu.VMEM((tq, 1), jnp.float32),   # running max
            pltpu.VMEM((tq, 1), jnp.float32),   # running denom
            pltpu.VMEM((tq, HD), jnp.float32),  # accumulator
        ],
        compiler_params=pltpu.CompilerParams(
            dimension_semantics=("parallel", "parallel", "parallel", "arbitrary"),
            vmem_limit_bytes=_VMEM_LIMIT),
    )(qkv, qkv, qkv, mask)


def logits_from_embedding(x2d_bf16, word_emb_bf16):
    M, H = x2d_bf16.shape
    V = word_emb_bf16.shape[0]
    tm = _pick_tile(M, 128, 16)
    tv = _pick_tile(V, 512, 128)
    tk = _pick_tile(H, 512, 128)
    return pl.pallas_call(
        _logits_kernel,
        out_shape=jax.ShapeDtypeStruct((M, V), jnp.float32),
        grid=(M // tm, V // tv, H // tk),
        in_specs=[
            pl.BlockSpec((tm, tk), lambda i, j, k: (i, k)),
            pl.BlockSpec((tv, tk), lambda i, j, k: (j, k)),
        ],
        out_specs=pl.BlockSpec((tm, tv), lambda i, j, k: (i, j)),
        scratch_shapes=[pltpu.VMEM((tm, tv), jnp.float32)],
        compiler_params=pltpu.CompilerParams(
            dimension_semantics=("parallel", "parallel", "arbitrary"),
            vmem_limit_bytes=_VMEM_LIMIT),
    )(x2d_bf16, word_emb_bf16)


# ----------------------------- model (glue in JAX) -----------------------------

def init_params(key, vocab, hidden, num_heads, num_layers, max_seq):
    def normal(k, shape, std=0.02, dtype=jnp.float32):
        return (std * jax.random.normal(k, shape, dtype=jnp.float32)).astype(dtype)

    bf16 = jnp.bfloat16
    k_emb, k_enc, k_dec = jax.random.split(key, 3)
    params = {"word_emb": normal(k_emb, (vocab, hidden))}

    def init_transformer(k):
        kk = jax.random.split(k, num_layers + 1)
        t = {"pos_emb": normal(kk[0], (max_seq, hidden)), "layers": []}
        for i in range(num_layers):
            lk = jax.random.split(kk[i + 1], 4)
            t["layers"].append({
                "ln1_g": jnp.ones((1, hidden), jnp.float32),
                "ln1_b": jnp.zeros((1, hidden), jnp.float32),
                "qkv_w": normal(lk[0], (hidden, 3 * hidden), dtype=bf16),
                "qkv_b": jnp.zeros((1, 3 * hidden), jnp.float32),
                "dense_w": normal(lk[1], (hidden, hidden), dtype=bf16),
                "dense_b": jnp.zeros((1, hidden), jnp.float32),
                "ln2_g": jnp.ones((1, hidden), jnp.float32),
                "ln2_b": jnp.zeros((1, hidden), jnp.float32),
                "fc1_w": normal(lk[2], (hidden, 4 * hidden), dtype=bf16),
                "fc1_b": jnp.zeros((1, 4 * hidden), jnp.float32),
                "fc2_w": normal(lk[3], (4 * hidden, hidden), dtype=bf16),
                "fc2_b": jnp.zeros((1, hidden), jnp.float32),
            })
        t["lnf_g"] = jnp.ones((1, hidden), jnp.float32)
        t["lnf_b"] = jnp.zeros((1, hidden), jnp.float32)
        return t

    params["encoder"] = init_transformer(k_enc)
    params["decoder"] = init_transformer(k_dec)
    return params


def transformer_forward(tparams, emb, position_ids, mask, num_heads):
    B, S, H = emb.shape
    pos = jnp.take(tparams["pos_emb"], position_ids, axis=0)      # (B,S,H)
    h2d = (emb + pos).astype(jnp.float32).reshape(B * S, H)       # f32 residual stream

    for layer in tparams["layers"]:
        # --- self attention block: fused LN1 + QKV, flash attention, dense + residual
        qkv = ln_linear(h2d, layer["ln1_g"], layer["ln1_b"],
                        layer["qkv_w"], layer["qkv_b"])           # (B*S, 3H) bf16
        ctx = attention_core(qkv.reshape(B, S, 3 * H), mask, num_heads)  # (B,S,H) bf16
        h2d = linear_residual(ctx.reshape(B * S, H),
                              layer["dense_w"], layer["dense_b"], h2d)   # f32

        # --- MLP block: fused LN2 + fc1 + gelu + fc2 + residual
        h2d = ln_mlp_residual(h2d, layer["ln2_g"], layer["ln2_b"],
                              layer["fc1_w"], layer["fc1_b"],
                              layer["fc2_w"], layer["fc2_b"])            # f32

    hf = layernorm(h2d, tparams["lnf_g"], tparams["lnf_b"])
    return hf.reshape(B, S, H)


def encoder_decoder_forward(params, source_ids, target_ids,
                            source_position_ids, target_position_ids,
                            source_mask, target_mask, *, num_heads,
                            output_predict=True, parallel_output=True):
    src_emb = jnp.take(params["word_emb"], source_ids, axis=0)
    tgt_emb = jnp.take(params["word_emb"], target_ids, axis=0)

    enc_out = transformer_forward(params["encoder"], src_emb,
                                  source_position_ids, source_mask, num_heads)
    dec_out = transformer_forward(params["decoder"], tgt_emb,
                                  target_position_ids, target_mask, num_heads)
    del enc_out  # not consumed by the reference forward either (XLA will DCE it)

    if output_predict:
        B, S, H = dec_out.shape
        V = params["word_emb"].shape[0]
        logits = logits_from_embedding(
            dec_out.reshape(B * S, H).astype(jnp.bfloat16),
            params["word_emb"].astype(jnp.bfloat16)).reshape(B, S, V)
        # parallel_output=True -> return partition-local logits (single partition here)
        return (logits,)
    return (dec_out,)


# ----------------------------- demo -----------------------------

if __name__ == "__main__":
    # small but TPU-tile-friendly shapes: head_dim = 128, lane dims multiples of 128
    B, S, H, NH, V, L, MAX_SEQ = 2, 128, 256, 2, 512, 2, 128

    key = jax.random.PRNGKey(0)
    k_params, k_src, k_tgt = jax.random.split(key, 3)
    params = init_params(k_params, V, H, NH, L, MAX_SEQ)

    source_ids = jax.random.randint(k_src, (B, S), 0, V, dtype=jnp.int32)
    target_ids = jax.random.randint(k_tgt, (B, S), 0, V, dtype=jnp.int32)
    source_position_ids = jnp.broadcast_to(jnp.arange(S, dtype=jnp.int32), (B, S))
    target_position_ids = jnp.broadcast_to(jnp.arange(S, dtype=jnp.int32), (B, S))
    source_mask = jnp.ones((B, 1, S, S), jnp.float32)               # bidirectional
    target_mask = jnp.broadcast_to(
        jnp.tril(jnp.ones((S, S), jnp.float32)), (B, 1, S, S))      # causal

    fwd = jax.jit(functools.partial(encoder_decoder_forward, params, num_heads=NH))
    (logits,) = fwd(source_ids, target_ids, source_position_ids,
                    target_position_ids, source_mask, target_mask)
    jax.block_until_ready(logits)
    assert logits.shape == (B, S, V) and logits.dtype == jnp.float32
    print("KERNEL_OK")
</pallas_src>

<mosaic_0001>
module attributes {stable_mosaic.version = 11 : i64} {
  func.func @_flash_attn_kernel(%arg0: i32, %arg1: i32, %arg2: i32, %arg3: i32, %arg4: memref<1x128x128xbf16, #tpu.memory_space<vmem>>, %arg5: memref<1x128x128xbf16, #tpu.memory_space<vmem>>, %arg6: memref<1x128x128xbf16, #tpu.memory_space<vmem>>, %arg7: memref<1x1x128x128xf32, #tpu.memory_space<vmem>>, %arg8: memref<1x128x128xbf16, #tpu.memory_space<vmem>>, %arg9: memref<128x1xf32, #tpu.memory_space<vmem>>, %arg10: memref<128x1xf32, #tpu.memory_space<vmem>>, %arg11: memref<128x128xf32, #tpu.memory_space<vmem>>) attributes {dimension_semantics = [#tpu.dimension_semantics<parallel>, #tpu.dimension_semantics<parallel>, #tpu.dimension_semantics<parallel>, #tpu.dimension_semantics<arbitrary>], iteration_bounds = array<i64: 2, 2, 1, 1>, scalar_prefetch = 0 : i64, scratch_operands = 3 : i64, tpu.core_type = #tpu.core_type<tc>, window_params = [{transform_indices = @transform_0, window_bounds = array<i64: 1, 128, 128>}, {transform_indices = @transform_1, window_bounds = array<i64: 1, 128, 128>}, {transform_indices = @transform_2, window_bounds = array<i64: 1, 128, 128>}, {transform_indices = @transform_3, window_bounds = array<i64: 1, 1, 128, 128>}, {transform_indices = @transform_4, window_bounds = array<i64: 1, 128, 128>}]} {
    %c0_i32 = arith.constant 0 : i32
    %0 = arith.cmpi eq, %arg3, %c0_i32 : i32
    %1 = arith.extui %0 : i1 to i32
    %c0_i32_0 = arith.constant 0 : i32
    %2 = arith.cmpi ne, %1, %c0_i32_0 : i32
    scf.if %2 {
      %cst_33 = arith.constant 0xFF800000 : f32
      %46 = vector.broadcast %cst_33 : f32 to vector<128x1xf32>
      %c0_34 = arith.constant 0 : index
      %c0_35 = arith.constant 0 : index
      %47 = vector.load %arg9[%c0_34, %c0_35] : memref<128x1xf32, #tpu.memory_space<vmem>>, vector<128x1xf32>
      tpu.vector_store %arg9[%c0_34, %c0_35], %46 {strides = array<i32>} : memref<128x1xf32, #tpu.memory_space<vmem>>, vector<128x1xf32>,
      %cst_36 = arith.constant 0.000000e+00 : f32
      %48 = vector.broadcast %cst_36 : f32 to vector<128x1xf32>
      %c0_37 = arith.constant 0 : index
      %c0_38 = arith.constant 0 : index
      %49 = vector.load %arg10[%c0_37, %c0_38] : memref<128x1xf32, #tpu.memory_space<vmem>>, vector<128x1xf32>
      tpu.vector_store %arg10[%c0_37, %c0_38], %48 {strides = array<i32>} : memref<128x1xf32, #tpu.memory_space<vmem>>, vector<128x1xf32>,
      %cst_39 = arith.constant 0.000000e+00 : f32
      %50 = vector.broadcast %cst_39 : f32 to vector<128x128xf32>
      %c0_40 = arith.constant 0 : index
      %c0_41 = arith.constant 0 : index
      %51 = vector.load %arg11[%c0_40, %c0_41] : memref<128x128xf32, #tpu.memory_space<vmem>>, vector<128x128xf32>
      tpu.vector_store %arg11[%c0_40, %c0_41], %50 {strides = array<i32>} : memref<128x128xf32, #tpu.memory_space<vmem>>, vector<128x128xf32>,
    } else {
    }
    %c0 = arith.constant 0 : index
    %c0_1 = arith.constant 0 : index
    %c0_2 = arith.constant 0 : index
    %3 = vector.load %arg4[%c0, %c0_1, %c0_2] : memref<1x128x128xbf16, #tpu.memory_space<vmem>>, vector<1x128x128xbf16>
    %4 = vector.shape_cast %3 : vector<1x128x128xbf16> to vector<128x128xbf16>
    %c0_3 = arith.constant 0 : index
    %c0_4 = arith.constant 0 : index
    %c0_5 = arith.constant 0 : index
    %5 = vector.load %arg5[%c0_3, %c0_4, %c0_5] : memref<1x128x128xbf16, #tpu.memory_space<vmem>>, vector<1x128x128xbf16>
    %6 = vector.shape_cast %5 : vector<1x128x128xbf16> to vector<128x128xbf16>
    %c0_6 = arith.constant 0 : index
    %c0_7 = arith.constant 0 : index
    %c0_8 = arith.constant 0 : index
    %7 = vector.load %arg6[%c0_6, %c0_7, %c0_8] : memref<1x128x128xbf16, #tpu.memory_space<vmem>>, vector<1x128x128xbf16>
    %8 = vector.shape_cast %7 : vector<1x128x128xbf16> to vector<128x128xbf16>
    %c0_9 = arith.constant 0 : index
    %c0_10 = arith.constant 0 : index
    %c0_11 = arith.constant 0 : index
    %c0_12 = arith.constant 0 : index
    %9 = vector.load %arg7[%c0_9, %c0_10, %c0_11, %c0_12] : memref<1x1x128x128xf32, #tpu.memory_space<vmem>>, vector<1x1x128x128xf32>
    %10 = vector.shape_cast %9 : vector<1x1x128x128xf32> to vector<128x128xf32>
    %cst = arith.constant dense<0.000000e+00> : vector<128x128xf32>
    %11 = tpu.matmul %4, %6, %cst {dimension_numbers = #tpu.dot_dimension_numbers<[1], [1], [0], [0], [0, 0, 1, 0], [], []>} : vector<128x128xbf16>, vector<128x128xbf16>, vector<128x128xf32> -> vector<128x128xf32>
    %cst_13 = arith.constant 0.0883883461 : f32
    %12 = vector.broadcast %cst_13 : f32 to vector<128x128xf32>
    %13 = arith.mulf %11, %12 : vector<128x128xf32>
    %14 = arith.mulf %13, %10 : vector<128x128xf32>
    %cst_14 = arith.constant 1.000000e+00 : f32
    %15 = vector.broadcast %cst_14 : f32 to vector<128x128xf32>
    %16 = arith.subf %15, %10 : vector<128x128xf32>
    %cst_15 = arith.constant 1.000000e+04 : f32
    %17 = vector.broadcast %cst_15 : f32 to vector<128x128xf32>
    %18 = arith.mulf %17, %16 : vector<128x128xf32>
    %19 = arith.subf %14, %18 : vector<128x128xf32>
    %c0_16 = arith.constant 0 : index
    %c0_17 = arith.constant 0 : index
    %20 = vector.load %arg9[%c0_16, %c0_17] : memref<128x1xf32, #tpu.memory_space<vmem>>, vector<128x1xf32>
    %cst_18 = arith.constant dense<0xFF800000> : vector<128xf32>
    %21 = vector.multi_reduction <maximumf>, %19, %cst_18 [1] : vector<128x128xf32> to vector<128xf32>
    %22 = vector.shape_cast %21 : vector<128xf32> to vector<128x1xf32>
    %23 = arith.maximumf %20, %22 : vector<128x1xf32>
    %24 = arith.subf %20, %23 : vector<128x1xf32>
    %25 = math.exp %24 : vector<128x1xf32>
    %26 = vector.broadcast %23 : vector<128x1xf32> to vector<128x128xf32>
    %27 = arith.subf %19, %26 : vector<128x128xf32>
    %28 = math.exp %27 : vector<128x128xf32>
    %c0_19 = arith.constant 0 : index
    %c0_20 = arith.constant 0 : index
    %29 = vector.load %arg10[%c0_19, %c0_20] : memref<128x1xf32, #tpu.memory_space<vmem>>, vector<128x1xf32>
    %30 = arith.mulf %25, %29 : vector<128x1xf32>
    %cst_21 = arith.constant dense<0.000000e+00> : vector<128xf32>
    %31 = vector.multi_reduction <add>, %28, %cst_21 [1] : vector<128x128xf32> to vector<128xf32>
    %32 = vector.shape_cast %31 : vector<128xf32> to vector<128x1xf32>
    %33 = arith.addf %30, %32 : vector<128x1xf32>
    %c0_22 = arith.constant 0 : index
    %c0_23 = arith.constant 0 : index
    %34 = vector.load %arg10[%c0_22, %c0_23] : memref<128x1xf32, #tpu.memory_space<vmem>>, vector<128x1xf32>
    tpu.vector_store %arg10[%c0_22, %c0_23], %33 {strides = array<i32>} : memref<128x1xf32, #tpu.memory_space<vmem>>, vector<128x1xf32>,
    %c0_24 = arith.constant 0 : index
    %c0_25 = arith.constant 0 : index
    %35 = vector.load %arg11[%c0_24, %c0_25] : memref<128x128xf32, #tpu.memory_space<vmem>>, vector<128x128xf32>
    %36 = vector.broadcast %25 : vector<128x1xf32> to vector<128x128xf32>
    %37 = arith.mulf %36, %35 : vector<128x128xf32>
    %38 = arith.truncf %28 : vector<128x128xf32> to vector<128x128xbf16>
    %cst_26 = arith.constant dense<0.000000e+00> : vector<128x128xf32>
    %39 = tpu.matmul %38, %8, %cst_26 {dimension_numbers = #tpu.dot_dimension_numbers<[1], [0], [0], [1], [0, 0, 1, 1], [], []>} : vector<128x128xbf16>, vector<128x128xbf16>, vector<128x128xf32> -> vector<128x128xf32>
    %40 = arith.addf %37, %39 : vector<128x128xf32>
    %c0_27 = arith.constant 0 : index
    %c0_28 = arith.constant 0 : index
    %41 = vector.load %arg11[%c0_27, %c0_28] : memref<128x128xf32, #tpu.memory_space<vmem>>, vector<128x128xf32>
    tpu.vector_store %arg11[%c0_27, %c0_28], %40 {strides = array<i32>} : memref<128x128xf32, #tpu.memory_space<vmem>>, vector<128x128xf32>,
    %c0_29 = arith.constant 0 : index
    %c0_30 = arith.constant 0 : index
    %42 = vector.load %arg9[%c0_29, %c0_30] : memref<128x1xf32, #tpu.memory_space<vmem>>, vector<128x1xf32>
    tpu.vector_store %arg9[%c0_29, %c0_30], %23 {strides = array<i32>} : memref<128x1xf32, #tpu.memory_space<vmem>>, vector<128x1xf32>,
    %c0_i32_31 = arith.constant 0 : i32
    %43 = arith.cmpi eq, %arg3, %c0_i32_31 : i32
    %44 = arith.extui %43 : i1 to i32
    %c0_i32_32 = arith.constant 0 : i32
    %45 = arith.cmpi ne, %44, %c0_i32_32 : i32
    scf.if %45 {
      %c0_33 = arith.constant 0 : index
      %c0_34 = arith.constant 0 : index
      %46 = vector.load %arg11[%c0_33, %c0_34] : memref<128x128xf32, #tpu.memory_space<vmem>>, vector<128x128xf32>
      %c0_35 = arith.constant 0 : index
      %c0_36 = arith.constant 0 : index
      %47 = vector.load %arg10[%c0_35, %c0_36] : memref<128x1xf32, #tpu.memory_space<vmem>>, vector<128x1xf32>
      %48 = tpu.reciprocal %47 {approx = true} : vector<128x1xf32> -> vector<128x1xf32>
      %49 = vector.broadcast %48 : vector<128x1xf32> to vector<128x128xf32>
      %50 = arith.mulf %46, %49 : vector<128x128xf32>
      %51 = arith.truncf %50 : vector<128x128xf32> to vector<128x128xbf16>
      %c0_37 = arith.constant 0 : index
      %c0_38 = arith.constant 0 : index
      %c0_39 = arith.constant 0 : index
      %52 = vector.load %arg8[%c0_37, %c0_38, %c0_39] : memref<1x128x128xbf16, #tpu.memory_space<vmem>>, vector<1x128x128xbf16>
      %53 = vector.shape_cast %52 : vector<1x128x128xbf16> to vector<128x128xbf16>
      %54 = vector.shape_cast %51 : vector<128x128xbf16> to vector<1x128x128xbf16>
      tpu.vector_store %arg8[%c0_37, %c0_38, %c0_39], %54 {strides = array<i32>} : memref<1x128x128xbf16, #tpu.memory_space<vmem>>, vector<1x128x128xbf16>,
    } else {
    }
    return
  }
  func.func @transform_0(%arg0: i32, %arg1: i32, %arg2: i32, %arg3: i32) -> (i32, i32, i32) {
    %c0_i32 = arith.constant 0 : i32
    return %arg0, %arg2, %arg1 : i32, i32, i32
  }
  func.func @transform_1(%arg0: i32, %arg1: i32, %arg2: i32, %arg3: i32) -> (i32, i32, i32) {
    %c2_i32 = arith.constant 2 : i32
    %0 = arith.addi %c2_i32, %arg1 : i32
    %c0_i32 = arith.constant 0 : i32
    return %arg0, %arg3, %0 : i32, i32, i32
  }
  func.func @transform_2(%arg0: i32, %arg1: i32, %arg2: i32, %arg3: i32) -> (i32, i32, i32) {
    %c4_i32 = arith.constant 4 : i32
    %0 = arith.addi %c4_i32, %arg1 : i32
    %c0_i32 = arith.constant 0 : i32
    return %arg0, %arg3, %0 : i32, i32, i32
  }
  func.func @transform_3(%arg0: i32, %arg1: i32, %arg2: i32, %arg3: i32) -> (i32, i32, i32, i32) {
    %c0_i32 = arith.constant 0 : i32
    %c0_i32_0 = arith.constant 0 : i32
    return %arg0, %c0_i32, %arg2, %arg3 : i32, i32, i32, i32
  }
  func.func @transform_4(%arg0: i32, %arg1: i32, %arg2: i32, %arg3: i32) -> (i32, i32, i32) {
    %c0_i32 = arith.constant 0 : i32
    return %arg0, %arg2, %arg1 : i32, i32, i32
  }
}

module attributes {stable_mosaic.version = 11 : i64} {
  func.func @_ln_linear_kernel(%arg0: i32, %arg1: i32, %arg2: memref<128x256xf32, #tpu.memory_space<vmem>>, %arg3: memref<1x256xf32, #tpu.memory_space<vmem>>, %arg4: memref<1x256xf32, #tpu.memory_space<vmem>>, %arg5: memref<256x384xbf16, #tpu.memory_space<vmem>>, %arg6: memref<1x384xf32, #tpu.memory_space<vmem>>, %arg7: memref<128x384xbf16, #tpu.memory_space<vmem>>) attributes {dimension_semantics = [#tpu.dimension_semantics<parallel>, #tpu.dimension_semantics<parallel>], iteration_bounds = array<i64: 2, 2>, scalar_prefetch = 0 : i64, scratch_operands = 0 : i64, tpu.core_type = #tpu.core_type<tc>, window_params = [{transform_indices = @transform_0, window_bounds = array<i64: 128, 256>}, {pipeline_mode = #tpu.pipeline_mode<synchronous>, transform_indices = @transform_1, window_bounds = array<i64: 1, 256>}, {pipeline_mode = #tpu.pipeline_mode<synchronous>, transform_indices = @transform_2, window_bounds = array<i64: 1, 256>}, {transform_indices = @transform_3, window_bounds = array<i64: 256, 384>}, {transform_indices = @transform_4, window_bounds = array<i64: 1, 384>}, {transform_indices = @transform_5, window_bounds = array<i64: 128, 384>}]} {
    %c0 = arith.constant 0 : index
    %c0_0 = arith.constant 0 : index
    %0 = vector.load %arg2[%c0, %c0_0] : memref<128x256xf32, #tpu.memory_space<vmem>>, vector<128x256xf32>
    %cst = arith.constant dense<0.000000e+00> : vector<128xf32>
    %1 = vector.multi_reduction <add>, %0, %cst [1] : vector<128x256xf32> to vector<128xf32>
    %2 = vector.shape_cast %1 : vector<128xf32> to vector<128x1xf32>
    %cst_1 = arith.constant 2.560000e+02 : f32
    %3 = vector.broadcast %cst_1 : f32 to vector<128x1xf32>
    %4 = arith.divf %2, %3 : vector<128x1xf32>
    %5 = vector.broadcast %4 : vector<128x1xf32> to vector<128x256xf32>
    %6 = arith.subf %0, %5 : vector<128x256xf32>
    %7 = arith.mulf %6, %6 : vector<128x256xf32>
    %cst_2 = arith.constant dense<0.000000e+00> : vector<128xf32>
    %8 = vector.multi_reduction <add>, %7, %cst_2 [1] : vector<128x256xf32> to vector<128xf32>
    %9 = vector.shape_cast %8 : vector<128xf32> to vector<128x1xf32>
    %cst_3 = arith.constant 2.560000e+02 : f32
    %10 = vector.broadcast %cst_3 : f32 to vector<128x1xf32>
    %11 = arith.divf %9, %10 : vector<128x1xf32>
    %12 = vector.broadcast %4 : vector<128x1xf32> to vector<128x256xf32>
    %13 = arith.subf %0, %12 : vector<128x256xf32>
    %cst_4 = arith.constant 9.99999974E-6 : f32
    %14 = vector.broadcast %cst_4 : f32 to vector<128x1xf32>
    %15 = arith.addf %11, %14 : vector<128x1xf32>
    %16 = math.rsqrt %15 : vector<128x1xf32>
    %17 = vector.broadcast %16 : vector<128x1xf32> to vector<128x256xf32>
    %18 = arith.mulf %13, %17 : vector<128x256xf32>
    %c0_5 = arith.constant 0 : index
    %c0_6 = arith.constant 0 : index
    %19 = vector.load %arg3[%c0_5, %c0_6] : memref<1x256xf32, #tpu.memory_space<vmem>>, vector<1x256xf32>
    %20 = vector.broadcast %19 : vector<1x256xf32> to vector<128x256xf32>
    %21 = arith.mulf %18, %20 : vector<128x256xf32>
    %c0_7 = arith.constant 0 : index
    %c0_8 = arith.constant 0 : index
    %22 = vector.load %arg4[%c0_7, %c0_8] : memref<1x256xf32, #tpu.memory_space<vmem>>, vector<1x256xf32>
    %23 = vector.broadcast %22 : vector<1x256xf32> to vector<128x256xf32>
    %24 = arith.addf %21, %23 : vector<128x256xf32>
    %25 = arith.truncf %24 : vector<128x256xf32> to vector<128x256xbf16>
    %c0_9 = arith.constant 0 : index
    %c0_10 = arith.constant 0 : index
    %26 = vector.load %arg5[%c0_9, %c0_10] : memref<256x384xbf16, #tpu.memory_space<vmem>>, vector<256x384xbf16>
    %cst_11 = arith.constant dense<0.000000e+00> : vector<128x384xf32>
    %27 = tpu.matmul %25, %26, %cst_11 {dimension_numbers = #tpu.dot_dimension_numbers<[1], [0], [0], [1], [0, 0, 1, 1], [], []>} : vector<128x256xbf16>, vector<256x384xbf16>, vector<128x384xf32> -> vector<128x384xf32>
    %c0_12 = arith.constant 0 : index
    %c0_13 = arith.constant 0 : index
    %28 = vector.load %arg6[%c0_12, %c0_13] : memref<1x384xf32, #tpu.memory_space<vmem>>, vector<1x384xf32>
    %29 = vector.broadcast %28 : vector<1x384xf32> to vector<128x384xf32>
    %30 = arith.addf %27, %29 : vector<128x384xf32>
    %31 = arith.truncf %30 : vector<128x384xf32> to vector<128x384xbf16>
    %c0_14 = arith.constant 0 : index
    %c0_15 = arith.constant 0 : index
    %32 = vector.load %arg7[%c0_14, %c0_15] : memref<128x384xbf16, #tpu.memory_space<vmem>>, vector<128x384xbf16>
    tpu.vector_store %arg7[%c0_14, %c0_15], %31 {strides = array<i32>} : memref<128x384xbf16, #tpu.memory_space<vmem>>, vector<128x384xbf16>,
    return
  }
  func.func @transform_0(%arg0: i32, %arg1: i32) -> (i32, i32) {
    %c0_i32 = arith.constant 0 : i32
    %c0_i32_0 = arith.constant 0 : i32
    return %arg0, %c0_i32 : i32, i32
  }
  func.func @transform_1(%arg0: i32, %arg1: i32) -> (i32, i32) {
    %c0_i32 = arith.constant 0 : i32
    %c0_i32_0 = arith.constant 0 : i32
    %c0_i32_1 = arith.constant 0 : i32
    return %c0_i32, %c0_i32_0 : i32, i32
  }
  func.func @transform_2(%arg0: i32, %arg1: i32) -> (i32, i32) {
    %c0_i32 = arith.constant 0 : i32
    %c0_i32_0 = arith.constant 0 : i32
    %c0_i32_1 = arith.constant 0 : i32
    return %c0_i32, %c0_i32_0 : i32, i32
  }
  func.func @transform_3(%arg0: i32, %arg1: i32) -> (i32, i32) {
    %c0_i32 = arith.constant 0 : i32
    %c0_i32_0 = arith.constant 0 : i32
    return %c0_i32, %arg1 : i32, i32
  }
  func.func @transform_4(%arg0: i32, %arg1: i32) -> (i32, i32) {
    %c0_i32 = arith.constant 0 : i32
    %c0_i32_0 = arith.constant 0 : i32
    return %c0_i32, %arg1 : i32, i32
  }
  func.func @transform_5(%arg0: i32, %arg1: i32) -> (i32, i32) {
    %c0_i32 = arith.constant 0 : i32
    return %arg0, %arg1 : i32, i32
  }
}

module attributes {stable_mosaic.version = 11 : i64} {
  func.func @_linear_residual_kernel(%arg0: i32, %arg1: i32, %arg2: memref<128x256xbf16, #tpu.memory_space<vmem>>, %arg3: memref<256x256xbf16, #tpu.memory_space<vmem>>, %arg4: memref<1x256xf32, #tpu.memory_space<vmem>>, %arg5: memref<128x256xf32, #tpu.memory_space<vmem>>, %arg6: memref<128x256xf32, #tpu.memory_space<vmem>>) attributes {dimension_semantics = [#tpu.dimension_semantics<parallel>, #tpu.dimension_semantics<parallel>], iteration_bounds = array<i64: 2, 1>, scalar_prefetch = 0 : i64, scratch_operands = 0 : i64, tpu.core_type = #tpu.core_type<tc>, window_params = [{transform_indices = @transform_0, window_bounds = array<i64: 128, 256>}, {transform_indices = @transform_1, window_bounds = array<i64: 256, 256>}, {transform_indices = @transform_2, window_bounds = array<i64: 1, 256>}, {transform_indices = @transform_3, window_bounds = array<i64: 128, 256>}, {transform_indices = @transform_4, window_bounds = array<i64: 128, 256>}]} {
    %c0 = arith.constant 0 : index
    %c0_0 = arith.constant 0 : index
    %0 = vector.load %arg2[%c0, %c0_0] : memref<128x256xbf16, #tpu.memory_space<vmem>>, vector<128x256xbf16>
    %c0_1 = arith.constant 0 : index
    %c0_2 = arith.constant 0 : index
    %1 = vector.load %arg3[%c0_1, %c0_2] : memref<256x256xbf16, #tpu.memory_space<vmem>>, vector<256x256xbf16>
    %cst = arith.constant dense<0.000000e+00> : vector<128x256xf32>
    %2 = tpu.matmul %0, %1, %cst {dimension_numbers = #tpu.dot_dimension_numbers<[1], [0], [0], [1], [0, 0, 1, 1], [], []>} : vector<128x256xbf16>, vector<256x256xbf16>, vector<128x256xf32> -> vector<128x256xf32>
    %c0_3 = arith.constant 0 : index
    %c0_4 = arith.constant 0 : index
    %3 = vector.load %arg4[%c0_3, %c0_4] : memref<1x256xf32, #tpu.memory_space<vmem>>, vector<1x256xf32>
    %4 = vector.broadcast %3 : vector<1x256xf32> to vector<128x256xf32>
    %5 = arith.addf %2, %4 : vector<128x256xf32>
    %c0_5 = arith.constant 0 : index
    %c0_6 = arith.constant 0 : index
    %6 = vector.load %arg5[%c0_5, %c0_6] : memref<128x256xf32, #tpu.memory_space<vmem>>, vector<128x256xf32>
    %7 = arith.addf %5, %6 : vector<128x256xf32>
    %c0_7 = arith.constant 0 : index
    %c0_8 = arith.constant 0 : index
    %8 = vector.load %arg6[%c0_7, %c0_8] : memref<128x256xf32, #tpu.memory_space<vmem>>, vector<128x256xf32>
    tpu.vector_store %arg6[%c0_7, %c0_8], %7 {strides = array<i32>} : memref<128x256xf32, #tpu.memory_space<vmem>>, vector<128x256xf32>,
    return
  }
  func.func @transform_0(%arg0: i32, %arg1: i32) -> (i32, i32) {
    %c0_i32 = arith.constant 0 : i32
    %c0_i32_0 = arith.constant 0 : i32
    return %arg0, %c0_i32 : i32, i32
  }
  func.func @transform_1(%arg0: i32, %arg1: i32) -> (i32, i32) {
    %c0_i32 = arith.constant 0 : i32
    %c0_i32_0 = arith.constant 0 : i32
    return %c0_i32, %arg1 : i32, i32
  }
  func.func @transform_2(%arg0: i32, %arg1: i32) -> (i32, i32) {
    %c0_i32 = arith.constant 0 : i32
    %c0_i32_0 = arith.constant 0 : i32
    return %c0_i32, %arg1 : i32, i32
  }
  func.func @transform_3(%arg0: i32, %arg1: i32) -> (i32, i32) {
    %c0_i32 = arith.constant 0 : i32
    return %arg0, %arg1 : i32, i32
  }
  func.func @transform_4(%arg0: i32, %arg1: i32) -> (i32, i32) {
    %c0_i32 = arith.constant 0 : i32
    return %arg0, %arg1 : i32, i32
  }
}

module attributes {stable_mosaic.version = 11 : i64} {
  func.func @_ln_mlp_residual_kernel(%arg0: i32, %arg1: memref<128x256xf32, #tpu.memory_space<vmem>>, %arg2: memref<1x256xf32, #tpu.memory_space<vmem>>, %arg3: memref<1x256xf32, #tpu.memory_space<vmem>>, %arg4: memref<256x1024xbf16, #tpu.memory_space<vmem>>, %arg5: memref<1x1024xf32, #tpu.memory_space<vmem>>, %arg6: memref<1024x256xbf16, #tpu.memory_space<vmem>>, %arg7: memref<1x256xf32, #tpu.memory_space<vmem>>, %arg8: memref<128x256xf32, #tpu.memory_space<vmem>>) attributes {dimension_semantics = [#tpu.dimension_semantics<parallel>], iteration_bounds = array<i64: 2>, scalar_prefetch = 0 : i64, scratch_operands = 0 : i64, tpu.core_type = #tpu.core_type<tc>, window_params = [{transform_indices = @transform_0, window_bounds = array<i64: 128, 256>}, {pipeline_mode = #tpu.pipeline_mode<synchronous>, transform_indices = @transform_1, window_bounds = array<i64: 1, 256>}, {pipeline_mode = #tpu.pipeline_mode<synchronous>, transform_indices = @transform_2, window_bounds = array<i64: 1, 256>}, {pipeline_mode = #tpu.pipeline_mode<synchronous>, transform_indices = @transform_3, window_bounds = array<i64: 256, 1024>}, {pipeline_mode = #tpu.pipeline_mode<synchronous>, transform_indices = @transform_4, window_bounds = array<i64: 1, 1024>}, {pipeline_mode = #tpu.pipeline_mode<synchronous>, transform_indices = @transform_5, window_bounds = array<i64: 1024, 256>}, {pipeline_mode = #tpu.pipeline_mode<synchronous>, transform_indices = @transform_6, window_bounds = array<i64: 1, 256>}, {transform_indices = @transform_7, window_bounds = array<i64: 128, 256>}]} {
    %c0 = arith.constant 0 : index
    %c0_0 = arith.constant 0 : index
    %0 = vector.load %arg1[%c0, %c0_0] : memref<128x256xf32, #tpu.memory_space<vmem>>, vector<128x256xf32>
    %cst = arith.constant dense<0.000000e+00> : vector<128xf32>
    %1 = vector.multi_reduction <add>, %0, %cst [1] : vector<128x256xf32> to vector<128xf32>
    %2 = vector.shape_cast %1 : vector<128xf32> to vector<128x1xf32>
    %cst_1 = arith.constant 2.560000e+02 : f32
    %3 = vector.broadcast %cst_1 : f32 to vector<128x1xf32>
    %4 = arith.divf %2, %3 : vector<128x1xf32>
    %5 = vector.broadcast %4 : vector<128x1xf32> to vector<128x256xf32>
    %6 = arith.subf %0, %5 : vector<128x256xf32>
    %7 = arith.mulf %6, %6 : vector<128x256xf32>
    %cst_2 = arith.constant dense<0.000000e+00> : vector<128xf32>
    %8 = vector.multi_reduction <add>, %7, %cst_2 [1] : vector<128x256xf32> to vector<128xf32>
    %9 = vector.shape_cast %8 : vector<128xf32> to vector<128x1xf32>
    %cst_3 = arith.constant 2.560000e+02 : f32
    %10 = vector.broadcast %cst_3 : f32 to vector<128x1xf32>
    %11 = arith.divf %9, %10 : vector<128x1xf32>
    %12 = vector.broadcast %4 : vector<128x1xf32> to vector<128x256xf32>
    %13 = arith.subf %0, %12 : vector<128x256xf32>
    %cst_4 = arith.constant 9.99999974E-6 : f32
    %14 = vector.broadcast %cst_4 : f32 to vector<128x1xf32>
    %15 = arith.addf %11, %14 : vector<128x1xf32>
    %16 = math.rsqrt %15 : vector<128x1xf32>
    %17 = vector.broadcast %16 : vector<128x1xf32> to vector<128x256xf32>
    %18 = arith.mulf %13, %17 : vector<128x256xf32>
    %c0_5 = arith.constant 0 : index
    %c0_6 = arith.constant 0 : index
    %19 = vector.load %arg2[%c0_5, %c0_6] : memref<1x256xf32, #tpu.memory_space<vmem>>, vector<1x256xf32>
    %20 = vector.broadcast %19 : vector<1x256xf32> to vector<128x256xf32>
    %21 = arith.mulf %18, %20 : vector<128x256xf32>
    %c0_7 = arith.constant 0 : index
    %c0_8 = arith.constant 0 : index
    %22 = vector.load %arg3[%c0_7, %c0_8] : memref<1x256xf32, #tpu.memory_space<vmem>>, vector<1x256xf32>
    %23 = vector.broadcast %22 : vector<1x256xf32> to vector<128x256xf32>
    %24 = arith.addf %21, %23 : vector<128x256xf32>
    %25 = arith.truncf %24 : vector<128x256xf32> to vector<128x256xbf16>
    %c0_9 = arith.constant 0 : index
    %c0_10 = arith.constant 0 : index
    %26 = vector.load %arg4[%c0_9, %c0_10] : memref<256x1024xbf16, #tpu.memory_space<vmem>>, vector<256x1024xbf16>
    %cst_11 = arith.constant dense<0.000000e+00> : vector<128x1024xf32>
    %27 = tpu.matmul %25, %26, %cst_11 {dimension_numbers = #tpu.dot_dimension_numbers<[1], [0], [0], [1], [0, 0, 1, 1], [], []>} : vector<128x256xbf16>, vector<256x1024xbf16>, vector<128x1024xf32> -> vector<128x1024xf32>
    %c0_12 = arith.constant 0 : index
    %c0_13 = arith.constant 0 : index
    %28 = vector.load %arg5[%c0_12, %c0_13] : memref<1x1024xf32, #tpu.memory_space<vmem>>, vector<1x1024xf32>
    %29 = vector.broadcast %28 : vector<1x1024xf32> to vector<128x1024xf32>
    %30 = arith.addf %27, %29 : vector<128x1024xf32>
    %31 = arith.mulf %30, %30 : vector<128x1024xf32>
    %32 = arith.mulf %30, %31 : vector<128x1024xf32>
    %cst_14 = arith.constant 4.471500e-02 : f32
    %33 = vector.broadcast %cst_14 : f32 to vector<128x1024xf32>
    %34 = arith.mulf %33, %32 : vector<128x1024xf32>
    %35 = arith.addf %30, %34 : vector<128x1024xf32>
    %cst_15 = arith.constant 0.797884583 : f32
    %36 = vector.broadcast %cst_15 : f32 to vector<128x1024xf32>
    %37 = arith.mulf %36, %35 : vector<128x1024xf32>
    %38 = math.tanh %37 : vector<128x1024xf32>
    %cst_16 = arith.constant 1.000000e+00 : f32
    %39 = vector.broadcast %cst_16 : f32 to vector<128x1024xf32>
    %40 = arith.addf %39, %38 : vector<128x1024xf32>
    %cst_17 = arith.constant 5.000000e-01 : f32
    %41 = vector.broadcast %cst_17 : f32 to vector<128x1024xf32>
    %42 = arith.mulf %41, %40 : vector<128x1024xf32>
    %43 = arith.mulf %30, %42 : vector<128x1024xf32>
    %44 = arith.truncf %43 : vector<128x1024xf32> to vector<128x1024xbf16>
    %c0_18 = arith.constant 0 : index
    %c0_19 = arith.constant 0 : index
    %45 = vector.load %arg6[%c0_18, %c0_19] : memref<1024x256xbf16, #tpu.memory_space<vmem>>, vector<1024x256xbf16>
    %cst_20 = arith.constant dense<0.000000e+00> : vector<128x256xf32>
    %46 = tpu.matmul %44, %45, %cst_20 {dimension_numbers = #tpu.dot_dimension_numbers<[1], [0], [0], [1], [0, 0, 1, 1], [], []>} : vector<128x1024xbf16>, vector<1024x256xbf16>, vector<128x256xf32> -> vector<128x256xf32>
    %c0_21 = arith.constant 0 : index
    %c0_22 = arith.constant 0 : index
    %47 = vector.load %arg7[%c0_21, %c0_22] : memref<1x256xf32, #tpu.memory_space<vmem>>, vector<1x256xf32>
    %48 = vector.broadcast %47 : vector<1x256xf32> to vector<128x256xf32>
    %49 = arith.addf %46, %48 : vector<128x256xf32>
    %50 = arith.addf %49, %0 : vector<128x256xf32>
    %c0_23 = arith.constant 0 : index
    %c0_24 = arith.constant 0 : index
    %51 = vector.load %arg8[%c0_23, %c0_24] : memref<128x256xf32, #tpu.memory_space<vmem>>, vector<128x256xf32>
    tpu.vector_store %arg8[%c0_23, %c0_24], %50 {strides = array<i32>} : memref<128x256xf32, #tpu.memory_space<vmem>>, vector<128x256xf32>,
    return
  }
  func.func @transform_0(%arg0: i32) -> (i32, i32) {
    %c0_i32 = arith.constant 0 : i32
    %c0_i32_0 = arith.constant 0 : i32
    return %arg0, %c0_i32 : i32, i32
  }
  func.func @transform_1(%arg0: i32) -> (i32, i32) {
    %c0_i32 = arith.constant 0 : i32
    %c0_i32_0 = arith.constant 0 : i32
    %c0_i32_1 = arith.constant 0 : i32
    return %c0_i32, %c0_i32_0 : i32, i32
  }
  func.func @transform_2(%arg0: i32) -> (i32, i32) {
    %c0_i32 = arith.constant 0 : i32
    %c0_i32_0 = arith.constant 0 : i32
    %c0_i32_1 = arith.constant 0 : i32
    return %c0_i32, %c0_i32_0 : i32, i32
  }
  func.func @transform_3(%arg0: i32) -> (i32, i32) {
    %c0_i32 = arith.constant 0 : i32
    %c0_i32_0 = arith.constant 0 : i32
    %c0_i32_1 = arith.constant 0 : i32
    return %c0_i32, %c0_i32_0 : i32, i32
  }
  func.func @transform_4(%arg0: i32) -> (i32, i32) {
    %c0_i32 = arith.constant 0 : i32
    %c0_i32_0 = arith.constant 0 : i32
    %c0_i32_1 = arith.constant 0 : i32
    return %c0_i32, %c0_i32_0 : i32, i32
  }
  func.func @transform_5(%arg0: i32) -> (i32, i32) {
    %c0_i32 = arith.constant 0 : i32
    %c0_i32_0 = arith.constant 0 : i32
    %c0_i32_1 = arith.constant 0 : i32
    return %c0_i32, %c0_i32_0 : i32, i32
  }
  func.func @transform_6(%arg0: i32) -> (i32, i32) {
    %c0_i32 = arith.constant 0 : i32
    %c0_i32_0 = arith.constant 0 : i32
    %c0_i32_1 = arith.constant 0 : i32
    return %c0_i32, %c0_i32_0 : i32, i32
  }
  func.func @transform_7(%arg0: i32) -> (i32, i32) {
    %c0_i32 = arith.constant 0 : i32
    %c0_i32_0 = arith.constant 0 : i32
    return %arg0, %c0_i32 : i32, i32
  }
}

module attributes {stable_mosaic.version = 11 : i64} {
  func.func @_layernorm_kernel(%arg0: i32, %arg1: memref<128x256xf32, #tpu.memory_space<vmem>>, %arg2: memref<1x256xf32, #tpu.memory_space<vmem>>, %arg3: memref<1x256xf32, #tpu.memory_space<vmem>>, %arg4: memref<128x256xf32, #tpu.memory_space<vmem>>) attributes {dimension_semantics = [#tpu.dimension_semantics<parallel>], iteration_bounds = array<i64: 2>, scalar_prefetch = 0 : i64, scratch_operands = 0 : i64, tpu.core_type = #tpu.core_type<tc>, window_params = [{transform_indices = @transform_0, window_bounds = array<i64: 128, 256>}, {pipeline_mode = #tpu.pipeline_mode<synchronous>, transform_indices = @transform_1, window_bounds = array<i64: 1, 256>}, {pipeline_mode = #tpu.pipeline_mode<synchronous>, transform_indices = @transform_2, window_bounds = array<i64: 1, 256>}, {transform_indices = @transform_3, window_bounds = array<i64: 128, 256>}]} {
    %c0 = arith.constant 0 : index
    %c0_0 = arith.constant 0 : index
    %0 = vector.load %arg1[%c0, %c0_0] : memref<128x256xf32, #tpu.memory_space<vmem>>, vector<128x256xf32>
    %cst = arith.constant dense<0.000000e+00> : vector<128xf32>
    %1 = vector.multi_reduction <add>, %0, %cst [1] : vector<128x256xf32> to vector<128xf32>
    %2 = vector.shape_cast %1 : vector<128xf32> to vector<128x1xf32>
    %cst_1 = arith.constant 2.560000e+02 : f32
    %3 = vector.broadcast %cst_1 : f32 to vector<128x1xf32>
    %4 = arith.divf %2, %3 : vector<128x1xf32>
    %5 = vector.broadcast %4 : vector<128x1xf32> to vector<128x256xf32>
    %6 = arith.subf %0, %5 : vector<128x256xf32>
    %7 = arith.mulf %6, %6 : vector<128x256xf32>
    %cst_2 = arith.constant dense<0.000000e+00> : vector<128xf32>
    %8 = vector.multi_reduction <add>, %7, %cst_2 [1] : vector<128x256xf32> to vector<128xf32>
    %9 = vector.shape_cast %8 : vector<128xf32> to vector<128x1xf32>
    %cst_3 = arith.constant 2.560000e+02 : f32
    %10 = vector.broadcast %cst_3 : f32 to vector<128x1xf32>
    %11 = arith.divf %9, %10 : vector<128x1xf32>
    %12 = vector.broadcast %4 : vector<128x1xf32> to vector<128x256xf32>
    %13 = arith.subf %0, %12 : vector<128x256xf32>
    %cst_4 = arith.constant 9.99999974E-6 : f32
    %14 = vector.broadcast %cst_4 : f32 to vector<128x1xf32>
    %15 = arith.addf %11, %14 : vector<128x1xf32>
    %16 = math.rsqrt %15 : vector<128x1xf32>
    %17 = vector.broadcast %16 : vector<128x1xf32> to vector<128x256xf32>
    %18 = arith.mulf %13, %17 : vector<128x256xf32>
    %c0_5 = arith.constant 0 : index
    %c0_6 = arith.constant 0 : index
    %19 = vector.load %arg2[%c0_5, %c0_6] : memref<1x256xf32, #tpu.memory_space<vmem>>, vector<1x256xf32>
    %20 = vector.broadcast %19 : vector<1x256xf32> to vector<128x256xf32>
    %21 = arith.mulf %18, %20 : vector<128x256xf32>
    %c0_7 = arith.constant 0 : index
    %c0_8 = arith.constant 0 : index
    %22 = vector.load %arg3[%c0_7, %c0_8] : memref<1x256xf32, #tpu.memory_space<vmem>>, vector<1x256xf32>
    %23 = vector.broadcast %22 : vector<1x256xf32> to vector<128x256xf32>
    %24 = arith.addf %21, %23 : vector<128x256xf32>
    %c0_9 = arith.constant 0 : index
    %c0_10 = arith.constant 0 : index
    %25 = vector.load %arg4[%c0_9, %c0_10] : memref<128x256xf32, #tpu.memory_space<vmem>>, vector<128x256xf32>
    tpu.vector_store %arg4[%c0_9, %c0_10], %24 {strides = array<i32>} : memref<128x256xf32, #tpu.memory_space<vmem>>, vector<128x256xf32>,
    return
  }
  func.func @transform_0(%arg0: i32) -> (i32, i32) {
    %c0_i32 = arith.constant 0 : i32
    %c0_i32_0 = arith.constant 0 : i32
    return %arg0, %c0_i32 : i32, i32
  }
  func.func @transform_1(%arg0: i32) -> (i32, i32) {
    %c0_i32 = arith.constant 0 : i32
    %c0_i32_0 = arith.constant 0 : i32
    %c0_i32_1 = arith.constant 0 : i32
    return %c0_i32, %c0_i32_0 : i32, i32
  }
  func.func @transform_2(%arg0: i32) -> (i32, i32) {
    %c0_i32 = arith.constant 0 : i32
    %c0_i32_0 = arith.constant 0 : i32
    %c0_i32_1 = arith.constant 0 : i32
    return %c0_i32, %c0_i32_0 : i32, i32
  }
  func.func @transform_3(%arg0: i32) -> (i32, i32) {
    %c0_i32 = arith.constant 0 : i32
    %c0_i32_0 = arith.constant 0 : i32
    return %arg0, %c0_i32 : i32, i32
  }
}

module attributes {stable_mosaic.version = 11 : i64} {
  func.func @_logits_kernel(%arg0: i32, %arg1: i32, %arg2: i32, %arg3: memref<128x256xbf16, #tpu.memory_space<vmem>>, %arg4: memref<512x256xbf16, #tpu.memory_space<vmem>>, %arg5: memref<128x512xf32, #tpu.memory_space<vmem>>, %arg6: memref<128x512xf32, #tpu.memory_space<vmem>>) attributes {dimension_semantics = [#tpu.dimension_semantics<parallel>, #tpu.dimension_semantics<parallel>, #tpu.dimension_semantics<arbitrary>], iteration_bounds = array<i64: 2, 1, 1>, scalar_prefetch = 0 : i64, scratch_operands = 1 : i64, tpu.core_type = #tpu.core_type<tc>, window_params = [{transform_indices = @transform_0, window_bounds = array<i64: 128, 256>}, {transform_indices = @transform_1, window_bounds = array<i64: 512, 256>}, {transform_indices = @transform_2, window_bounds = array<i64: 128, 512>}]} {
    %c0_i32 = arith.constant 0 : i32
    %0 = arith.cmpi eq, %arg2, %c0_i32 : i32
    %1 = arith.extui %0 : i1 to i32
    %c0_i32_0 = arith.constant 0 : i32
    %2 = arith.cmpi ne, %1, %c0_i32_0 : i32
    scf.if %2 {
      %cst_10 = arith.constant 0.000000e+00 : f32
      %12 = vector.broadcast %cst_10 : f32 to vector<128x512xf32>
      %c0_11 = arith.constant 0 : index
      %c0_12 = arith.constant 0 : index
      %13 = vector.load %arg6[%c0_11, %c0_12] : memref<128x512xf32, #tpu.memory_space<vmem>>, vector<128x512xf32>
      tpu.vector_store %arg6[%c0_11, %c0_12], %12 {strides = array<i32>} : memref<128x512xf32, #tpu.memory_space<vmem>>, vector<128x512xf32>,
    } else {
    }
    %c0 = arith.constant 0 : index
    %c0_1 = arith.constant 0 : index
    %3 = vector.load %arg6[%c0, %c0_1] : memref<128x512xf32, #tpu.memory_space<vmem>>, vector<128x512xf32>
    %c0_2 = arith.constant 0 : index
    %c0_3 = arith.constant 0 : index
    %4 = vector.load %arg3[%c0_2, %c0_3] : memref<128x256xbf16, #tpu.memory_space<vmem>>, vector<128x256xbf16>
    %c0_4 = arith.constant 0 : index
    %c0_5 = arith.constant 0 : index
    %5 = vector.load %arg4[%c0_4, %c0_5] : memref<512x256xbf16, #tpu.memory_space<vmem>>, vector<512x256xbf16>
    %cst = arith.constant dense<0.000000e+00> : vector<128x512xf32>
    %6 = tpu.matmul %4, %5, %cst {dimension_numbers = #tpu.dot_dimension_numbers<[1], [1], [0], [0], [0, 0, 1, 0], [], []>} : vector<128x256xbf16>, vector<512x256xbf16>, vector<128x512xf32> -> vector<128x512xf32>
    %7 = arith.addf %3, %6 : vector<128x512xf32>
    %c0_6 = arith.constant 0 : index
    %c0_7 = arith.constant 0 : index
    %8 = vector.load %arg6[%c0_6, %c0_7] : memref<128x512xf32, #tpu.memory_space<vmem>>, vector<128x512xf32>
    tpu.vector_store %arg6[%c0_6, %c0_7], %7 {strides = array<i32>} : memref<128x512xf32, #tpu.memory_space<vmem>>, vector<128x512xf32>,
    %c0_i32_8 = arith.constant 0 : i32
    %9 = arith.cmpi eq, %arg2, %c0_i32_8 : i32
    %10 = arith.extui %9 : i1 to i32
    %c0_i32_9 = arith.constant 0 : i32
    %11 = arith.cmpi ne, %10, %c0_i32_9 : i32
    scf.if %11 {
      %c0_10 = arith.constant 0 : index
      %c0_11 = arith.constant 0 : index
      %12 = vector.load %arg6[%c0_10, %c0_11] : memref<128x512xf32, #tpu.memory_space<vmem>>, vector<128x512xf32>
      %c0_12 = arith.constant 0 : index
      %c0_13 = arith.constant 0 : index
      %13 = vector.load %arg5[%c0_12, %c0_13] : memref<128x512xf32, #tpu.memory_space<vmem>>, vector<128x512xf32>
      tpu.vector_store %arg5[%c0_12, %c0_13], %12 {strides = array<i32>} : memref<128x512xf32, #tpu.memory_space<vmem>>, vector<128x512xf32>,
    } else {
    }
    return
  }
  func.func @transform_0(%arg0: i32, %arg1: i32, %arg2: i32) -> (i32, i32) {
    %c0_i32 = arith.constant 0 : i32
    return %arg0, %arg2 : i32, i32
  }
  func.func @transform_1(%arg0: i32, %arg1: i32, %arg2: i32) -> (i32, i32) {
    %c0_i32 = arith.constant 0 : i32
    return %arg1, %arg2 : i32, i32
  }
  func.func @transform_2(%arg0: i32, %arg1: i32, %arg2: i32) -> (i32, i32) {
    %c0_i32 = arith.constant 0 : i32
    return %arg0, %arg1 : i32, i32
  }
}

</mosaic_0001>

<bundles_post_ra>
// kernel: encoder_decoder_forward.11
= control target key start
LH: loop header
LB: loop body
LE: loop exit
PB: predicated region body
PF: predicated region fallthrough
CT: control target
= control target key end

     0   :  { %s3486_s0 = inlined_call_operand.vmem [shape: bf16[2,128,768], index: 0, kind: input, shape index: {}, may-alias: {0,1,2}]   ;;  %s3487_s1 = inlined_call_operand.vmem [shape: bf16[2,128,768], index: 1, kind: input, shape index: {}, may-alias: {0,1,2}]   ;;  %s3488_s2 = inlined_call_operand.vmem [shape: bf16[2,128,768], index: 2, kind: input, shape index: {}, may-alias: {0,1,2}]   ;;  %s3489_s3 = inlined_call_operand.vmem [shape: f32[2,1,128,128], index: 3, kind: input, shape index: {}]   ;;  %s3490_s4 = inlined_call_operand.vmem [shape: bf16[2,128,256], index: 4, kind: output, shape index: {}]  }
   0x1   :  { %3492 = sst [smem:[#allocation11_spill]] %s3490_s4 }
   0x2   :  { %s2765_s15 = smov 0   ;;  %s2767_s16 = smov 0  }
   0x3   :  { %s2769_s17 = smov 0   ;;  %s2771_s18 = smov 0  }
   0x4   :  { %s2773_s19 = smov 0   ;;  %s2775_s20 = smov 0  }
   0x5   :  { %s2777_s21 = smov 0   ;;  %s2779_s22 = smov 0  }
   0x6   :  { %s2781_s23 = smov 0   ;;  %s2783_s24 = smov 0  }
   0x7   :  { %s2785_s25 = smov 0  }
   0x8 LB: > { %3493 = sst [smem:[#allocation9_spill]] %s2719_s21  ;;  %s36_s27 = sadd.s32 1, %s2727_s23  ;;  %s2735_s25 = sphi %s2785_s25, %s14_s25   ;;  %s2731_s24 = sphi %s2783_s24, %s3526_s24   ;;  %s2727_s23 = sphi %s2781_s23, %s3525_s23   ;;  %s2723_s22 = sphi %s2779_s22, %s3524_s22   ;;  %s2719_s21 = sphi %s2777_s21, %s3523_s21   ;;  %s2715_s20 = sphi %s2775_s20, %s3522_s20   ;;  %s2711_s19 = sphi %s2773_s19, %s3521_s19   ;;  %s2707_s18 = sphi %s2771_s18, %s3520_s18   ;;  %s2703_s17 = sphi %s2769_s17, %s3519_s17   ;;  %s2699_s16 = sphi %s2767_s16, %s3518_s16   ;;  %s2695_s15 = sphi %s2765_s15, %s3517_s15  }
   0x9   : > { %p38_p0 = scmp.ge.s32.totalorder %s36_s27, 2  ;;  %s40_s28 = sadd.s32 1, %s2731_s24 }
   0xa   : > { %s51_s29 = sadd.s32 1, %s2715_s20  ;;  %p58_p1 = scmp.ne.s32.totalorder %s2715_s20, %s2711_s19 }
   0xb   : > { %s3528_s27 = smov (%p38_p0, %s36_s27), 0  ;;  %s3530_s28 = smov (!%p38_p0, %s40_s28), %s2731_s24 }
   0xc   : > { %s47_s30 = ssub.s32 %s2727_s23, %s3528_s27  ;;  %p59_p2 = scmp.eq.s32.totalorder %s2735_s25, 0 }
   0xd   : > { %p42_p3 = scmp.ge.s32.totalorder %s3530_s28, 2  ;;  %s74_s5 = sadd.s32 2, %s2727_s23 }
   0xe   : > { %p2838_p4 = por %p59_p2, %p58_p1  ;;  %s75_s7 = sadd.s32 2, %s3528_s27 }
   0xf   : > { %s3532_s28 = smov (%p42_p3, %s3530_s28), 0  ;;  %s79_s8 = ssub.s32 %s74_s5, %s75_s7 }
  0x10   : > { %3495 = sst [smem:[#allocation10_spill]] %s3532_s28  ;;  %s83_s9 = sadd.s32 1, %s2707_s18 }
  0x11   : > { %s44_s10 = ssub.s32 %s2731_s24, %s3532_s28  ;;  %p90_p5 = scmp.ne.s32.totalorder %s2707_s18, %s2703_s17 }
  0x12   : > { %s48_s11 = sor.u32 %s47_s30, %s44_s10  ;;  %s80_s12 = sor.u32 %s79_s8, %s44_s10 }
  0x13   : > { %p49_p6 = scmp.eq.s32.totalorder %s48_s11, 0  ;;  %p81_p7 = scmp.eq.s32.totalorder %s80_s12, 0 }
  0x14   : > { %p2852_p8 = por %p90_p5, %p59_p2  ;;  %s106_s14 = sadd.s32 4, %s2727_s23 }
  0x15   : > { %s2858_s26 = scalar_select %p49_p6, %s2715_s20, %s51_s29  }
  0x16   : > { %s2861_s5 = scalar_select %p81_p7, %s2707_s18, %s83_s9  }
  0x17   : > { %s107_s7 = sadd.s32 4, %s3528_s27  ;;  %s115_s28 = sadd.s32 1, %s2699_s16 }
  0x18   : > { %s111_s4 = ssub.s32 %s106_s14, %s107_s7  ;;  %p122_p9 = scmp.ne.s32.totalorder %s2699_s16, %s2695_s15 }
  0x19   : > { %s112_s30 = sor.u32 %s111_s4, %s44_s10  ;;  %s3497_s21 = sadd.s32 4294967295, %s2735_s25  }
  0x1a   : > { %p186_p10 = scmp.eq.s32.totalorder %s3497_s21, 3  ;;  %p113_p11 = scmp.eq.s32.totalorder %s112_s30, 0 }
  0x1b   : > { %p2871_p12 = por %p122_p9, %p59_p2  ;;  %p2184_p0 = scmp.ge.s32.totalorder %s2735_s25, 4 }
  0x1c   : > { %p2878_p13 = por %p186_p10, %p58_p1 }
  0x1d   : > { %s2883_s29 = scalar_select %p113_p11, %s2699_s16, %s115_s28  }
  0x1e   : > { %208 = sbr.rel (%p2184_p0) target bundleno = 88 (0x58), region = 16 }
  0x25   : > { %211 = sbr.rel (!%p2838_p4) target bundleno = 54 (0x36), region = 20  ;;  %s213_s4 = sand.u32 (%p2838_p4), 1, %s2715_s20  }
  0x26   : > { %s2435_s21 = smul.u32 (%p2838_p4), 96, %s2731_s24  ;;  %s2185_s9 = sshll.u32 (%p2838_p4), %s213_s4, 6 }
  0x27   : > { %s215_s28 = scalar_lea.vmem (%p2838_p4), [#allocation5], %s2185_s9 }
  0x28   : > { %s220_s10 = sadd.s32 (%p2838_p4), %s2727_s23, %s2435_s21 }
  0x29   : > { %s2186_s12 = sshll.u32 (%p2838_p4), %s220_s10, 2 }
  0x2a   : > { %s2894_s30 = scalar_lea.vmem (%p2838_p4), %s3486_s0, %s2186_s12 }
  0x2b   : > { %v238_v0 = vld [vmem:[%s2894_s30] sm:$0xf] (%p2838_p4)  ;;  %v240_v1 = vld [vmem:[%s2894_s30 + $0x18] sm:$0xf] (%p2838_p4)  ;;  %v242_v2 = vld [vmem:[%s2894_s30 + $0x30] sm:$0xf] (%p2838_p4) }
  0x2c   : > { %239 = vst [vmem:[%s215_s28] sm:$0xf] %v238_v0  ;;  %241 = vst [vmem:[%s215_s28 + $0x4] sm:$0xf] %v240_v1  ;;  %v244_v3 = vld [vmem:[%s2894_s30 + $0x48] sm:$0xf] }
  0x2d   : > { %243 = vst [vmem:[%s215_s28 + $0x8] sm:$0xf] %v242_v2  ;;  %v246_v4 = vld [vmem:[%s2894_s30 + $0x60] sm:$0xf]  ;;  %v248_v5 = vld [vmem:[%s2894_s30 + $0x78] sm:$0xf] }
  0x2e   : > { %245 = vst [vmem:[%s215_s28 + $0xc] sm:$0xf] %v244_v3  ;;  %247 = vst [vmem:[%s215_s28 + $0x10] sm:$0xf] %v246_v4  ;;  %v250_v6 = vld [vmem:[%s2894_s30 + $0x90] sm:$0xf] }
  0x2f   : > { %249 = vst [vmem:[%s215_s28 + $0x14] sm:$0xf] %v248_v5  ;;  %v252_v7 = vld [vmem:[%s2894_s30 + $0xa8] sm:$0xf]  ;;  %v254_v8 = vld [vmem:[%s2894_s30 + $0xc0] sm:$0xf] }
  0x30   : > { %251 = vst [vmem:[%s215_s28 + $0x18] sm:$0xf] %v250_v6  ;;  %253 = vst [vmem:[%s215_s28 + $0x1c] sm:$0xf] %v252_v7  ;;  %v256_v9 = vld [vmem:[%s2894_s30 + $0xd8] sm:$0xf] }
  0x31   : > { %255 = vst [vmem:[%s215_s28 + $0x20] sm:$0xf] %v254_v8  ;;  %v258_v10 = vld [vmem:[%s2894_s30 + $0xf0] sm:$0xf]  ;;  %v260_v11 = vld [vmem:[%s2894_s30 + $0x108] sm:$0xf] }
  0x32   : > { %257 = vst [vmem:[%s215_s28 + $0x24] sm:$0xf] %v256_v9  ;;  %259 = vst [vmem:[%s215_s28 + $0x28] sm:$0xf] %v258_v10  ;;  %v262_v12 = vld [vmem:[%s2894_s30 + $0x120] sm:$0xf] }
  0x33   : > { %261 = vst [vmem:[%s215_s28 + $0x2c] sm:$0xf] %v260_v11  ;;  %v264_v13 = vld [vmem:[%s2894_s30 + $0x138] sm:$0xf]  ;;  %v266_v14 = vld [vmem:[%s2894_s30 + $0x150] sm:$0xf] }
  0x34   : > { %263 = vst [vmem:[%s215_s28 + $0x30] sm:$0xf] %v262_v12  ;;  %265 = vst [vmem:[%s215_s28 + $0x34] sm:$0xf] %v264_v13  ;;  %v268_v15 = vld [vmem:[%s2894_s30 + $0x168] sm:$0xf] }
  0x35   : > { %267 = vst [vmem:[%s215_s28 + $0x38] sm:$0xf] %v266_v14  ;;  %269 = vst [vmem:[%s215_s28 + $0x3c] sm:$0xf] %v268_v15 }
  0x36 PF: > { %324 = sbr.rel (!%p2852_p8) target bundleno = 71 (0x47), region = 61  ;;  %s326_s6 = sand.u32 (%p2852_p8), 1, %s2707_s18  }
  0x37   : > { %s2056_s4 = smul.u32 (%p2852_p8), 96, %s2731_s24  ;;  %s2187_s21 = sshll.u32 (%p2852_p8), %s326_s6, 6 }
  0x38   : > { %s328_s13 = scalar_lea.vmem (%p2852_p8), [#allocation6], %s2187_s21 }
  0x39   : > { %s2057_s9 = sadd.s32 (%p2852_p8), %s2727_s23, %s2056_s4 }
  0x3a   : > { %s2188_s10 = sshll.u32 (%p2852_p8), %s2057_s9, 2 }
  0x3b   : > { %s2920_s7 = scalar_lea.vmem (%p2852_p8), %s3487_s1, %s2188_s10 }
  0x3c   : > { %v2189_v16 = vld [vmem:[%s2920_s7 + $0x8] sm:$0xf] (%p2852_p8)  ;;  %v2190_v17 = vld [vmem:[%s2920_s7 + $0x20] sm:$0xf] (%p2852_p8)  ;;  %v2191_v18 = vld [vmem:[%s2920_s7 + $0x38] sm:$0xf] (%p2852_p8) }
  0x3d   : > { %353 = vst [vmem:[%s328_s13] sm:$0xf] %v2189_v16  ;;  %355 = vst [vmem:[%s328_s13 + $0x4] sm:$0xf] %v2190_v17  ;;  %v2192_v19 = vld [vmem:[%s2920_s7 + $0x50] sm:$0xf] }
  0x3e   : > { %357 = vst [vmem:[%s328_s13 + $0x8] sm:$0xf] %v2191_v18  ;;  %v2193_v20 = vld [vmem:[%s2920_s7 + $0x68] sm:$0xf]  ;;  %v2194_v21 = vld [vmem:[%s2920_s7 + $0x80] sm:$0xf] }
  0x3f   : > { %359 = vst [vmem:[%s328_s13 + $0xc] sm:$0xf] %v2192_v19  ;;  %361 = vst [vmem:[%s328_s13 + $0x10] sm:$0xf] %v2193_v20  ;;  %v2195_v22 = vld [vmem:[%s2920_s7 + $0x98] sm:$0xf] }
  0x40   : > { %363 = vst [vmem:[%s328_s13 + $0x14] sm:$0xf] %v2194_v21  ;;  %v2196_v23 = vld [vmem:[%s2920_s7 + $0xb0] sm:$0xf]  ;;  %v2197_v24 = vld [vmem:[%s2920_s7 + $0xc8] sm:$0xf] }
  0x41   : > { %365 = vst [vmem:[%s328_s13 + $0x18] sm:$0xf] %v2195_v22  ;;  %367 = vst [vmem:[%s328_s13 + $0x1c] sm:$0xf] %v2196_v23  ;;  %v2198_v25 = vld [vmem:[%s2920_s7 + $0xe0] sm:$0xf] }
  0x42   : > { %369 = vst [vmem:[%s328_s13 + $0x20] sm:$0xf] %v2197_v24  ;;  %v2199_v26 = vld [vmem:[%s2920_s7 + $0xf8] sm:$0xf]  ;;  %v2200_v27 = vld [vmem:[%s2920_s7 + $0x110] sm:$0xf] }
  0x43   : > { %371 = vst [vmem:[%s328_s13 + $0x24] sm:$0xf] %v2198_v25  ;;  %373 = vst [vmem:[%s328_s13 + $0x28] sm:$0xf] %v2199_v26  ;;  %v2201_v28 = vld [vmem:[%s2920_s7 + $0x128] sm:$0xf] }
  0x44   : > { %375 = vst [vmem:[%s328_s13 + $0x2c] sm:$0xf] %v2200_v27  ;;  %v2202_v29 = vld [vmem:[%s2920_s7 + $0x140] sm:$0xf]  ;;  %v2203_v30 = vld [vmem:[%s2920_s7 + $0x158] sm:$0xf] }
  0x45   : > { %377 = vst [vmem:[%s328_s13 + $0x30] sm:$0xf] %v2201_v28  ;;  %379 = vst [vmem:[%s328_s13 + $0x34] sm:$0xf] %v2202_v29  ;;  %v2204_v31 = vld [vmem:[%s2920_s7 + $0x170] sm:$0xf] }
  0x46   : > { %381 = vst [vmem:[%s328_s13 + $0x38] sm:$0xf] %v2203_v30  ;;  %383 = vst [vmem:[%s328_s13 + $0x3c] sm:$0xf] %v2204_v31 }
  0x47 PF: > { %438 = sbr.rel (!%p2871_p12) target bundleno = 88 (0x58), region = 102  ;;  %s440_s30 = sand.u32 (%p2871_p12), 1, %s2699_s16  }
  0x48   : > { %s2065_s28 = smul.u32 (%p2871_p12), 96, %s2731_s24  ;;  %s2205_s6 = sshll.u32 (%p2871_p12), %s440_s30, 6 }
  0x49   : > { %s442_s8 = scalar_lea.vmem (%p2871_p12), [#allocation7], %s2205_s6 }
  0x4a   : > { %s2066_s4 = sadd.s32 (%p2871_p12), %s2727_s23, %s2065_s28 }
  0x4b   : > { %s2206_s21 = sshll.u32 (%p2871_p12), %s2066_s4, 2 }
  0x4c   : > { %s2946_s12 = scalar_lea.vmem (%p2871_p12), %s3488_s2, %s2206_s21 }
  0x4d   : > { %v2207_v32 = vld [vmem:[%s2946_s12 + $0x10] sm:$0xf] (%p2871_p12)  ;;  %v2208_v33 = vld [vmem:[%s2946_s12 + $0x28] sm:$0xf] (%p2871_p12)  ;;  %v2209_v34 = vld [vmem:[%s2946_s12 + $0x40] sm:$0xf] (%p2871_p12) }
  0x4e   : > { %467 = vst [vmem:[%s442_s8] sm:$0xf] %v2207_v32  ;;  %469 = vst [vmem:[%s442_s8 + $0x4] sm:$0xf] %v2208_v33  ;;  %v2210_v35 = vld [vmem:[%s2946_s12 + $0x58] sm:$0xf] }
  0x4f   : > { %471 = vst [vmem:[%s442_s8 + $0x8] sm:$0xf] %v2209_v34  ;;  %v2211_v36 = vld [vmem:[%s2946_s12 + $0x70] sm:$0xf]  ;;  %v2212_v37 = vld [vmem:[%s2946_s12 + $0x88] sm:$0xf] }
  0x50   : > { %473 = vst [vmem:[%s442_s8 + $0xc] sm:$0xf] %v2210_v35  ;;  %475 = vst [vmem:[%s442_s8 + $0x10] sm:$0xf] %v2211_v36  ;;  %v2213_v38 = vld [vmem:[%s2946_s12 + $0xa0] sm:$0xf] }
  0x51   : > { %477 = vst [vmem:[%s442_s8 + $0x14] sm:$0xf] %v2212_v37  ;;  %v2214_v39 = vld [vmem:[%s2946_s12 + $0xb8] sm:$0xf]  ;;  %v2215_v40 = vld [vmem:[%s2946_s12 + $0xd0] sm:$0xf] }
  0x52   : > { %479 = vst [vmem:[%s442_s8 + $0x18] sm:$0xf] %v2213_v38  ;;  %481 = vst [vmem:[%s442_s8 + $0x1c] sm:$0xf] %v2214_v39  ;;  %v2216_v41 = vld [vmem:[%s2946_s12 + $0xe8] sm:$0xf] }
  0x53   : > { %483 = vst [vmem:[%s442_s8 + $0x20] sm:$0xf] %v2215_v40  ;;  %v2217_v42 = vld [vmem:[%s2946_s12 + $0x100] sm:$0xf]  ;;  %v2218_v43 = vld [vmem:[%s2946_s12 + $0x118] sm:$0xf] }
  0x54   : > { %485 = vst [vmem:[%s442_s8 + $0x24] sm:$0xf] %v2216_v41  ;;  %487 = vst [vmem:[%s442_s8 + $0x28] sm:$0xf] %v2217_v42  ;;  %v2219_v44 = vld [vmem:[%s2946_s12 + $0x130] sm:$0xf] }
  0x55   : > { %489 = vst [vmem:[%s442_s8 + $0x2c] sm:$0xf] %v2218_v43  ;;  %v2220_v45 = vld [vmem:[%s2946_s12 + $0x148] sm:$0xf]  ;;  %v2221_v46 = vld [vmem:[%s2946_s12 + $0x160] sm:$0xf] }
  0x56   : > { %491 = vst [vmem:[%s442_s8 + $0x30] sm:$0xf] %v2219_v44  ;;  %493 = vst [vmem:[%s442_s8 + $0x34] sm:$0xf] %v2220_v45  ;;  %v2222_v47 = vld [vmem:[%s2946_s12 + $0x178] sm:$0xf] }
  0x57   : > { %495 = vst [vmem:[%s442_s8 + $0x38] sm:$0xf] %v2221_v46  ;;  %497 = vst [vmem:[%s442_s8 + $0x3c] sm:$0xf] %v2222_v47 }
  0x58 PF: > { %p2223_p1 = scmp.ge.s32.totalorder %s2735_s25, 1  ;;  %p567_p2 = scmp.lt.s32.totalorder %s2735_s25, 5 }
  0x5a   : > { %p568_p3 = pnand %p2223_p1, %p567_p2 }
  0x5b   : > { %s581_s14 = sand.u32 (!%p568_p3), 1, %s2703_s17   ;;  %s574_s13 = sand.u32 (!%p568_p3), 1, %s2711_s19   ;;  %vm656_vm0 = vcmask (!%p568_p3), 7168   ;;  %v2737_v0 = vmov (!%p568_p3), -inf  }
  0x5c   : > { %571 = sbr.rel (%p568_p3) target bundleno = 1018 (0x3fa), region = 147  ;;  %s2225_s7 = sshll.u32 (!%p568_p3), %s581_s14, 6  ;;  %659 = vst.msk [vmem:[#allocation2 + $0x10] sm:$0xff] (!%p568_p3), %vm656_vm0, %v2737_v0  ;;  %657 = vst.msk [vmem:[#allocation2] sm:$0xff] (!%p568_p3), %vm656_vm0, %v2737_v0 }
  0x5d   : > { %s583_s30 = scalar_lea.vmem (!%p568_p3), [#allocation6], %s2225_s7  ;;  %s2968_s28 = sshll.u32 (!%p568_p3), %s574_s13, 6  ;;  %658 = vst.msk [vmem:[#allocation2 + $0x8] sm:$0xff] (!%p568_p3), %vm656_vm0, %v2737_v0  ;;  %660 = vst.msk [vmem:[#allocation2 + $0x18] sm:$0xff] (!%p568_p3), %vm656_vm0, %v2737_v0 }
  0x5e   : > { %v2529_v48 = vld [vmem:[%s583_s30] sm:$0xff] (!%p568_p3)   ;;  %v2530_v49 = vld [vmem:[%s583_s30 + $0x8] sm:$0xff] (!%p568_p3)   ;;  %v2531_v50 = vld [vmem:[%s583_s30 + $0x10] sm:$0xff] (!%p568_p3)   ;;  %s2971_s6 = scalar_lea.vmem (!%p568_p3), [#allocation5], %s2968_s28  ;;  %661 = vst.msk [vmem:[#allocation2 + $0x20] sm:$0xff] (!%p568_p3), %vm656_vm0, %v2737_v0  ;;  %p638_p4 = scmp.lt.s32.totalorder (!%p568_p3), %s2723_s22, 1 }
  0x5f   : > { %2371 = vmatprep.subr.bf16.mxu0 (!%p568_p3), %v2529_v48  ;;  %v2537_v51 = vld [vmem:[%s2971_s6] sm:$0xff] (!%p568_p3)   ;;  %v2532_v52 = vld [vmem:[%s583_s30 + $0x18] sm:$0xff] (!%p568_p3)   ;;  %v2534_v54 = vld [vmem:[%s583_s30 + $0x28] sm:$0xff] (!%p568_p3)   ;;  %662 = vst.msk [vmem:[#allocation2 + $0x28] sm:$0xff] (!%p568_p3), %vm656_vm0, %v2737_v0  ;;  %s588_s10 = sand.u32 (!%p568_p3), 1, %s2695_s15   ;;  %s3408_s15 = scalar_lea.vmem (!%p568_p3), [#allocation8], %s2968_s28 }
  0x60   : > { %2372 = vmatpush3.bf16.xpose.msra.mxu0 (!%p568_p3), %v2529_v48  ;;  %2387 = vmatprep.mubr.bf16.mxu0 (!%p568_p3), %v2537_v51  ;;  %v2533_v53 = vld [vmem:[%s583_s30 + $0x20] sm:$0xff] (!%p568_p3)   ;;  %v2535_v55 = vld [vmem:[%s583_s30 + $0x30] sm:$0xff] (!%p568_p3)   ;;  %v2536_v56 = vld [vmem:[%s583_s30 + $0x38] sm:$0xff] (!%p568_p3)   ;;  %663 = vst.msk [vmem:[#allocation2 + $0x30] sm:$0xff] (!%p568_p3), %vm656_vm0, %v2737_v0  ;;  %s2226_s12 = sshll.u32 (!%p568_p3), %s588_s10, 6 }
  0x61   : > { %2373 = vmatprep.subr.bf16.mxu0 (!%p568_p3), %v2530_v49  ;;  %v2538_v57 = vld [vmem:[%s2971_s6 + $0x8] sm:$0xff] (!%p568_p3)   ;;  %v2539_v58 = vld [vmem:[%s2971_s6 + $0x10] sm:$0xff] (!%p568_p3)   ;;  %v2540_v59 = vld [vmem:[%s2971_s6 + $0x18] sm:$0xff] (!%p568_p3)   ;;  %664 = vst.msk [vmem:[#allocation2 + $0x38] sm:$0xff] (!%p568_p3), %vm656_vm0, %v2737_v0  ;;  %s3085_s8 = scalar_lea.vmem (!%p568_p3), [#allocation7], %s2226_s12 }
  0x62   : > { %v2541_v60 = vld [vmem:[%s2971_s6 + $0x20] sm:$0xff] (!%p568_p3)   ;;  %v2542_v61 = vld [vmem:[%s2971_s6 + $0x28] sm:$0xff] (!%p568_p3)   ;;  %v2543_v62 = vld [vmem:[%s2971_s6 + $0x30] sm:$0xff] (!%p568_p3)   ;;  %665 = vst.msk [vmem:[#allocation2 + $0x40] sm:$0xff] (!%p568_p3), %vm656_vm0, %v2737_v0 }
  0x63   : > { %v2544_v63 = vld [vmem:[%s2971_s6 + $0x38] sm:$0xff]   ;;  %666 = vst.msk [vmem:[#allocation2 + $0x48] sm:$0xff] %vm656_vm0, %v2737_v0  ;;  %667 = vst.msk [vmem:[#allocation2 + $0x50] sm:$0xff] %vm656_vm0, %v2737_v0  ;;  %s639_s17 = scalar_select %p638_p4, %s2723_s22, 1 }
  0x64   : > { %668 = vst.msk [vmem:[#allocation2 + $0x58] sm:$0xff] %vm656_vm0, %v2737_v0  ;;  %669 = vst.msk [vmem:[#allocation2 + $0x60] sm:$0xff] %vm656_vm0, %v2737_v0  ;;  %s3514_s14 = sld [smem:[#allocation9_spill]] (%p2878_p13)  ;;  %s2271_s7 = sshll.u32 (%p2878_p13), %s2723_s22, 5 }
  0x65   : > { %670 = vst.msk [vmem:[#allocation2 + $0x68] sm:$0xff] %vm656_vm0, %v2737_v0  ;;  %671 = vst.msk [vmem:[#allocation2 + $0x70] sm:$0xff] %vm656_vm0, %v2737_v0  ;;  %s2275_s19 = sshll.u32 %s639_s17, 7  ;;  %s3515_s6 = sld [smem:[#allocation11_spill]] (%p2878_p13) }
  0x66   : > { %672 = vst.msk [vmem:[#allocation2 + $0x78] sm:$0xff] %vm656_vm0, %v2737_v0  ;;  %s3002_s9 = scalar_lea.vmem %s3489_s3, %s2275_s19 }
  0x67   : > { %v755_v1 = vld [vmem:[%s3002_s9 + $0x10] sm:$0xff]  ;;  %v753_v2 = vld [vmem:[%s3002_s9] sm:$0xff]  ;;  %v756_v4 = vld [vmem:[%s3002_s9 + $0x18] sm:$0xff] }
  0x68   : > { %2374 = vmatpush3.bf16.xpose.msra.mxu0 %v2530_v49  ;;  %v996_v3 = vsub.f32 1.0, %v755_v1  ;;  %v994_v5 = vsub.f32 1.0, %v753_v2  ;;  %v754_v6 = vld [vmem:[%s3002_s9 + $0x8] sm:$0xff]  ;;  %v997_v11 = vsub.f32 1.0, %v756_v4  ;;  %v757_v19 = vld [vmem:[%s3002_s9 + $0x20] sm:$0xff]  ;;  %v760_v22 = vld [vmem:[%s3002_s9 + $0x38] sm:$0xff] }
  0x69   : > { %2375 = vmatprep.subr.bf16.mxu0 %v2531_v50  ;;  %v995_v15 = vsub.f32 1.0, %v754_v6  ;;  %v759_v28 = vld [vmem:[%s3002_s9 + $0x30] sm:$0xff]  ;;  %v998_v30 = vsub.f32 1.0, %v757_v19  ;;  %v1001_v31 = vsub.f32 1.0, %v760_v22  ;;  %v758_v33 = vld [vmem:[%s3002_s9 + $0x28] sm:$0xff]  ;;  %v761_v45 = vld [vmem:[%s3002_s9 + $0x40] sm:$0xff] }
  0x6a   : > { %v1012_v10 = vmul.f32 10000.0, %v996_v3  ;;  %v1010_v14 = vmul.f32 10000.0, %v994_v5  ;;  %v1013_v25 = vmul.f32 10000.0, %v997_v11  ;;  %v1000_v36 = vsub.f32 1.0, %v759_v28  ;;  %v764_v49 = vld [vmem:[%s3002_s9 + $0x58] sm:$0xff]  ;;  %v763_v51 = vld [vmem:[%s3002_s9 + $0x50] sm:$0xff]  ;;  %s1930_s13 = sadd.s32 (%p2878_p13), %s3514_s14, %s2271_s7 }
  0x6b   : > { %v1011_v29 = vmul.f32 10000.0, %v995_v15  ;;  %v1014_v41 = vmul.f32 10000.0, %v998_v30  ;;  %v1017_v44 = vmul.f32 10000.0, %v1001_v31  ;;  %v999_v46 = vsub.f32 1.0, %v758_v33  ;;  %s2272_s11 = sshll.u32 (%p2878_p13), %s1930_s13, 2 }
  0x6c   : > { %s1932_s17 = scalar_lea.vmem (%p2878_p13), %s3515_s6, %s2272_s11 }
  0x70   : > { %2376 = vmatpush3.bf16.xpose.msra.mxu0 %v2531_v50 }
  0x71   : > { %2377 = vmatprep.subr.bf16.mxu0 %v2532_v52 }
  0x78   : > { %2378 = vmatpush3.bf16.xpose.msra.mxu0 %v2532_v52 }
  0x79   : > { %2379 = vmatprep.subr.bf16.mxu0 %v2533_v53 }
  0x80   : > { %2380 = vmatpush3.bf16.xpose.msra.mxu0 %v2533_v53 }
  0x81   : > { %2381 = vmatprep.subr.bf16.mxu0 %v2534_v54 }
  0x88   : > { %2382 = vmatpush3.bf16.xpose.msra.mxu0 %v2534_v54  ;;  %v1016_v54 = vmul.f32 10000.0, %v1000_v36 }
  0x89   : > { %2383 = vmatprep.subr.bf16.mxu0 %v2535_v55 }
  0x90   : > { %2384 = vmatpush3.bf16.xpose.msra.mxu0 %v2535_v55  ;;  %v762_v55 = vld [vmem:[%s3002_s9 + $0x48] sm:$0xff] }
  0x91   : > { %2385 = vmatprep.subr.bf16.mxu0 %v2536_v56 }
  0x98   : > { %2386 = vmatpush3.bf16.xpose.msra.mxu0 %v2536_v56  ;;  %v1002_v56 = vsub.f32 1.0, %v761_v45 }
  0x9a   : > { %v1018_v5 = vmul.f32 10000.0, %v1002_v56  ;;  %v2545_v56 = vld [vmem:[%s3085_s8] sm:$0xff]  }
  0x9b   : > { %2403 = vmatprep.subr.bf16.mxu1 %v2545_v56 }
  0x9c   : > { %2404 = vmatpush3.bf16.msra.mxu1 %v2545_v56 }
  0x9f   : > { %2388 = vmatmul.mubr.bf16.vlgmr.msra.gmra.mrb[0].mxu0 %v2538_v57 }
  0xa0   : > { %2391 = vmatprep.mubr.bf16.mxu0 %v2539_v58 }
  0xa7   : > { %2392 = vmatmul.mubr.bf16.gmra.mrb[4].mxu0 %v2540_v59  ;;  %v1015_v59 = vmul.f32 10000.0, %v999_v46 }
  0xa8   : > { %2395 = vmatprep.mubr.bf16.mxu0 %v2541_v60  ;;  %v1005_v60 = vsub.f32 1.0, %v764_v49 }
  0xaf   : > { %2396 = vmatmul.mubr.bf16.gmra.mrb[8].mxu0 %v2542_v61 }
  0xb0   : > { %2399 = vmatprep.mubr.bf16.mxu0 %v2543_v62  ;;  %v1004_v62 = vsub.f32 1.0, %v763_v51 }
  0xb2   : > { %v1020_v15 = vmul.f32 10000.0, %v1004_v62 }
  0xb7   : > { %2400 = vmatmul.mubr.bf16.gmra.mrb[12].mxu0 %v2544_v63 }
 0x172   : > { %v2389_v7 = vpop.f32.mrb[0].mxu0 }
 0x173   : > { %v964_v8 = vmul.f32 0.088388346, %v2389_v7  ;;  %v899_v9 = vpop.f32.mrb[1].mxu0 }
 0x174   : > { %v962_v12 = vmul.f32 0.088388346, %v899_v9  ;;  %v2390_v13 = vpop.f32.mrb[2].mxu0  ;;  %v1021_v9 = vmul.f32 10000.0, %v1005_v60  ;;  %v3091_v60 = vld [vmem:[#allocation2] sm:$0xff] }
 0x175   : > { %v980_v16 = vmul.f32 %v964_v8, %v755_v1  ;;  %v965_v17 = vmul.f32 0.088388346, %v2390_v13  ;;  %v902_v18 = vpop.f32.mrb[3].mxu0  ;;  %v1003_v1 = vsub.f32 1.0, %v762_v55 }
 0x176   : > { %v978_v20 = vmul.f32 %v962_v12, %v753_v2  ;;  %v963_v21 = vmul.f32 0.088388346, %v902_v18 }
 0x177   : > { %v981_v23 = vmul.f32 %v965_v17, %v756_v4  ;;  %v3010_v24 = vsub.f32 %v980_v16, %v1012_v10  ;;  %v765_v10 = vld [vmem:[%s3002_s9 + $0x60] sm:$0xff]  ;;  %v767_v17 = vld [vmem:[%s3002_s9 + $0x70] sm:$0xff]  ;;  %v1019_v18 = vmul.f32 10000.0, %v1003_v1  ;;  %v3099_v1 = vld [vmem:[#allocation2 + $0x18] sm:$0xff] }
 0x178   : > { %v979_v26 = vmul.f32 %v963_v21, %v754_v6  ;;  %v3012_v27 = vsub.f32 %v978_v20, %v1010_v14  ;;  %v768_v14 = vld [vmem:[%s3002_s9 + $0x78] sm:$0xff]  ;;  %v766_v21 = vld [vmem:[%s3002_s9 + $0x68] sm:$0xff]  ;;  %v1008_v30 = vsub.f32 1.0, %v767_v17 }
 0x179   : > { %1062 = vmax.xlane.f32.xlu1 %v3010_v24  ;;  %v3018_v35 = vsub.f32 %v981_v23, %v1013_v25  ;;  %v2738_v23 = vmov 0  }
 0x17a   : > { %1058 = vmax.xlane.f32.xlu0 %v3012_v27  ;;  %v2393_v32 = vpop.f32.mrb[4].mxu0  ;;  %v3020_v40 = vsub.f32 %v979_v26, %v1011_v29  ;;  %2528 = vset.pattern.permute.xlu1 %v2738_v23  ;;  %v1009_v26 = vsub.f32 1.0, %v768_v14  ;;  %v1024_v46 = vmul.f32 10000.0, %v1008_v30 }
 0x17b   : > { %v915_v34 = vpop.f32.mrb[5].mxu0  ;;  %v968_v37 = vmul.f32 0.088388346, %v2393_v32  ;;  %2527 = vset.pattern.permute.xlu0 %v2738_v23  ;;  %v2549_v23 = vld [vmem:[%s3085_s8 + $0x20] sm:$0xff]  }
 0x17c   : > { %v966_v38 = vmul.f32 0.088388346, %v915_v34  ;;  %v2394_v39 = vpop.f32.mrb[6].mxu0  ;;  %v1007_v34 = vsub.f32 1.0, %v766_v21 }
 0x17d   : > { %v969_v42 = vmul.f32 0.088388346, %v2394_v39  ;;  %1064 = vmax.xlane.f32.xlu1 %v3018_v35  ;;  %v918_v43 = vpop.f32.mrb[7].mxu0  ;;  %v984_v52 = vmul.f32 %v968_v37, %v759_v28 }
 0x17e   : > { %v982_v47 = vmul.f32 %v966_v38, %v757_v19  ;;  %v967_v48 = vmul.f32 0.088388346, %v918_v43  ;;  %1060 = vmax.xlane.f32.xlu0 %v3020_v40 }
 0x17f   : > { %v985_v50 = vmul.f32 %v969_v42, %v760_v22  ;;  %v3034_v4 = vsub.f32 %v984_v52, %v1016_v54  ;;  %v1006_v22 = vsub.f32 1.0, %v765_v10  ;;  %v1025_v42 = vmul.f32 10000.0, %v1009_v26 }
 0x180   : > { %v3027_v53 = vsub.f32 %v982_v47, %v1014_v41  ;;  %v983_v57 = vmul.f32 %v967_v48, %v758_v33  ;;  %v1023_v48 = vmul.f32 10000.0, %v1007_v34 }
 0x181   : > { %v3030_v58 = vsub.f32 %v985_v50, %v1017_v44  ;;  %v1022_v38 = vmul.f32 10000.0, %v1006_v22  ;;  %v3141_v22 = vld [vmem:[#allocation2 + $0x30] sm:$0xff] }
 0x182   : > { %1066 = vmax.xlane.f32.xlu0 %v3027_v53  ;;  %v2397_v61 = vpop.f32.mrb[8].mxu0  ;;  %v3036_v7 = vsub.f32 %v983_v57, %v1015_v59  ;;  %v2546_v57 = vld [vmem:[%s3085_s8 + $0x8] sm:$0xff]   ;;  %v3089_v59 = vld [vmem:[#allocation2 + $0x10] sm:$0xff] }
 0x183   : > { %v972_v63 = vmul.f32 0.088388346, %v2397_v61  ;;  %1072 = vmax.xlane.f32.xlu1 %v3030_v58  ;;  %v931_v0 = vpop.f32.mrb[9].mxu0  ;;  %2405 = vmatprep.subr.bf16.mxu1 %v2546_v57 }
 0x184   : > { %v970_v2 = vmul.f32 0.088388346, %v931_v0  ;;  %v2398_v3 = vpop.f32.mrb[10].mxu0  ;;  %2406 = vmatpush3.bf16.msra.mxu1 %v2546_v57 }
 0x185   : > { %v973_v6 = vmul.f32 0.088388346, %v2398_v3  ;;  %v934_v8 = vpop.f32.mrb[11].mxu0  ;;  %v988_v11 = vmul.f32 %v972_v63, %v763_v51  ;;  %v2739_v51 = vmov 0.0   ;;  %v3106_v3 = vld [vmem:[#allocation2 + $0x8] sm:$0xff] }
 0x186   : > { %v986_v12 = vmul.f32 %v970_v2, %v761_v45  ;;  %1070 = vmax.xlane.f32.xlu0 %v3034_v4  ;;  %v971_v13 = vmul.f32 0.088388346, %v934_v8  ;;  %675 = vst.msk [vmem:[#allocation3 + $0x10] sm:$0xff] %vm656_vm0, %v2739_v51  ;;  %673 = vst.msk [vmem:[#allocation3] sm:$0xff] %vm656_vm0, %v2739_v51 }
 0x187   : > { %v989_v16 = vmul.f32 %v973_v6, %v764_v49  ;;  %1068 = vmax.xlane.f32.xlu1 %v3036_v7  ;;  %v3049_v29 = vsub.f32 %v988_v11, %v1020_v15  ;;  %674 = vst.msk [vmem:[#allocation3 + $0x8] sm:$0xff] %vm656_vm0, %v2739_v51  ;;  %676 = vst.msk [vmem:[#allocation3 + $0x18] sm:$0xff] %vm656_vm0, %v2739_v51 }
 0x188   : > { %v987_v19 = vmul.f32 %v971_v13, %v762_v55  ;;  %v3043_v20 = vsub.f32 %v986_v12, %v1018_v5  ;;  %677 = vst.msk [vmem:[#allocation3 + $0x20] sm:$0xff] %vm656_vm0, %v2739_v51  ;;  %678 = vst.msk [vmem:[#allocation3 + $0x28] sm:$0xff] %vm656_vm0, %v2739_v51  ;;  %v2547_v5 = vld [vmem:[%s3085_s8 + $0x10] sm:$0xff]   ;;  %v3125_v13 = vld [vmem:[#allocation2 + $0x20] sm:$0xff] }
 0x189   : > { %v3046_v25 = vsub.f32 %v989_v16, %v1021_v9  ;;  %679 = vst.msk [vmem:[#allocation3 + $0x30] sm:$0xff] %vm656_vm0, %v2739_v51  ;;  %680 = vst.msk [vmem:[#allocation3 + $0x38] sm:$0xff] %vm656_vm0, %v2739_v51  ;;  %2407 = vmatprep.subr.bf16.mxu1 %v2547_v5  ;;  %v3132_v16 = vld [vmem:[#allocation2 + $0x38] sm:$0xff] }
 0x18a   : > { %v2401_v28 = vpop.f32.mrb[12].mxu0  ;;  %1074 = vmax.xlane.f32.xlu0 %v3043_v20  ;;  %v3052_v33 = vsub.f32 %v987_v19, %v1019_v18  ;;  %681 = vst.msk [vmem:[#allocation3 + $0x40] sm:$0xff] %vm656_vm0, %v2739_v51  ;;  %682 = vst.msk [vmem:[#allocation3 + $0x48] sm:$0xff] %vm656_vm0, %v2739_v51  ;;  %2408 = vmatpush3.bf16.msra.mxu1 %v2547_v5 }
 0x18b   : > { %v976_v31 = vmul.f32 0.088388346, %v2401_v28  ;;  %1080 = vmax.xlane.f32.xlu1 %v3046_v25  ;;  %v947_v32 = vpop.f32.mrb[13].mxu0  ;;  %683 = vst.msk [vmem:[#allocation3 + $0x50] sm:$0xff] %vm656_vm0, %v2739_v51  ;;  %684 = vst.msk [vmem:[#allocation3 + $0x58] sm:$0xff] %vm656_vm0, %v2739_v51  ;;  %v3148_v28 = vld [vmem:[#allocation2 + $0x28] sm:$0xff] }
 0x18c   : > { %v974_v36 = vmul.f32 0.088388346, %v947_v32  ;;  %v2402_v37 = vpop.f32.mrb[14].mxu0  ;;  %685 = vst.msk [vmem:[#allocation3 + $0x60] sm:$0xff] %vm656_vm0, %v2739_v51  ;;  %686 = vst.msk [vmem:[#allocation3 + $0x68] sm:$0xff] %vm656_vm0, %v2739_v51 }
 0x18d   : > { %v977_v39 = vmul.f32 0.088388346, %v2402_v37  ;;  %v950_v41 = vpop.f32.mrb[15].mxu0  ;;  %v992_v43 = vmul.f32 %v976_v31, %v767_v17  ;;  %687 = vst.msk [vmem:[#allocation3 + $0x70] sm:$0xff] %vm656_vm0, %v2739_v51  ;;  %688 = vst.msk [vmem:[#allocation3 + $0x78] sm:$0xff] %vm656_vm0, %v2739_v51  ;;  %v3160_v37 = vld [vmem:[#allocation2 + $0x40] sm:$0xff] }
 0x18e   : > { %v990_v44 = vmul.f32 %v974_v36, %v765_v10  ;;  %1078 = vmax.xlane.f32.xlu0 %v3049_v29  ;;  %v975_v45 = vmul.f32 0.088388346, %v950_v41  ;;  %v3168_v41 = vld [vmem:[#allocation2 + $0x58] sm:$0xff]  ;;  %v3188_v51 = vld [vmem:[#allocation2 + $0x48] sm:$0xff] }
 0x18f   : > { %v993_v47 = vmul.f32 %v977_v39, %v768_v14  ;;  %1076 = vmax.xlane.f32.xlu1 %v3052_v33  ;;  %v3077_v54 = vsub.f32 %v992_v43, %v1024_v46  ;;  %v2548_v14 = vld [vmem:[%s3085_s8 + $0x18] sm:$0xff]  }
 0x190   : > { %v991_v49 = vmul.f32 %v975_v45, %v766_v21  ;;  %v3056_v50 = vsub.f32 %v990_v44, %v1022_v38  ;;  %2409 = vmatprep.subr.bf16.mxu1 %v2548_v14  ;;  %v2550_v38 = vld [vmem:[%s3085_s8 + $0x28] sm:$0xff]  }
 0x191   : > { %v3074_v52 = vsub.f32 %v993_v47, %v1025_v42  ;;  %2410 = vmatpush3.bf16.msra.mxu1 %v2548_v14  ;;  %v3180_v47 = vld [vmem:[#allocation2 + $0x50] sm:$0xff] }
 0x192   : > { %1082 = vmax.xlane.f32.xlu0 %v3056_v50  ;;  %v3080_v55 = vsub.f32 %v991_v49, %v1023_v48  ;;  %2411 = vmatprep.subr.bf16.mxu1 %v2549_v23  ;;  %v2551_v48 = vld [vmem:[%s3085_s8 + $0x30] sm:$0xff]  }
 0x193   : > { %1088 = vmax.xlane.f32.xlu1 %v3074_v52 }
 0x195   : > { %2412 = vmatpush3.bf16.msra.mxu1 %v2549_v23 }
 0x196   : > { %1086 = vmax.xlane.f32.xlu0 %v3077_v54  ;;  %2413 = vmatprep.subr.bf16.mxu1 %v2550_v38 }
 0x197   : > { %1084 = vmax.xlane.f32.xlu1 %v3080_v55 }
 0x199   : > { %2414 = vmatpush3.bf16.msra.mxu1 %v2550_v38 }
 0x19a   : > { %2415 = vmatprep.subr.bf16.mxu1 %v2551_v48 }
 0x19d   : > { %2416 = vmatpush3.bf16.msra.mxu1 %v2551_v48  ;;  %v3228_v48 = vld [vmem:[#allocation2 + $0x68] sm:$0xff] }
 0x206   : > { %v1063_v61 = vpop.xlane.xlu1 %1062 }
 0x207   : > { %v3094_v62 = vmax.f32 %v3089_v59, %v1063_v61  ;;  %v1059_v63 = vpop.xlane.xlu0 %1058 }
 0x208   : > { %v3097_v0 = vmax.f32 %v3091_v60, %v1059_v63 }
 0x209   : > { %v1108_v2 = vsub.f32 %v3089_v59, %v3094_v62  ;;  %1678 = vst.msk [vmem:[#allocation2 + $0x10] sm:$0xff] %vm656_vm0, %v3094_v62  ;;  %1166 = vperm.xlu1 %2528, %v3094_v62  }
 0x20a   : > { %1676 = vst.msk [vmem:[#allocation2] sm:$0xff] %vm656_vm0, %v3097_v0  ;;  %v1065_v8 = vpop.xlane.xlu1 %1064  ;;  %1156 = vperm.xlu0 %2527, %v3097_v0  }
 0x20b   : > { %v3115_v9 = vmax.f32 %v3099_v1, %v1065_v8  ;;  %v1061_v10 = vpop.xlane.xlu0 %1060  ;;  %v3200_v8 = vld [vmem:[#allocation2 + $0x60] sm:$0xff] }
 0x20c   : > { %v3118_v11 = vmax.f32 %v3106_v3, %v1061_v10  ;;  %v2552_v10 = vld [vmem:[%s3085_s8 + $0x38] sm:$0xff]  }
 0x20d   : > { %1679 = vst.msk [vmem:[#allocation2 + $0x18] sm:$0xff] %vm656_vm0, %v3115_v9  ;;  %1171 = vperm.xlu1 %2528, %v3115_v9   ;;  %2417 = vmatprep.subr.bf16.mxu1 %v2552_v10 }
 0x20e   : > { %v1107_v15 = vsub.f32 %v3106_v3, %v3118_v11  ;;  %1677 = vst.msk [vmem:[#allocation2 + $0x8] sm:$0xff] %vm656_vm0, %v3118_v11  ;;  %2418 = vmatpush3.bf16.msra.mxu1 %v2552_v10 }
 0x20f   : > { %v1067_v17 = vpop.xlane.xlu0 %1066 }
 0x210   : > { %v3135_v18 = vmax.f32 %v3125_v13, %v1067_v17  ;;  %v1073_v19 = vpop.xlane.xlu1 %1072  ;;  %v3208_v17 = vld [vmem:[#allocation2 + $0x78] sm:$0xff] }
 0x211   : > { %v3138_v21 = vmax.f32 %v3132_v16, %v1073_v19  ;;  %1161 = vperm.xlu1 %2528, %v3118_v11  }
 0x212   : > { %1680 = vst.msk [vmem:[#allocation2 + $0x20] sm:$0xff] %vm656_vm0, %v3135_v18 }
 0x213   : > { %1683 = vst.msk [vmem:[#allocation2 + $0x38] sm:$0xff] %vm656_vm0, %v3138_v21  ;;  %v1071_v31 = vpop.xlane.xlu0 %1070 }
 0x214   : > { %v3155_v32 = vmax.f32 %v3141_v22, %v1071_v31  ;;  %v1069_v34 = vpop.xlane.xlu1 %1068 }
 0x215   : > { %v3158_v36 = vmax.f32 %v3148_v28, %v1069_v34 }
 0x216   : > { %1682 = vst.msk [vmem:[#allocation2 + $0x30] sm:$0xff] %vm656_vm0, %v3155_v32  ;;  %1186 = vperm.xlu1 %2528, %v3155_v32   ;;  %v3503_v59 = vsub.f32 %v3141_v22, %v3155_v32 }
 0x217   : > { %1681 = vst.msk [vmem:[#allocation2 + $0x28] sm:$0xff] %vm656_vm0, %v3158_v36  ;;  %v1075_v43 = vpop.xlane.xlu0 %1074 }
 0x218   : > { %v1081_v44 = vpop.xlane.xlu1 %1080  ;;  %v3175_v45 = vmax.f32 %v3160_v37, %v1075_v43  ;;  %v3221_v43 = vld [vmem:[#allocation2 + $0x70] sm:$0xff]  ;;  %v1134_v62 = vmul.f32 1.442695, %v3503_v59 }
 0x219   : > { %v3178_v46 = vmax.f32 %v3168_v41, %v1081_v44 }
 0x21a   : > { %1684 = vst.msk [vmem:[#allocation2 + $0x40] sm:$0xff] %vm656_vm0, %v3175_v45  ;;  %1176 = vperm.xlu1 %2528, %v3135_v18   ;;  %v3505_v11 = vsub.f32 %v3160_v37, %v3175_v45 }
 0x21b   : > { %1687 = vst.msk [vmem:[#allocation2 + $0x58] sm:$0xff] %vm656_vm0, %v3178_v46  ;;  %v1079_v57 = vpop.xlane.xlu0 %1078 }
 0x21c   : > { %v1077_v61 = vpop.xlane.xlu1 %1076  ;;  %v3195_v63 = vmax.f32 %v3180_v47, %v1079_v57 }
 0x21d   : > { %v3198_v5 = vmax.f32 %v3188_v51, %v1077_v61 }
 0x21e   : > { %1686 = vst.msk [vmem:[#allocation2 + $0x50] sm:$0xff] %vm656_vm0, %v3195_v63  ;;  %1181 = vperm.xlu1 %2528, %v3158_v36   ;;  %v3507_v22 = vsub.f32 %v3180_v47, %v3195_v63  ;;  %v3510_v47 = vsub.f32 %v3168_v41, %v3178_v46 }
 0x21f   : > { %1685 = vst.msk [vmem:[#allocation2 + $0x48] sm:$0xff] %vm656_vm0, %v3198_v5  ;;  %1201 = vperm.xlu0 %2527, %v3198_v5   ;;  %v1083_v23 = vpop.xlane.xlu0 %1082  ;;  %v3508_v32 = vsub.f32 %v3188_v51, %v3198_v5 }
 0x220   : > { %v1089_v31 = vpop.xlane.xlu1 %1088  ;;  %v3216_v34 = vmax.f32 %v3200_v8, %v1083_v23 }
 0x221   : > { %v3219_v38 = vmax.f32 %v3208_v17, %v1089_v31 }
 0x222   : > { %1688 = vst.msk [vmem:[#allocation2 + $0x60] sm:$0xff] %vm656_vm0, %v3216_v34  ;;  %1191 = vperm.xlu1 %2528, %v3138_v21  }
 0x223   : > { %1691 = vst.msk [vmem:[#allocation2 + $0x78] sm:$0xff] %vm656_vm0, %v3219_v38  ;;  %1211 = vperm.xlu0 %2527, %v3178_v46   ;;  %v1087_v61 = vpop.xlane.xlu0 %1086  ;;  %v3513_v46 = vsub.f32 %v3208_v17, %v3219_v38 }
 0x224   : > { %v1085_v10 = vpop.xlane.xlu1 %1084  ;;  %v3236_v23 = vmax.f32 %v3221_v43, %v1087_v61 }
 0x225   : > { %v3239_v31 = vmax.f32 %v3228_v48, %v1085_v10 }
 0x226   : > { %1690 = vst.msk [vmem:[#allocation2 + $0x70] sm:$0xff] %vm656_vm0, %v3236_v23  ;;  %1196 = vperm.xlu1 %2528, %v3175_v45   ;;  %v3511_v51 = vsub.f32 %v3221_v43, %v3236_v23  ;;  %v1152_v43 = vmul.f32 1.442695, %v3513_v46 }
 0x227   : > { %1689 = vst.msk [vmem:[#allocation2 + $0x68] sm:$0xff] %vm656_vm0, %v3239_v31  ;;  %1221 = vperm.xlu0 %2527, %v3239_v31  }
 0x228   : > { %v1150_v5 = vmul.f32 1.442695, %v3511_v51  ;;  %v1290_v51 = vld [vmem:[#allocation3 + $0x40] sm:$0xff] }
 0x22a   : > { %1206 = vperm.xlu1 %2528, %v3195_v63   ;;  %v1144_v63 = vmul.f32 1.442695, %v3510_v47 }
 0x22b   : > { %1231 = vperm.xlu0 %2527, %v3219_v38  }
 0x22e   : > { %1216 = vperm.xlu1 %2528, %v3216_v34  }
 0x232   : > { %1226 = vperm.xlu1 %2528, %v3236_v23  }
 0x288   : > { %v1167_v61 = vpop.permute.xlu1 %1166 }
 0x289   : > { %v1236_v10 = vsub.f32 %v3010_v24, %v1167_v61  ;;  %v1157_v56 = vpop.permute.xlu0 %1156 }
 0x28a   : > { %v1234_v44 = vsub.f32 %v3012_v27, %v1157_v56 }
 0x28b   : > { %v1254_v57 = vmul.f32 1.442695, %v1236_v10 }
 0x28c   : > { %v1250_v19 = vmul.f32 1.442695, %v1234_v44  ;;  %v1172_v14 = vpop.permute.xlu1 %1171 }
 0x28d   : > { %2553 = vpow2.f32 %v1254_v57  ;;  %v1237_v30 = vsub.f32 %v3018_v35, %v1172_v14 }
 0x28e   : > { %2555 = vpow2.f32 %v1250_v19 }
 0x28f   : > { %v1256_v49 = vmul.f32 1.442695, %v1237_v30 }
 0x290   : > { %v1162_v42 = vpop.permute.xlu1 %1161 }
 0x291   : > { %2557 = vpow2.f32 %v1256_v49  ;;  %v1235_v39 = vsub.f32 %v3020_v40, %v1162_v42 }
 0x293   : > { %v1252_v12 = vmul.f32 1.442695, %v1235_v39 }
 0x295   : > { %2559 = vpow2.f32 %v1252_v12  ;;  %v1187_v26 = vpop.permute.xlu1 %1186 }
 0x296   : > { %v1240_v24 = vsub.f32 %v3034_v4, %v1187_v26 }
 0x297   : > { %v2554_v61 = vpop.eup %2553 }
 0x298   : > { %v2556_v6 = vpop.eup %2555  ;;  %v1262_v27 = vmul.f32 1.442695, %v1240_v24  ;;  %1318 = vadd.xlane.f32.xlu0 %v2554_v61 }
 0x299   : > { %1314 = vadd.xlane.f32.xlu1 %v2556_v6  ;;  %v1177_v56 = vpop.permute.xlu1 %1176 }
 0x29a   : > { %2561 = vpow2.f32 %v1262_v27  ;;  %v1238_v35 = vsub.f32 %v3027_v53, %v1177_v56 }
 0x29b   : > { %v2558_v14 = vpop.eup %2557 }
 0x29c   : > { %v1258_v30 = vmul.f32 1.442695, %v1238_v35  ;;  %v1492_v44 = vpack.c.bf16 %v2558_v14, %v2554_v61 }
 0x29d   : > { %1320 = vadd.xlane.f32.xlu1 %v2558_v14  ;;  %v1182_v49 = vpop.permute.xlu1 %1181 }
 0x29e   : > { %2563 = vpow2.f32 %v1258_v30  ;;  %v1239_v40 = vsub.f32 %v3036_v7, %v1182_v49  ;;  %v1202_v12 = vpop.permute.xlu0 %1201 }
 0x29f   : > { %v2560_v39 = vpop.eup %2559  ;;  %v1243_v26 = vsub.f32 %v3052_v33, %v1202_v12 }
 0x2a0   : > { %v1260_v42 = vmul.f32 1.442695, %v1239_v40  ;;  %1316 = vadd.xlane.f32.xlu0 %v2560_v39  ;;  %v1491_v4 = vpack.c.bf16 %v2560_v39, %v2556_v6 }
 0x2a1   : > { %v1192_v19 = vpop.permute.xlu1 %1191  ;;  %v1268_v27 = vmul.f32 1.442695, %v1243_v26 }
 0x2a2   : > { %2565 = vpow2.f32 %v1260_v42  ;;  %v1241_v57 = vsub.f32 %v3030_v58, %v1192_v19  ;;  %v1212_v53 = vpop.permute.xlu0 %1211  ;;  %2419 = vmatprep.mubr.bf16.mxu1 %v1491_v4 }
 0x2a3   : > { %2420 = vmatmul.mubr.bf16.vlgmr.msra.gmra.mrb[0].mxu1 %v1492_v44  ;;  %v1245_v7 = vsub.f32 %v3046_v25, %v1212_v53 }
 0x2a4   : > { %v2562_v10 = vpop.eup %2561  ;;  %v1264_v24 = vmul.f32 1.442695, %v1241_v57 }
 0x2a5   : > { %1326 = vadd.xlane.f32.xlu0 %v2562_v10  ;;  %v1197_v56 = vpop.permute.xlu1 %1196  ;;  %v1272_v61 = vmul.f32 1.442695, %v1245_v7 }
 0x2a6   : > { %2567 = vpow2.f32 %v1264_v24  ;;  %v1242_v6 = vsub.f32 %v3043_v20, %v1197_v56  ;;  %v1222_v35 = vpop.permute.xlu0 %1221 }
 0x2a7   : > { %2569 = vpow2.f32 %v1268_v27  ;;  %v1247_v58 = vsub.f32 %v3080_v55, %v1222_v35 }
 0x2a8   : > { %v2564_v33 = vpop.eup %2563  ;;  %v1266_v30 = vmul.f32 1.442695, %v1242_v6 }
 0x2a9   : > { %1322 = vadd.xlane.f32.xlu0 %v2564_v33  ;;  %v1207_v14 = vpop.permute.xlu1 %1206  ;;  %v1276_v39 = vmul.f32 1.442695, %v1247_v58  ;;  %v1124_v58 = vmul.f32 1.442695, %v1107_v15 }
 0x2aa   : > { %2571 = vpow2.f32 %v1266_v30  ;;  %v1244_v49 = vsub.f32 %v3049_v29, %v1207_v14  ;;  %v1232_v40 = vpop.permute.xlu0 %1231  ;;  %v1126_v14 = vmul.f32 1.442695, %v1108_v2 }
 0x2ab   : > { %2573 = vpow2.f32 %v1272_v61  ;;  %v1249_v42 = vsub.f32 %v3074_v52, %v1232_v40 }
 0x2ac   : > { %v2566_v12 = vpop.eup %2565  ;;  %v1270_v25 = vmul.f32 1.442695, %v1244_v49  ;;  %v3500_v49 = vsub.f32 %v3091_v60, %v3097_v0  ;;  %v3504_v60 = vsub.f32 %v3148_v28, %v3158_v36  ;;  %v1142_v28 = vmul.f32 1.442695, %v3507_v22 }
 0x2ad   : > { %v1217_v20 = vpop.permute.xlu1 %1216  ;;  %v1493_v4 = vpack.c.bf16 %v2566_v12, %v2564_v33  ;;  %v1280_v44 = vmul.f32 1.442695, %v1249_v42  ;;  %v1140_v36 = vmul.f32 1.442695, %v3508_v32 }
 0x2ae   : > { %2575 = vpow2.f32 %v1270_v25  ;;  %v1246_v26 = vsub.f32 %v3056_v50, %v1217_v20  ;;  %v1122_v40 = vmul.f32 1.442695, %v3500_v49  ;;  %v1132_v0 = vmul.f32 1.442695, %v3504_v60 }
 0x2af   : > { %2423 = vmatprep.mubr.bf16.mxu1 %v1493_v4  ;;  %2577 = vpow2.f32 %v1276_v39  ;;  %v3502_v39 = vsub.f32 %v3099_v1, %v3115_v9  ;;  %v1138_v1 = vmul.f32 1.442695, %v3505_v11  ;;  %v3506_v9 = vsub.f32 %v3132_v16, %v3138_v21 }
 0x2b0   : > { %v2568_v19 = vpop.eup %2567  ;;  %v1274_v55 = vmul.f32 1.442695, %v1246_v26  ;;  %v3509_v16 = vsub.f32 %v3200_v8, %v3216_v34  ;;  %v3512_v8 = vsub.f32 %v3228_v48, %v3239_v31 }
 0x2b1   : > { %1328 = vadd.xlane.f32.xlu1 %v2568_v19  ;;  %v1227_v57 = vpop.permute.xlu1 %1226  ;;  %v1494_v29 = vpack.c.bf16 %v2568_v19, %v2562_v10  ;;  %v2570_v24 = vpop.eup %2569  ;;  %v1128_v3 = vmul.f32 1.442695, %v3502_v39 }
 0x2b2   : > { %2579 = vpow2.f32 %v1274_v55  ;;  %v1248_v53 = vsub.f32 %v3077_v54, %v1227_v57  ;;  %v1146_v21 = vmul.f32 1.442695, %v3509_v16  ;;  %v1148_v34 = vmul.f32 1.442695, %v3512_v8  ;;  %v1284_v55 = vld [vmem:[#allocation3 + $0x10] sm:$0xff] }
 0x2b3   : > { %2424 = vmatmul.mubr.bf16.gmra.mrb[4].mxu1 %v1494_v29  ;;  %2581 = vpow2.f32 %v1280_v44  ;;  %v1282_v44 = vld [vmem:[#allocation3] sm:$0xff] }
 0x2b4   : > { %v2572_v27 = vpop.eup %2571  ;;  %v1278_v52 = vmul.f32 1.442695, %v1248_v53 }
 0x2b5   : > { %1324 = vadd.xlane.f32.xlu1 %v2566_v12  ;;  %v1495_v7 = vpack.c.bf16 %v2570_v24, %v2572_v27  ;;  %v2574_v50 = vpop.eup %2573  ;;  %v3501_v12 = vsub.f32 %v3125_v13, %v3135_v18  ;;  %v1136_v13 = vmul.f32 1.442695, %v3506_v9 }
 0x2b6   : > { %2583 = vpow2.f32 %v1278_v52  ;;  %v1285_v52 = vld [vmem:[#allocation3 + $0x18] sm:$0xff] }
 0x2b7   : > { %2427 = vmatprep.mubr.bf16.mxu1 %v1495_v7  ;;  %2585 = vpow2.f32 %v1124_v58  ;;  %v1130_v25 = vmul.f32 1.442695, %v3501_v12 }
 0x2b8   : > { %v2576_v56 = vpop.eup %2575  ;;  %2587 = vpow2.f32 %v1126_v14 }
 0x2b9   : > { %1336 = vadd.xlane.f32.xlu1 %v2574_v50  ;;  %1334 = vadd.xlane.f32.xlu0 %v2576_v56  ;;  %v1496_v6 = vpack.c.bf16 %v2574_v50, %v2576_v56  ;;  %v2578_v35 = vpop.eup %2577  ;;  %2589 = vpow2.f32 %v1122_v40  ;;  %v1283_v56 = vld [vmem:[#allocation3 + $0x8] sm:$0xff]  ;;  %v1286_v40 = vld [vmem:[#allocation3 + $0x20] sm:$0xff] }
 0x2ba   : > { %2591 = vpow2.f32 %v1130_v25 }
 0x2bb   : > { %2428 = vmatmul.mubr.bf16.gmra.mrb[8].mxu1 %v1496_v6  ;;  %2593 = vpow2.f32 %v1128_v3 }
 0x2bc   : > { %v2580_v10 = vpop.eup %2579  ;;  %2595 = vpow2.f32 %v1134_v62 }
 0x2bd   : > { %1332 = vadd.xlane.f32.xlu1 %v2570_v24  ;;  %1330 = vadd.xlane.f32.xlu0 %v2572_v27  ;;  %v1497_v54 = vpack.c.bf16 %v2578_v35, %v2580_v10  ;;  %v2582_v33 = vpop.eup %2581  ;;  %2597 = vpow2.f32 %v1132_v0  ;;  %v1289_v0 = vld [vmem:[#allocation3 + $0x38] sm:$0xff] }
 0x2be   : > { %2599 = vpow2.f32 %v1138_v1 }
 0x2bf   : > { %2431 = vmatprep.mubr.bf16.mxu1 %v1497_v54  ;;  %2601 = vpow2.f32 %v1136_v13  ;;  %v1287_v13 = vld [vmem:[#allocation3 + $0x28] sm:$0xff] }
 0x2c0   : > { %v2584_v30 = vpop.eup %2583  ;;  %2603 = vpow2.f32 %v1142_v28 }
 0x2c1   : > { %1344 = vadd.xlane.f32.xlu1 %v2582_v33  ;;  %1338 = vadd.xlane.f32.xlu0 %v2580_v10  ;;  %v1498_v61 = vpack.c.bf16 %v2582_v33, %v2584_v30  ;;  %v3292_v2 = vpop.eup %2585  ;;  %2605 = vpow2.f32 %v1140_v36 }
 0x2c2   : > { %v2588_v15 = vpop.eup %2587  ;;  %2607 = vpow2.f32 %v1146_v21  ;;  %v1299_v10 = vmul.f32 %v3292_v2, %v1283_v56 }
 0x2c3   : > { %2432 = vmatmul.mubr.bf16.gmra.mrb[12].mxu1 %v1498_v61  ;;  %v2590_v18 = vpop.eup %2589  ;;  %2609 = vpow2.f32 %v1144_v63  ;;  %v1300_v57 = vmul.f32 %v2588_v15, %v1284_v55  ;;  %v1294_v55 = vld [vmem:[#allocation3 + $0x60] sm:$0xff] }
 0x2c4   : > { %v3307_v37 = vpop.eup %2591  ;;  %2611 = vpow2.f32 %v1150_v5  ;;  %v1298_v53 = vmul.f32 %v2590_v18, %v1282_v44  ;;  %v1291_v5 = vld [vmem:[#allocation3 + $0x48] sm:$0xff]  ;;  %v1297_v44 = vld [vmem:[#allocation3 + $0x78] sm:$0xff] }
 0x2c5   : > { %1340 = vadd.xlane.f32.xlu1 %v2578_v35  ;;  %1342 = vadd.xlane.f32.xlu0 %v2584_v30  ;;  %v2594_v45 = vpop.eup %2593  ;;  %2613 = vpow2.f32 %v1148_v34  ;;  %v1288_v30 = vld [vmem:[#allocation3 + $0x30] sm:$0xff]  ;;  %v1302_v39 = vmul.f32 %v3307_v37, %v1286_v40 }
 0x2c6   : > { %v2596_v42 = vpop.eup %2595  ;;  %2615 = vpow2.f32 %v1152_v43  ;;  %v1301_v50 = vmul.f32 %v2594_v45, %v1285_v52 }
 0x2c7   : > { %v3316_v20 = vpop.eup %2597  ;;  %v1304_v58 = vmul.f32 %v2596_v42, %v1288_v30 }
 0x2c8   : > { %v3325_v4 = vpop.eup %2599  ;;  %v1303_v28 = vmul.f32 %v3316_v20, %v1287_v13 }
 0x2c9   : > { %v3327_v41 = vpop.eup %2601  ;;  %v1306_v46 = vmul.f32 %v3325_v4, %v1290_v51 }
 0x2ca   : > { %v3334_v23 = vpop.eup %2603  ;;  %v1305_v11 = vmul.f32 %v3327_v41, %v1289_v0 }
 0x2cb   : > { %v3336_v26 = vpop.eup %2605 }
 0x2cc   : > { %v3340_v48 = vpop.eup %2607  ;;  %v1307_v43 = vmul.f32 %v3336_v26, %v1291_v5 }
 0x2cd   : > { %v3342_v31 = vpop.eup %2609 }
 0x2ce   : > { %v3346_v17 = vpop.eup %2611 }
 0x2cf   : > { %v3348_v38 = vpop.eup %2613 }
 0x2d0   : > { %v3352_v19 = vpop.eup %2615 }
 0x2d6   : > { %1402 = vperm.xlu1 %2528, %v3292_v2  }
 0x2da   : > { %1407 = vperm.xlu1 %2528, %v2588_v15  }
 0x2db   : > { %1397 = vperm.xlu0 %2527, %v2590_v18  }
 0x2de   : > { %1417 = vperm.xlu1 %2528, %v3307_v37   ;;  %v1292_v37 = vld [vmem:[#allocation3 + $0x50] sm:$0xff] }
 0x2df   : > { %1412 = vperm.xlu0 %2527, %v2594_v45   ;;  %v1293_v45 = vld [vmem:[#allocation3 + $0x58] sm:$0xff]  ;;  %v1308_v21 = vmul.f32 %v3334_v23, %v1292_v37 }
 0x2e0   : > { %v1309_v47 = vmul.f32 %v3342_v31, %v1293_v45 }
 0x2e2   : > { %1427 = vperm.xlu1 %2528, %v2596_v42  }
 0x2e3   : > { %1422 = vperm.xlu0 %2527, %v3316_v20  }
 0x2e6   : > { %1437 = vperm.xlu1 %2528, %v3325_v4   ;;  %v1313_v4 = vmul.f32 %v3352_v19, %v1297_v44 }
 0x2e7   : > { %1432 = vperm.xlu0 %2527, %v3327_v41  }
 0x2ea   : > { %1447 = vperm.xlu1 %2528, %v3334_v23  }
 0x2eb   : > { %1442 = vperm.xlu0 %2527, %v3336_v26  }
 0x2ee   : > { %1457 = vperm.xlu1 %2528, %v3340_v48  }
 0x2ef   : > { %1452 = vperm.xlu0 %2527, %v3342_v31  }
 0x2f2   : > { %1467 = vperm.xlu1 %2528, %v3346_v17  }
 0x2f3   : > { %1462 = vperm.xlu0 %2527, %v3348_v38  }
 0x2f7   : > { %1472 = vperm.xlu0 %2527, %v3352_v19  }
 0x325   : > { %v1319_v29 = vpop.xlane.xlu0 %1318 }
 0x326   : > { %v1348_v24 = vadd.f32 %v1319_v29, %v1300_v57  ;;  %v1315_v27 = vpop.xlane.xlu1 %1314 }
 0x327   : > { %v1346_v7 = vadd.f32 %v1315_v27, %v1298_v53  ;;  %v1310_v27 = vmul.f32 %v3340_v48, %v1294_v55 }
 0x328   : > { %1365 = vst.msk [vmem:[#allocation3 + $0x10] sm:$0xff] %vm656_vm0, %v1348_v24 }
 0x329   : > { %1363 = vst.msk [vmem:[#allocation3] sm:$0xff] %vm656_vm0, %v1346_v7  ;;  %v1296_v7 = vld [vmem:[#allocation3 + $0x70] sm:$0xff] }
 0x32a   : > { %v1321_v6 = vpop.xlane.xlu1 %1320 }
 0x32b   : > { %v1349_v35 = vadd.f32 %v1321_v6, %v1301_v50  ;;  %v1295_v50 = vld [vmem:[#allocation3 + $0x68] sm:$0xff] }
 0x32d   : > { %1366 = vst.msk [vmem:[#allocation3 + $0x18] sm:$0xff] %vm656_vm0, %v1349_v35  ;;  %v1317_v54 = vpop.xlane.xlu0 %1316 }
 0x32e   : > { %v1347_v33 = vadd.f32 %v1317_v54, %v1299_v10  ;;  %v1312_v54 = vmul.f32 %v3346_v17, %v1296_v7 }
 0x32f   : > { %v1713_v61 = vld [vmem:[#allocation3 + $0x10] sm:$0xff] }
 0x330   : > { %1364 = vst.msk [vmem:[#allocation3 + $0x8] sm:$0xff] %vm656_vm0, %v1347_v33  ;;  %2617 = vrcp.f32 %v1713_v61  ;;  %v1711_v14 = vld [vmem:[#allocation3] sm:$0xff]  ;;  %v1311_v33 = vmul.f32 %v3348_v38, %v1295_v50 }
 0x331   : > { %2619 = vrcp.f32 %v1711_v14 }
 0x332   : > { %v1327_v49 = vpop.xlane.xlu0 %1326 }
 0x333   : > { %v1352_v12 = vadd.f32 %v1327_v49, %v1304_v58 }
 0x334   : > { %v1714_v25 = vld [vmem:[#allocation3 + $0x18] sm:$0xff] }
 0x335   : > { %1369 = vst.msk [vmem:[#allocation3 + $0x30] sm:$0xff] %vm656_vm0, %v1352_v12  ;;  %2621 = vrcp.f32 %v1714_v25 }
 0x336   : > { %v1323_v3 = vpop.xlane.xlu0 %1322 }
 0x337   : > { %v1350_v59 = vadd.f32 %v1323_v3, %v1302_v39  ;;  %v1712_v62 = vld [vmem:[#allocation3 + $0x8] sm:$0xff] }
 0x338   : > { %2623 = vrcp.f32 %v1712_v62 }
 0x339   : > { %1367 = vst.msk [vmem:[#allocation3 + $0x20] sm:$0xff] %vm656_vm0, %v1350_v59 }
 0x33a   : > { %v2618_v60 = vpop.eup %2617 }
 0x33b   : > { %1755 = vperm.xlu1 %2528, %v2618_v60   ;;  %v2620_v1 = vpop.eup %2619 }
 0x33c   : > { %v1717_v2 = vld [vmem:[#allocation3 + $0x30] sm:$0xff] }
 0x33d   : > { %2625 = vrcp.f32 %v1717_v2 }
 0x33e   : > { %v1329_v9 = vpop.xlane.xlu1 %1328 }
 0x33f   : > { %v2622_v15 = vpop.eup %2621  ;;  %v1353_v18 = vadd.f32 %v1329_v9, %v1305_v11  ;;  %1745 = vperm.xlu1 %2528, %v2620_v1  }
 0x340   : > { %1760 = vperm.xlu0 %2527, %v2622_v15   ;;  %v1715_v22 = vld [vmem:[#allocation3 + $0x20] sm:$0xff] }
 0x341   : > { %1370 = vst.msk [vmem:[#allocation3 + $0x38] sm:$0xff] %vm656_vm0, %v1353_v18  ;;  %2627 = vrcp.f32 %v1715_v22 }
 0x342   : > { %v2624_v32 = vpop.eup %2623  ;;  %v1325_v36 = vpop.xlane.xlu1 %1324 }
 0x343   : > { %v1351_v16 = vadd.f32 %v1325_v36, %v1303_v28 }
 0x344   : > { %1750 = vperm.xlu0 %2527, %v2624_v32  }
 0x345   : > { %1368 = vst.msk [vmem:[#allocation3 + $0x28] sm:$0xff] %vm656_vm0, %v1351_v16 }
 0x346   : > { %v1335_v63 = vpop.xlane.xlu0 %1334  ;;  %v1337_v42 = vpop.xlane.xlu1 %1336 }
 0x347   : > { %v2626_v8 = vpop.eup %2625  ;;  %v1356_v34 = vadd.f32 %v1335_v63, %v1308_v21  ;;  %v1357_v20 = vadd.f32 %v1337_v42, %v1309_v47 }
 0x348   : > { %1775 = vperm.xlu1 %2528, %v2626_v8   ;;  %v1718_v41 = vld [vmem:[#allocation3 + $0x38] sm:$0xff] }
 0x349   : > { %1373 = vst.msk [vmem:[#allocation3 + $0x50] sm:$0xff] %vm656_vm0, %v1356_v34  ;;  %1374 = vst.msk [vmem:[#allocation3 + $0x58] sm:$0xff] %vm656_vm0, %v1357_v20  ;;  %2629 = vrcp.f32 %v1718_v41 }
 0x34a   : > { %v1331_v23 = vpop.xlane.xlu0 %1330  ;;  %v1333_v31 = vpop.xlane.xlu1 %1332 }
 0x34b   : > { %v2628_v57 = vpop.eup %2627  ;;  %v1354_v29 = vadd.f32 %v1331_v23, %v1306_v46  ;;  %v1355_v53 = vadd.f32 %v1333_v31, %v1307_v43 }
 0x34c   : > { %1765 = vperm.xlu1 %2528, %v2628_v57   ;;  %v1716_v24 = vld [vmem:[#allocation3 + $0x28] sm:$0xff] }
 0x34d   : > { %1371 = vst.msk [vmem:[#allocation3 + $0x40] sm:$0xff] %vm656_vm0, %v1354_v29  ;;  %1372 = vst.msk [vmem:[#allocation3 + $0x48] sm:$0xff] %vm656_vm0, %v1355_v53  ;;  %2631 = vrcp.f32 %v1716_v24 }
 0x34e   : > { %v1339_v26 = vpop.xlane.xlu0 %1338  ;;  %v1345_v52 = vpop.xlane.xlu1 %1344 }
 0x34f   : > { %v1358_v56 = vadd.f32 %v1339_v26, %v1310_v27  ;;  %v1361_v6 = vadd.f32 %v1345_v52, %v1313_v4 }
 0x350   : > { %v1721_v35 = vld [vmem:[#allocation3 + $0x50] sm:$0xff]  ;;  %v1722_v10 = vld [vmem:[#allocation3 + $0x58] sm:$0xff] }
 0x351   : > { %1375 = vst.msk [vmem:[#allocation3 + $0x60] sm:$0xff] %vm656_vm0, %v1358_v56  ;;  %1378 = vst.msk [vmem:[#allocation3 + $0x78] sm:$0xff] %vm656_vm0, %v1361_v6  ;;  %2633 = vrcp.f32 %v1721_v35 }
 0x352   : > { %v1343_v48 = vpop.xlane.xlu0 %1342  ;;  %v1341_v19 = vpop.xlane.xlu1 %1340  ;;  %2635 = vrcp.f32 %v1722_v10 }
 0x353   : > { %v2630_v30 = vpop.eup %2629  ;;  %v1360_v61 = vadd.f32 %v1343_v48, %v1312_v54  ;;  %v1359_v58 = vadd.f32 %v1341_v19, %v1311_v33 }
 0x354   : > { %1780 = vperm.xlu0 %2527, %v2630_v30   ;;  %v1719_v14 = vld [vmem:[#allocation3 + $0x40] sm:$0xff]  ;;  %v1720_v49 = vld [vmem:[#allocation3 + $0x48] sm:$0xff] }
 0x355   : > { %1377 = vst.msk [vmem:[#allocation3 + $0x70] sm:$0xff] %vm656_vm0, %v1360_v61  ;;  %1376 = vst.msk [vmem:[#allocation3 + $0x68] sm:$0xff] %vm656_vm0, %v1359_v58  ;;  %2637 = vrcp.f32 %v1719_v14 }
 0x356   : > { %2639 = vrcp.f32 %v1720_v49  ;;  %v1403_v36 = vpop.permute.xlu1 %1402 }
 0x357   : > { %v2632_v40 = vpop.eup %2631  ;;  %v1476_v56 = vmul.f32 0.0, %v1403_v36 }
 0x358   : > { %1770 = vperm.xlu0 %2527, %v2632_v40   ;;  %v1723_v17 = vld [vmem:[#allocation3 + $0x60] sm:$0xff]  ;;  %v1726_v59 = vld [vmem:[#allocation3 + $0x78] sm:$0xff] }
 0x359   : > { %2641 = vrcp.f32 %v1723_v17 }
 0x35a   : > { %v1398_v21 = vpop.permute.xlu0 %1397  ;;  %v1408_v63 = vpop.permute.xlu1 %1407 }
 0x35b   : > { %v2634_v38 = vpop.eup %2633  ;;  %v1477_v4 = vmul.f32 0.0, %v1408_v63  ;;  %v1475_v6 = vmul.f32 0.0, %v1398_v21 }
 0x35c   : > { %v2636_v12 = vpop.eup %2635  ;;  %1795 = vperm.xlu1 %2528, %v2634_v38   ;;  %v1725_v25 = vld [vmem:[#allocation3 + $0x70] sm:$0xff]  ;;  %v1724_v39 = vld [vmem:[#allocation3 + $0x68] sm:$0xff] }
 0x35d   : > { %1800 = vperm.xlu0 %2527, %v2636_v12   ;;  %2643 = vrcp.f32 %v1725_v25 }
 0x35e   : > { %2645 = vrcp.f32 %v1724_v39  ;;  %v1413_v51 = vpop.permute.xlu0 %1412  ;;  %v1418_v34 = vpop.permute.xlu1 %1417 }
 0x35f   : > { %v2638_v3 = vpop.eup %2637  ;;  %2647 = vrcp.f32 %v1726_v59  ;;  %v1478_v26 = vmul.f32 0.0, %v1413_v51  ;;  %v1479_v39 = vmul.f32 0.0, %v1418_v34 }
 0x360   : > { %v2640_v62 = vpop.eup %2639  ;;  %1785 = vperm.xlu1 %2528, %v2638_v3  }
 0x361   : > { %1790 = vperm.xlu0 %2527, %v2640_v62  }
 0x362   : > { %v1423_v41 = vpop.permute.xlu0 %1422  ;;  %v1428_v46 = vpop.permute.xlu1 %1427 }
 0x363   : > { %v2642_v60 = vpop.eup %2641  ;;  %v1481_v40 = vmul.f32 0.0, %v1428_v46  ;;  %v1480_v3 = vmul.f32 0.0, %v1423_v41 }
 0x364   : > { %1805 = vperm.xlu1 %2528, %v2642_v60  }
 0x366   : > { %v1433_v43 = vpop.permute.xlu0 %1432  ;;  %v1438_v23 = vpop.permute.xlu1 %1437 }
 0x367   : > { %v2644_v0 = vpop.eup %2643  ;;  %v1482_v17 = vmul.f32 0.0, %v1433_v43  ;;  %v1483_v51 = vmul.f32 0.0, %v1438_v23 }
 0x368   : > { %v2646_v2 = vpop.eup %2645  ;;  %1815 = vperm.xlu1 %2528, %v2644_v0  }
 0x369   : > { %1810 = vperm.xlu0 %2527, %v2646_v2   ;;  %v2648_v11 = vpop.eup %2647 }
 0x36a   : > { %v1443_v31 = vpop.permute.xlu0 %1442  ;;  %v1448_v55 = vpop.permute.xlu1 %1447 }
 0x36d   : > { %1820 = vperm.xlu0 %2527, %v2648_v11  }
 0x36e   : > { %v1453_v44 = vpop.permute.xlu0 %1452  ;;  %v3399_v57 = vpop.permute.xlu1 %1457 }
 0x36f   : > { %v1486_v36 = vmul.f32 0.0, %v1453_v44  ;;  %v1487_v23 = vmul.f32 0.0, %v3399_v57 }
 0x372   : > { %v3401_v29 = vpop.permute.xlu0 %1462  ;;  %v3403_v53 = vpop.permute.xlu1 %1467 }
 0x376   : > { %v2421_v1 = vpop.f32.mrb[0].mxu1  ;;  %v3405_v24 = vpop.permute.xlu0 %1472 }
 0x377   : > { %v1581_v9 = vpop.f32.mrb[1].mxu1  ;;  %v1646_v52 = vadd.f32 %v2421_v1, %v1477_v4 }
 0x378   : > { %v2422_v13 = vpop.f32.mrb[2].mxu1  ;;  %v1644_v33 = vadd.f32 %v1581_v9, %v1475_v6  ;;  %v1485_v9 = vmul.f32 0.0, %v1448_v55 }
 0x379   : > { %v1584_v15 = vpop.f32.mrb[3].mxu1  ;;  %v1647_v7 = vadd.f32 %v2422_v13, %v1478_v26 }
 0x37a   : > { %v1645_v48 = vadd.f32 %v1584_v15, %v1476_v56 }
 0x386   : > { %v2425_v18 = vpop.f32.mrb[4].mxu1 }
 0x387   : > { %v1597_v22 = vpop.f32.mrb[5].mxu1  ;;  %v1650_v38 = vadd.f32 %v2425_v18, %v1481_v40 }
 0x388   : > { %v2426_v28 = vpop.f32.mrb[6].mxu1  ;;  %v1648_v0 = vadd.f32 %v1597_v22, %v1479_v39 }
 0x389   : > { %v1600_v32 = vpop.f32.mrb[7].mxu1  ;;  %v1651_v12 = vadd.f32 %v2426_v28, %v1482_v17 }
 0x38a   : > { %v1649_v2 = vadd.f32 %v1600_v32, %v1480_v3  ;;  %v1484_v32 = vmul.f32 0.0, %v1443_v31 }
 0x38e   : > { %v3383_v37 = vpop.f32.mrb[8].mxu1 }
 0x38f   : > { %v3385_v45 = vpop.f32.mrb[9].mxu1  ;;  %v1654_v21 = vadd.f32 %v3383_v37, %v1485_v9 }
 0x390   : > { %v3387_v16 = vpop.f32.mrb[10].mxu1  ;;  %v1652_v46 = vadd.f32 %v3385_v45, %v1483_v51 }
 0x391   : > { %v3389_v47 = vpop.f32.mrb[11].mxu1  ;;  %v1655_v28 = vadd.f32 %v3387_v16, %v1486_v36 }
 0x392   : > { %v1653_v43 = vadd.f32 %v3389_v47, %v1484_v32 }
 0x396   : > { %v3391_v42 = vpop.f32.mrb[12].mxu1 }
 0x397   : > { %v3393_v5 = vpop.f32.mrb[13].mxu1 }
 0x398   : > { %v3395_v8 = vpop.f32.mrb[14].mxu1  ;;  %v1656_v31 = vadd.f32 %v3393_v5, %v1487_v23 }
 0x399   : > { %v3397_v20 = vpop.f32.mrb[15].mxu1 }
 0x3ba   : > { %v1756_v27 = vpop.permute.xlu1 %1755 }
 0x3bb   : > { %v1825_v35 = vmul.f32 %v1756_v27, %v1646_v52  ;;  %v1488_v52 = vmul.f32 0.0, %v3401_v29 }
 0x3bd   : > { %v1657_v45 = vadd.f32 %v3397_v20, %v1488_v52 }
 0x3be   : > { %v1746_v54 = vpop.permute.xlu1 %1745 }
 0x3bf   : > { %v1761_v50 = vpop.permute.xlu0 %1760  ;;  %v1823_v61 = vmul.f32 %v1746_v54, %v1644_v33 }
 0x3c0   : > { %v1826_v10 = vmul.f32 %v1761_v50, %v1647_v7  ;;  %v1489_v7 = vmul.f32 0.0, %v3403_v53  ;;  %v1490_v50 = vmul.f32 0.0, %v3405_v24 }
 0x3c2   : > { %v2300_v19 = vpack.c.bf16 %v1826_v10, %v1825_v35  ;;  %v1658_v10 = vadd.f32 %v3391_v42, %v1489_v7  ;;  %v1659_v57 = vadd.f32 %v3395_v8, %v1490_v50 }
 0x3c3   : > { %v1751_v30 = vpop.permute.xlu0 %1750 }
 0x3c4   : > { %2332 = vst [vmem:[%s3408_s15 + $0x8] sm:$0xff] %v2300_v19   ;;  %v1824_v58 = vmul.f32 %v1751_v30, %v1645_v48 }
 0x3c6   : > { %v2295_v14 = vpack.c.bf16 %v1824_v58, %v1823_v61 }
 0x3c7   : > { %v1776_v49 = vpop.permute.xlu1 %1775 }
 0x3c8   : > { %2296 = vst [vmem:[%s3408_s15] sm:$0xff] %v2295_v14   ;;  %v1829_v59 = vmul.f32 %v1776_v49, %v1650_v38 }
 0x3cb   : > { %v1766_v60 = vpop.permute.xlu1 %1765  ;;  %v1952_v20 = vld [vmem:[%s3408_s15 + $0x8] sm:$0xf] (%p2878_p13)  ;;  %v1954_v53 = vld [vmem:[%s3408_s15 + $0xc] sm:$0xf] (%p2878_p13) }
 0x3cc   : > { %v1827_v13 = vmul.f32 %v1766_v60, %v1648_v0  ;;  %1953 = vst [vmem:[%s1932_s17 + $0x10] sm:$0xf] (%p2878_p13), %v1952_v20  ;;  %1955 = vst [vmem:[%s1932_s17 + $0x18] sm:$0xf] (%p2878_p13), %v1954_v53 }
 0x3cf   : > { %v1948_v42 = vld [vmem:[%s3408_s15] sm:$0xf] (%p2878_p13)  ;;  %v1950_v8 = vld [vmem:[%s3408_s15 + $0x4] sm:$0xf] (%p2878_p13) }
 0x3d0   : > { %1949 = vst [vmem:[%s1932_s17] sm:$0xf] (%p2878_p13), %v1948_v42  ;;  %1951 = vst [vmem:[%s1932_s17 + $0x8] sm:$0xf] (%p2878_p13), %v1950_v8 }
 0x3d3   : > { %v1781_v25 = vpop.permute.xlu0 %1780 }
 0x3d4   : > { %v1830_v62 = vmul.f32 %v1781_v25, %v1651_v12 }
 0x3d6   : > { %v2310_v11 = vpack.c.bf16 %v1830_v62, %v1829_v59 }
 0x3d7   : > { %v1771_v1 = vpop.permute.xlu0 %1770 }
 0x3d8   : > { %2334 = vst [vmem:[%s3408_s15 + $0x18] sm:$0xff] %v2310_v11   ;;  %v1828_v15 = vmul.f32 %v1771_v1, %v1649_v2 }
 0x3da   : > { %v2305_v18 = vpack.c.bf16 %v1828_v15, %v1827_v13 }
 0x3db   : > { %v1796_v63 = vpop.permute.xlu1 %1795 }
 0x3dc   : > { %2333 = vst [vmem:[%s3408_s15 + $0x10] sm:$0xff] %v2305_v18   ;;  %v1801_v34 = vpop.permute.xlu0 %1800  ;;  %v1833_v22 = vmul.f32 %v1796_v63, %v1654_v21 }
 0x3dd   : > { %v1834_v41 = vmul.f32 %v1801_v34, %v1655_v28 }
 0x3df   : > { %v2320_v55 = vpack.c.bf16 %v1834_v41, %v1833_v22  ;;  %v1786_v44 = vpop.permute.xlu1 %1785  ;;  %v1960_v30 = vld [vmem:[%s3408_s15 + $0x18] sm:$0xf] (%p2878_p13)  ;;  %v1962_v61 = vld [vmem:[%s3408_s15 + $0x1c] sm:$0xf] (%p2878_p13) }
 0x3e0   : > { %v1791_v27 = vpop.permute.xlu0 %1790  ;;  %v1831_v37 = vmul.f32 %v1786_v44, %v1652_v46  ;;  %1961 = vst [vmem:[%s1932_s17 + $0x30] sm:$0xf] (%p2878_p13), %v1960_v30  ;;  %1963 = vst [vmem:[%s1932_s17 + $0x38] sm:$0xf] (%p2878_p13), %v1962_v61 }
 0x3e1   : > { %2336 = vst [vmem:[%s3408_s15 + $0x28] sm:$0xff] %v2320_v55   ;;  %v1832_v4 = vmul.f32 %v1791_v27, %v1653_v43 }
 0x3e3   : > { %v2315_v26 = vpack.c.bf16 %v1832_v4, %v1831_v37  ;;  %v1806_v16 = vpop.permute.xlu1 %1805  ;;  %v1956_v24 = vld [vmem:[%s3408_s15 + $0x10] sm:$0xf] (%p2878_p13)  ;;  %v1958_v19 = vld [vmem:[%s3408_s15 + $0x14] sm:$0xf] (%p2878_p13) }
 0x3e4   : > { %v1835_v56 = vmul.f32 %v1806_v16, %v1656_v31  ;;  %1957 = vst [vmem:[%s1932_s17 + $0x20] sm:$0xf] (%p2878_p13), %v1956_v24  ;;  %1959 = vst [vmem:[%s1932_s17 + $0x28] sm:$0xf] (%p2878_p13), %v1958_v19 }
 0x3e5   : > { %2335 = vst [vmem:[%s3408_s15 + $0x20] sm:$0xff] %v2315_v26  }
 0x3e7   : > { %v1816_v35 = vpop.permute.xlu1 %1815 }
 0x3e8   : > { %v1811_v47 = vpop.permute.xlu0 %1810  ;;  %v1837_v33 = vmul.f32 %v1816_v35, %v1658_v10  ;;  %v1968_v49 = vld [vmem:[%s3408_s15 + $0x28] sm:$0xf] (%p2878_p13)  ;;  %v1970_v40 = vld [vmem:[%s3408_s15 + $0x2c] sm:$0xf] (%p2878_p13) }
 0x3e9   : > { %v1836_v6 = vmul.f32 %v1811_v47, %v1657_v45  ;;  %1969 = vst [vmem:[%s1932_s17 + $0x50] sm:$0xf] (%p2878_p13), %v1968_v49  ;;  %1971 = vst [vmem:[%s1932_s17 + $0x58] sm:$0xf] (%p2878_p13), %v1970_v40 }
 0x3eb   : > { %v2325_v54 = vpack.c.bf16 %v1836_v6, %v1835_v56  ;;  %1925 = sbr.rel (!%p2878_p13) target bundleno = 1018 (0x3fa), region = 171 }
 0x3ec   : > { %v1821_v29 = vpop.permute.xlu0 %1820  ;;  %v1964_v58 = vld [vmem:[%s3408_s15 + $0x20] sm:$0xf] (%p2878_p13)  ;;  %v1966_v14 = vld [vmem:[%s3408_s15 + $0x24] sm:$0xf] (%p2878_p13) }
 0x3ed   : > { %2337 = vst [vmem:[%s3408_s15 + $0x30] sm:$0xff] %v2325_v54   ;;  %v1838_v5 = vmul.f32 %v1821_v29, %v1659_v57  ;;  %1965 = vst [vmem:[%s1932_s17 + $0x40] sm:$0xf] (%p2878_p13), %v1964_v58 }
 0x3ee   : > { %1967 = vst [vmem:[%s1932_s17 + $0x48] sm:$0xf] (%p2878_p13), %v1966_v14 }
 0x3ef   : > { %v2330_v48 = vpack.c.bf16 %v1838_v5, %v1837_v33 }
 0x3f1   : > { %2338 = vst [vmem:[%s3408_s15 + $0x38] sm:$0xff] %v2330_v48  }
 0x3f4   : > { %v1972_v17 = vld [vmem:[%s3408_s15 + $0x30] sm:$0xf]  ;;  %v1974_v38 = vld [vmem:[%s3408_s15 + $0x34] sm:$0xf] }
 0x3f5   : > { %1973 = vst [vmem:[%s1932_s17 + $0x60] sm:$0xf] %v1972_v17  ;;  %1975 = vst [vmem:[%s1932_s17 + $0x68] sm:$0xf] %v1974_v38 }
 0x3f8   : > { %v1976_v12 = vld [vmem:[%s3408_s15 + $0x38] sm:$0xf]  ;;  %v1978_v25 = vld [vmem:[%s3408_s15 + $0x3c] sm:$0xf] }
 0x3f9   : > { %1977 = vst [vmem:[%s1932_s17 + $0x70] sm:$0xf] %v1976_v12  ;;  %1979 = vst [vmem:[%s1932_s17 + $0x78] sm:$0xf] %v1978_v25 }
 0x3fa PF: > { %s14_s25 = sadd.s32 1, %s2735_s25   ;;  %s3516_s4 = sld [smem:[#allocation10_spill]] }
 0x3fb   : > { %p11_p5 = scmp.ge.s32.totalorder %s14_s25, 6   ;;  %s3517_s15 = smov %s2699_s16 }
 0x3fc   : > { %s3518_s16 = smov %s2883_s29  ;;  %s3519_s17 = smov %s2707_s18 }
 0x3fd   : > { %s3520_s18 = smov %s2861_s5  ;;  %s3521_s19 = smov %s2715_s20 }
 0x3fe   : > { %s3522_s20 = smov %s2858_s26  ;;  %s3523_s21 = smov %s2727_s23 }
 0x3ff   : > { %s3524_s22 = smov %s2731_s24  ;;  %s3525_s23 = smov %s3528_s27 }
 0x400   : > { %s3526_s24 = smov %s3516_s4  ;;  %13 = sbr.rel (!%p11_p5) target bundleno = 8 (0x8), region = 262 }

// kernel: encoder_decoder_forward.10
= control target key start
LH: loop header
LB: loop body
LE: loop exit
PB: predicated region body
PF: predicated region fallthrough
CT: control target
= control target key end

     0   :  { %s2331_s18 = smov 0   ;;  %s2333_s19 = smov 0   ;;  %s3212_s0 = inlined_call_operand.vmem [shape: f32[256,256], index: 0, kind: input, shape index: {}]   ;;  %s3213_s1 = inlined_call_operand.vmem [shape: f32[1,256], index: 1, kind: input, shape index: {}]   ;;  %s3214_s2 = inlined_call_operand.vmem [shape: f32[1,256], index: 2, kind: input, shape index: {}]   ;;  %s3215_s3 = inlined_call_operand.vmem [shape: bf16[256,768], index: 3, kind: input, shape index: {}]   ;;  %s3216_s4 = inlined_call_operand.vmem [shape: f32[1,768], index: 4, kind: input, shape index: {}]   ;;  %s3217_s5 = inlined_call_operand.vmem [shape: bf16[256,768], index: 5, kind: output, shape index: {}]  }
   0x1   :  { %s2335_s20 = smov 0   ;;  %s2337_s21 = smov 0  }
   0x2   :  { %s2339_s22 = smov 0   ;;  %s2341_s23 = smov 0  }
   0x3   :  { %s2343_s24 = smov 0   ;;  %s2345_s25 = smov 0  }
   0x4   :  { %s2347_s26 = smov 0  }
   0x5 LB: > { %s1769_s27 = sadd.s32 4294967295, %s2299_s26   ;;  %s24_s28 = sadd.s32 1, %s2291_s24  ;;  %s2299_s26 = sphi %s2347_s26, %s15_s26   ;;  %s2295_s25 = sphi %s2345_s25, %s3226_s25   ;;  %s2291_s24 = sphi %s2343_s24, %s3225_s24   ;;  %s2287_s23 = sphi %s2341_s23, %s3224_s23   ;;  %s2283_s22 = sphi %s2339_s22, %s3223_s22   ;;  %s2279_s21 = sphi %s2337_s21, %s3222_s21   ;;  %s2275_s20 = sphi %s2335_s20, %s3221_s20   ;;  %s2271_s19 = sphi %s2333_s19, %s3220_s19   ;;  %s2267_s18 = sphi %s2331_s18, %s3219_s18  }
   0x6   : > { %p25_p0 = scmp.ge.s32.totalorder %s24_s28, 2  ;;  %s27_s29 = sadd.s32 1, %s2295_s25 }
   0x7   : > { %s102_s30 = sadd.s32 1, %s2279_s21  ;;  %p109_p1 = scmp.ne.s32.totalorder %s2279_s21, %s2275_s20 }
   0x8   : > { %s3228_s28 = smov (%p25_p0, %s24_s28), 0  ;;  %s3230_s29 = smov (!%p25_p0, %s27_s29), %s2295_s25 }
   0x9   : > { %s99_s6 = ssub.s32 %s2291_s24, %s3228_s28  ;;  %p110_p2 = scmp.eq.s32.totalorder %s2299_s26, 0 }
   0xa   : > { %p29_p3 = scmp.ge.s32.totalorder %s3230_s29, 2  ;;  %p100_p4 = scmp.eq.s32.totalorder %s99_s6, 0 }
   0xb   : > { %p111_p5 = por %p110_p2, %p109_p1  ;;  %s156_s7 = sadd.s32 1, %s2271_s19 }
   0xc   : > { %s3232_s29 = smov (%p29_p3, %s3230_s29), 0  ;;  %p166_p6 = scmp.ne.s32.totalorder %s2271_s19, %s2267_s18 }
   0xd   : > { %s2392_s8 = scalar_select %p100_p4, %s2279_s21, %s102_s30  }
   0xe   : > { %s151_s9 = ssub.s32 %s2295_s25, %s3232_s29  ;;  %p167_p7 = scmp.eq.s32.totalorder %s1769_s27, 3 }
   0xf   : > { %s153_s10 = sor.u32 %s151_s9, %s99_s6  ;;  %p1772_p10 = scmp.ge.s32.totalorder %s2299_s26, 4 }
  0x10   : > { %p154_p8 = scmp.eq.s32.totalorder %s153_s10, 0  ;;  %p2398_p9 = por %p167_p7, %p166_p6 }
  0x11   : > { %195 = sbr.rel (%p1772_p10) target bundleno = 66 (0x42), region = 24 }
  0x12   : > { %s2403_s12 = scalar_select %p154_p8, %s2271_s19, %s156_s7  }
  0x18   : > { %208 = sbr.rel (!%p111_p5) target bundleno = 66 (0x42), region = 32  ;;  %s210_s13 = sand.u32 (%p111_p5), 1, %s2279_s21  }
  0x19   : > { %s1959_s14 = smul.u32 (%p111_p5), 12, %s2291_s24 }
  0x1a   : > { %s2057_s15 = smul.u32 (%p111_p5), 384, %s210_s13 }
  0x1b   : > { %s2411_s27 = scalar_lea.vmem (%p111_p5), %s3215_s3, %s1959_s14 }
  0x1c   : > { %v230_v0 = vld [vmem:[%s2411_s27] sm:$0xff] (%p111_p5)  ;;  %v232_v1 = vld [vmem:[%s2411_s27 + $0x18] sm:$0xff] (%p111_p5)  ;;  %v234_v2 = vld [vmem:[%s2411_s27 + $0x30] sm:$0xff] (%p111_p5)  ;;  %s2416_s30 = scalar_lea.vmem (%p111_p5), [#allocation2], %s2057_s15 }
  0x1d   : > { %231 = vst [vmem:[%s2416_s30] sm:$0xff] (%p111_p5), %v230_v0  ;;  %233 = vst [vmem:[%s2416_s30 + $0xc] sm:$0xff] (%p111_p5), %v232_v1  ;;  %v236_v3 = vld [vmem:[%s2411_s27 + $0x48] sm:$0xff] (%p111_p5)  ;;  %v238_v4 = vld [vmem:[%s2411_s27 + $0x60] sm:$0xff] (%p111_p5) }
  0x1e   : > { %235 = vst [vmem:[%s2416_s30 + $0x18] sm:$0xff] (%p111_p5), %v234_v2  ;;  %v240_v5 = vld [vmem:[%s2411_s27 + $0x78] sm:$0xff] (%p111_p5)  ;;  %237 = vst [vmem:[%s2416_s30 + $0x24] sm:$0xff] (%p111_p5), %v236_v3  ;;  %v242_v6 = vld [vmem:[%s2411_s27 + $0x90] sm:$0xff] (%p111_p5) }
  0x1f   : > { %239 = vst [vmem:[%s2416_s30 + $0x30] sm:$0xff] %v238_v4  ;;  %241 = vst [vmem:[%s2416_s30 + $0x3c] sm:$0xff] %v240_v5  ;;  %v244_v7 = vld [vmem:[%s2411_s27 + $0xa8] sm:$0xff]  ;;  %v246_v8 = vld [vmem:[%s2411_s27 + $0xc0] sm:$0xff] }
  0x20   : > { %243 = vst [vmem:[%s2416_s30 + $0x48] sm:$0xff] %v242_v6  ;;  %245 = vst [vmem:[%s2416_s30 + $0x54] sm:$0xff] %v244_v7  ;;  %v248_v9 = vld [vmem:[%s2411_s27 + $0xd8] sm:$0xff]  ;;  %v250_v10 = vld [vmem:[%s2411_s27 + $0xf0] sm:$0xff] }
  0x21   : > { %247 = vst [vmem:[%s2416_s30 + $0x60] sm:$0xff] %v246_v8  ;;  %v252_v11 = vld [vmem:[%s2411_s27 + $0x108] sm:$0xff]  ;;  %249 = vst [vmem:[%s2416_s30 + $0x6c] sm:$0xff] %v248_v9  ;;  %v254_v12 = vld [vmem:[%s2411_s27 + $0x120] sm:$0xff] }
  0x22   : > { %251 = vst [vmem:[%s2416_s30 + $0x78] sm:$0xff] %v250_v10  ;;  %253 = vst [vmem:[%s2416_s30 + $0x84] sm:$0xff] %v252_v11  ;;  %v256_v13 = vld [vmem:[%s2411_s27 + $0x138] sm:$0xff]  ;;  %v258_v14 = vld [vmem:[%s2411_s27 + $0x150] sm:$0xff] }
  0x23   : > { %255 = vst [vmem:[%s2416_s30 + $0x90] sm:$0xff] %v254_v12  ;;  %257 = vst [vmem:[%s2416_s30 + $0x9c] sm:$0xff] %v256_v13  ;;  %v260_v15 = vld [vmem:[%s2411_s27 + $0x168] sm:$0xff]  ;;  %v262_v16 = vld [vmem:[%s2411_s27 + $0x180] sm:$0xff] }
  0x24   : > { %259 = vst [vmem:[%s2416_s30 + $0xa8] sm:$0xff] %v258_v14  ;;  %v264_v17 = vld [vmem:[%s2411_s27 + $0x198] sm:$0xff]  ;;  %261 = vst [vmem:[%s2416_s30 + $0xb4] sm:$0xff] %v260_v15  ;;  %v266_v18 = vld [vmem:[%s2411_s27 + $0x1b0] sm:$0xff] }
  0x25   : > { %263 = vst [vmem:[%s2416_s30 + $0xc0] sm:$0xff] %v262_v16  ;;  %265 = vst [vmem:[%s2416_s30 + $0xcc] sm:$0xff] %v264_v17  ;;  %v268_v19 = vld [vmem:[%s2411_s27 + $0x1c8] sm:$0xff]  ;;  %v270_v20 = vld [vmem:[%s2411_s27 + $0x1e0] sm:$0xff] }
  0x26   : > { %267 = vst [vmem:[%s2416_s30 + $0xd8] sm:$0xff] %v266_v18  ;;  %269 = vst [vmem:[%s2416_s30 + $0xe4] sm:$0xff] %v268_v19  ;;  %v272_v21 = vld [vmem:[%s2411_s27 + $0x1f8] sm:$0xff]  ;;  %v274_v22 = vld [vmem:[%s2411_s27 + $0x210] sm:$0xff] }
  0x27   : > { %271 = vst [vmem:[%s2416_s30 + $0xf0] sm:$0xff] %v270_v20  ;;  %v276_v23 = vld [vmem:[%s2411_s27 + $0x228] sm:$0xff]  ;;  %273 = vst [vmem:[%s2416_s30 + $0xfc] sm:$0xff] %v272_v21  ;;  %v278_v24 = vld [vmem:[%s2411_s27 + $0x240] sm:$0xff] }
  0x28   : > { %275 = vst [vmem:[%s2416_s30 + $0x108] sm:$0xff] %v274_v22  ;;  %277 = vst [vmem:[%s2416_s30 + $0x114] sm:$0xff] %v276_v23  ;;  %v280_v25 = vld [vmem:[%s2411_s27 + $0x258] sm:$0xff]  ;;  %v282_v26 = vld [vmem:[%s2411_s27 + $0x270] sm:$0xff] }
  0x29   : > { %279 = vst [vmem:[%s2416_s30 + $0x120] sm:$0xff] %v278_v24  ;;  %281 = vst [vmem:[%s2416_s30 + $0x12c] sm:$0xff] %v280_v25  ;;  %v284_v27 = vld [vmem:[%s2411_s27 + $0x288] sm:$0xff]  ;;  %v286_v28 = vld [vmem:[%s2411_s27 + $0x2a0] sm:$0xff] }
  0x2a   : > { %283 = vst [vmem:[%s2416_s30 + $0x138] sm:$0xff] %v282_v26  ;;  %v288_v29 = vld [vmem:[%s2411_s27 + $0x2b8] sm:$0xff]  ;;  %285 = vst [vmem:[%s2416_s30 + $0x144] sm:$0xff] %v284_v27  ;;  %v290_v30 = vld [vmem:[%s2411_s27 + $0x2d0] sm:$0xff] }
  0x2b   : > { %287 = vst [vmem:[%s2416_s30 + $0x150] sm:$0xff] %v286_v28  ;;  %289 = vst [vmem:[%s2416_s30 + $0x15c] sm:$0xff] %v288_v29  ;;  %v292_v31 = vld [vmem:[%s2411_s27 + $0x2e8] sm:$0xff]  ;;  %v1776_v33 = vld [vmem:[%s2411_s27 + $0x20] sm:$0xf] }
  0x2c   : > { %v1774_v32 = vld [vmem:[%s2411_s27 + $0x8] sm:$0xf]  ;;  %291 = vst [vmem:[%s2416_s30 + $0x168] sm:$0xff] %v290_v30  ;;  %293 = vst [vmem:[%s2416_s30 + $0x174] sm:$0xff] %v292_v31  ;;  %v1778_v34 = vld [vmem:[%s2411_s27 + $0x38] sm:$0xf] }
  0x2d   : > { %1775 = vst [vmem:[%s2416_s30 + $0x8] sm:$0xf] %v1774_v32  ;;  %v1780_v35 = vld [vmem:[%s2411_s27 + $0x50] sm:$0xf]  ;;  %1777 = vst [vmem:[%s2416_s30 + $0x14] sm:$0xf] %v1776_v33 }
  0x2e   : > { %1779 = vst [vmem:[%s2416_s30 + $0x20] sm:$0xf] %v1778_v34  ;;  %1781 = vst [vmem:[%s2416_s30 + $0x2c] sm:$0xf] %v1780_v35  ;;  %v1782_v36 = vld [vmem:[%s2411_s27 + $0x68] sm:$0xf] }
  0x2f   : > { %v1784_v37 = vld [vmem:[%s2411_s27 + $0x80] sm:$0xf]  ;;  %v1786_v38 = vld [vmem:[%s2411_s27 + $0x98] sm:$0xf]  ;;  %1783 = vst [vmem:[%s2416_s30 + $0x38] sm:$0xf] %v1782_v36 }
  0x30   : > { %1785 = vst [vmem:[%s2416_s30 + $0x44] sm:$0xf] %v1784_v37  ;;  %1787 = vst [vmem:[%s2416_s30 + $0x50] sm:$0xf] %v1786_v38  ;;  %v1788_v39 = vld [vmem:[%s2411_s27 + $0xb0] sm:$0xf] }
  0x31   : > { %v1790_v40 = vld [vmem:[%s2411_s27 + $0xc8] sm:$0xf]  ;;  %v1792_v41 = vld [vmem:[%s2411_s27 + $0xe0] sm:$0xf]  ;;  %1789 = vst [vmem:[%s2416_s30 + $0x5c] sm:$0xf] %v1788_v39 }
  0x32   : > { %1791 = vst [vmem:[%s2416_s30 + $0x68] sm:$0xf] %v1790_v40  ;;  %1793 = vst [vmem:[%s2416_s30 + $0x74] sm:$0xf] %v1792_v41  ;;  %v1794_v42 = vld [vmem:[%s2411_s27 + $0xf8] sm:$0xf] }
  0x33   : > { %v1796_v43 = vld [vmem:[%s2411_s27 + $0x110] sm:$0xf]  ;;  %v1798_v44 = vld [vmem:[%s2411_s27 + $0x128] sm:$0xf]  ;;  %1795 = vst [vmem:[%s2416_s30 + $0x80] sm:$0xf] %v1794_v42 }
  0x34   : > { %1797 = vst [vmem:[%s2416_s30 + $0x8c] sm:$0xf] %v1796_v43  ;;  %1799 = vst [vmem:[%s2416_s30 + $0x98] sm:$0xf] %v1798_v44  ;;  %v1800_v45 = vld [vmem:[%s2411_s27 + $0x140] sm:$0xf] }
  0x35   : > { %v1802_v46 = vld [vmem:[%s2411_s27 + $0x158] sm:$0xf]  ;;  %v1804_v47 = vld [vmem:[%s2411_s27 + $0x170] sm:$0xf]  ;;  %1801 = vst [vmem:[%s2416_s30 + $0xa4] sm:$0xf] %v1800_v45 }
  0x36   : > { %1803 = vst [vmem:[%s2416_s30 + $0xb0] sm:$0xf] %v1802_v46  ;;  %1805 = vst [vmem:[%s2416_s30 + $0xbc] sm:$0xf] %v1804_v47  ;;  %v1806_v48 = vld [vmem:[%s2411_s27 + $0x188] sm:$0xf] }
  0x37   : > { %v1808_v49 = vld [vmem:[%s2411_s27 + $0x1a0] sm:$0xf]  ;;  %v1810_v50 = vld [vmem:[%s2411_s27 + $0x1b8] sm:$0xf]  ;;  %1807 = vst [vmem:[%s2416_s30 + $0xc8] sm:$0xf] %v1806_v48 }
  0x38   : > { %1809 = vst [vmem:[%s2416_s30 + $0xd4] sm:$0xf] %v1808_v49  ;;  %1811 = vst [vmem:[%s2416_s30 + $0xe0] sm:$0xf] %v1810_v50  ;;  %v1812_v51 = vld [vmem:[%s2411_s27 + $0x1d0] sm:$0xf] }
  0x39   : > { %v1814_v52 = vld [vmem:[%s2411_s27 + $0x1e8] sm:$0xf]  ;;  %v1816_v53 = vld [vmem:[%s2411_s27 + $0x200] sm:$0xf]  ;;  %1813 = vst [vmem:[%s2416_s30 + $0xec] sm:$0xf] %v1812_v51 }
  0x3a   : > { %1815 = vst [vmem:[%s2416_s30 + $0xf8] sm:$0xf] %v1814_v52  ;;  %1817 = vst [vmem:[%s2416_s30 + $0x104] sm:$0xf] %v1816_v53  ;;  %v1818_v54 = vld [vmem:[%s2411_s27 + $0x218] sm:$0xf] }
  0x3b   : > { %v1820_v55 = vld [vmem:[%s2411_s27 + $0x230] sm:$0xf]  ;;  %v1822_v56 = vld [vmem:[%s2411_s27 + $0x248] sm:$0xf]  ;;  %1819 = vst [vmem:[%s2416_s30 + $0x110] sm:$0xf] %v1818_v54 }
  0x3c   : > { %1821 = vst [vmem:[%s2416_s30 + $0x11c] sm:$0xf] %v1820_v55  ;;  %1823 = vst [vmem:[%s2416_s30 + $0x128] sm:$0xf] %v1822_v56  ;;  %v1824_v57 = vld [vmem:[%s2411_s27 + $0x260] sm:$0xf] }
  0x3d   : > { %v1826_v58 = vld [vmem:[%s2411_s27 + $0x278] sm:$0xf]  ;;  %v1828_v59 = vld [vmem:[%s2411_s27 + $0x290] sm:$0xf]  ;;  %1825 = vst [vmem:[%s2416_s30 + $0x134] sm:$0xf] %v1824_v57 }
  0x3e   : > { %1827 = vst [vmem:[%s2416_s30 + $0x140] sm:$0xf] %v1826_v58  ;;  %1829 = vst [vmem:[%s2416_s30 + $0x14c] sm:$0xf] %v1828_v59  ;;  %v1830_v60 = vld [vmem:[%s2411_s27 + $0x2a8] sm:$0xf] }
  0x3f   : > { %v1832_v61 = vld [vmem:[%s2411_s27 + $0x2c0] sm:$0xf]  ;;  %v1834_v62 = vld [vmem:[%s2411_s27 + $0x2d8] sm:$0xf]  ;;  %1831 = vst [vmem:[%s2416_s30 + $0x158] sm:$0xf] %v1830_v60 }
  0x40   : > { %1833 = vst [vmem:[%s2416_s30 + $0x164] sm:$0xf] %v1832_v61  ;;  %1835 = vst [vmem:[%s2416_s30 + $0x170] sm:$0xf] %v1834_v62  ;;  %v1836_v63 = vld [vmem:[%s2411_s27 + $0x2f0] sm:$0xf] }
  0x41   : > { %1837 = vst [vmem:[%s2416_s30 + $0x17c] sm:$0xf] %v1836_v63 }
  0x42 PF: > { %p1838_p11 = scmp.ge.s32.totalorder %s2299_s26, 1  ;;  %p377_p12 = scmp.lt.s32.totalorder %s2299_s26, 5 }
  0x44   : > { %p378_p13 = pnand %p1838_p11, %p377_p12 }
  0x45   : > { %s1839_s6 = sshll.u32 (!%p378_p13), %s2287_s23, 4  ;;  %s384_s14 = sand.u32 (!%p378_p13), 1, %s2275_s20  }
  0x46   : > { %381 = sbr.rel (%p378_p13) target bundleno = 689 (0x2b1), region = 62  ;;  %p421_p0 = scmp.lt.s32.totalorder (!%p378_p13), %s1839_s6, 31 }
  0x47   : > { %s2058_s15 = smul.u32 (!%p378_p13), 384, %s384_s14  ;;  %s417_s14 = sand.u32 (!%p378_p13), 1, %s2267_s18  }
  0x49   : > { %s2680_s16 = scalar_lea.vmem (!%p378_p13), [#allocation2], %s2058_s15 }
  0x4a   : > { %v2133_v48 = vld [vmem:[%s2680_s16 + $0x4] ss:$12 sps:$4 sm:$0xff] (!%p378_p13)   ;;  %v2135_v49 = vld [vmem:[%s2680_s16] ss:$12 sps:$4 sm:$0xff] (!%p378_p13)   ;;  %v2136_v50 = vld [vmem:[%s2680_s16 + $0x1c] ss:$12 sps:$4 sm:$0xff] (!%p378_p13)  }
  0x4b   : > { %1166 = vmatprep.subr.bf16.mxu0 (!%p378_p13), %v2133_v48  ;;  %v2138_v51 = vld [vmem:[%s2680_s16 + $0x18] ss:$12 sps:$4 sm:$0xff] (!%p378_p13)   ;;  %v2139_v52 = vld [vmem:[%s2680_s16 + $0x34] ss:$12 sps:$4 sm:$0xff] (!%p378_p13)   ;;  %v2141_v53 = vld [vmem:[%s2680_s16 + $0x30] ss:$12 sps:$4 sm:$0xff] (!%p378_p13)  }
  0x4c   : > { %1167 = vmatpush1.bf16.msra.mxu0 (!%p378_p13), %v2135_v49  ;;  %v2142_v54 = vld [vmem:[%s2680_s16 + $0x4c] ss:$12 sps:$4 sm:$0xff] (!%p378_p13)   ;;  %v2144_v55 = vld [vmem:[%s2680_s16 + $0x48] ss:$12 sps:$4 sm:$0xff] (!%p378_p13)   ;;  %v2145_v56 = vld [vmem:[%s2680_s16 + $0x64] ss:$12 sps:$4 sm:$0xff] (!%p378_p13)  }
  0x4d   : > { %s3234_s6 = smov (!%p421_p0, %s1839_s6), 31  ;;  %1168 = vmatprep.subr.bf16.mxu0 %v2136_v50  ;;  %v2159_v57 = vld [vmem:[%s2680_s16 + $0xc8] ss:$12 sps:$4 sm:$0xff]   ;;  %v2147_v58 = vld [vmem:[%s2680_s16 + $0x60] ss:$12 sps:$4 sm:$0xff]   ;;  %s2060_s15 = smul.u32 (%p2398_p9), 96, %s2287_s23 }
  0x4e   : > { %s1960_s7 = sshll.u32 %s3234_s6, 4  ;;  %v2161_v59 = vld [vmem:[%s2680_s16 + $0x8] ss:$12 sps:$4 sm:$0xff]   ;;  %1993 = vmatprep.subr.bf16.mxu1 %v2159_v57  ;;  %v2150_v61 = vld [vmem:[%s2680_s16 + $0x78] ss:$12 sps:$4 sm:$0xff]   ;;  %s3013_s6 = smul.u32 3, %s2283_s22 }
  0x4f   : > { %s2549_s13 = scalar_lea.vmem %s3212_s0, %s1960_s7  ;;  %v2148_v60 = vld [vmem:[%s2680_s16 + $0x7c] ss:$12 sps:$4 sm:$0xff]   ;;  %1994 = vmatpush3.bf16.msra.mxu1 %v2161_v59  ;;  %v2151_v62 = vld [vmem:[%s2680_s16 + $0x94] ss:$12 sps:$4 sm:$0xff]   ;;  %s2059_s22 = smul.u32 192, %s417_s14 }
  0x50   : > { %v2552_v0 = vld [vmem:[%s2549_s13] sm:$0xff]  ;;  %v2555_v1 = vld [vmem:[%s2549_s13 + $0x8] sm:$0xff]  ;;  %v2566_v5 = vld [vmem:[%s2549_s13 + $0x10] sm:$0xff]  ;;  %1169 = vmatpush1.bf16.msra.mxu0 %v2138_v51  ;;  %p429_p1 = scmp.lt.s32.totalorder %s3013_s6, 5  ;;  %s1578_s11 = sadd.s32 (%p2398_p9), %s2060_s15, %s3013_s6 }
  0x51   : > { %v2558_v2 = vld [vmem:[%s2549_s13 + $0x20] sm:$0xff]  ;;  %v468_v3 = vadd.f32 %v2555_v1, %v2552_v0  ;;  %v2563_v4 = vld [vmem:[%s2549_s13 + $0x28] sm:$0xff]  ;;  %v2569_v6 = vld [vmem:[%s2549_s13 + $0x18] sm:$0xff]  ;;  %1170 = vmatprep.subr.bf16.mxu0 %v2139_v52  ;;  %s3035_s18 = scalar_lea.vmem [#allocation3], %s2059_s22 }
  0x52   : > { %v474_v7 = vadd.f32 %v2563_v4, %v2558_v2  ;;  %v2574_v8 = vld [vmem:[%s2549_s13 + $0x30] sm:$0xff]  ;;  %v2577_v9 = vld [vmem:[%s2549_s13 + $0x38] sm:$0xff]  ;;  %v471_v10 = vadd.f32 %v2569_v6, %v2566_v5  ;;  %v2584_v12 = vld [vmem:[%s2549_s13 + $0x40] sm:$0xff]  ;;  %s430_s7 = scalar_select %p429_p1, %s3013_s6, 5 }
  0x53   : > { %469 = vadd.xlane.f32.xlu0 %v468_v3  ;;  %v477_v11 = vadd.f32 %v2577_v9, %v2574_v8  ;;  %v2587_v13 = vld [vmem:[%s2549_s13 + $0x48] sm:$0xff]  ;;  %v2590_v14 = vld [vmem:[%s2549_s13 + $0x50] sm:$0xff]  ;;  %v2593_v15 = vld [vmem:[%s2549_s13 + $0x58] sm:$0xff] }
  0x54   : > { %475 = vadd.xlane.f32.xlu1 %v474_v7  ;;  %v480_v16 = vadd.f32 %v2587_v13, %v2584_v12  ;;  %v483_v17 = vadd.f32 %v2593_v15, %v2590_v14  ;;  %v2600_v18 = vld [vmem:[%s2549_s13 + $0x60] sm:$0xff]  ;;  %v2603_v19 = vld [vmem:[%s2549_s13 + $0x68] sm:$0xff]  ;;  %v2606_v20 = vld [vmem:[%s2549_s13 + $0x70] sm:$0xff]  ;;  %1171 = vmatpush1.bf16.msra.mxu0 %v2141_v53 }
  0x55   : > { %v2609_v21 = vld [vmem:[%s2549_s13 + $0x78] sm:$0xff]  ;;  %v486_v22 = vadd.f32 %v2603_v19, %v2600_v18  ;;  %v2616_v24 = vld [vmem:[%s2549_s13 + $0x80] sm:$0xff]  ;;  %v2619_v25 = vld [vmem:[%s2549_s13 + $0x88] sm:$0xff]  ;;  %1172 = vmatprep.subr.bf16.mxu0 %v2142_v54 }
  0x56   : > { %v489_v23 = vadd.f32 %v2609_v21, %v2606_v20  ;;  %v2622_v26 = vld [vmem:[%s2549_s13 + $0x90] sm:$0xff]  ;;  %v2625_v27 = vld [vmem:[%s2549_s13 + $0x98] sm:$0xff]  ;;  %v492_v28 = vadd.f32 %v2619_v25, %v2616_v24  ;;  %v2632_v30 = vld [vmem:[%s2549_s13 + $0xa0] sm:$0xff] }
  0x57   : > { %472 = vadd.xlane.f32.xlu0 %v471_v10  ;;  %v495_v29 = vadd.f32 %v2625_v27, %v2622_v26  ;;  %v2635_v31 = vld [vmem:[%s2549_s13 + $0xa8] sm:$0xff]  ;;  %v2638_v32 = vld [vmem:[%s2549_s13 + $0xb0] sm:$0xff]  ;;  %v2641_v33 = vld [vmem:[%s2549_s13 + $0xb8] sm:$0xff] }
  0x58   : > { %478 = vadd.xlane.f32.xlu1 %v477_v11  ;;  %v498_v34 = vadd.f32 %v2635_v31, %v2632_v30  ;;  %v501_v35 = vadd.f32 %v2641_v33, %v2638_v32  ;;  %v2648_v36 = vld [vmem:[%s2549_s13 + $0xc0] sm:$0xff]  ;;  %v2651_v37 = vld [vmem:[%s2549_s13 + $0xc8] sm:$0xff]  ;;  %v2654_v38 = vld [vmem:[%s2549_s13 + $0xd0] sm:$0xff]  ;;  %1173 = vmatpush1.bf16.msra.mxu0 %v2144_v55 }
  0x59   : > { %v2657_v39 = vld [vmem:[%s2549_s13 + $0xd8] sm:$0xff]  ;;  %v504_v40 = vadd.f32 %v2651_v37, %v2648_v36  ;;  %v2664_v42 = vld [vmem:[%s2549_s13 + $0xe0] sm:$0xff]  ;;  %v2667_v43 = vld [vmem:[%s2549_s13 + $0xe8] sm:$0xff]  ;;  %1174 = vmatprep.subr.bf16.mxu0 %v2145_v56 }
  0x5a   : > { %v507_v41 = vadd.f32 %v2657_v39, %v2654_v38  ;;  %v2670_v44 = vld [vmem:[%s2549_s13 + $0xf0] sm:$0xff]  ;;  %v2673_v45 = vld [vmem:[%s2549_s13 + $0xf8] sm:$0xff]  ;;  %v510_v46 = vadd.f32 %v2667_v43, %v2664_v42  ;;  %v2160_v11 = vld [vmem:[%s2680_s16 + $0xc0] ss:$12 sps:$4 sm:$0xff]   ;;  %s431_s13 = scalar_lea.vmem %s3216_s4, %s430_s7 }
  0x5b   : > { %481 = vadd.xlane.f32.xlu0 %v480_v16  ;;  %v513_v47 = vadd.f32 %v2673_v45, %v2670_v44  ;;  %v2153_v63 = vld [vmem:[%s2680_s16 + $0x90] ss:$12 sps:$4 sm:$0xff]   ;;  %v2154_v3 = vld [vmem:[%s2680_s16 + $0xac] ss:$12 sps:$4 sm:$0xff]   ;;  %v2156_v7 = vld [vmem:[%s2680_s16 + $0xa8] ss:$12 sps:$4 sm:$0xff]  }
  0x5c   : > { %484 = vadd.xlane.f32.xlu1 %v483_v17  ;;  %1175 = vmatpush1.bf16.msra.mxu0 %v2147_v58  ;;  %v2157_v10 = vld [vmem:[%s2680_s16 + $0xc4] ss:$12 sps:$4 sm:$0xff]  }
  0x5d   : > { %1176 = vmatprep.subr.bf16.mxu0 %v2148_v60 }
  0x5f   : > { %487 = vadd.xlane.f32.xlu0 %v486_v22 }
  0x60   : > { %490 = vadd.xlane.f32.xlu1 %v489_v23  ;;  %1177 = vmatpush1.bf16.msra.mxu0 %v2150_v61 }
  0x61   : > { %1178 = vmatprep.subr.bf16.mxu0 %v2151_v62 }
  0x63   : > { %493 = vadd.xlane.f32.xlu0 %v492_v28 }
  0x64   : > { %496 = vadd.xlane.f32.xlu1 %v495_v29  ;;  %1179 = vmatpush1.bf16.msra.mxu0 %v2153_v63 }
  0x65   : > { %1180 = vmatprep.subr.bf16.mxu0 %v2154_v3 }
  0x67   : > { %499 = vadd.xlane.f32.xlu0 %v498_v34 }
  0x68   : > { %502 = vadd.xlane.f32.xlu1 %v501_v35  ;;  %1181 = vmatpush1.bf16.msra.mxu0 %v2156_v7 }
  0x69   : > { %1182 = vmatprep.subr.bf16.mxu0 %v2157_v10 }
  0x6b   : > { %505 = vadd.xlane.f32.xlu0 %v504_v40 }
  0x6c   : > { %508 = vadd.xlane.f32.xlu1 %v507_v41  ;;  %1183 = vmatpush1.bf16.msra.mxu0 %v2160_v11 }
  0x6f   : > { %511 = vadd.xlane.f32.xlu0 %v510_v46 }
  0x70   : > { %514 = vadd.xlane.f32.xlu1 %v513_v47 }
  0xe0   : > { %v470_v16 = vpop.xlane.xlu0 %469 }
  0xe1   : > { %v517_v17 = vmul.f32 0.00390625, %v470_v16  ;;  %v476_v22 = vpop.xlane.xlu1 %475 }
  0xe2   : > { %v519_v23 = vmul.f32 0.00390625, %v476_v22 }
  0xe3   : > { %v2703_v28 = vsub.f32 %v2552_v0, %v517_v17  ;;  %v2706_v29 = vsub.f32 %v2555_v1, %v517_v17 }
  0xe4   : > { %v2709_v34 = vsub.f32 %v2558_v2, %v519_v23  ;;  %v2712_v35 = vsub.f32 %v2563_v4, %v519_v23  ;;  %v473_v40 = vpop.xlane.xlu0 %472 }
  0xe5   : > { %v518_v41 = vmul.f32 0.00390625, %v473_v40  ;;  %v479_v46 = vpop.xlane.xlu1 %478  ;;  %v565_v47 = vmul.f32 %v2703_v28, %v2703_v28  ;;  %v566_v48 = vmul.f32 %v2706_v29, %v2706_v29 }
  0xe6   : > { %v520_v0 = vmul.f32 0.00390625, %v479_v46  ;;  %v569_v1 = vmul.f32 %v2709_v34, %v2709_v34  ;;  %v570_v2 = vmul.f32 %v2712_v35, %v2712_v35 }
  0xe7   : > { %v2723_v49 = vsub.f32 %v2566_v5, %v518_v41  ;;  %v2726_v4 = vsub.f32 %v2569_v6, %v518_v41  ;;  %v597_v50 = vadd.f32 %v566_v48, %v565_v47 }
  0xe8   : > { %v2729_v51 = vsub.f32 %v2574_v8, %v520_v0  ;;  %v2732_v52 = vsub.f32 %v2577_v9, %v520_v0  ;;  %v482_v53 = vpop.xlane.xlu0 %481  ;;  %v603_v56 = vadd.f32 %v570_v2, %v569_v1 }
  0xe9   : > { %v521_v54 = vmul.f32 0.00390625, %v482_v53  ;;  %598 = vadd.xlane.f32.xlu0 %v597_v50  ;;  %v485_v55 = vpop.xlane.xlu1 %484  ;;  %v567_v57 = vmul.f32 %v2723_v49, %v2723_v49  ;;  %v568_v5 = vmul.f32 %v2726_v4, %v2726_v4 }
  0xea   : > { %v522_v6 = vmul.f32 0.00390625, %v485_v55  ;;  %v571_v58 = vmul.f32 %v2729_v51, %v2729_v51  ;;  %v572_v8 = vmul.f32 %v2732_v52, %v2732_v52 }
  0xeb   : > { %v2743_v9 = vsub.f32 %v2584_v12, %v521_v54  ;;  %v2746_v59 = vsub.f32 %v2587_v13, %v521_v54  ;;  %v600_v60 = vadd.f32 %v568_v5, %v567_v57 }
  0xec   : > { %v2749_v61 = vsub.f32 %v2590_v14, %v522_v6  ;;  %v2752_v62 = vsub.f32 %v2593_v15, %v522_v6  ;;  %v488_v63 = vpop.xlane.xlu0 %487  ;;  %v606_v10 = vadd.f32 %v572_v8, %v571_v58  ;;  %v2162_v6 = vld [vmem:[%s2680_s16 + $0xdc] ss:$12 sps:$4 sm:$0xff]   ;;  %v2164_v58 = vld [vmem:[%s2680_s16 + $0xe0] ss:$12 sps:$4 sm:$0xff]  }
  0xed   : > { %v523_v3 = vmul.f32 0.00390625, %v488_v63  ;;  %604 = vadd.xlane.f32.xlu0 %v603_v56  ;;  %601 = vadd.xlane.f32.xlu1 %v600_v60  ;;  %v491_v7 = vpop.xlane.xlu1 %490  ;;  %v573_v12 = vmul.f32 %v2743_v9, %v2743_v9  ;;  %v574_v13 = vmul.f32 %v2746_v59, %v2746_v59  ;;  %v2165_v60 = vld [vmem:[%s2680_s16 + $0xd8] ss:$12 sps:$4 sm:$0xff]   ;;  %v2166_v63 = vld [vmem:[%s2680_s16 + $0x20] ss:$12 sps:$4 sm:$0xff]  }
  0xee   : > { %v524_v11 = vmul.f32 0.00390625, %v491_v7  ;;  %v575_v14 = vmul.f32 %v2749_v61, %v2749_v61  ;;  %v576_v15 = vmul.f32 %v2752_v62, %v2752_v62  ;;  %1184 = vmatprep.subr.bf16.mxu0 %v2162_v6  ;;  %1995 = vmatprep.subr.bf16.mxu1 %v2164_v58  ;;  %v2174_v6 = vld [vmem:[%s2680_s16 + $0x110] ss:$12 sps:$4 sm:$0xff]  }
  0xef   : > { %v2763_v16 = vsub.f32 %v2600_v18, %v523_v3  ;;  %v2766_v17 = vsub.f32 %v2603_v19, %v523_v3  ;;  %v609_v22 = vadd.f32 %v574_v13, %v573_v12  ;;  %1185 = vmatpush1.bf16.msra.mxu0 %v2165_v60  ;;  %1996 = vmatpush3.bf16.msra.mxu1 %v2166_v63  ;;  %v2176_v60 = vld [vmem:[%s2680_s16 + $0x50] ss:$12 sps:$4 sm:$0xff]  }
  0xf0   : > { %v2769_v23 = vsub.f32 %v2606_v20, %v524_v11  ;;  %v2772_v40 = vsub.f32 %v2609_v21, %v524_v11  ;;  %v494_v41 = vpop.xlane.xlu0 %493  ;;  %v612_v48 = vadd.f32 %v576_v15, %v575_v14 }
  0xf1   : > { %v525_v46 = vmul.f32 0.00390625, %v494_v41  ;;  %607 = vadd.xlane.f32.xlu1 %v606_v10  ;;  %610 = vadd.xlane.f32.xlu0 %v609_v22  ;;  %v497_v47 = vpop.xlane.xlu1 %496  ;;  %v577_v18 = vmul.f32 %v2763_v16, %v2763_v16  ;;  %v578_v19 = vmul.f32 %v2766_v17, %v2766_v17 }
  0xf2   : > { %v526_v0 = vmul.f32 0.00390625, %v497_v47  ;;  %v579_v20 = vmul.f32 %v2769_v23, %v2769_v23  ;;  %v580_v21 = vmul.f32 %v2772_v40, %v2772_v40  ;;  %v2169_v47 = vld [vmem:[%s2680_s16 + $0xf8] ss:$12 sps:$4 sm:$0xff]  }
  0xf3   : > { %v2783_v1 = vsub.f32 %v2616_v24, %v525_v46  ;;  %v2786_v2 = vsub.f32 %v2619_v25, %v525_v46  ;;  %v615_v50 = vadd.f32 %v578_v19, %v577_v18  ;;  %v2167_v46 = vld [vmem:[%s2680_s16 + $0xf4] ss:$12 sps:$4 sm:$0xff]   ;;  %1997 = vmatprep.subr.bf16.mxu1 %v2169_v47 }
  0xf4   : > { %v2789_v53 = vsub.f32 %v2622_v26, %v526_v0  ;;  %v2792_v54 = vsub.f32 %v2625_v27, %v526_v0  ;;  %v500_v55 = vpop.xlane.xlu0 %499  ;;  %v618_v5 = vadd.f32 %v580_v21, %v579_v20  ;;  %v2170_v0 = vld [vmem:[%s2680_s16 + $0xf0] ss:$12 sps:$4 sm:$0xff]   ;;  %v2171_v20 = vld [vmem:[%s2680_s16 + $0x38] ss:$12 sps:$4 sm:$0xff]   ;;  %1186 = vmatprep.subr.bf16.mxu0 %v2167_v46  ;;  %v2186_v47 = vld [vmem:[%s2680_s16 + $0x80] ss:$12 sps:$4 sm:$0xff]  }
  0xf5   : > { %v527_v56 = vmul.f32 0.00390625, %v500_v55  ;;  %613 = vadd.xlane.f32.xlu1 %v612_v48  ;;  %616 = vadd.xlane.f32.xlu0 %v615_v50  ;;  %v503_v57 = vpop.xlane.xlu1 %502  ;;  %v581_v24 = vmul.f32 %v2783_v1, %v2783_v1  ;;  %v582_v25 = vmul.f32 %v2786_v2, %v2786_v2  ;;  %v2185_v46 = vld [vmem:[%s2680_s16 + $0x138] ss:$12 sps:$4 sm:$0xff]  }
  0xf6   : > { %v528_v26 = vmul.f32 0.00390625, %v503_v57  ;;  %v583_v8 = vmul.f32 %v2789_v53, %v2789_v53  ;;  %v584_v27 = vmul.f32 %v2792_v54, %v2792_v54  ;;  %1187 = vmatpush1.bf16.msra.mxu0 %v2170_v0  ;;  %1998 = vmatpush3.bf16.msra.mxu1 %v2171_v20  ;;  %v2189_v0 = vld [vmem:[%s2680_s16 + $0x158] ss:$12 sps:$4 sm:$0xff]   ;;  %v2190_v20 = vld [vmem:[%s2680_s16 + $0x150] ss:$12 sps:$4 sm:$0xff]  }
  0xf7   : > { %v2807_v3 = vsub.f32 %v2632_v30, %v527_v56  ;;  %v2810_v7 = vsub.f32 %v2635_v31, %v527_v56  ;;  %v621_v10 = vadd.f32 %v582_v25, %v581_v24  ;;  %v2172_v25 = vld [vmem:[%s2680_s16 + $0x10c] ss:$12 sps:$4 sm:$0xff]   ;;  %1999 = vmatprep.subr.bf16.mxu1 %v2174_v6 }
  0xf8   : > { %v2813_v12 = vsub.f32 %v2638_v32, %v528_v26  ;;  %v2816_v13 = vsub.f32 %v2641_v33, %v528_v26  ;;  %v506_v11 = vpop.xlane.xlu0 %505  ;;  %v624_v14 = vadd.f32 %v584_v27, %v583_v8  ;;  %v2175_v27 = vld [vmem:[%s2680_s16 + $0x108] ss:$12 sps:$4 sm:$0xff]   ;;  %1188 = vmatprep.subr.bf16.mxu0 %v2172_v25 }
  0xf9   : > { %v529_v30 = vmul.f32 0.00390625, %v506_v11  ;;  %619 = vadd.xlane.f32.xlu1 %v618_v5  ;;  %622 = vadd.xlane.f32.xlu0 %v621_v10  ;;  %v509_v31 = vpop.xlane.xlu1 %508  ;;  %v585_v15 = vmul.f32 %v2807_v3, %v2807_v3  ;;  %v586_v32 = vmul.f32 %v2810_v7, %v2810_v7 }
  0xfa   : > { %v530_v22 = vmul.f32 0.00390625, %v509_v31  ;;  %v587_v33 = vmul.f32 %v2813_v12, %v2813_v12  ;;  %v588_v41 = vmul.f32 %v2816_v13, %v2816_v13  ;;  %1189 = vmatpush1.bf16.msra.mxu0 %v2175_v27  ;;  %2000 = vmatpush3.bf16.msra.mxu1 %v2176_v60  ;;  %v2179_v31 = vld [vmem:[%s2680_s16 + $0x128] ss:$12 sps:$4 sm:$0xff]  }
  0xfb   : > { %v2829_v48 = vsub.f32 %v2648_v36, %v529_v30  ;;  %v2832_v18 = vsub.f32 %v2651_v37, %v529_v30  ;;  %v627_v19 = vadd.f32 %v586_v32, %v585_v15  ;;  %v2177_v30 = vld [vmem:[%s2680_s16 + $0x124] ss:$12 sps:$4 sm:$0xff]   ;;  %v2180_v15 = vld [vmem:[%s2680_s16 + $0x120] ss:$12 sps:$4 sm:$0xff]   ;;  %v2181_v32 = vld [vmem:[%s2680_s16 + $0x68] ss:$12 sps:$4 sm:$0xff]   ;;  %2001 = vmatprep.subr.bf16.mxu1 %v2179_v31 }
  0xfc   : > { %v2837_v21 = vsub.f32 %v2654_v38, %v530_v22  ;;  %v2840_v50 = vsub.f32 %v2657_v39, %v530_v22  ;;  %v512_v55 = vpop.xlane.xlu0 %511  ;;  %v630_v37 = vadd.f32 %v588_v41, %v587_v33  ;;  %1190 = vmatprep.subr.bf16.mxu0 %v2177_v30  ;;  %v2182_v33 = vld [vmem:[%s2680_s16 + $0x13c] ss:$12 sps:$4 sm:$0xff]   ;;  %v2184_v41 = vld [vmem:[%s2680_s16 + $0x140] ss:$12 sps:$4 sm:$0xff]  }
  0xfd   : > { %v531_v56 = vmul.f32 0.00390625, %v512_v55  ;;  %625 = vadd.xlane.f32.xlu1 %v624_v14  ;;  %628 = vadd.xlane.f32.xlu0 %v627_v19  ;;  %v515_v36 = vpop.xlane.xlu1 %514  ;;  %v589_v57 = vmul.f32 %v2829_v48, %v2829_v48  ;;  %v590_v38 = vmul.f32 %v2832_v18, %v2832_v18  ;;  %v2187_v19 = vld [vmem:[%s2680_s16 + $0x154] ss:$12 sps:$4 sm:$0xff]   ;;  %v2191_v55 = vld [vmem:[%s2680_s16 + $0x98] ss:$12 sps:$4 sm:$0xff]  }
  0xfe   : > { %v532_v39 = vmul.f32 0.00390625, %v515_v36  ;;  %v591_v5 = vmul.f32 %v2837_v21, %v2837_v21  ;;  %v592_v24 = vmul.f32 %v2840_v50, %v2840_v50  ;;  %1191 = vmatpush1.bf16.msra.mxu0 %v2180_v15  ;;  %2002 = vmatpush3.bf16.msra.mxu1 %v2181_v32  ;;  %v2194_v36 = vld [vmem:[%s2680_s16 + $0x170] ss:$12 sps:$4 sm:$0xff]  }
  0xff   : > { %v2853_v58 = vsub.f32 %v2664_v42, %v531_v56  ;;  %v2856_v26 = vsub.f32 %v2667_v43, %v531_v56  ;;  %v633_v8 = vadd.f32 %v590_v38, %v589_v57  ;;  %1192 = vmatprep.subr.bf16.mxu0 %v2182_v33  ;;  %2003 = vmatprep.subr.bf16.mxu1 %v2184_v41  ;;  %v2192_v56 = vld [vmem:[%s2680_s16 + $0x16c] ss:$12 sps:$4 sm:$0xff]   ;;  %v2196_v57 = vld [vmem:[%s2680_s16 + $0xb0] ss:$12 sps:$4 sm:$0xff]   ;;  %v725_v41 = vld [vmem:[%s3213_s1] sm:$0x3] }
 0x100   : > { %v2861_v63 = vsub.f32 %v2670_v44, %v532_v39  ;;  %v2864_v10 = vsub.f32 %v2673_v45, %v532_v39  ;;  %v636_v42 = vadd.f32 %v592_v24, %v591_v5  ;;  %v727_v24 = vlaneseq }
 0x101   : > { %631 = vadd.xlane.f32.xlu1 %v630_v37  ;;  %634 = vadd.xlane.f32.xlu0 %v633_v8  ;;  %v593_v43 = vmul.f32 %v2853_v58, %v2853_v58  ;;  %v594_v11 = vmul.f32 %v2856_v26, %v2856_v26  ;;  %v2195_v37 = vld [vmem:[%s2680_s16 + $0x168] ss:$12 sps:$4 sm:$0xff]   ;;  %s1924_s16 = sshll.u32 (%p2398_p9), %s1578_s11, 2 }
 0x102   : > { %v595_v44 = vmul.f32 %v2861_v63, %v2861_v63  ;;  %v596_v45 = vmul.f32 %v2864_v10, %v2864_v10  ;;  %1193 = vmatpush1.bf16.msra.mxu0 %v2185_v46  ;;  %2004 = vmatpush3.bf16.msra.mxu1 %v2186_v47  ;;  %s3131_s23 = scalar_lea.vmem (%p2398_p9), %s3217_s5, %s1924_s16 }
 0x103   : > { %v639_v14 = vadd.f32 %v594_v11, %v593_v43  ;;  %1194 = vmatprep.subr.bf16.mxu0 %v2187_v19  ;;  %2005 = vmatprep.subr.bf16.mxu1 %v2189_v0  ;;  %v2890_v43 = vshrl.u32 %v727_v24, 7 }
 0x104   : > { %v642_v22 = vadd.f32 %v596_v45, %v595_v44 }
 0x105   : > { %637 = vadd.xlane.f32.xlu1 %v636_v42  ;;  %640 = vadd.xlane.f32.xlu0 %v639_v14  ;;  %v2893_v15 = vsub.s32 0, %v2890_v43  ;;  %v2896_v32 = vsub.s32 1, %v2890_v43 }
 0x106   : > { %1195 = vmatpush1.bf16.msra.mxu0 %v2190_v20  ;;  %2006 = vmatpush3.bf16.msra.mxu1 %v2191_v55 }
 0x107   : > { %1196 = vmatprep.subr.bf16.mxu0 %v2192_v56  ;;  %2007 = vmatprep.subr.bf16.mxu1 %v2194_v36  ;;  %v2902_v20 = vrot.slane %v725_v41, %v2893_v15  ;;  %v2905_v55 = vrot.slane %v725_v41, %v2896_v32  ;;  %v769_v56 = vld [vmem:[%s3214_s2] sm:$0x3] }
 0x108   : > { %v2913_v24 = vrot.slane %v769_v56, %v2893_v15 }
 0x109   : > { %643 = vadd.xlane.f32.xlu1 %v642_v22 }
 0x10a   : > { %1197 = vmatpush1.bf16.msra.mxu0 %v2195_v37  ;;  %2008 = vmatpush3.bf16.msra.mxu1 %v2196_v57 }
 0x176   : > { %v599_v38 = vpop.xlane.xlu0 %598 }
 0x177   : > { %v645_v39 = vmul.f32 0.00390625, %v599_v38 }
 0x179   : > { %v661_v5 = vadd.f32 1e-05, %v645_v39 }
 0x17a   : > { %v602_v25 = vpop.xlane.xlu1 %601  ;;  %v605_v6 = vpop.xlane.xlu0 %604 }
 0x17b   : > { %2197 = vrsqrt.f32 %v661_v5  ;;  %v646_v8 = vmul.f32 0.00390625, %v602_v25  ;;  %v647_v27 = vmul.f32 0.00390625, %v605_v6 }
 0x17d   : > { %v662_v60 = vadd.f32 1e-05, %v646_v8  ;;  %v663_v42 = vadd.f32 1e-05, %v647_v27  ;;  %v2917_v27 = vrot.slane %v769_v56, %v2896_v32 }
 0x17e   : > { %v608_v11 = vpop.xlane.xlu1 %607  ;;  %v611_v44 = vpop.xlane.xlu0 %610 }
 0x17f   : > { %2199 = vrsqrt.f32 %v662_v60  ;;  %v648_v45 = vmul.f32 0.00390625, %v608_v11  ;;  %v649_v30 = vmul.f32 0.00390625, %v611_v44 }
 0x180   : > { %2201 = vrsqrt.f32 %v663_v42 }
 0x181   : > { %v664_v31 = vadd.f32 1e-05, %v648_v45  ;;  %v665_v14 = vadd.f32 1e-05, %v649_v30 }
 0x182   : > { %v614_v22 = vpop.xlane.xlu1 %613  ;;  %v617_v33 = vpop.xlane.xlu0 %616 }
 0x183   : > { %2203 = vrsqrt.f32 %v664_v31  ;;  %v650_v46 = vmul.f32 0.00390625, %v614_v22  ;;  %v651_v47 = vmul.f32 0.00390625, %v617_v33 }
 0x184   : > { %2205 = vrsqrt.f32 %v665_v14 }
 0x185   : > { %v2198_v19 = vpop.eup %2197  ;;  %v666_v0 = vadd.f32 1e-05, %v650_v46  ;;  %v667_v36 = vadd.f32 1e-05, %v651_v47 }
 0x186   : > { %v620_v37 = vpop.xlane.xlu1 %619  ;;  %v694_v57 = vmul.f32 %v2198_v19, %v2706_v29  ;;  %v693_v38 = vmul.f32 %v2198_v19, %v2703_v28  ;;  %v623_v5 = vpop.xlane.xlu0 %622 }
 0x187   : > { %2207 = vrsqrt.f32 %v666_v0  ;;  %v652_v39 = vmul.f32 0.00390625, %v620_v37  ;;  %v653_v44 = vmul.f32 0.00390625, %v623_v5 }
 0x188   : > { %v738_v8 = vmul.f32 %v2905_v55, %v694_v57  ;;  %v737_v60 = vmul.f32 %v2902_v20, %v693_v38  ;;  %2209 = vrsqrt.f32 %v667_v36 }
 0x189   : > { %v2200_v25 = vpop.eup %2199  ;;  %v668_v6 = vadd.f32 1e-05, %v652_v39  ;;  %v669_v36 = vadd.f32 1e-05, %v653_v44 }
 0x18a   : > { %v2202_v42 = vpop.eup %2201  ;;  %v626_v29 = vpop.xlane.xlu1 %625  ;;  %v696_v28 = vmul.f32 %v2200_v25, %v2726_v4  ;;  %v695_v11 = vmul.f32 %v2200_v25, %v2723_v49  ;;  %v782_v41 = vadd.f32 %v2917_v27, %v738_v8  ;;  %v781_v46 = vadd.f32 %v2913_v24, %v737_v60 }
 0x18b   : > { %2211 = vrsqrt.f32 %v668_v6  ;;  %v654_v45 = vmul.f32 0.00390625, %v626_v29  ;;  %v698_v30 = vmul.f32 %v2202_v42, %v2712_v35  ;;  %v697_v37 = vmul.f32 %v2202_v42, %v2709_v34  ;;  %v629_v57 = vpop.xlane.xlu0 %628 }
 0x18c   : > { %v740_v31 = vmul.f32 %v2905_v55, %v696_v28  ;;  %v739_v14 = vmul.f32 %v2902_v20, %v695_v11  ;;  %v655_v42 = vmul.f32 0.00390625, %v629_v57 }
 0x18d   : > { %v2204_v22 = vpop.eup %2203  ;;  %v670_v33 = vadd.f32 1e-05, %v654_v45  ;;  %v742_v47 = vmul.f32 %v2905_v55, %v698_v30  ;;  %v741_v29 = vmul.f32 %v2902_v20, %v697_v37 }
 0x18e   : > { %v632_v4 = vpop.xlane.xlu1 %631  ;;  %v784_v49 = vadd.f32 %v2917_v27, %v740_v31  ;;  %v783_v19 = vadd.f32 %v2913_v24, %v739_v14  ;;  %v700_v0 = vmul.f32 %v2204_v22, %v2732_v52  ;;  %v699_v35 = vmul.f32 %v2204_v22, %v2729_v51  ;;  %v2206_v56 = vpop.eup %2205 }
 0x18f   : > { %2213 = vrsqrt.f32 %v670_v33  ;;  %v656_v6 = vmul.f32 0.00390625, %v632_v4  ;;  %v786_v8 = vadd.f32 %v2917_v27, %v742_v47  ;;  %v702_v52 = vmul.f32 %v2206_v56, %v2746_v59  ;;  %v635_v47 = vpop.xlane.xlu0 %634 }
 0x190   : > { %v814_v38 = vpack.c.bf16 %v784_v49, %v782_v41  ;;  %v813_v39 = vpack.c.bf16 %v783_v19, %v781_v46  ;;  %v744_v5 = vmul.f32 %v2905_v55, %v700_v0  ;;  %v743_v60 = vmul.f32 %v2902_v20, %v699_v35 }
 0x191   : > { %v2208_v25 = vpop.eup %2207  ;;  %2215 = vrsqrt.f32 %v669_v36  ;;  %v746_v44 = vmul.f32 %v2905_v55, %v702_v52  ;;  %v672_v30 = vadd.f32 1e-05, %v656_v6  ;;  %v785_v33 = vadd.f32 %v2913_v24, %v741_v29 }
 0x192   : > { %1198 = vmatprep.mubr.bf16.mxu0 %v814_v38  ;;  %1311 = vmatprep.mubr.bf16.mxu1 %v814_v38  ;;  %v788_v51 = vadd.f32 %v2917_v27, %v744_v5  ;;  %v704_v34 = vmul.f32 %v2208_v25, %v2752_v62  ;;  %v2210_v28 = vpop.eup %2209  ;;  %v787_v31 = vadd.f32 %v2913_v24, %v743_v60  ;;  %v638_v22 = vpop.xlane.xlu1 %637  ;;  %v671_v62 = vadd.f32 1e-05, %v655_v42 }
 0x193   : > { %1199 = vmatmul.mubr.bf16.vlgmr.msra.gmra.mrb[0].mxu0 %v813_v39  ;;  %1312 = vmatmul.mubr.bf16.vlgmr.msra.gmra.mrb[0].mxu1 %v813_v39  ;;  %v703_v59 = vmul.f32 %v2208_v25, %v2749_v61  ;;  %v701_v46 = vmul.f32 %v2206_v56, %v2743_v9  ;;  %v790_v4 = vadd.f32 %v2917_v27, %v746_v44  ;;  %2217 = vrsqrt.f32 %v672_v30 }
 0x194   : > { %v816_v11 = vpack.c.bf16 %v788_v51, %v786_v8  ;;  %v748_v14 = vmul.f32 %v2905_v55, %v704_v34  ;;  %v706_v49 = vmul.f32 %v2210_v28, %v2766_v17  ;;  %v658_v0 = vmul.f32 0.00390625, %v638_v22  ;;  %v641_v34 = vpop.xlane.xlu0 %640 }
 0x195   : > { %v2212_v45 = vpop.eup %2211  ;;  %v815_v35 = vpack.c.bf16 %v787_v31, %v785_v33  ;;  %v747_v36 = vmul.f32 %v2902_v20, %v703_v59  ;;  %2219 = vrsqrt.f32 %v671_v62  ;;  %v657_v38 = vmul.f32 0.00390625, %v635_v47 }
 0x196   : > { %1208 = vmatprep.mubr.bf16.mxu0 %v816_v11  ;;  %1319 = vmatprep.mubr.bf16.mxu1 %v816_v11  ;;  %v792_v41 = vadd.f32 %v2917_v27, %v748_v14  ;;  %v708_v19 = vmul.f32 %v2212_v45, %v2772_v40  ;;  %v745_v9 = vmul.f32 %v2902_v20, %v701_v46  ;;  %v674_v56 = vadd.f32 1e-05, %v658_v0  ;;  %v644_v25 = vpop.xlane.xlu1 %643 }
 0x197   : > { %v750_v17 = vmul.f32 %v2905_v55, %v706_v49  ;;  %v791_v39 = vadd.f32 %v2913_v24, %v747_v36  ;;  %v707_v5 = vmul.f32 %v2212_v45, %v2769_v23  ;;  %v673_v60 = vadd.f32 1e-05, %v657_v38 }
 0x198   : > { %v818_v61 = vpack.c.bf16 %v792_v41, %v790_v4  ;;  %v752_v37 = vmul.f32 %v2905_v55, %v708_v19  ;;  %v789_v51 = vadd.f32 %v2913_v24, %v745_v9  ;;  %v705_v52 = vmul.f32 %v2210_v28, %v2763_v16 }
 0x199   : > { %v2214_v57 = vpop.eup %2213  ;;  %v794_v42 = vadd.f32 %v2917_v27, %v750_v17  ;;  %2221 = vrsqrt.f32 %v674_v56  ;;  %v660_v11 = vmul.f32 0.00390625, %v644_v25  ;;  %v751_v23 = vmul.f32 %v2902_v20, %v707_v5 }
 0x19a   : > { %v796_v6 = vadd.f32 %v2917_v27, %v752_v37  ;;  %v712_v8 = vmul.f32 %v2214_v57, %v2792_v54  ;;  %v817_v44 = vpack.c.bf16 %v791_v39, %v789_v51  ;;  %2223 = vrsqrt.f32 %v673_v60 }
 0x19b   : > { %1209 = vmatmul.mubr.bf16.gmra.mrb[4].mxu0 %v815_v35  ;;  %1320 = vmatmul.mubr.bf16.gmra.mrb[4].mxu1 %v815_v35  ;;  %v2216_v40 = vpop.eup %2215  ;;  %v659_v54 = vmul.f32 0.00390625, %v641_v34  ;;  %v749_v16 = vmul.f32 %v2902_v20, %v705_v52  ;;  %v676_v14 = vadd.f32 1e-05, %v660_v11  ;;  %v795_v22 = vadd.f32 %v2913_v24, %v751_v23 }
 0x19c   : > { %1218 = vmatprep.mubr.bf16.mxu0 %v818_v61  ;;  %1327 = vmatprep.mubr.bf16.mxu1 %v818_v61  ;;  %v710_v29 = vmul.f32 %v2216_v40, %v2786_v2  ;;  %v820_v45 = vpack.c.bf16 %v796_v6, %v794_v42  ;;  %v756_v30 = vmul.f32 %v2905_v55, %v712_v8 }
 0x19d   : > { %v2218_v31 = vpop.eup %2217  ;;  %v711_v59 = vmul.f32 %v2214_v57, %v2789_v53  ;;  %v675_v41 = vadd.f32 1e-05, %v659_v54  ;;  %v793_v46 = vadd.f32 %v2913_v24, %v749_v16  ;;  %v709_v47 = vmul.f32 %v2216_v40, %v2783_v1 }
 0x19e   : > { %v754_v28 = vmul.f32 %v2905_v55, %v710_v29  ;;  %v800_v62 = vadd.f32 %v2917_v27, %v756_v30  ;;  %v716_v33 = vmul.f32 %v2218_v31, %v2816_v13  ;;  %2225 = vrsqrt.f32 %v676_v14 }
 0x19f   : > { %v2220_v2 = vpop.eup %2219  ;;  %v819_v19 = vpack.c.bf16 %v795_v22, %v793_v46  ;;  %v755_v0 = vmul.f32 %v2902_v20, %v711_v59  ;;  %2227 = vrsqrt.f32 %v675_v41  ;;  %v753_v13 = vmul.f32 %v2902_v20, %v709_v47 }
 0x1a0   : > { %v798_v4 = vadd.f32 %v2917_v27, %v754_v28  ;;  %v714_v49 = vmul.f32 %v2220_v2, %v2810_v7  ;;  %v760_v53 = vmul.f32 %v2905_v55, %v716_v33  ;;  %v715_v37 = vmul.f32 %v2218_v31, %v2813_v12 }
 0x1a1   : > { %v799_v7 = vadd.f32 %v2913_v24, %v755_v0  ;;  %v797_v9 = vadd.f32 %v2913_v24, %v753_v13  ;;  %v713_v17 = vmul.f32 %v2220_v2, %v2807_v3 }
 0x1a2   : > { %v822_v35 = vpack.c.bf16 %v800_v62, %v798_v4  ;;  %v758_v1 = vmul.f32 %v2905_v55, %v714_v49  ;;  %v804_v57 = vadd.f32 %v2917_v27, %v760_v53  ;;  %v759_v5 = vmul.f32 %v2902_v20, %v715_v37 }
 0x1a3   : > { %1219 = vmatmul.mubr.bf16.gmra.mrb[8].mxu0 %v817_v44  ;;  %1328 = vmatmul.mubr.bf16.gmra.mrb[8].mxu1 %v817_v44  ;;  %v2222_v36 = vpop.eup %2221  ;;  %v821_v39 = vpack.c.bf16 %v799_v7, %v797_v9  ;;  %v757_v12 = vmul.f32 %v2902_v20, %v713_v17 }
 0x1a4   : > { %1228 = vmatprep.mubr.bf16.mxu0 %v820_v45  ;;  %1335 = vmatprep.mubr.bf16.mxu1 %v820_v45  ;;  %v2224_v61 = vpop.eup %2223  ;;  %v720_v38 = vmul.f32 %v2222_v36, %v2840_v50  ;;  %v802_v40 = vadd.f32 %v2917_v27, %v758_v1  ;;  %v803_v60 = vadd.f32 %v2913_v24, %v759_v5 }
 0x1a5   : > { %v718_v56 = vmul.f32 %v2224_v61, %v2832_v18  ;;  %v719_v18 = vmul.f32 %v2222_v36, %v2837_v21  ;;  %v801_v34 = vadd.f32 %v2913_v24, %v757_v12  ;;  %v717_v42 = vmul.f32 %v2224_v61, %v2829_v48 }
 0x1a6   : > { %v824_v25 = vpack.c.bf16 %v804_v57, %v802_v40  ;;  %v764_v6 = vmul.f32 %v2905_v55, %v720_v38 }
 0x1a7   : > { %v762_v50 = vmul.f32 %v2905_v55, %v718_v56  ;;  %v823_v44 = vpack.c.bf16 %v803_v60, %v801_v34  ;;  %v763_v23 = vmul.f32 %v2902_v20, %v719_v18  ;;  %v761_v21 = vmul.f32 %v2902_v20, %v717_v42 }
 0x1a8   : > { %v2226_v8 = vpop.eup %2225  ;;  %v808_v51 = vadd.f32 %v2917_v27, %v764_v6 }
 0x1a9   : > { %v2228_v3 = vpop.eup %2227  ;;  %v724_v52 = vmul.f32 %v2226_v8, %v2864_v10  ;;  %v806_v29 = vadd.f32 %v2917_v27, %v762_v50  ;;  %v807_v48 = vadd.f32 %v2913_v24, %v763_v23  ;;  %v723_v31 = vmul.f32 %v2226_v8, %v2861_v63 }
 0x1aa   : > { %v722_v11 = vmul.f32 %v2228_v3, %v2856_v26  ;;  %v805_v54 = vadd.f32 %v2913_v24, %v761_v21  ;;  %v721_v16 = vmul.f32 %v2228_v3, %v2853_v58  ;;  %v893_v58 = vld [vmem:[%s431_s13] sm:$0x7] }
 0x1ab   : > { %1229 = vmatmul.mubr.bf16.gmra.mrb[12].mxu0 %v819_v19  ;;  %1336 = vmatmul.mubr.bf16.gmra.mrb[12].mxu1 %v819_v19  ;;  %v826_v45 = vpack.c.bf16 %v808_v51, %v806_v29  ;;  %v768_v30 = vmul.f32 %v2905_v55, %v724_v52  ;;  %v767_v14 = vmul.f32 %v2902_v20, %v723_v31 }
 0x1ac   : > { %1238 = vmatprep.mubr.bf16.mxu0 %v822_v35  ;;  %1343 = vmatprep.mubr.bf16.mxu1 %v822_v35  ;;  %v766_v10 = vmul.f32 %v2905_v55, %v722_v11  ;;  %v825_v2 = vpack.c.bf16 %v807_v48, %v805_v54  ;;  %v765_v55 = vmul.f32 %v2902_v20, %v721_v16  ;;  %v905_v20 = vsub.s32 2, %v2890_v43 }
 0x1ad   : > { %v812_v26 = vadd.f32 %v2917_v27, %v768_v30  ;;  %v811_v63 = vadd.f32 %v2913_v24, %v767_v14 }
 0x1ae   : > { %v810_v28 = vadd.f32 %v2917_v27, %v766_v10  ;;  %v809_v59 = vadd.f32 %v2913_v24, %v765_v55  ;;  %v3023_v27 = vrot.slane %v893_v58, %v2893_v15  ;;  %v3026_v24 = vrot.slane %v893_v58, %v2896_v32 }
 0x1af   : > { %v3028_v46 = vrot.slane %v893_v58, %v905_v20 }
 0x1b0   : > { %v828_v22 = vpack.c.bf16 %v812_v26, %v810_v28  ;;  %v827_v62 = vpack.c.bf16 %v811_v63, %v809_v59 }
 0x1b3   : > { %1239 = vmatmul.mubr.bf16.gmra.mrb[16].mxu0 %v821_v39  ;;  %1344 = vmatmul.mubr.bf16.gmra.mrb[16].mxu1 %v821_v39 }
 0x1b4   : > { %1248 = vmatprep.mubr.bf16.mxu0 %v824_v25  ;;  %1351 = vmatprep.mubr.bf16.mxu1 %v824_v25 }
 0x1bb   : > { %1249 = vmatmul.mubr.bf16.gmra.mrb[20].mxu0 %v823_v44  ;;  %1352 = vmatmul.mubr.bf16.gmra.mrb[20].mxu1 %v823_v44 }
 0x1bc   : > { %1258 = vmatprep.mubr.bf16.mxu0 %v826_v45  ;;  %1359 = vmatprep.mubr.bf16.mxu1 %v826_v45 }
 0x1c3   : > { %1259 = vmatmul.mubr.bf16.gmra.mrb[24].mxu0 %v825_v2  ;;  %1360 = vmatmul.mubr.bf16.gmra.mrb[24].mxu1 %v825_v2 }
 0x1c4   : > { %1268 = vmatprep.mubr.bf16.mxu0 %v828_v22  ;;  %1367 = vmatprep.mubr.bf16.mxu1 %v828_v22 }
 0x1cb   : > { %1269 = vmatmul.mubr.bf16.gmra.mrb[28].mxu0 %v827_v62  ;;  %1368 = vmatmul.mubr.bf16.gmra.mrb[28].mxu1 %v827_v62 }
 0x266   : > { %v1200_v33 = vpop.f32.mrb[0].mxu0  ;;  %v2009_v41 = vpop.f32.mrb[0].mxu1 }
 0x267   : > { %v1201_v47 = vadd.f32 %v1200_v33, %v3023_v27  ;;  %v1202_v4 = vpop.f32.mrb[1].mxu0  ;;  %v2010_v49 = vpop.f32.mrb[1].mxu1 }
 0x268   : > { %v1203_v19 = vadd.f32 %v1202_v4, %v3026_v24  ;;  %v2011_v0 = vadd.f32 %v2010_v49, %v2009_v41  ;;  %v1204_v35 = vpop.f32.mrb[2].mxu0  ;;  %v2012_v43 = vpop.f32.mrb[2].mxu1 }
 0x269   : > { %v1205_v15 = vadd.f32 %v1204_v35, %v3023_v27  ;;  %v1206_v53 = vpop.f32.mrb[3].mxu0  ;;  %v2013_v36 = vpop.f32.mrb[3].mxu1 }
 0x26a   : > { %v1961_v32 = vpack.c.bf16 %v1203_v19, %v1201_v47  ;;  %v1314_v13 = vadd.f32 %v2011_v0, %v3028_v46  ;;  %v1207_v1 = vadd.f32 %v1206_v53, %v3026_v24  ;;  %v2014_v61 = vadd.f32 %v2013_v36, %v2012_v43 }
 0x26c   : > { %1536 = vst [vmem:[%s3035_s18] sm:$0xff] %v1961_v32  ;;  %v1962_v7 = vpack.c.bf16 %v1314_v13, %v1314_v13  ;;  %v1963_v37 = vpack.c.bf16 %v1207_v1, %v1205_v15  ;;  %v1317_v57 = vadd.f32 %v2014_v61, %v3028_v46 }
 0x26e   : > { %1537 = vst [vmem:[%s3035_s18 + $0x8] sm:$0xf] %v1962_v7  ;;  %1538 = vst [vmem:[%s3035_s18 + $0xc] sm:$0xff] %v1963_v37  ;;  %v1964_v38 = vpack.c.bf16 %v1317_v57, %v1317_v57  ;;  %v1210_v9 = vpop.f32.mrb[4].mxu0  ;;  %v2015_v17 = vpop.f32.mrb[4].mxu1 }
 0x26f   : > { %v1211_v40 = vadd.f32 %v1210_v9, %v3023_v27  ;;  %v1212_v56 = vpop.f32.mrb[5].mxu0  ;;  %v2016_v39 = vpop.f32.mrb[5].mxu1 }
 0x270   : > { %1539 = vst [vmem:[%s3035_s18 + $0x14] sm:$0xf] %v1964_v38  ;;  %v1213_v5 = vadd.f32 %v1212_v56, %v3026_v24  ;;  %v2017_v25 = vadd.f32 %v2016_v39, %v2015_v17  ;;  %v1214_v6 = vpop.f32.mrb[6].mxu0  ;;  %v2018_v8 = vpop.f32.mrb[6].mxu1 }
 0x271   : > { %v1215_v12 = vadd.f32 %v1214_v6, %v3023_v27  ;;  %v1216_v50 = vpop.f32.mrb[7].mxu0  ;;  %v2019_v3 = vpop.f32.mrb[7].mxu1 }
 0x272   : > { %v1965_v60 = vpack.c.bf16 %v1213_v5, %v1211_v40  ;;  %v1322_v18 = vadd.f32 %v2017_v25, %v3028_v46  ;;  %v1217_v51 = vadd.f32 %v1216_v50, %v3026_v24  ;;  %v2020_v52 = vadd.f32 %v2019_v3, %v2018_v8 }
 0x274   : > { %1540 = vst [vmem:[%s3035_s18 + $0x18] sm:$0xff] %v1965_v60  ;;  %v1966_v34 = vpack.c.bf16 %v1322_v18, %v1322_v18  ;;  %v1967_v42 = vpack.c.bf16 %v1217_v51, %v1215_v12  ;;  %v1325_v29 = vadd.f32 %v2020_v52, %v3028_v46 }
 0x276   : > { %1541 = vst [vmem:[%s3035_s18 + $0x20] sm:$0xf] %v1966_v34  ;;  %1542 = vst [vmem:[%s3035_s18 + $0x24] sm:$0xff] %v1967_v42  ;;  %v1968_v11 = vpack.c.bf16 %v1325_v29, %v1325_v29  ;;  %v1220_v44 = vpop.f32.mrb[8].mxu0  ;;  %v2021_v23 = vpop.f32.mrb[8].mxu1 }
 0x277   : > { %v1221_v45 = vadd.f32 %v1220_v44, %v3023_v27  ;;  %v1222_v30 = vpop.f32.mrb[9].mxu0  ;;  %v2022_v21 = vpop.f32.mrb[9].mxu1 }
 0x278   : > { %1543 = vst [vmem:[%s3035_s18 + $0x2c] sm:$0xf] %v1968_v11  ;;  %v1223_v10 = vadd.f32 %v1222_v30, %v3026_v24  ;;  %v2023_v48 = vadd.f32 %v2022_v21, %v2021_v23  ;;  %v1224_v31 = vpop.f32.mrb[10].mxu0  ;;  %v2024_v26 = vpop.f32.mrb[10].mxu1 }
 0x279   : > { %v1225_v54 = vadd.f32 %v1224_v31, %v3023_v27  ;;  %v1226_v16 = vpop.f32.mrb[11].mxu0  ;;  %v2025_v28 = vpop.f32.mrb[11].mxu1 }
 0x27a   : > { %v1969_v2 = vpack.c.bf16 %v1223_v10, %v1221_v45  ;;  %v1330_v14 = vadd.f32 %v2023_v48, %v3028_v46  ;;  %v1227_v22 = vadd.f32 %v1226_v16, %v3026_v24  ;;  %v2026_v55 = vadd.f32 %v2025_v28, %v2024_v26 }
 0x27c   : > { %1544 = vst [vmem:[%s3035_s18 + $0x30] sm:$0xff] %v1969_v2  ;;  %v1970_v63 = vpack.c.bf16 %v1330_v14, %v1330_v14  ;;  %v1971_v59 = vpack.c.bf16 %v1227_v22, %v1225_v54  ;;  %v1333_v62 = vadd.f32 %v2026_v55, %v3028_v46 }
 0x27e   : > { %1545 = vst [vmem:[%s3035_s18 + $0x38] sm:$0xf] %v1970_v63  ;;  %1546 = vst [vmem:[%s3035_s18 + $0x3c] sm:$0xff] %v1971_v59  ;;  %v1972_v58 = vpack.c.bf16 %v1333_v62, %v1333_v62  ;;  %v1230_v20 = vpop.f32.mrb[12].mxu0  ;;  %v2027_v33 = vpop.f32.mrb[12].mxu1 }
 0x27f   : > { %v1231_v41 = vadd.f32 %v1230_v20, %v3023_v27  ;;  %v1232_v47 = vpop.f32.mrb[13].mxu0  ;;  %v2028_v4 = vpop.f32.mrb[13].mxu1 }
 0x280   : > { %1547 = vst [vmem:[%s3035_s18 + $0x44] sm:$0xf] %v1972_v58  ;;  %v1233_v49 = vadd.f32 %v1232_v47, %v3026_v24  ;;  %v2029_v19 = vadd.f32 %v2028_v4, %v2027_v33  ;;  %v1234_v0 = vpop.f32.mrb[14].mxu0  ;;  %v2030_v35 = vpop.f32.mrb[14].mxu1 }
 0x281   : > { %v1235_v43 = vadd.f32 %v1234_v0, %v3023_v27  ;;  %v1236_v15 = vpop.f32.mrb[15].mxu0  ;;  %v2031_v53 = vpop.f32.mrb[15].mxu1 }
 0x282   : > { %v1973_v36 = vpack.c.bf16 %v1233_v49, %v1231_v41  ;;  %v1338_v32 = vadd.f32 %v2029_v19, %v3028_v46  ;;  %v1237_v13 = vadd.f32 %v1236_v15, %v3026_v24  ;;  %v2032_v1 = vadd.f32 %v2031_v53, %v2030_v35 }
 0x284   : > { %1548 = vst [vmem:[%s3035_s18 + $0x48] sm:$0xff] %v1973_v36  ;;  %v1974_v61 = vpack.c.bf16 %v1338_v32, %v1338_v32  ;;  %v1975_v7 = vpack.c.bf16 %v1237_v13, %v1235_v43  ;;  %v1341_v37 = vadd.f32 %v2032_v1, %v3028_v46 }
 0x286   : > { %1549 = vst [vmem:[%s3035_s18 + $0x50] sm:$0xf] %v1974_v61  ;;  %1550 = vst [vmem:[%s3035_s18 + $0x54] sm:$0xff] %v1975_v7  ;;  %v1976_v57 = vpack.c.bf16 %v1341_v37, %v1341_v37  ;;  %v1240_v38 = vpop.f32.mrb[16].mxu0  ;;  %v2033_v9 = vpop.f32.mrb[16].mxu1 }
 0x287   : > { %v1241_v17 = vadd.f32 %v1240_v38, %v3023_v27  ;;  %v1242_v40 = vpop.f32.mrb[17].mxu0  ;;  %v2034_v56 = vpop.f32.mrb[17].mxu1 }
 0x288   : > { %1551 = vst [vmem:[%s3035_s18 + $0x5c] sm:$0xf] %v1976_v57  ;;  %v1243_v39 = vadd.f32 %v1242_v40, %v3026_v24  ;;  %v2035_v5 = vadd.f32 %v2034_v56, %v2033_v9  ;;  %v1244_v25 = vpop.f32.mrb[18].mxu0  ;;  %v2036_v6 = vpop.f32.mrb[18].mxu1 }
 0x289   : > { %v1245_v8 = vadd.f32 %v1244_v25, %v3023_v27  ;;  %v1246_v12 = vpop.f32.mrb[19].mxu0  ;;  %v2037_v50 = vpop.f32.mrb[19].mxu1 }
 0x28a   : > { %v1977_v3 = vpack.c.bf16 %v1243_v39, %v1241_v17  ;;  %v1346_v60 = vadd.f32 %v2035_v5, %v3028_v46  ;;  %v1247_v18 = vadd.f32 %v1246_v12, %v3026_v24  ;;  %v2038_v51 = vadd.f32 %v2037_v50, %v2036_v6 }
 0x28c   : > { %1552 = vst [vmem:[%s3035_s18 + $0x60] sm:$0xff] %v1977_v3  ;;  %v1978_v52 = vpack.c.bf16 %v1346_v60, %v1346_v60  ;;  %v1979_v34 = vpack.c.bf16 %v1247_v18, %v1245_v8  ;;  %v1349_v42 = vadd.f32 %v2038_v51, %v3028_v46 }
 0x28e   : > { %1553 = vst [vmem:[%s3035_s18 + $0x68] sm:$0xf] %v1978_v52  ;;  %1554 = vst [vmem:[%s3035_s18 + $0x6c] sm:$0xff] %v1979_v34  ;;  %v1980_v29 = vpack.c.bf16 %v1349_v42, %v1349_v42  ;;  %v1250_v11 = vpop.f32.mrb[20].mxu0  ;;  %v2039_v44 = vpop.f32.mrb[20].mxu1 }
 0x28f   : > { %v1251_v23 = vadd.f32 %v1250_v11, %v3023_v27  ;;  %v1252_v45 = vpop.f32.mrb[21].mxu0  ;;  %v2040_v30 = vpop.f32.mrb[21].mxu1  ;;  %v1603_v11 = vld [vmem:[%s3035_s18 + $0x30] sm:$0xff] (%p2398_p9) }
 0x290   : > { %1555 = vst [vmem:[%s3035_s18 + $0x74] sm:$0xf] %v1980_v29  ;;  %v1253_v21 = vadd.f32 %v1252_v45, %v3026_v24  ;;  %v2041_v10 = vadd.f32 %v2040_v30, %v2039_v44  ;;  %v1254_v48 = vpop.f32.mrb[22].mxu0  ;;  %v2042_v31 = vpop.f32.mrb[22].mxu1  ;;  %v1601_v29 = vld [vmem:[%s3035_s18 + $0x24] sm:$0xff] (%p2398_p9)  ;;  %v1605_v44 = vld [vmem:[%s3035_s18 + $0x3c] sm:$0xff] (%p2398_p9) }
 0x291   : > { %v1255_v26 = vadd.f32 %v1254_v48, %v3023_v27  ;;  %v1256_v54 = vpop.f32.mrb[23].mxu0  ;;  %v2043_v16 = vpop.f32.mrb[23].mxu1  ;;  %v1609_v45 = vld [vmem:[%s3035_s18 + $0x54] sm:$0xff] (%p2398_p9)  ;;  %1602 = vst [vmem:[%s3131_s23 + $0x48] sm:$0xff] (%p2398_p9), %v1601_v29  ;;  %1604 = vst [vmem:[%s3131_s23 + $0x60] sm:$0xff] (%p2398_p9), %v1603_v11 }
 0x292   : > { %v1981_v28 = vpack.c.bf16 %v1253_v21, %v1251_v23  ;;  %v1354_v2 = vadd.f32 %v2041_v10, %v3028_v46  ;;  %v1257_v14 = vadd.f32 %v1256_v54, %v3026_v24  ;;  %v2044_v22 = vadd.f32 %v2043_v16, %v2042_v31  ;;  %v1607_v23 = vld [vmem:[%s3035_s18 + $0x48] sm:$0xff] (%p2398_p9)  ;;  %1606 = vst [vmem:[%s3131_s23 + $0x78] sm:$0xff] (%p2398_p9), %v1605_v44 }
 0x293   : > { %v1611_v30 = vld [vmem:[%s3035_s18 + $0x60] sm:$0xff] (%p2398_p9)  ;;  %1608 = vst [vmem:[%s3131_s23 + $0x90] sm:$0xff] (%p2398_p9), %v1607_v23  ;;  %1610 = vst [vmem:[%s3131_s23 + $0xa8] sm:$0xff] (%p2398_p9), %v1609_v45 }
 0x294   : > { %1556 = vst [vmem:[%s3035_s18 + $0x78] sm:$0xff] %v1981_v28  ;;  %v1982_v55 = vpack.c.bf16 %v1354_v2, %v1354_v2  ;;  %v1983_v63 = vpack.c.bf16 %v1257_v14, %v1255_v26  ;;  %v1357_v59 = vadd.f32 %v2044_v22, %v3028_v46  ;;  %1612 = vst [vmem:[%s3131_s23 + $0xc0] sm:$0xff] (%p2398_p9), %v1611_v30  ;;  %v1925_v28 = vld [vmem:[%s3035_s18 + $0x8] sm:$0xf] (%p2398_p9)  ;;  %v1927_v2 = vld [vmem:[%s3035_s18 + $0x14] sm:$0xf] (%p2398_p9) }
 0x295   : > { %v1613_v21 = vld [vmem:[%s3035_s18 + $0x6c] sm:$0xff] (%p2398_p9)  ;;  %1926 = vst [vmem:[%s3131_s23 + $0x8] sm:$0xf] (%p2398_p9), %v1925_v28  ;;  %1928 = vst [vmem:[%s3131_s23 + $0x20] sm:$0xf] (%p2398_p9), %v1927_v2 }
 0x296   : > { %1557 = vst [vmem:[%s3035_s18 + $0x80] sm:$0xf] %v1982_v55  ;;  %1558 = vst [vmem:[%s3035_s18 + $0x84] sm:$0xff] %v1983_v63  ;;  %v1984_v62 = vpack.c.bf16 %v1357_v59, %v1357_v59  ;;  %v1260_v58 = vpop.f32.mrb[24].mxu0  ;;  %v2045_v20 = vpop.f32.mrb[24].mxu1 }
 0x297   : > { %v1261_v33 = vadd.f32 %v1260_v58, %v3023_v27  ;;  %v1262_v41 = vpop.f32.mrb[25].mxu0  ;;  %v2046_v47 = vpop.f32.mrb[25].mxu1  ;;  %1614 = vst [vmem:[%s3131_s23 + $0xd8] sm:$0xff] (%p2398_p9), %v1613_v21  ;;  %v1929_v14 = vld [vmem:[%s3035_s18 + $0x20] sm:$0xf] (%p2398_p9) }
 0x298   : > { %1559 = vst [vmem:[%s3035_s18 + $0x8c] sm:$0xf] %v1984_v62  ;;  %v1263_v4 = vadd.f32 %v1262_v41, %v3026_v24  ;;  %v2047_v49 = vadd.f32 %v2046_v47, %v2045_v20  ;;  %v1264_v19 = vpop.f32.mrb[26].mxu0  ;;  %v2048_v0 = vpop.f32.mrb[26].mxu1  ;;  %v1931_v22 = vld [vmem:[%s3035_s18 + $0x2c] sm:$0xf] (%p2398_p9) }
 0x299   : > { %v1265_v35 = vadd.f32 %v1264_v19, %v3023_v27  ;;  %v1266_v43 = vpop.f32.mrb[27].mxu0  ;;  %v2049_v15 = vpop.f32.mrb[27].mxu1  ;;  %v1933_v55 = vld [vmem:[%s3035_s18 + $0x38] sm:$0xf] (%p2398_p9)  ;;  %1930 = vst [vmem:[%s3131_s23 + $0x38] sm:$0xf] (%p2398_p9), %v1929_v14 }
 0x29a   : > { %v1985_v53 = vpack.c.bf16 %v1263_v4, %v1261_v33  ;;  %v1362_v36 = vadd.f32 %v2047_v49, %v3028_v46  ;;  %v1267_v32 = vadd.f32 %v1266_v43, %v3026_v24  ;;  %v2050_v13 = vadd.f32 %v2049_v15, %v2048_v0  ;;  %1932 = vst [vmem:[%s3131_s23 + $0x50] sm:$0xf] (%p2398_p9), %v1931_v22  ;;  %v1935_v63 = vld [vmem:[%s3035_s18 + $0x44] sm:$0xf] (%p2398_p9)  ;;  %v1937_v59 = vld [vmem:[%s3035_s18 + $0x50] sm:$0xf] (%p2398_p9) }
 0x29b   : > { %v1615_v10 = vld [vmem:[%s3035_s18 + $0x78] sm:$0xff] (%p2398_p9)  ;;  %1934 = vst [vmem:[%s3131_s23 + $0x68] sm:$0xf] (%p2398_p9), %v1933_v55  ;;  %1936 = vst [vmem:[%s3131_s23 + $0x80] sm:$0xf] (%p2398_p9), %v1935_v63 }
 0x29c   : > { %1560 = vst [vmem:[%s3035_s18 + $0x90] sm:$0xff] %v1985_v53  ;;  %v1986_v1 = vpack.c.bf16 %v1362_v36, %v1362_v36  ;;  %v1987_v61 = vpack.c.bf16 %v1267_v32, %v1265_v35  ;;  %v1365_v7 = vadd.f32 %v2050_v13, %v3028_v46  ;;  %1616 = vst [vmem:[%s3131_s23 + $0xf0] sm:$0xff] (%p2398_p9), %v1615_v10  ;;  %v1939_v62 = vld [vmem:[%s3035_s18 + $0x5c] sm:$0xf] (%p2398_p9)  ;;  %v1941_v58 = vld [vmem:[%s3035_s18 + $0x68] sm:$0xf] (%p2398_p9) }
 0x29d   : > { %v1617_v48 = vld [vmem:[%s3035_s18 + $0x84] sm:$0xff] (%p2398_p9)  ;;  %1938 = vst [vmem:[%s3131_s23 + $0x98] sm:$0xf] (%p2398_p9), %v1937_v59  ;;  %1940 = vst [vmem:[%s3131_s23 + $0xb0] sm:$0xf] (%p2398_p9), %v1939_v62 }
 0x29e   : > { %1561 = vst [vmem:[%s3035_s18 + $0x98] sm:$0xf] %v1986_v1  ;;  %1562 = vst [vmem:[%s3035_s18 + $0x9c] sm:$0xff] %v1987_v61  ;;  %v1988_v37 = vpack.c.bf16 %v1365_v7, %v1365_v7  ;;  %v1270_v57 = vpop.f32.mrb[28].mxu0  ;;  %v2051_v38 = vpop.f32.mrb[28].mxu1 }
 0x29f   : > { %v1271_v9 = vadd.f32 %v1270_v57, %v3023_v27  ;;  %v1272_v17 = vpop.f32.mrb[29].mxu0  ;;  %v2052_v40 = vpop.f32.mrb[29].mxu1  ;;  %1618 = vst [vmem:[%s3131_s23 + $0x108] sm:$0xff] (%p2398_p9), %v1617_v48  ;;  %v1943_v20 = vld [vmem:[%s3035_s18 + $0x74] sm:$0xf] (%p2398_p9) }
 0x2a0   : > { %1563 = vst [vmem:[%s3035_s18 + $0xa4] sm:$0xf] %v1988_v37  ;;  %v1273_v56 = vadd.f32 %v1272_v17, %v3026_v24  ;;  %v2053_v39 = vadd.f32 %v2052_v40, %v2051_v38  ;;  %v1274_v5 = vpop.f32.mrb[30].mxu0  ;;  %v2054_v25 = vpop.f32.mrb[30].mxu1  ;;  %v1945_v33 = vld [vmem:[%s3035_s18 + $0x80] sm:$0xf] (%p2398_p9) }
 0x2a1   : > { %v1275_v6 = vadd.f32 %v1274_v5, %v3023_v27  ;;  %v1276_v8 = vpop.f32.mrb[31].mxu0  ;;  %v2055_v12 = vpop.f32.mrb[31].mxu1  ;;  %v1595_v27 = vld [vmem:[%s3035_s18] sm:$0xff] (%p2398_p9)  ;;  %1942 = vst [vmem:[%s3131_s23 + $0xc8] sm:$0xf] (%p2398_p9), %v1941_v58 }
 0x2a2   : > { %v1989_v50 = vpack.c.bf16 %v1273_v56, %v1271_v9  ;;  %v1370_v3 = vadd.f32 %v2053_v39, %v3028_v46  ;;  %v1277_v60 = vadd.f32 %v1276_v8, %v3026_v24  ;;  %v2056_v18 = vadd.f32 %v2055_v12, %v2054_v25  ;;  %1574 = sbr.rel (!%p2398_p9) target bundleno = 689 (0x2b1), region = 70  ;;  %v1597_v24 = vld [vmem:[%s3035_s18 + $0xc] sm:$0xff] (%p2398_p9)  ;;  %1596 = vst [vmem:[%s3131_s23] sm:$0xff] (%p2398_p9), %v1595_v27 }
 0x2a3   : > { %v1619_v31 = vld [vmem:[%s3035_s18 + $0x90] sm:$0xff] (%p2398_p9)  ;;  %1598 = vst [vmem:[%s3131_s23 + $0x18] sm:$0xff] (%p2398_p9), %v1597_v24  ;;  %1944 = vst [vmem:[%s3131_s23 + $0xe0] sm:$0xf] (%p2398_p9), %v1943_v20  ;;  %v1947_v41 = vld [vmem:[%s3035_s18 + $0x8c] sm:$0xf] (%p2398_p9) }
 0x2a4   : > { %1564 = vst [vmem:[%s3035_s18 + $0xa8] sm:$0xff] %v1989_v50  ;;  %v1990_v51 = vpack.c.bf16 %v1370_v3, %v1370_v3  ;;  %v1991_v52 = vpack.c.bf16 %v1277_v60, %v1275_v6  ;;  %v1373_v34 = vadd.f32 %v2056_v18, %v3028_v46  ;;  %v1599_v46 = vld [vmem:[%s3035_s18 + $0x18] sm:$0xff] (%p2398_p9)  ;;  %1620 = vst [vmem:[%s3131_s23 + $0x120] sm:$0xff] (%p2398_p9), %v1619_v31 }
 0x2a5   : > { %v1621_v26 = vld [vmem:[%s3035_s18 + $0x9c] sm:$0xff] (%p2398_p9)  ;;  %1600 = vst [vmem:[%s3131_s23 + $0x30] sm:$0xff] (%p2398_p9), %v1599_v46  ;;  %1946 = vst [vmem:[%s3131_s23 + $0xf8] sm:$0xf] (%p2398_p9), %v1945_v33  ;;  %v1949_v47 = vld [vmem:[%s3035_s18 + $0x98] sm:$0xf] (%p2398_p9) }
 0x2a6   : > { %1565 = vst [vmem:[%s3035_s18 + $0xb0] sm:$0xf] %v1990_v51  ;;  %1566 = vst [vmem:[%s3035_s18 + $0xb4] sm:$0xff] %v1991_v52  ;;  %v1992_v42 = vpack.c.bf16 %v1373_v34, %v1373_v34 }
 0x2a7   : > { %1622 = vst [vmem:[%s3131_s23 + $0x138] sm:$0xff] (%p2398_p9), %v1621_v26  ;;  %v1951_v4 = vld [vmem:[%s3035_s18 + $0xa4] sm:$0xf] (%p2398_p9)  ;;  %1948 = vst [vmem:[%s3131_s23 + $0x110] sm:$0xf] (%p2398_p9), %v1947_v41 }
 0x2a8   : > { %1567 = vst [vmem:[%s3035_s18 + $0xbc] sm:$0xf] %v1992_v42  ;;  %1950 = vst [vmem:[%s3131_s23 + $0x128] sm:$0xf] (%p2398_p9), %v1949_v47 }
 0x2a9   : > { %1952 = vst [vmem:[%s3131_s23 + $0x140] sm:$0xf] %v1951_v4 }
 0x2ab   : > { %v1623_v54 = vld [vmem:[%s3035_s18 + $0xa8] sm:$0xff] }
 0x2ac   : > { %1624 = vst [vmem:[%s3131_s23 + $0x150] sm:$0xff] %v1623_v54 }
 0x2ad   : > { %v1625_v16 = vld [vmem:[%s3035_s18 + $0xb4] sm:$0xff]  ;;  %v1953_v49 = vld [vmem:[%s3035_s18 + $0xb0] sm:$0xf] }
 0x2ae   : > { %1626 = vst [vmem:[%s3131_s23 + $0x168] sm:$0xff] %v1625_v16  ;;  %1954 = vst [vmem:[%s3131_s23 + $0x158] sm:$0xf] %v1953_v49 }
 0x2af   : > { %v1955_v19 = vld [vmem:[%s3035_s18 + $0xbc] sm:$0xf] }
 0x2b0   : > { %1956 = vst [vmem:[%s3131_s23 + $0x170] sm:$0xf] %v1955_v19 }
 0x2b1 PF: > { %s15_s26 = sadd.s32 1, %s2299_s26   ;;  %s3219_s18 = smov %s2271_s19 }
 0x2b2   : > { %p12_p2 = scmp.ge.s32.totalorder %s15_s26, 6   ;;  %s3220_s19 = smov %s2403_s12 }
 0x2b3   : > { %s3221_s20 = smov %s2279_s21  ;;  %s3222_s21 = smov %s2392_s8 }
 0x2b4   : > { %s3223_s22 = smov %s2291_s24  ;;  %s3224_s23 = smov %s2295_s25 }
 0x2b5   : > { %s3225_s24 = smov %s3228_s28  ;;  %s3226_s25 = smov %s3232_s29 }
 0x2b6   :  { %14 = sbr.rel (!%p12_p2) target bundleno = 5 (0x5), region = 145 }

// kernel: encoder_decoder_forward.12
= control target key start
LH: loop header
LB: loop body
LE: loop exit
PB: predicated region body
PF: predicated region fallthrough
CT: control target
= control target key end

     0   :  { %s1195_s15 = smov 0   ;;  %s1197_s16 = smov 0   ;;  %s1459_s0 = inlined_call_operand.vmem [shape: bf16[256,256], index: 0, kind: input, shape index: {}]   ;;  %s1460_s1 = inlined_call_operand.vmem [shape: bf16[256,256], index: 1, kind: input, shape index: {}]   ;;  %s1461_s2 = inlined_call_operand.vmem [shape: f32[1,256], index: 2, kind: input, shape index: {}]   ;;  %s1462_s3 = inlined_call_operand.vmem [shape: f32[256,256], index: 3, kind: input, shape index: {}]   ;;  %s1463_s4 = inlined_call_operand.vmem [shape: f32[256,256], index: 4, kind: output, shape index: {}]  }
   0x1   :  { %s1199_s17 = smov 0  }
   0x2 LB: > { %s26_s18 = sadd.s32 1, %s1164_s16  ;;  %p955_p0 = scmp.ge.s32.totalorder %s1168_s17, 1  ;;  %s1168_s17 = sphi %s1199_s17, %s14_s17   ;;  %s1164_s16 = sphi %s1197_s16, %s1465_s16   ;;  %s1160_s15 = sphi %s1195_s15, %s1464_s15  }
   0x3   : > { %p28_p1 = scmp.ge.s32.totalorder %s26_s18, 2  ;;  %p218_p2 = scmp.lt.s32.totalorder %s1168_s17, 3 }
   0x5   : > { %s1467_s18 = smov (%p28_p1, %s26_s18), 0  ;;  %p219_p3 = pnand %p955_p0, %p218_p2 }
   0x6   : > { %v1074_v0 = vld [vmem:[%s1460_s1 + $0x4] ss:$8 sps:$4 sm:$0xff] (!%p219_p3)   ;;  %v1076_v1 = vld [vmem:[%s1460_s1] ss:$8 sps:$4 sm:$0xff] (!%p219_p3)   ;;  %v1077_v2 = vld [vmem:[%s1460_s1 + $0x14] ss:$8 sps:$4 sm:$0xff] (!%p219_p3)   ;;  %v361_v48 = vlaneseq (!%p219_p3) }
   0x7   : > { %222 = sbr.rel (%p219_p3) target bundleno = 315 (0x13b), region = 36  ;;  %611 = vmatprep.subr.bf16.mxu0 (!%p219_p3), %v1074_v0  ;;  %1018 = vmatprep.subr.bf16.mxu1 (!%p219_p3), %v1074_v0  ;;  %v1079_v3 = vld [vmem:[%s1460_s1 + $0x10] ss:$8 sps:$4 sm:$0xff] (!%p219_p3)   ;;  %v1080_v4 = vld [vmem:[%s1460_s1 + $0x24] ss:$8 sps:$4 sm:$0xff] (!%p219_p3)   ;;  %s956_s29 = sshll.u32 (!%p219_p3), %s1160_s15, 4 }
   0x8   : > { %612 = vmatpush1.bf16.msra.mxu0 (!%p219_p3), %v1076_v1  ;;  %1034 = vmatpush1.bf16.msra.mxu1 (!%p219_p3), %v1076_v1  ;;  %v1082_v5 = vld [vmem:[%s1460_s1 + $0x20] ss:$8 sps:$4 sm:$0xff] (!%p219_p3)   ;;  %v1083_v6 = vld [vmem:[%s1460_s1 + $0x34] ss:$8 sps:$4 sm:$0xff] (!%p219_p3)   ;;  %p270_p4 = scmp.lt.s32.totalorder (!%p219_p3), %s956_s29, 31  ;;  %v362_v49 = vshrl.u32 (!%p219_p3), %v361_v48, 7 }
   0x9   : > { %613 = vmatprep.subr.bf16.mxu0 (!%p219_p3), %v1077_v2  ;;  %1019 = vmatprep.subr.bf16.mxu1 (!%p219_p3), %v1077_v2  ;;  %v1085_v7 = vld [vmem:[%s1460_s1 + $0x30] ss:$8 sps:$4 sm:$0xff] (!%p219_p3)   ;;  %v1086_v8 = vld [vmem:[%s1460_s1 + $0x44] ss:$8 sps:$4 sm:$0xff] (!%p219_p3)   ;;  %v1088_v9 = vld [vmem:[%s1460_s1 + $0x40] ss:$8 sps:$4 sm:$0xff] (!%p219_p3)  }
   0xa   : > { %v1089_v10 = vld [vmem:[%s1460_s1 + $0x54] ss:$8 sps:$4 sm:$0xff] (!%p219_p3)   ;;  %v1091_v11 = vld [vmem:[%s1460_s1 + $0x50] ss:$8 sps:$4 sm:$0xff] (!%p219_p3)   ;;  %v1092_v12 = vld [vmem:[%s1460_s1 + $0x64] ss:$8 sps:$4 sm:$0xff] (!%p219_p3)  }
   0xb   : > { %v1094_v14 = vld [vmem:[%s1460_s1 + $0x60] ss:$8 sps:$4 sm:$0xff] (!%p219_p3)   ;;  %v1095_v16 = vld [vmem:[%s1460_s1 + $0x74] ss:$8 sps:$4 sm:$0xff] (!%p219_p3)   ;;  %v1097_v17 = vld [vmem:[%s1460_s1 + $0x70] ss:$8 sps:$4 sm:$0xff] (!%p219_p3)  }
   0xc   : > { %614 = vmatpush1.bf16.msra.mxu0 (!%p219_p3), %v1079_v3  ;;  %1035 = vmatpush1.bf16.msra.mxu1 (!%p219_p3), %v1079_v3  ;;  %v1098_v18 = vld [vmem:[%s1460_s1 + $0x84] ss:$8 sps:$4 sm:$0xff] (!%p219_p3)   ;;  %v1100_v19 = vld [vmem:[%s1460_s1 + $0x80] ss:$8 sps:$4 sm:$0xff] (!%p219_p3)   ;;  %v1101_v20 = vld [vmem:[%s1460_s1 + $0x94] ss:$8 sps:$4 sm:$0xff] (!%p219_p3)  }
   0xd   : > { %615 = vmatprep.subr.bf16.mxu0 (!%p219_p3), %v1080_v4  ;;  %1020 = vmatprep.subr.bf16.mxu1 (!%p219_p3), %v1080_v4  ;;  %v1103_v21 = vld [vmem:[%s1460_s1 + $0x90] ss:$8 sps:$4 sm:$0xff] (!%p219_p3)   ;;  %v1104_v22 = vld [vmem:[%s1460_s1 + $0xa4] ss:$8 sps:$4 sm:$0xff] (!%p219_p3)   ;;  %v1106_v23 = vld [vmem:[%s1460_s1 + $0xa0] ss:$8 sps:$4 sm:$0xff] (!%p219_p3)  }
   0xe   : > { %s1469_s29 = smov (!%p270_p4, %s956_s29), 31  ;;  %v1107_v24 = vld [vmem:[%s1460_s1 + $0xb4] ss:$8 sps:$4 sm:$0xff]   ;;  %v1109_v25 = vld [vmem:[%s1460_s1 + $0xb0] ss:$8 sps:$4 sm:$0xff]   ;;  %v363_v50 = vsub.s32 0, %v362_v49 }
   0xf   : > { %s1015_s19 = sshll.u32 %s1469_s29, 3  ;;  %v1110_v26 = vld [vmem:[%s1460_s1 + $0xc4] ss:$8 sps:$4 sm:$0xff]   ;;  %v1112_v27 = vld [vmem:[%s1460_s1 + $0xc0] ss:$8 sps:$4 sm:$0xff]   ;;  %s1016_s22 = sshll.u32 %s1469_s29, 4 }
  0x10   : > { %616 = vmatpush1.bf16.msra.mxu0 %v1082_v5  ;;  %1036 = vmatpush1.bf16.msra.mxu1 %v1082_v5  ;;  %s1258_s24 = scalar_lea.vmem %s1459_s0, %s1015_s19  ;;  %v1113_v28 = vld [vmem:[%s1460_s1 + $0xd4] ss:$8 sps:$4 sm:$0xff]   ;;  %v1115_v29 = vld [vmem:[%s1460_s1 + $0xd0] ss:$8 sps:$4 sm:$0xff]   ;;  %v1116_v30 = vld [vmem:[%s1460_s1 + $0xe4] ss:$8 sps:$4 sm:$0xff]   ;;  %s1343_s28 = scalar_lea.vmem %s1462_s3, %s1016_s22 }
  0x11   : > { %617 = vmatprep.subr.bf16.mxu0 %v1083_v6  ;;  %1021 = vmatprep.subr.bf16.mxu1 %v1083_v6  ;;  %v1124_v13 = vld [vmem:[%s1258_s24 + $0x4] ss:$8 sps:$4 sm:$0xff]   ;;  %v1118_v31 = vld [vmem:[%s1460_s1 + $0xe0] ss:$8 sps:$4 sm:$0xff]   ;;  %v1119_v32 = vld [vmem:[%s1460_s1 + $0xf4] ss:$8 sps:$4 sm:$0xff]   ;;  %s1358_s30 = scalar_lea.vmem %s1463_s4, %s1016_s22 }
  0x12   : > { %v1127_v15 = vld [vmem:[%s1258_s24 + $0x44] ss:$8 sps:$4 sm:$0xff]   ;;  %643 = vmatprep.mubr.bf16.mxu0 %v1124_v13  ;;  %v1121_v33 = vld [vmem:[%s1460_s1 + $0xf0] ss:$8 sps:$4 sm:$0xff]   ;;  %v1122_v34 = vld [vmem:[%s1258_s24] ss:$8 sps:$4 sm:$0xff]  }
  0x13   : > { %683 = vmatprep.mubr.bf16.mxu1 %v1127_v15  ;;  %v1125_v35 = vld [vmem:[%s1258_s24 + $0x40] ss:$8 sps:$4 sm:$0xff]   ;;  %v1128_v36 = vld [vmem:[%s1258_s24 + $0x14] ss:$8 sps:$4 sm:$0xff]   ;;  %v1132_v38 = vld [vmem:[%s1258_s24 + $0x10] ss:$8 sps:$4 sm:$0xff]  }
  0x14   : > { %618 = vmatpush1.bf16.msra.mxu0 %v1085_v7  ;;  %1037 = vmatpush1.bf16.msra.mxu1 %v1085_v7  ;;  %v1130_v37 = vld [vmem:[%s1258_s24 + $0x54] ss:$8 sps:$4 sm:$0xff]   ;;  %v1133_v39 = vld [vmem:[%s1258_s24 + $0x50] ss:$8 sps:$4 sm:$0xff]   ;;  %v1134_v40 = vld [vmem:[%s1258_s24 + $0x24] ss:$8 sps:$4 sm:$0xff]  }
  0x15   : > { %619 = vmatprep.subr.bf16.mxu0 %v1086_v8  ;;  %1022 = vmatprep.subr.bf16.mxu1 %v1086_v8  ;;  %v1136_v41 = vld [vmem:[%s1258_s24 + $0x64] ss:$8 sps:$4 sm:$0xff]   ;;  %v1138_v42 = vld [vmem:[%s1258_s24 + $0x20] ss:$8 sps:$4 sm:$0xff]   ;;  %v1140_v44 = vld [vmem:[%s1258_s24 + $0x34] ss:$8 sps:$4 sm:$0xff]  }
  0x16   : > { %v1139_v43 = vld [vmem:[%s1258_s24 + $0x60] ss:$8 sps:$4 sm:$0xff]   ;;  %v1142_v45 = vld [vmem:[%s1258_s24 + $0x74] ss:$8 sps:$4 sm:$0xff]   ;;  %v1144_v46 = vld [vmem:[%s1258_s24 + $0x30] ss:$8 sps:$4 sm:$0xff]  }
  0x17   : > { %v1145_v47 = vld [vmem:[%s1258_s24 + $0x70] ss:$8 sps:$4 sm:$0xff]   ;;  %v359_v51 = vld [vmem:[%s1461_s2] sm:$0x3]  ;;  %v367_v52 = vsub.s32 1, %v362_v49  ;;  %v725_v62 = vld [vmem:[%s1343_s28 + $0x8] sm:$0xff] }
  0x18   : > { %620 = vmatpush1.bf16.msra.mxu0 %v1088_v9  ;;  %1038 = vmatpush1.bf16.msra.mxu1 %v1088_v9  ;;  %v1345_v53 = vrot.slane %v359_v51, %v363_v50  ;;  %v724_v56 = vld [vmem:[%s1343_s28] sm:$0xff]  ;;  %v741_v0 = vld [vmem:[%s1343_s28 + $0x88] sm:$0xff]  ;;  %v726_v4 = vld [vmem:[%s1343_s28 + $0x10] sm:$0xff] }
  0x19   : > { %621 = vmatprep.subr.bf16.mxu0 %v1089_v10  ;;  %1023 = vmatprep.subr.bf16.mxu1 %v1089_v10  ;;  %v1347_v54 = vrot.slane %v359_v51, %v367_v52  ;;  %v740_v58 = vld [vmem:[%s1343_s28 + $0x80] sm:$0xff]  ;;  %v742_v6 = vld [vmem:[%s1343_s28 + $0x90] sm:$0xff] }
  0x1c   : > { %622 = vmatpush1.bf16.msra.mxu0 %v1091_v11  ;;  %1039 = vmatpush1.bf16.msra.mxu1 %v1091_v11 }
  0x1d   : > { %623 = vmatprep.subr.bf16.mxu0 %v1092_v12  ;;  %1024 = vmatprep.subr.bf16.mxu1 %v1092_v12  ;;  %v727_v12 = vld [vmem:[%s1343_s28 + $0x18] sm:$0xff] }
  0x20   : > { %624 = vmatpush1.bf16.msra.mxu0 %v1094_v14  ;;  %1040 = vmatpush1.bf16.msra.mxu1 %v1094_v14  ;;  %v743_v14 = vld [vmem:[%s1343_s28 + $0x98] sm:$0xff] }
  0x21   : > { %625 = vmatprep.subr.bf16.mxu0 %v1095_v16  ;;  %1025 = vmatprep.subr.bf16.mxu1 %v1095_v16 }
  0x24   : > { %626 = vmatpush1.bf16.msra.mxu0 %v1097_v17  ;;  %1041 = vmatpush1.bf16.msra.mxu1 %v1097_v17 }
  0x25   : > { %627 = vmatprep.subr.bf16.mxu0 %v1098_v18  ;;  %1026 = vmatprep.subr.bf16.mxu1 %v1098_v18 }
  0x28   : > { %628 = vmatpush1.bf16.msra.mxu0 %v1100_v19  ;;  %1042 = vmatpush1.bf16.msra.mxu1 %v1100_v19 }
  0x29   : > { %629 = vmatprep.subr.bf16.mxu0 %v1101_v20  ;;  %1027 = vmatprep.subr.bf16.mxu1 %v1101_v20 }
  0x2c   : > { %630 = vmatpush1.bf16.msra.mxu0 %v1103_v21  ;;  %1043 = vmatpush1.bf16.msra.mxu1 %v1103_v21 }
  0x2d   : > { %631 = vmatprep.subr.bf16.mxu0 %v1104_v22  ;;  %1028 = vmatprep.subr.bf16.mxu1 %v1104_v22 }
  0x30   : > { %632 = vmatpush1.bf16.msra.mxu0 %v1106_v23  ;;  %1044 = vmatpush1.bf16.msra.mxu1 %v1106_v23 }
  0x31   : > { %633 = vmatprep.subr.bf16.mxu0 %v1107_v24  ;;  %1029 = vmatprep.subr.bf16.mxu1 %v1107_v24  ;;  %v728_v24 = vld [vmem:[%s1343_s28 + $0x20] sm:$0xff] }
  0x34   : > { %634 = vmatpush1.bf16.msra.mxu0 %v1109_v25  ;;  %1045 = vmatpush1.bf16.msra.mxu1 %v1109_v25 }
  0x35   : > { %635 = vmatprep.subr.bf16.mxu0 %v1110_v26  ;;  %1030 = vmatprep.subr.bf16.mxu1 %v1110_v26  ;;  %v744_v26 = vld [vmem:[%s1343_s28 + $0xa0] sm:$0xff] }
  0x38   : > { %636 = vmatpush1.bf16.msra.mxu0 %v1112_v27  ;;  %1046 = vmatpush1.bf16.msra.mxu1 %v1112_v27 }
  0x39   : > { %637 = vmatprep.subr.bf16.mxu0 %v1113_v28  ;;  %1031 = vmatprep.subr.bf16.mxu1 %v1113_v28 }
  0x3c   : > { %638 = vmatpush1.bf16.msra.mxu0 %v1115_v29  ;;  %1047 = vmatpush1.bf16.msra.mxu1 %v1115_v29 }
  0x3d   : > { %639 = vmatprep.subr.bf16.mxu0 %v1116_v30  ;;  %1032 = vmatprep.subr.bf16.mxu1 %v1116_v30  ;;  %v729_v30 = vld [vmem:[%s1343_s28 + $0x28] sm:$0xff] }
  0x40   : > { %640 = vmatpush1.bf16.msra.mxu0 %v1118_v31  ;;  %1048 = vmatpush1.bf16.msra.mxu1 %v1118_v31 }
  0x41   : > { %641 = vmatprep.subr.bf16.mxu0 %v1119_v32  ;;  %1033 = vmatprep.subr.bf16.mxu1 %v1119_v32  ;;  %v745_v32 = vld [vmem:[%s1343_s28 + $0xa8] sm:$0xff] }
  0x44   : > { %642 = vmatpush1.bf16.msra.mxu0 %v1121_v33  ;;  %1049 = vmatpush1.bf16.msra.mxu1 %v1121_v33 }
  0x47   : > { %644 = vmatmul.mubr.bf16.vlgmr.msra.gmra.mrb[0].mxu0 %v1122_v34  ;;  %684 = vmatmul.mubr.bf16.vlgmr.msra.gmra.mrb[0].mxu1 %v1125_v35 }
  0x48   : > { %653 = vmatprep.mubr.bf16.mxu0 %v1128_v36  ;;  %693 = vmatprep.mubr.bf16.mxu1 %v1130_v37  ;;  %v730_v36 = vld [vmem:[%s1343_s28 + $0x30] sm:$0xff] }
  0x4f   : > { %654 = vmatmul.mubr.bf16.gmra.mrb[4].mxu0 %v1132_v38  ;;  %694 = vmatmul.mubr.bf16.gmra.mrb[4].mxu1 %v1133_v39  ;;  %v746_v38 = vld [vmem:[%s1343_s28 + $0xb0] sm:$0xff] }
  0x50   : > { %663 = vmatprep.mubr.bf16.mxu0 %v1134_v40  ;;  %703 = vmatprep.mubr.bf16.mxu1 %v1136_v41 }
  0x57   : > { %664 = vmatmul.mubr.bf16.gmra.mrb[8].mxu0 %v1138_v42  ;;  %704 = vmatmul.mubr.bf16.gmra.mrb[8].mxu1 %v1139_v43 }
  0x58   : > { %673 = vmatprep.mubr.bf16.mxu0 %v1140_v44  ;;  %713 = vmatprep.mubr.bf16.mxu1 %v1142_v45  ;;  %v731_v44 = vld [vmem:[%s1343_s28 + $0x38] sm:$0xff] }
  0x5f   : > { %674 = vmatmul.mubr.bf16.gmra.mrb[12].mxu0 %v1144_v46  ;;  %714 = vmatmul.mubr.bf16.gmra.mrb[12].mxu1 %v1145_v47  ;;  %v747_v46 = vld [vmem:[%s1343_s28 + $0xb8] sm:$0xff] }
 0x11a   : > { %v645_v55 = vpop.f32.mrb[0].mxu0  ;;  %v685_v57 = vpop.f32.mrb[0].mxu1 }
 0x11b   : > { %v646_v59 = vadd.f32 %v645_v55, %v1345_v53  ;;  %v686_v60 = vadd.f32 %v685_v57, %v1345_v53  ;;  %v647_v61 = vpop.f32.mrb[1].mxu0  ;;  %v687_v63 = vpop.f32.mrb[1].mxu1 }
 0x11c   : > { %v648_v1 = vadd.f32 %v647_v61, %v1347_v54  ;;  %v688_v2 = vadd.f32 %v687_v63, %v1347_v54  ;;  %v649_v3 = vpop.f32.mrb[2].mxu0  ;;  %v689_v5 = vpop.f32.mrb[2].mxu1 }
 0x11d   : > { %v756_v7 = vadd.f32 %v724_v56, %v646_v59  ;;  %v772_v8 = vadd.f32 %v740_v58, %v686_v60  ;;  %v650_v9 = vadd.f32 %v649_v3, %v1345_v53  ;;  %v690_v10 = vadd.f32 %v689_v5, %v1345_v53  ;;  %v651_v11 = vpop.f32.mrb[3].mxu0  ;;  %v691_v13 = vpop.f32.mrb[3].mxu1  ;;  %v732_v58 = vld [vmem:[%s1343_s28 + $0x40] sm:$0xff] }
 0x11e   : > { %v757_v15 = vadd.f32 %v725_v62, %v648_v1  ;;  %v773_v16 = vadd.f32 %v741_v0, %v688_v2  ;;  %v652_v17 = vadd.f32 %v651_v11, %v1347_v54  ;;  %v692_v18 = vadd.f32 %v691_v13, %v1347_v54  ;;  %v748_v60 = vld [vmem:[%s1343_s28 + $0xc0] sm:$0xff]  ;;  %v733_v0 = vld [vmem:[%s1343_s28 + $0x48] sm:$0xff] }
 0x11f   : > { %788 = vst [vmem:[%s1358_s30] sm:$0xff] %v756_v7  ;;  %804 = vst [vmem:[%s1358_s30 + $0x80] sm:$0xff] %v772_v8  ;;  %v758_v19 = vadd.f32 %v726_v4, %v650_v9  ;;  %v774_v20 = vadd.f32 %v742_v6, %v690_v10  ;;  %v749_v2 = vld [vmem:[%s1343_s28 + $0xc8] sm:$0xff]  ;;  %v734_v6 = vld [vmem:[%s1343_s28 + $0x50] sm:$0xff] }
 0x120   : > { %789 = vst [vmem:[%s1358_s30 + $0x8] sm:$0xff] %v757_v15  ;;  %805 = vst [vmem:[%s1358_s30 + $0x88] sm:$0xff] %v773_v16  ;;  %v759_v21 = vadd.f32 %v727_v12, %v652_v17  ;;  %v775_v22 = vadd.f32 %v743_v14, %v692_v18  ;;  %v750_v8 = vld [vmem:[%s1343_s28 + $0xd0] sm:$0xff]  ;;  %v735_v14 = vld [vmem:[%s1343_s28 + $0x58] sm:$0xff] }
 0x121   : > { %790 = vst [vmem:[%s1358_s30 + $0x10] sm:$0xff] %v758_v19  ;;  %806 = vst [vmem:[%s1358_s30 + $0x90] sm:$0xff] %v774_v20  ;;  %v751_v16 = vld [vmem:[%s1343_s28 + $0xd8] sm:$0xff] }
 0x122   : > { %791 = vst [vmem:[%s1358_s30 + $0x18] sm:$0xff] %v759_v21  ;;  %807 = vst [vmem:[%s1358_s30 + $0x98] sm:$0xff] %v775_v22  ;;  %v655_v23 = vpop.f32.mrb[4].mxu0  ;;  %v695_v25 = vpop.f32.mrb[4].mxu1 }
 0x123   : > { %v656_v27 = vadd.f32 %v655_v23, %v1345_v53  ;;  %v696_v28 = vadd.f32 %v695_v25, %v1345_v53  ;;  %v657_v29 = vpop.f32.mrb[5].mxu0  ;;  %v697_v31 = vpop.f32.mrb[5].mxu1 }
 0x124   : > { %v658_v33 = vadd.f32 %v657_v29, %v1347_v54  ;;  %v698_v34 = vadd.f32 %v697_v31, %v1347_v54  ;;  %v659_v35 = vpop.f32.mrb[6].mxu0  ;;  %v699_v37 = vpop.f32.mrb[6].mxu1 }
 0x125   : > { %v760_v39 = vadd.f32 %v728_v24, %v656_v27  ;;  %v776_v40 = vadd.f32 %v744_v26, %v696_v28  ;;  %v660_v41 = vadd.f32 %v659_v35, %v1345_v53  ;;  %v700_v42 = vadd.f32 %v699_v37, %v1345_v53  ;;  %v661_v43 = vpop.f32.mrb[7].mxu0  ;;  %v701_v45 = vpop.f32.mrb[7].mxu1  ;;  %v736_v26 = vld [vmem:[%s1343_s28 + $0x60] sm:$0xff] }
 0x126   : > { %v761_v47 = vadd.f32 %v729_v30, %v658_v33  ;;  %v777_v48 = vadd.f32 %v745_v32, %v698_v34  ;;  %v662_v49 = vadd.f32 %v661_v43, %v1347_v54  ;;  %v702_v50 = vadd.f32 %v701_v45, %v1347_v54  ;;  %v752_v28 = vld [vmem:[%s1343_s28 + $0xe0] sm:$0xff]  ;;  %v737_v32 = vld [vmem:[%s1343_s28 + $0x68] sm:$0xff] }
 0x127   : > { %792 = vst [vmem:[%s1358_s30 + $0x20] sm:$0xff] %v760_v39  ;;  %808 = vst [vmem:[%s1358_s30 + $0xa0] sm:$0xff] %v776_v40  ;;  %v762_v51 = vadd.f32 %v730_v36, %v660_v41  ;;  %v778_v52 = vadd.f32 %v746_v38, %v700_v42  ;;  %v753_v34 = vld [vmem:[%s1343_s28 + $0xe8] sm:$0xff]  ;;  %v738_v38 = vld [vmem:[%s1343_s28 + $0x70] sm:$0xff] }
 0x128   : > { %793 = vst [vmem:[%s1358_s30 + $0x28] sm:$0xff] %v761_v47  ;;  %809 = vst [vmem:[%s1358_s30 + $0xa8] sm:$0xff] %v777_v48  ;;  %v763_v55 = vadd.f32 %v731_v44, %v662_v49  ;;  %v779_v56 = vadd.f32 %v747_v46, %v702_v50  ;;  %v754_v40 = vld [vmem:[%s1343_s28 + $0xf0] sm:$0xff]  ;;  %v739_v46 = vld [vmem:[%s1343_s28 + $0x78] sm:$0xff] }
 0x129   : > { %794 = vst [vmem:[%s1358_s30 + $0x30] sm:$0xff] %v762_v51  ;;  %810 = vst [vmem:[%s1358_s30 + $0xb0] sm:$0xff] %v778_v52  ;;  %v755_v48 = vld [vmem:[%s1343_s28 + $0xf8] sm:$0xff] }
 0x12a   : > { %795 = vst [vmem:[%s1358_s30 + $0x38] sm:$0xff] %v763_v55  ;;  %811 = vst [vmem:[%s1358_s30 + $0xb8] sm:$0xff] %v779_v56  ;;  %v665_v57 = vpop.f32.mrb[8].mxu0  ;;  %v705_v59 = vpop.f32.mrb[8].mxu1 }
 0x12b   : > { %v666_v61 = vadd.f32 %v665_v57, %v1345_v53  ;;  %v706_v62 = vadd.f32 %v705_v59, %v1345_v53  ;;  %v667_v63 = vpop.f32.mrb[9].mxu0  ;;  %v707_v1 = vpop.f32.mrb[9].mxu1 }
 0x12c   : > { %v668_v3 = vadd.f32 %v667_v63, %v1347_v54  ;;  %v708_v4 = vadd.f32 %v707_v1, %v1347_v54  ;;  %v669_v5 = vpop.f32.mrb[10].mxu0  ;;  %v709_v7 = vpop.f32.mrb[10].mxu1 }
 0x12d   : > { %v764_v9 = vadd.f32 %v732_v58, %v666_v61  ;;  %v780_v10 = vadd.f32 %v748_v60, %v706_v62  ;;  %v670_v11 = vadd.f32 %v669_v5, %v1345_v53  ;;  %v710_v12 = vadd.f32 %v709_v7, %v1345_v53  ;;  %v671_v13 = vpop.f32.mrb[11].mxu0  ;;  %v711_v15 = vpop.f32.mrb[11].mxu1 }
 0x12e   : > { %v765_v17 = vadd.f32 %v733_v0, %v668_v3  ;;  %v781_v18 = vadd.f32 %v749_v2, %v708_v4  ;;  %v672_v19 = vadd.f32 %v671_v13, %v1347_v54  ;;  %v712_v20 = vadd.f32 %v711_v15, %v1347_v54 }
 0x12f   : > { %796 = vst [vmem:[%s1358_s30 + $0x40] sm:$0xff] %v764_v9  ;;  %812 = vst [vmem:[%s1358_s30 + $0xc0] sm:$0xff] %v780_v10  ;;  %v766_v21 = vadd.f32 %v734_v6, %v670_v11  ;;  %v782_v22 = vadd.f32 %v750_v8, %v710_v12 }
 0x130   : > { %797 = vst [vmem:[%s1358_s30 + $0x48] sm:$0xff] %v765_v17  ;;  %813 = vst [vmem:[%s1358_s30 + $0xc8] sm:$0xff] %v781_v18  ;;  %v767_v23 = vadd.f32 %v735_v14, %v672_v19  ;;  %v783_v24 = vadd.f32 %v751_v16, %v712_v20 }
 0x131   : > { %798 = vst [vmem:[%s1358_s30 + $0x50] sm:$0xff] %v766_v21  ;;  %814 = vst [vmem:[%s1358_s30 + $0xd0] sm:$0xff] %v782_v22 }
 0x132   : > { %799 = vst [vmem:[%s1358_s30 + $0x58] sm:$0xff] %v767_v23  ;;  %815 = vst [vmem:[%s1358_s30 + $0xd8] sm:$0xff] %v783_v24  ;;  %v675_v25 = vpop.f32.mrb[12].mxu0  ;;  %v715_v27 = vpop.f32.mrb[12].mxu1 }
 0x133   : > { %v676_v29 = vadd.f32 %v675_v25, %v1345_v53  ;;  %v716_v30 = vadd.f32 %v715_v27, %v1345_v53  ;;  %v677_v31 = vpop.f32.mrb[13].mxu0  ;;  %v717_v33 = vpop.f32.mrb[13].mxu1 }
 0x134   : > { %v678_v35 = vadd.f32 %v677_v31, %v1347_v54  ;;  %v718_v36 = vadd.f32 %v717_v33, %v1347_v54  ;;  %v679_v37 = vpop.f32.mrb[14].mxu0  ;;  %v719_v39 = vpop.f32.mrb[14].mxu1 }
 0x135   : > { %v768_v41 = vadd.f32 %v736_v26, %v676_v29  ;;  %v784_v42 = vadd.f32 %v752_v28, %v716_v30  ;;  %v680_v43 = vadd.f32 %v679_v37, %v1345_v53  ;;  %v720_v44 = vadd.f32 %v719_v39, %v1345_v53  ;;  %v681_v45 = vpop.f32.mrb[15].mxu0  ;;  %v721_v47 = vpop.f32.mrb[15].mxu1 }
 0x136   : > { %v769_v49 = vadd.f32 %v737_v32, %v678_v35  ;;  %v785_v50 = vadd.f32 %v753_v34, %v718_v36  ;;  %v682_v51 = vadd.f32 %v681_v45, %v1347_v54  ;;  %v722_v52 = vadd.f32 %v721_v47, %v1347_v54 }
 0x137   : > { %800 = vst [vmem:[%s1358_s30 + $0x60] sm:$0xff] %v768_v41  ;;  %816 = vst [vmem:[%s1358_s30 + $0xe0] sm:$0xff] %v784_v42  ;;  %v770_v55 = vadd.f32 %v738_v38, %v680_v43  ;;  %v786_v56 = vadd.f32 %v754_v40, %v720_v44 }
 0x138   : > { %801 = vst [vmem:[%s1358_s30 + $0x68] sm:$0xff] %v769_v49  ;;  %817 = vst [vmem:[%s1358_s30 + $0xe8] sm:$0xff] %v785_v50  ;;  %v771_v53 = vadd.f32 %v739_v46, %v682_v51  ;;  %v787_v57 = vadd.f32 %v755_v48, %v722_v52 }
 0x139   : > { %802 = vst [vmem:[%s1358_s30 + $0x70] sm:$0xff] %v770_v55  ;;  %818 = vst [vmem:[%s1358_s30 + $0xf0] sm:$0xff] %v786_v56 }
 0x13a   : > { %803 = vst [vmem:[%s1358_s30 + $0x78] sm:$0xff] %v771_v53  ;;  %819 = vst [vmem:[%s1358_s30 + $0xf8] sm:$0xff] %v787_v57 }
 0x13b PF: > { %s14_s17 = sadd.s32 1, %s1168_s17   ;;  %s1464_s15 = smov %s1164_s16 }
 0x13c   : > { %p11_p5 = scmp.ge.s32.totalorder %s14_s17, 4   ;;  %s1465_s16 = smov %s1467_s18 }
 0x13e   :  { %13 = sbr.rel (!%p11_p5) target bundleno = 2 (0x2), region = 75 }

// kernel: encoder_decoder_forward.18
= control target key start
LH: loop header
LB: loop body
LE: loop exit
PB: predicated region body
PF: predicated region fallthrough
CT: control target
= control target key end

     0   :  { %s729_s12 = smov 0   ;;  %s1187_s0 = inlined_call_operand.vmem [shape: f32[256,256], index: 0, kind: input, shape index: {}]   ;;  %s1188_s1 = inlined_call_operand.vmem [shape: f32[1,256], index: 1, kind: input, shape index: {}]   ;;  %s1189_s2 = inlined_call_operand.vmem [shape: f32[1,256], index: 2, kind: input, shape index: {}]   ;;  %s1190_s3 = inlined_call_operand.vmem [shape: f32[256,256], index: 3, kind: output, shape index: {}]  }
   0x1 LB: > { %s646_s13 = sadd.s32 4294967295, %s707_s12   ;;  %p650_p0 = scmp.ge.s32.totalorder %s707_s12, 1  ;;  %s707_s12 = sphi %s729_s12, %s13_s12  }
   0x2   : > { %p139_p1 = scmp.lt.s32.totalorder %s707_s12, 3 }
   0x4   : > { %p140_p2 = pnand %p650_p0, %p139_p1 }
   0x5   : > { %s651_s14 = sshll.u32 (!%p140_p2), %s646_s13, 4 }
   0x6   : > { %143 = sbr.rel (%p140_p2) target bundleno = 370 (0x172), region = 32  ;;  %p166_p3 = scmp.lt.s32.totalorder (!%p140_p2), %s651_s14, 31 }
   0xd   : > { %s1192_s14 = smov (!%p166_p3, %s651_s14), 31 }
   0xe   : > { %s659_s15 = sshll.u32 %s1192_s14, 4 }
   0xf   : > { %s745_s18 = scalar_lea.vmem %s1187_s0, %s659_s15  ;;  %s1058_s25 = scalar_lea.vmem %s1190_s3, %s659_s15 }
  0x10   : > { %v748_v0 = vld [vmem:[%s745_s18] sm:$0xff]  ;;  %v751_v1 = vld [vmem:[%s745_s18 + $0x8] sm:$0xff]  ;;  %v762_v5 = vld [vmem:[%s745_s18 + $0x10] sm:$0xff] }
  0x11   : > { %v754_v2 = vld [vmem:[%s745_s18 + $0x20] sm:$0xff]  ;;  %v211_v3 = vadd.f32 %v751_v1, %v748_v0  ;;  %v759_v4 = vld [vmem:[%s745_s18 + $0x28] sm:$0xff]  ;;  %v765_v6 = vld [vmem:[%s745_s18 + $0x18] sm:$0xff] }
  0x12   : > { %v217_v7 = vadd.f32 %v759_v4, %v754_v2  ;;  %v770_v8 = vld [vmem:[%s745_s18 + $0x30] sm:$0xff]  ;;  %v773_v9 = vld [vmem:[%s745_s18 + $0x38] sm:$0xff]  ;;  %v214_v10 = vadd.f32 %v765_v6, %v762_v5  ;;  %v780_v12 = vld [vmem:[%s745_s18 + $0x40] sm:$0xff] }
  0x13   : > { %212 = vadd.xlane.f32.xlu0 %v211_v3  ;;  %v220_v11 = vadd.f32 %v773_v9, %v770_v8  ;;  %v783_v13 = vld [vmem:[%s745_s18 + $0x48] sm:$0xff]  ;;  %v786_v14 = vld [vmem:[%s745_s18 + $0x50] sm:$0xff]  ;;  %v789_v15 = vld [vmem:[%s745_s18 + $0x58] sm:$0xff] }
  0x14   : > { %218 = vadd.xlane.f32.xlu1 %v217_v7  ;;  %v223_v16 = vadd.f32 %v783_v13, %v780_v12  ;;  %v226_v17 = vadd.f32 %v789_v15, %v786_v14  ;;  %v796_v18 = vld [vmem:[%s745_s18 + $0x60] sm:$0xff]  ;;  %v799_v19 = vld [vmem:[%s745_s18 + $0x68] sm:$0xff]  ;;  %v802_v20 = vld [vmem:[%s745_s18 + $0x70] sm:$0xff] }
  0x15   : > { %v805_v21 = vld [vmem:[%s745_s18 + $0x78] sm:$0xff]  ;;  %v229_v22 = vadd.f32 %v799_v19, %v796_v18  ;;  %v812_v24 = vld [vmem:[%s745_s18 + $0x80] sm:$0xff]  ;;  %v815_v25 = vld [vmem:[%s745_s18 + $0x88] sm:$0xff] }
  0x16   : > { %v232_v23 = vadd.f32 %v805_v21, %v802_v20  ;;  %v818_v26 = vld [vmem:[%s745_s18 + $0x90] sm:$0xff]  ;;  %v821_v27 = vld [vmem:[%s745_s18 + $0x98] sm:$0xff]  ;;  %v235_v28 = vadd.f32 %v815_v25, %v812_v24  ;;  %v828_v30 = vld [vmem:[%s745_s18 + $0xa0] sm:$0xff] }
  0x17   : > { %215 = vadd.xlane.f32.xlu0 %v214_v10  ;;  %v238_v29 = vadd.f32 %v821_v27, %v818_v26  ;;  %v831_v31 = vld [vmem:[%s745_s18 + $0xa8] sm:$0xff]  ;;  %v834_v32 = vld [vmem:[%s745_s18 + $0xb0] sm:$0xff]  ;;  %v837_v33 = vld [vmem:[%s745_s18 + $0xb8] sm:$0xff] }
  0x18   : > { %221 = vadd.xlane.f32.xlu1 %v220_v11  ;;  %v241_v34 = vadd.f32 %v831_v31, %v828_v30  ;;  %v244_v35 = vadd.f32 %v837_v33, %v834_v32  ;;  %v844_v36 = vld [vmem:[%s745_s18 + $0xc0] sm:$0xff]  ;;  %v847_v37 = vld [vmem:[%s745_s18 + $0xc8] sm:$0xff]  ;;  %v850_v38 = vld [vmem:[%s745_s18 + $0xd0] sm:$0xff] }
  0x19   : > { %v853_v39 = vld [vmem:[%s745_s18 + $0xd8] sm:$0xff]  ;;  %v247_v40 = vadd.f32 %v847_v37, %v844_v36  ;;  %v860_v42 = vld [vmem:[%s745_s18 + $0xe0] sm:$0xff]  ;;  %v863_v43 = vld [vmem:[%s745_s18 + $0xe8] sm:$0xff] }
  0x1a   : > { %v250_v41 = vadd.f32 %v853_v39, %v850_v38  ;;  %v866_v44 = vld [vmem:[%s745_s18 + $0xf0] sm:$0xff]  ;;  %v869_v45 = vld [vmem:[%s745_s18 + $0xf8] sm:$0xff]  ;;  %v253_v46 = vadd.f32 %v863_v43, %v860_v42 }
  0x1b   : > { %224 = vadd.xlane.f32.xlu0 %v223_v16  ;;  %v256_v47 = vadd.f32 %v869_v45, %v866_v44 }
  0x1c   : > { %227 = vadd.xlane.f32.xlu1 %v226_v17 }
  0x1f   : > { %230 = vadd.xlane.f32.xlu0 %v229_v22 }
  0x20   : > { %233 = vadd.xlane.f32.xlu1 %v232_v23 }
  0x23   : > { %236 = vadd.xlane.f32.xlu0 %v235_v28 }
  0x24   : > { %239 = vadd.xlane.f32.xlu1 %v238_v29 }
  0x27   : > { %242 = vadd.xlane.f32.xlu0 %v241_v34 }
  0x28   : > { %245 = vadd.xlane.f32.xlu1 %v244_v35 }
  0x2b   : > { %248 = vadd.xlane.f32.xlu0 %v247_v40 }
  0x2c   : > { %251 = vadd.xlane.f32.xlu1 %v250_v41 }
  0x2f   : > { %254 = vadd.xlane.f32.xlu0 %v253_v46 }
  0x30   : > { %257 = vadd.xlane.f32.xlu1 %v256_v47 }
  0xa0   : > { %v213_v48 = vpop.xlane.xlu0 %212 }
  0xa1   : > { %v260_v49 = vmul.f32 0.00390625, %v213_v48  ;;  %v219_v50 = vpop.xlane.xlu1 %218 }
  0xa2   : > { %v262_v51 = vmul.f32 0.00390625, %v219_v50 }
  0xa3   : > { %v876_v52 = vsub.f32 %v748_v0, %v260_v49  ;;  %v879_v53 = vsub.f32 %v751_v1, %v260_v49 }
  0xa4   : > { %v882_v54 = vsub.f32 %v754_v2, %v262_v51  ;;  %v885_v55 = vsub.f32 %v759_v4, %v262_v51  ;;  %v216_v56 = vpop.xlane.xlu0 %215 }
  0xa5   : > { %v261_v57 = vmul.f32 0.00390625, %v216_v56  ;;  %v222_v58 = vpop.xlane.xlu1 %221  ;;  %v308_v59 = vmul.f32 %v876_v52, %v876_v52  ;;  %v309_v60 = vmul.f32 %v879_v53, %v879_v53 }
  0xa6   : > { %v263_v61 = vmul.f32 0.00390625, %v222_v58  ;;  %v312_v62 = vmul.f32 %v882_v54, %v882_v54  ;;  %v313_v63 = vmul.f32 %v885_v55, %v885_v55 }
  0xa7   : > { %v896_v0 = vsub.f32 %v762_v5, %v261_v57  ;;  %v899_v1 = vsub.f32 %v765_v6, %v261_v57  ;;  %v340_v2 = vadd.f32 %v309_v60, %v308_v59 }
  0xa8   : > { %v902_v3 = vsub.f32 %v770_v8, %v263_v61  ;;  %v905_v4 = vsub.f32 %v773_v9, %v263_v61  ;;  %v225_v7 = vpop.xlane.xlu0 %224  ;;  %v346_v16 = vadd.f32 %v313_v63, %v312_v62 }
  0xa9   : > { %v264_v10 = vmul.f32 0.00390625, %v225_v7  ;;  %341 = vadd.xlane.f32.xlu0 %v340_v2  ;;  %v228_v11 = vpop.xlane.xlu1 %227  ;;  %v310_v17 = vmul.f32 %v896_v0, %v896_v0  ;;  %v311_v5 = vmul.f32 %v899_v1, %v899_v1 }
  0xaa   : > { %v265_v6 = vmul.f32 0.00390625, %v228_v11  ;;  %v314_v22 = vmul.f32 %v902_v3, %v902_v3  ;;  %v315_v8 = vmul.f32 %v905_v4, %v905_v4 }
  0xab   : > { %v916_v9 = vsub.f32 %v780_v12, %v264_v10  ;;  %v919_v23 = vsub.f32 %v783_v13, %v264_v10  ;;  %v343_v28 = vadd.f32 %v311_v5, %v310_v17 }
  0xac   : > { %v922_v29 = vsub.f32 %v786_v14, %v265_v6  ;;  %v925_v34 = vsub.f32 %v789_v15, %v265_v6  ;;  %v231_v35 = vpop.xlane.xlu0 %230  ;;  %v349_v46 = vadd.f32 %v315_v8, %v314_v22 }
  0xad   : > { %v266_v40 = vmul.f32 0.00390625, %v231_v35  ;;  %347 = vadd.xlane.f32.xlu0 %v346_v16  ;;  %344 = vadd.xlane.f32.xlu1 %v343_v28  ;;  %v234_v41 = vpop.xlane.xlu1 %233  ;;  %v316_v12 = vmul.f32 %v916_v9, %v916_v9  ;;  %v317_v13 = vmul.f32 %v919_v23, %v919_v23 }
  0xae   : > { %v267_v47 = vmul.f32 0.00390625, %v234_v41  ;;  %v318_v14 = vmul.f32 %v922_v29, %v922_v29  ;;  %v319_v15 = vmul.f32 %v925_v34, %v925_v34 }
  0xaf   : > { %v936_v48 = vsub.f32 %v796_v18, %v266_v40  ;;  %v939_v49 = vsub.f32 %v799_v19, %v266_v40  ;;  %v352_v50 = vadd.f32 %v317_v13, %v316_v12 }
  0xb0   : > { %v942_v51 = vsub.f32 %v802_v20, %v267_v47  ;;  %v945_v56 = vsub.f32 %v805_v21, %v267_v47  ;;  %v237_v57 = vpop.xlane.xlu0 %236  ;;  %v355_v60 = vadd.f32 %v319_v15, %v318_v14 }
  0xb1   : > { %v268_v58 = vmul.f32 0.00390625, %v237_v57  ;;  %350 = vadd.xlane.f32.xlu1 %v349_v46  ;;  %353 = vadd.xlane.f32.xlu0 %v352_v50  ;;  %v240_v59 = vpop.xlane.xlu1 %239  ;;  %v320_v18 = vmul.f32 %v936_v48, %v936_v48  ;;  %v321_v19 = vmul.f32 %v939_v49, %v939_v49 }
  0xb2   : > { %v269_v61 = vmul.f32 0.00390625, %v240_v59  ;;  %v322_v20 = vmul.f32 %v942_v51, %v942_v51  ;;  %v323_v21 = vmul.f32 %v945_v56, %v945_v56 }
  0xb3   : > { %v956_v62 = vsub.f32 %v812_v24, %v268_v58  ;;  %v959_v63 = vsub.f32 %v815_v25, %v268_v58  ;;  %v358_v2 = vadd.f32 %v321_v19, %v320_v18 }
  0xb4   : > { %v962_v7 = vsub.f32 %v818_v26, %v269_v61  ;;  %v965_v10 = vsub.f32 %v821_v27, %v269_v61  ;;  %v243_v11 = vpop.xlane.xlu0 %242  ;;  %v361_v5 = vadd.f32 %v323_v21, %v322_v20 }
  0xb5   : > { %v270_v16 = vmul.f32 0.00390625, %v243_v11  ;;  %356 = vadd.xlane.f32.xlu1 %v355_v60  ;;  %359 = vadd.xlane.f32.xlu0 %v358_v2  ;;  %v246_v17 = vpop.xlane.xlu1 %245  ;;  %v324_v24 = vmul.f32 %v956_v62, %v956_v62  ;;  %v325_v25 = vmul.f32 %v959_v63, %v959_v63 }
  0xb6   : > { %v271_v6 = vmul.f32 0.00390625, %v246_v17  ;;  %v326_v26 = vmul.f32 %v962_v7, %v962_v7  ;;  %v327_v27 = vmul.f32 %v965_v10, %v965_v10 }
  0xb7   : > { %v976_v22 = vsub.f32 %v828_v30, %v270_v16  ;;  %v979_v8 = vsub.f32 %v831_v31, %v270_v16  ;;  %v364_v28 = vadd.f32 %v325_v25, %v324_v24 }
  0xb8   : > { %v982_v35 = vsub.f32 %v834_v32, %v271_v6  ;;  %v985_v40 = vsub.f32 %v837_v33, %v271_v6  ;;  %v249_v41 = vpop.xlane.xlu0 %248  ;;  %v367_v13 = vadd.f32 %v327_v27, %v326_v26  ;;  %v470_v26 = vlaneseq }
  0xb9   : > { %v272_v46 = vmul.f32 0.00390625, %v249_v41  ;;  %362 = vadd.xlane.f32.xlu1 %v361_v5  ;;  %365 = vadd.xlane.f32.xlu0 %v364_v28  ;;  %v252_v12 = vpop.xlane.xlu1 %251  ;;  %v328_v30 = vmul.f32 %v976_v22, %v976_v22  ;;  %v329_v31 = vmul.f32 %v979_v8, %v979_v8 }
  0xba   : > { %v273_v47 = vmul.f32 0.00390625, %v252_v12  ;;  %v330_v32 = vmul.f32 %v982_v35, %v982_v35  ;;  %v331_v33 = vmul.f32 %v985_v40, %v985_v40 }
  0xbb   : > { %v996_v14 = vsub.f32 %v844_v36, %v272_v46  ;;  %v999_v15 = vsub.f32 %v847_v37, %v272_v46  ;;  %v370_v50 = vadd.f32 %v329_v31, %v328_v30 }
  0xbc   : > { %v1002_v57 = vsub.f32 %v850_v38, %v273_v47  ;;  %v1005_v58 = vsub.f32 %v853_v39, %v273_v47  ;;  %v255_v59 = vpop.xlane.xlu0 %254  ;;  %v373_v19 = vadd.f32 %v331_v33, %v330_v32 }
  0xbd   : > { %v274_v60 = vmul.f32 0.00390625, %v255_v59  ;;  %368 = vadd.xlane.f32.xlu1 %v367_v13  ;;  %371 = vadd.xlane.f32.xlu0 %v370_v50  ;;  %v258_v18 = vpop.xlane.xlu1 %257  ;;  %v332_v36 = vmul.f32 %v996_v14, %v996_v14  ;;  %v333_v37 = vmul.f32 %v999_v15, %v999_v15  ;;  %v471_v13 = vshrl.u32 %v470_v26, 7 }
  0xbe   : > { %v275_v61 = vmul.f32 0.00390625, %v258_v18  ;;  %v334_v38 = vmul.f32 %v1002_v57, %v1002_v57  ;;  %v335_v39 = vmul.f32 %v1005_v58, %v1005_v58  ;;  %v468_v18 = vld [vmem:[%s1188_s1] sm:$0x3] }
  0xbf   : > { %v1016_v20 = vsub.f32 %v860_v42, %v274_v60  ;;  %v1019_v21 = vsub.f32 %v863_v43, %v274_v60  ;;  %v376_v2 = vadd.f32 %v333_v37, %v332_v36  ;;  %v472_v59 = vsub.s32 0, %v471_v13 }
  0xc0   : > { %v1022_v11 = vsub.f32 %v866_v44, %v275_v61  ;;  %v1025_v16 = vsub.f32 %v869_v45, %v275_v61  ;;  %v379_v17 = vadd.f32 %v335_v39, %v334_v38  ;;  %v476_v60 = vsub.s32 1, %v471_v13  ;;  %v512_v38 = vld [vmem:[%s1189_s2] sm:$0x3] }
  0xc1   : > { %374 = vadd.xlane.f32.xlu1 %v373_v19  ;;  %377 = vadd.xlane.f32.xlu0 %v376_v2  ;;  %v336_v5 = vmul.f32 %v1016_v20, %v1016_v20  ;;  %v337_v42 = vmul.f32 %v1019_v21, %v1019_v21 }
  0xc2   : > { %v338_v43 = vmul.f32 %v1022_v11, %v1022_v11  ;;  %v339_v24 = vmul.f32 %v1025_v16, %v1025_v16 }
  0xc3   : > { %v382_v44 = vadd.f32 %v337_v42, %v336_v5  ;;  %v1043_v5 = vrot.slane %v468_v18, %v476_v60 }
  0xc4   : > { %v385_v45 = vadd.f32 %v339_v24, %v338_v43 }
  0xc5   : > { %380 = vadd.xlane.f32.xlu1 %v379_v17  ;;  %383 = vadd.xlane.f32.xlu0 %v382_v44  ;;  %v1041_v17 = vrot.slane %v468_v18, %v472_v59  ;;  %v1045_v44 = vrot.slane %v512_v38, %v472_v59 }
  0xc9   : > { %386 = vadd.xlane.f32.xlu1 %v385_v45  ;;  %v1047_v45 = vrot.slane %v512_v38, %v476_v60 }
 0x136   : > { %v342_v25 = vpop.xlane.xlu0 %341 }
 0x137   : > { %v388_v6 = vmul.f32 0.00390625, %v342_v25 }
 0x139   : > { %v404_v27 = vadd.f32 1e-05, %v388_v6 }
 0x13a   : > { %v345_v28 = vpop.xlane.xlu1 %344  ;;  %v348_v41 = vpop.xlane.xlu0 %347 }
 0x13b   : > { %669 = vrsqrt.f32 %v404_v27  ;;  %v389_v46 = vmul.f32 0.00390625, %v345_v28  ;;  %v390_v12 = vmul.f32 0.00390625, %v348_v41 }
 0x13d   : > { %v405_v30 = vadd.f32 1e-05, %v389_v46  ;;  %v406_v31 = vadd.f32 1e-05, %v390_v12 }
 0x13e   : > { %v351_v47 = vpop.xlane.xlu1 %350  ;;  %v354_v32 = vpop.xlane.xlu0 %353 }
 0x13f   : > { %671 = vrsqrt.f32 %v405_v30  ;;  %v391_v33 = vmul.f32 0.00390625, %v351_v47  ;;  %v392_v50 = vmul.f32 0.00390625, %v354_v32 }
 0x140   : > { %673 = vrsqrt.f32 %v406_v31 }
 0x141   : > { %v407_v19 = vadd.f32 1e-05, %v391_v33  ;;  %v408_v36 = vadd.f32 1e-05, %v392_v50 }
 0x142   : > { %v357_v37 = vpop.xlane.xlu1 %356  ;;  %v360_v61 = vpop.xlane.xlu0 %359 }
 0x143   : > { %675 = vrsqrt.f32 %v407_v19  ;;  %v393_v39 = vmul.f32 0.00390625, %v357_v37  ;;  %v394_v2 = vmul.f32 0.00390625, %v360_v61 }
 0x144   : > { %677 = vrsqrt.f32 %v408_v36 }
 0x145   : > { %v670_v42 = vpop.eup %669  ;;  %v409_v43 = vadd.f32 1e-05, %v393_v39  ;;  %v410_v24 = vadd.f32 1e-05, %v394_v2 }
 0x146   : > { %v436_v25 = vmul.f32 %v670_v42, %v876_v52  ;;  %v437_v6 = vmul.f32 %v670_v42, %v879_v53  ;;  %v363_v26 = vpop.xlane.xlu1 %362  ;;  %v366_v27 = vpop.xlane.xlu0 %365 }
 0x147   : > { %679 = vrsqrt.f32 %v409_v43  ;;  %v395_v28 = vmul.f32 0.00390625, %v363_v26  ;;  %v396_v41 = vmul.f32 0.00390625, %v366_v27 }
 0x148   : > { %v480_v46 = vmul.f32 %v1041_v17, %v436_v25  ;;  %v481_v12 = vmul.f32 %v1043_v5, %v437_v6  ;;  %681 = vrsqrt.f32 %v410_v24 }
 0x149   : > { %v672_v13 = vpop.eup %671  ;;  %v411_v52 = vadd.f32 1e-05, %v395_v28  ;;  %v412_v53 = vadd.f32 1e-05, %v396_v41 }
 0x14a   : > { %v674_v30 = vpop.eup %673  ;;  %v524_v31 = vadd.f32 %v1045_v44, %v480_v46  ;;  %v525_v47 = vadd.f32 %v1047_v45, %v481_v12  ;;  %v438_v32 = vmul.f32 %v672_v13, %v896_v0  ;;  %v439_v33 = vmul.f32 %v672_v13, %v899_v1  ;;  %v369_v50 = vpop.xlane.xlu1 %368 }
 0x14b   : > { %v372_v59 = vpop.xlane.xlu0 %371  ;;  %v440_v60 = vmul.f32 %v674_v30, %v882_v54  ;;  %v441_v18 = vmul.f32 %v674_v30, %v885_v55  ;;  %683 = vrsqrt.f32 %v411_v52  ;;  %v397_v19 = vmul.f32 0.00390625, %v369_v50 }
 0x14c   : > { %556 = vst [vmem:[%s1058_s25] sm:$0xff] %v524_v31  ;;  %557 = vst [vmem:[%s1058_s25 + $0x8] sm:$0xff] %v525_v47  ;;  %v482_v36 = vmul.f32 %v1041_v17, %v438_v32  ;;  %v483_v37 = vmul.f32 %v1043_v5, %v439_v33  ;;  %685 = vrsqrt.f32 %v412_v53  ;;  %v398_v61 = vmul.f32 0.00390625, %v372_v59 }
 0x14d   : > { %v676_v0 = vpop.eup %675  ;;  %v484_v1 = vmul.f32 %v1041_v17, %v440_v60  ;;  %v485_v38 = vmul.f32 %v1043_v5, %v441_v18  ;;  %v413_v54 = vadd.f32 1e-05, %v397_v19 }
 0x14e   : > { %v678_v39 = vpop.eup %677  ;;  %v526_v55 = vadd.f32 %v1045_v44, %v482_v36  ;;  %v527_v2 = vadd.f32 %v1047_v45, %v483_v37  ;;  %v442_v42 = vmul.f32 %v676_v0, %v902_v3  ;;  %v443_v43 = vmul.f32 %v676_v0, %v905_v4  ;;  %v375_v24 = vpop.xlane.xlu1 %374 }
 0x14f   : > { %v378_v25 = vpop.xlane.xlu0 %377  ;;  %v528_v6 = vadd.f32 %v1045_v44, %v484_v1  ;;  %v529_v26 = vadd.f32 %v1047_v45, %v485_v38  ;;  %v444_v27 = vmul.f32 %v678_v39, %v916_v9  ;;  %v445_v28 = vmul.f32 %v678_v39, %v919_v23 }
 0x150   : > { %558 = vst [vmem:[%s1058_s25 + $0x10] sm:$0xff] %v526_v55  ;;  %559 = vst [vmem:[%s1058_s25 + $0x18] sm:$0xff] %v527_v2  ;;  %v486_v41 = vmul.f32 %v1041_v17, %v442_v42  ;;  %v487_v46 = vmul.f32 %v1043_v5, %v443_v43  ;;  %687 = vrsqrt.f32 %v413_v54  ;;  %v414_v3 = vadd.f32 1e-05, %v398_v61 }
 0x151   : > { %v680_v12 = vpop.eup %679  ;;  %560 = vst [vmem:[%s1058_s25 + $0x20] sm:$0xff] %v528_v6  ;;  %561 = vst [vmem:[%s1058_s25 + $0x28] sm:$0xff] %v529_v26  ;;  %v488_v4 = vmul.f32 %v1041_v17, %v444_v27  ;;  %v489_v13 = vmul.f32 %v1043_v5, %v445_v28  ;;  %v399_v9 = vmul.f32 0.00390625, %v375_v24  ;;  %v400_v52 = vmul.f32 0.00390625, %v378_v25 }
 0x152   : > { %v682_v23 = vpop.eup %681  ;;  %v530_v53 = vadd.f32 %v1045_v44, %v486_v41  ;;  %v531_v30 = vadd.f32 %v1047_v45, %v487_v46  ;;  %v446_v31 = vmul.f32 %v680_v12, %v922_v29  ;;  %v447_v47 = vmul.f32 %v680_v12, %v925_v34  ;;  %v381_v32 = vpop.xlane.xlu1 %380 }
 0x153   : > { %v532_v33 = vadd.f32 %v1045_v44, %v488_v4  ;;  %v533_v50 = vadd.f32 %v1047_v45, %v489_v13  ;;  %v448_v59 = vmul.f32 %v682_v23, %v936_v48  ;;  %v449_v60 = vmul.f32 %v682_v23, %v939_v49  ;;  %v384_v39 = vpop.xlane.xlu0 %383 }
 0x154   : > { %562 = vst [vmem:[%s1058_s25 + $0x30] sm:$0xff] %v530_v53  ;;  %563 = vst [vmem:[%s1058_s25 + $0x38] sm:$0xff] %v531_v30  ;;  %v490_v18 = vmul.f32 %v1041_v17, %v446_v31  ;;  %v491_v19 = vmul.f32 %v1043_v5, %v447_v47  ;;  %689 = vrsqrt.f32 %v414_v3  ;;  %v415_v36 = vadd.f32 1e-05, %v399_v9 }
 0x155   : > { %v684_v29 = vpop.eup %683  ;;  %564 = vst [vmem:[%s1058_s25 + $0x40] sm:$0xff] %v532_v33  ;;  %565 = vst [vmem:[%s1058_s25 + $0x48] sm:$0xff] %v533_v50  ;;  %v492_v34 = vmul.f32 %v1041_v17, %v448_v59  ;;  %v493_v37 = vmul.f32 %v1043_v5, %v449_v60  ;;  %v416_v48 = vadd.f32 1e-05, %v400_v52  ;;  %v401_v61 = vmul.f32 0.00390625, %v381_v32 }
 0x156   : > { %v686_v49 = vpop.eup %685  ;;  %v534_v0 = vadd.f32 %v1045_v44, %v490_v18  ;;  %v535_v1 = vadd.f32 %v1047_v45, %v491_v19  ;;  %v450_v38 = vmul.f32 %v684_v29, %v942_v51  ;;  %v451_v54 = vmul.f32 %v684_v29, %v945_v56  ;;  %v387_v24 = vpop.xlane.xlu1 %386 }
 0x157   : > { %v536_v55 = vadd.f32 %v1045_v44, %v492_v34  ;;  %v537_v2 = vadd.f32 %v1047_v45, %v493_v37  ;;  %v452_v42 = vmul.f32 %v686_v49, %v956_v62  ;;  %v453_v43 = vmul.f32 %v686_v49, %v959_v63 }
 0x158   : > { %566 = vst [vmem:[%s1058_s25 + $0x50] sm:$0xff] %v534_v0  ;;  %567 = vst [vmem:[%s1058_s25 + $0x58] sm:$0xff] %v535_v1  ;;  %v494_v25 = vmul.f32 %v1041_v17, %v450_v38  ;;  %v495_v6 = vmul.f32 %v1043_v5, %v451_v54  ;;  %691 = vrsqrt.f32 %v415_v36  ;;  %v417_v51 = vadd.f32 1e-05, %v401_v61 }
 0x159   : > { %568 = vst [vmem:[%s1058_s25 + $0x60] sm:$0xff] %v536_v55  ;;  %569 = vst [vmem:[%s1058_s25 + $0x68] sm:$0xff] %v537_v2  ;;  %v496_v56 = vmul.f32 %v1041_v17, %v452_v42  ;;  %v497_v26 = vmul.f32 %v1043_v5, %v453_v43  ;;  %693 = vrsqrt.f32 %v416_v48  ;;  %v402_v62 = vmul.f32 0.00390625, %v384_v39 }
 0x15a   : > { %v688_v63 = vpop.eup %687  ;;  %v538_v27 = vadd.f32 %v1045_v44, %v494_v25  ;;  %v539_v28 = vadd.f32 %v1047_v45, %v495_v6  ;;  %695 = vrsqrt.f32 %v417_v51  ;;  %v403_v41 = vmul.f32 0.00390625, %v387_v24 }
 0x15b   : > { %v540_v46 = vadd.f32 %v1045_v44, %v496_v56  ;;  %v541_v3 = vadd.f32 %v1047_v45, %v497_v26  ;;  %v454_v12 = vmul.f32 %v688_v63, %v962_v7  ;;  %v455_v4 = vmul.f32 %v688_v63, %v965_v10 }
 0x15c   : > { %570 = vst [vmem:[%s1058_s25 + $0x70] sm:$0xff] %v538_v27  ;;  %571 = vst [vmem:[%s1058_s25 + $0x78] sm:$0xff] %v539_v28  ;;  %v418_v13 = vadd.f32 1e-05, %v402_v62  ;;  %v419_v9 = vadd.f32 1e-05, %v403_v41 }
 0x15d   : > { %572 = vst [vmem:[%s1058_s25 + $0x80] sm:$0xff] %v540_v46  ;;  %573 = vst [vmem:[%s1058_s25 + $0x88] sm:$0xff] %v541_v3  ;;  %v498_v52 = vmul.f32 %v1041_v17, %v454_v12  ;;  %v499_v23 = vmul.f32 %v1043_v5, %v455_v4 }
 0x15e   : > { %v690_v53 = vpop.eup %689  ;;  %697 = vrsqrt.f32 %v418_v13 }
 0x15f   : > { %v542_v30 = vadd.f32 %v1045_v44, %v498_v52  ;;  %v543_v7 = vadd.f32 %v1047_v45, %v499_v23  ;;  %v456_v10 = vmul.f32 %v690_v53, %v976_v22  ;;  %v457_v31 = vmul.f32 %v690_v53, %v979_v8 }
 0x160   : > { %699 = vrsqrt.f32 %v419_v9 }
 0x161   : > { %574 = vst [vmem:[%s1058_s25 + $0x90] sm:$0xff] %v542_v30  ;;  %575 = vst [vmem:[%s1058_s25 + $0x98] sm:$0xff] %v543_v7  ;;  %v500_v47 = vmul.f32 %v1041_v17, %v456_v10  ;;  %v501_v32 = vmul.f32 %v1043_v5, %v457_v31 }
 0x162   : > { %v692_v33 = vpop.eup %691 }
 0x163   : > { %v694_v50 = vpop.eup %693  ;;  %v544_v59 = vadd.f32 %v1045_v44, %v500_v47  ;;  %v545_v60 = vadd.f32 %v1047_v45, %v501_v32  ;;  %v458_v18 = vmul.f32 %v692_v33, %v982_v35  ;;  %v459_v22 = vmul.f32 %v692_v33, %v985_v40 }
 0x164   : > { %v696_v19 = vpop.eup %695  ;;  %v460_v8 = vmul.f32 %v694_v50, %v996_v14  ;;  %v461_v36 = vmul.f32 %v694_v50, %v999_v15 }
 0x165   : > { %576 = vst [vmem:[%s1058_s25 + $0xa0] sm:$0xff] %v544_v59  ;;  %577 = vst [vmem:[%s1058_s25 + $0xa8] sm:$0xff] %v545_v60  ;;  %v502_v29 = vmul.f32 %v1041_v17, %v458_v18  ;;  %v503_v34 = vmul.f32 %v1043_v5, %v459_v22  ;;  %v462_v37 = vmul.f32 %v696_v19, %v1002_v57 }
 0x166   : > { %v463_v48 = vmul.f32 %v696_v19, %v1005_v58  ;;  %v504_v35 = vmul.f32 %v1041_v17, %v460_v8  ;;  %v505_v40 = vmul.f32 %v1043_v5, %v461_v36 }
 0x167   : > { %v546_v14 = vadd.f32 %v1045_v44, %v502_v29  ;;  %v547_v15 = vadd.f32 %v1047_v45, %v503_v34  ;;  %v506_v61 = vmul.f32 %v1041_v17, %v462_v37 }
 0x168   : > { %v507_v49 = vmul.f32 %v1043_v5, %v463_v48  ;;  %v698_v0 = vpop.eup %697  ;;  %v548_v57 = vadd.f32 %v1045_v44, %v504_v35  ;;  %v549_v58 = vadd.f32 %v1047_v45, %v505_v40 }
 0x169   : > { %578 = vst [vmem:[%s1058_s25 + $0xb0] sm:$0xff] %v546_v14  ;;  %579 = vst [vmem:[%s1058_s25 + $0xb8] sm:$0xff] %v547_v15  ;;  %v550_v1 = vadd.f32 %v1045_v44, %v506_v61  ;;  %v464_v54 = vmul.f32 %v698_v0, %v1016_v20  ;;  %v465_v39 = vmul.f32 %v698_v0, %v1019_v21 }
 0x16a   : > { %v551_v38 = vadd.f32 %v1047_v45, %v507_v49  ;;  %v700_v55 = vpop.eup %699  ;;  %580 = vst [vmem:[%s1058_s25 + $0xc0] sm:$0xff] %v548_v57  ;;  %581 = vst [vmem:[%s1058_s25 + $0xc8] sm:$0xff] %v549_v58 }
 0x16b   : > { %582 = vst [vmem:[%s1058_s25 + $0xd0] sm:$0xff] %v550_v1  ;;  %v508_v2 = vmul.f32 %v1041_v17, %v464_v54  ;;  %v509_v42 = vmul.f32 %v1043_v5, %v465_v39  ;;  %v466_v43 = vmul.f32 %v700_v55, %v1022_v11  ;;  %v467_v24 = vmul.f32 %v700_v55, %v1025_v16 }
 0x16c   : > { %583 = vst [vmem:[%s1058_s25 + $0xd8] sm:$0xff] %v551_v38 }
 0x16d   : > { %v552_v20 = vadd.f32 %v1045_v44, %v508_v2  ;;  %v553_v25 = vadd.f32 %v1047_v45, %v509_v42  ;;  %v510_v21 = vmul.f32 %v1041_v17, %v466_v43  ;;  %v511_v6 = vmul.f32 %v1043_v5, %v467_v24 }
 0x16f   : > { %584 = vst [vmem:[%s1058_s25 + $0xe0] sm:$0xff] %v552_v20  ;;  %585 = vst [vmem:[%s1058_s25 + $0xe8] sm:$0xff] %v553_v25  ;;  %v554_v51 = vadd.f32 %v1045_v44, %v510_v21  ;;  %v555_v56 = vadd.f32 %v1047_v45, %v511_v6 }
 0x171   : > { %586 = vst [vmem:[%s1058_s25 + $0xf0] sm:$0xff] %v554_v51  ;;  %587 = vst [vmem:[%s1058_s25 + $0xf8] sm:$0xff] %v555_v56 }
 0x172 PF: > { %s13_s12 = sadd.s32 1, %s707_s12  }
 0x173   : > { %p10_p4 = scmp.ge.s32.totalorder %s13_s12, 4  }
 0x175   :  { %12 = sbr.rel (!%p10_p4) target bundleno = 1 (0x1), region = 62 }

// kernel: encoder_decoder_forward.19
= control target key start
LH: loop header
LB: loop body
LE: loop exit
PB: predicated region body
PF: predicated region fallthrough
CT: control target
= control target key end

     0   :  { %7 = vsyncpa [#allocation4], 0  ;;  %s2213_s0 = inlined_call_operand.vmem [shape: bf16[256,256], index: 0, kind: input, shape index: {}]   ;;  %s2214_s1 = inlined_call_operand.vmem [shape: bf16[512,256], index: 1, kind: input, shape index: {}]   ;;  %s2215_s2 = inlined_call_operand.hbm [shape: f32[256,512], index: 2, kind: output, shape index: {}]  }
   0x1   :  { %9 = vsyncpa [#allocation4 + $0x1], 0  ;;  %s1818_s9 = smov 0   ;;  %s1820_s10 = smov 0  }
   0x2   :  { %s1822_s11 = smov 0   ;;  %s1824_s12 = smov 0  }
   0x3   :  { %s1826_s13 = smov 0   ;;  %s1828_s14 = smov 0  }
   0x4 LB: > { %s1444_s15 = sadd.s32 4294967295, %s1798_s14   ;;  %s1445_s16 = sadd.s32 4294967294, %s1798_s14   ;;  %s1798_s14 = sphi %s1828_s14, %s15_s14   ;;  %s1794_s13 = sphi %s1826_s13, %s2222_s13   ;;  %s1790_s12 = sphi %s1824_s12, %s2221_s12   ;;  %s1786_s11 = sphi %s1822_s11, %s2220_s11   ;;  %s1782_s10 = sphi %s1820_s10, %s2219_s10   ;;  %s1778_s9 = sphi %s1818_s9, %s2218_s9  }
   0x5   : > { %s34_s17 = sadd.s32 1, %s1794_s13  ;;  %s99_s18 = sadd.s32 1, %s1786_s11 }
   0x6   : > { %p36_p0 = scmp.ge.s32.totalorder %s34_s17, 2  ;;  %p109_p1 = scmp.ne.s32.totalorder %s1786_s11, %s1782_s10 }
   0x7   : > { %p110_p2 = scmp.eq.s32.totalorder %s1444_s15, 1  ;;  %p115_p3 = scmp.ne.s32.totalorder %s1782_s10, %s1778_s9 }
   0x8   : > { %s2224_s17 = smov (%p36_p0, %s34_s17), 0  ;;  %p116_p5 = scmp.eq.s32.totalorder %s1445_s16, 1 }
   0x9   : > { %p1858_p4 = por %p110_p2, %p109_p1  ;;  %s94_s20 = ssub.s32 %s1794_s13, %s2224_s17 }
   0xa   : > { %p1449_p6 = scmp.ge.s32.totalorder %s1798_s14, 1  ;;  %p97_p7 = scmp.eq.s32.totalorder %s94_s20, 0 }
   0xb   : > { %p1865_p8 = por %p116_p5, %p115_p3  ;;  %p164_p9 = scmp.lt.s32.totalorder %s1798_s14, 3 }
   0xc   : > { %s1871_s22 = scalar_select %p97_p7, %s1786_s11, %s99_s18  }
   0xd   : > { %p165_p10 = pnand %p1449_p6, %p164_p9 }
   0xe   : > { %v1600_v0 = vld [vmem:[%s2214_s1 + $0x4] ss:$8 sps:$4 sm:$0xff] (!%p165_p10)   ;;  %v1604_v2 = vld [vmem:[%s2214_s1] ss:$8 sps:$4 sm:$0xff] (!%p165_p10)   ;;  %v1606_v4 = vld [vmem:[%s2214_s1 + $0x14] ss:$8 sps:$4 sm:$0xff] (!%p165_p10)  }
   0xf   : > { %168 = sbr.rel (%p165_p10) target bundleno = 430 (0x1ae), region = 28  ;;  %v1602_v1 = vld [vmem:[%s2214_s1 + $0x104] ss:$8 sps:$4 sm:$0xff] (!%p165_p10)   ;;  %839 = vmatprep.subr.bf16.mxu0 (!%p165_p10), %v1600_v0  ;;  %v1605_v3 = vld [vmem:[%s2214_s1 + $0x100] ss:$8 sps:$4 sm:$0xff] (!%p165_p10)   ;;  %s1451_s23 = sshll.u32 (!%p165_p10), %s1790_s12, 4 }
  0x10   : > { %952 = vmatprep.subr.bf16.mxu1 (!%p165_p10), %v1602_v1  ;;  %840 = vmatpush1.bf16.xpose.msra.mxu0 (!%p165_p10), %v1604_v2  ;;  %v1608_v5 = vld [vmem:[%s2214_s1 + $0x114] ss:$8 sps:$4 sm:$0xff] (!%p165_p10)   ;;  %v1610_v6 = vld [vmem:[%s2214_s1 + $0x10] ss:$8 sps:$4 sm:$0xff] (!%p165_p10)   ;;  %v1612_v8 = vld [vmem:[%s2214_s1 + $0x24] ss:$8 sps:$4 sm:$0xff] (!%p165_p10)  }
  0x11   : > { %953 = vmatpush1.bf16.xpose.msra.mxu1 (!%p165_p10), %v1605_v3  ;;  %841 = vmatprep.subr.bf16.mxu0 (!%p165_p10), %v1606_v4  ;;  %v1611_v7 = vld [vmem:[%s2214_s1 + $0x110] ss:$8 sps:$4 sm:$0xff] (!%p165_p10)   ;;  %v1614_v9 = vld [vmem:[%s2214_s1 + $0x124] ss:$8 sps:$4 sm:$0xff] (!%p165_p10)   ;;  %v1616_v10 = vld [vmem:[%s2214_s1 + $0x20] ss:$8 sps:$4 sm:$0xff] (!%p165_p10)  }
  0x12   : > { %954 = vmatprep.subr.bf16.mxu1 (!%p165_p10), %v1608_v5  ;;  %v1617_v11 = vld [vmem:[%s2214_s1 + $0x120] ss:$8 sps:$4 sm:$0xff] (!%p165_p10)   ;;  %v1618_v12 = vld [vmem:[%s2214_s1 + $0x34] ss:$8 sps:$4 sm:$0xff] (!%p165_p10)   ;;  %v1622_v14 = vld [vmem:[%s2214_s1 + $0x30] ss:$8 sps:$4 sm:$0xff] (!%p165_p10)  }
  0x13   : > { %v1620_v13 = vld [vmem:[%s2214_s1 + $0x134] ss:$8 sps:$4 sm:$0xff] (!%p165_p10)   ;;  %v1623_v15 = vld [vmem:[%s2214_s1 + $0x130] ss:$8 sps:$4 sm:$0xff] (!%p165_p10)   ;;  %v1624_v16 = vld [vmem:[%s2214_s1 + $0x44] ss:$8 sps:$4 sm:$0xff] (!%p165_p10)  }
  0x14   : > { %v1626_v17 = vld [vmem:[%s2214_s1 + $0x144] ss:$8 sps:$4 sm:$0xff] (!%p165_p10)   ;;  %p203_p11 = scmp.lt.s32.totalorder (!%p165_p10), %s1451_s23, 31  ;;  %v1628_v18 = vld [vmem:[%s2214_s1 + $0x40] ss:$8 sps:$4 sm:$0xff] (!%p165_p10)   ;;  %s198_s6 = sand.u32 (!%p165_p10), 1, %s1782_s10  }
  0x15   : > { %v1629_v19 = vld [vmem:[%s2214_s1 + $0x140] ss:$8 sps:$4 sm:$0xff] (!%p165_p10)   ;;  %v1630_v20 = vld [vmem:[%s2214_s1 + $0x54] ss:$8 sps:$4 sm:$0xff] (!%p165_p10)   ;;  %v1634_v22 = vld [vmem:[%s2214_s1 + $0x50] ss:$8 sps:$4 sm:$0xff] (!%p165_p10)  }
  0x16   : > { %v1632_v21 = vld [vmem:[%s2214_s1 + $0x154] ss:$8 sps:$4 sm:$0xff]   ;;  %s2226_s23 = smov (!%p203_p11, %s1451_s23), 31  ;;  %v1635_v23 = vld [vmem:[%s2214_s1 + $0x150] ss:$8 sps:$4 sm:$0xff]   ;;  %s1450_s7 = sshll.u32 %s198_s6, 9 }
  0x17   : > { %s1540_s4 = sshll.u32 %s2226_s23, 3  ;;  %v1636_v24 = vld [vmem:[%s2214_s1 + $0x64] ss:$8 sps:$4 sm:$0xff]   ;;  %v1640_v27 = vld [vmem:[%s2214_s1 + $0x60] ss:$8 sps:$4 sm:$0xff]   ;;  %s2090_s8 = scalar_lea.vmem [#allocation3], %s1450_s7 }
  0x18   : > { %842 = vmatpush1.bf16.xpose.msra.mxu0 %v1610_v6  ;;  %s1952_s24 = scalar_lea.vmem %s2213_s0, %s1540_s4  ;;  %v1638_v25 = vld [vmem:[%s2214_s1 + $0x164] ss:$8 sps:$4 sm:$0xff]   ;;  %v1641_v28 = vld [vmem:[%s2214_s1 + $0x160] ss:$8 sps:$4 sm:$0xff]   ;;  %v1642_v29 = vld [vmem:[%s2214_s1 + $0x74] ss:$8 sps:$4 sm:$0xff]  }
  0x19   : > { %955 = vmatpush1.bf16.xpose.msra.mxu1 %v1611_v7  ;;  %843 = vmatprep.subr.bf16.mxu0 %v1612_v8  ;;  %v1698_v26 = vld [vmem:[%s1952_s24 + $0x4] ss:$8 sps:$4 sm:$0xff]   ;;  %v1644_v30 = vld [vmem:[%s2214_s1 + $0x174] ss:$8 sps:$4 sm:$0xff]   ;;  %v1646_v31 = vld [vmem:[%s2214_s1 + $0x70] ss:$8 sps:$4 sm:$0xff]  }
  0x1a   : > { %956 = vmatprep.subr.bf16.mxu1 %v1614_v9  ;;  %871 = vmatprep.mubr.bf16.mxu0 %v1698_v26  ;;  %v1647_v32 = vld [vmem:[%s2214_s1 + $0x170] ss:$8 sps:$4 sm:$0xff]   ;;  %v1648_v33 = vld [vmem:[%s2214_s1 + $0x84] ss:$8 sps:$4 sm:$0xff]   ;;  %v1652_v35 = vld [vmem:[%s2214_s1 + $0x80] ss:$8 sps:$4 sm:$0xff]  }
  0x1b   : > { %984 = vmatprep.mubr.bf16.mxu1 %v1698_v26  ;;  %v1650_v34 = vld [vmem:[%s2214_s1 + $0x184] ss:$8 sps:$4 sm:$0xff]   ;;  %v1653_v36 = vld [vmem:[%s2214_s1 + $0x180] ss:$8 sps:$4 sm:$0xff]   ;;  %v1654_v37 = vld [vmem:[%s2214_s1 + $0x94] ss:$8 sps:$4 sm:$0xff]  }
  0x1c   : > { %v1656_v38 = vld [vmem:[%s2214_s1 + $0x194] ss:$8 sps:$4 sm:$0xff]   ;;  %v1658_v39 = vld [vmem:[%s2214_s1 + $0x90] ss:$8 sps:$4 sm:$0xff]   ;;  %v1660_v41 = vld [vmem:[%s2214_s1 + $0xa4] ss:$8 sps:$4 sm:$0xff]  }
  0x1d   : > { %v1659_v40 = vld [vmem:[%s2214_s1 + $0x190] ss:$8 sps:$4 sm:$0xff]   ;;  %v1662_v42 = vld [vmem:[%s2214_s1 + $0x1a4] ss:$8 sps:$4 sm:$0xff]   ;;  %v1664_v43 = vld [vmem:[%s2214_s1 + $0xa0] ss:$8 sps:$4 sm:$0xff]  }
  0x1e   : > { %v1665_v44 = vld [vmem:[%s2214_s1 + $0x1a0] ss:$8 sps:$4 sm:$0xff]   ;;  %v1666_v45 = vld [vmem:[%s2214_s1 + $0xb4] ss:$8 sps:$4 sm:$0xff]   ;;  %v1670_v47 = vld [vmem:[%s2214_s1 + $0xb0] ss:$8 sps:$4 sm:$0xff]  }
  0x1f   : > { %v1668_v46 = vld [vmem:[%s2214_s1 + $0x1b4] ss:$8 sps:$4 sm:$0xff]   ;;  %v1671_v48 = vld [vmem:[%s2214_s1 + $0x1b0] ss:$8 sps:$4 sm:$0xff]   ;;  %v1672_v49 = vld [vmem:[%s2214_s1 + $0xc4] ss:$8 sps:$4 sm:$0xff]  }
  0x20   : > { %844 = vmatpush1.bf16.xpose.msra.mxu0 %v1616_v10  ;;  %v1674_v50 = vld [vmem:[%s2214_s1 + $0x1c4] ss:$8 sps:$4 sm:$0xff]   ;;  %v1676_v51 = vld [vmem:[%s2214_s1 + $0xc0] ss:$8 sps:$4 sm:$0xff]   ;;  %v1678_v53 = vld [vmem:[%s2214_s1 + $0xd4] ss:$8 sps:$4 sm:$0xff]  }
  0x21   : > { %957 = vmatpush1.bf16.xpose.msra.mxu1 %v1617_v11  ;;  %845 = vmatprep.subr.bf16.mxu0 %v1618_v12  ;;  %v1677_v52 = vld [vmem:[%s2214_s1 + $0x1c0] ss:$8 sps:$4 sm:$0xff]   ;;  %v1680_v54 = vld [vmem:[%s2214_s1 + $0x1d4] ss:$8 sps:$4 sm:$0xff]   ;;  %v1682_v55 = vld [vmem:[%s2214_s1 + $0xd0] ss:$8 sps:$4 sm:$0xff]  }
  0x22   : > { %958 = vmatprep.subr.bf16.mxu1 %v1620_v13  ;;  %v1683_v56 = vld [vmem:[%s2214_s1 + $0x1d0] ss:$8 sps:$4 sm:$0xff]   ;;  %v1684_v57 = vld [vmem:[%s2214_s1 + $0xe4] ss:$8 sps:$4 sm:$0xff]   ;;  %v1688_v59 = vld [vmem:[%s2214_s1 + $0xe0] ss:$8 sps:$4 sm:$0xff]  }
  0x23   : > { %v1686_v58 = vld [vmem:[%s2214_s1 + $0x1e4] ss:$8 sps:$4 sm:$0xff]   ;;  %v1689_v60 = vld [vmem:[%s2214_s1 + $0x1e0] ss:$8 sps:$4 sm:$0xff]   ;;  %v1690_v61 = vld [vmem:[%s2214_s1 + $0xf4] ss:$8 sps:$4 sm:$0xff]  }
  0x24   : > { %v1692_v62 = vld [vmem:[%s2214_s1 + $0x1f4] ss:$8 sps:$4 sm:$0xff]   ;;  %v1694_v63 = vld [vmem:[%s2214_s1 + $0xf0] ss:$8 sps:$4 sm:$0xff]   ;;  %v1696_v1 = vld [vmem:[%s1952_s24] ss:$8 sps:$4 sm:$0xff]  }
  0x25   : > { %v1695_v0 = vld [vmem:[%s2214_s1 + $0x1f0] ss:$8 sps:$4 sm:$0xff]   ;;  %v1699_v2 = vld [vmem:[%s1952_s24 + $0x14] ss:$8 sps:$4 sm:$0xff]   ;;  %v1702_v4 = vld [vmem:[%s1952_s24 + $0x24] ss:$8 sps:$4 sm:$0xff]  }
  0x26   : > { %v1701_v3 = vld [vmem:[%s1952_s24 + $0x10] ss:$8 sps:$4 sm:$0xff]   ;;  %v1704_v5 = vld [vmem:[%s1952_s24 + $0x20] ss:$8 sps:$4 sm:$0xff]   ;;  %v1705_v6 = vld [vmem:[%s1952_s24 + $0x34] ss:$8 sps:$4 sm:$0xff]  }
  0x27   : > { %v1707_v7 = vld [vmem:[%s1952_s24 + $0x30] ss:$8 sps:$4 sm:$0xff]   ;;  %v1708_v8 = vld [vmem:[%s1952_s24 + $0x44] ss:$8 sps:$4 sm:$0xff]   ;;  %v1710_v9 = vld [vmem:[%s1952_s24 + $0x40] ss:$8 sps:$4 sm:$0xff]  }
  0x28   : > { %846 = vmatpush1.bf16.xpose.msra.mxu0 %v1622_v14  ;;  %v1711_v10 = vld [vmem:[%s1952_s24 + $0x54] ss:$8 sps:$4 sm:$0xff]   ;;  %v1713_v11 = vld [vmem:[%s1952_s24 + $0x50] ss:$8 sps:$4 sm:$0xff]   ;;  %v1714_v12 = vld [vmem:[%s1952_s24 + $0x64] ss:$8 sps:$4 sm:$0xff]  }
  0x29   : > { %959 = vmatpush1.bf16.xpose.msra.mxu1 %v1623_v15  ;;  %847 = vmatprep.subr.bf16.mxu0 %v1624_v16  ;;  %v1716_v13 = vld [vmem:[%s1952_s24 + $0x60] ss:$8 sps:$4 sm:$0xff]   ;;  %v1717_v14 = vld [vmem:[%s1952_s24 + $0x74] ss:$8 sps:$4 sm:$0xff]   ;;  %v1719_v15 = vld [vmem:[%s1952_s24 + $0x70] ss:$8 sps:$4 sm:$0xff]  }
  0x2a   : > { %960 = vmatprep.subr.bf16.mxu1 %v1626_v17  ;;  %s1542_s24 = sshll.u32 %s1790_s12, 13  ;;  %s1341_s15 = sshll.u32 %s2090_s8, 4  ;;  %s2157_s15 = int_to_ptr.vmem [resolvable:$true] %s1341_s15 }
  0x2b   : > { %s2155_s20 = scalar_lea.hbm %s2215_s2, %s1542_s24  ;;  %s2167_s12 = scalar_lea.sflag [#allocation4], %s198_s6 }
  0x2c   : > { %s1720_s25 = scalar_lea.vmem %s2157_s15, 8192  ;;  %s1800_s26 = smov [#allocation3]  }
  0x2d   : > { %p1721_p12 = scmp.ne.s32.totalorder %s2157_s15, %s1720_s25  ;;  %s1724_s23 = sshll.u32 %s1800_s26, 4  ;;  %s1725_s23 = int_to_ptr.vmem [resolvable:$false] %s1724_s23 }
  0x2e   : > { %s1726_s27 = scalar_lea.vmem %s1725_s23, 16384  ;;  %p1727_p1 = scmp.lt.s32.totalorder %s2157_s15, %s1725_s23 }
  0x2f   : > { %p1722_p13 = pnand %p1721_p12, %p1858_p4  ;;  %p1728_p2 = scmp.lt.s32.totalorder %s1726_s27, %s1720_s25 }
  0x30   : > { %848 = vmatpush1.bf16.xpose.msra.mxu0 %v1628_v18 }
  0x31   : > { %961 = vmatpush1.bf16.xpose.msra.mxu1 %v1629_v19  ;;  %849 = vmatprep.subr.bf16.mxu0 %v1630_v20  ;;  %p1723_p0 = pneg %p1722_p13  ;;  %p1729_p3 = por %p1728_p2, %p1727_p1 }
  0x32   : > { %962 = vmatprep.subr.bf16.mxu1 %v1632_v21 }
  0x33   : > { %p1730_p5 = pnand %p1729_p3, %p1723_p0 }
  0x38   : > { %850 = vmatpush1.bf16.xpose.msra.mxu0 %v1634_v22 }
  0x39   : > { %963 = vmatpush1.bf16.xpose.msra.mxu1 %v1635_v23  ;;  %851 = vmatprep.subr.bf16.mxu0 %v1636_v24 }
  0x3a   : > { %964 = vmatprep.subr.bf16.mxu1 %v1638_v25 }
  0x40   : > { %852 = vmatpush1.bf16.xpose.msra.mxu0 %v1640_v27 }
  0x41   : > { %965 = vmatpush1.bf16.xpose.msra.mxu1 %v1641_v28  ;;  %853 = vmatprep.subr.bf16.mxu0 %v1642_v29 }
  0x42   : > { %966 = vmatprep.subr.bf16.mxu1 %v1644_v30 }
  0x48   : > { %854 = vmatpush1.bf16.xpose.msra.mxu0 %v1646_v31 }
  0x49   : > { %967 = vmatpush1.bf16.xpose.msra.mxu1 %v1647_v32  ;;  %855 = vmatprep.subr.bf16.mxu0 %v1648_v33 }
  0x4a   : > { %968 = vmatprep.subr.bf16.mxu1 %v1650_v34 }
  0x50   : > { %856 = vmatpush1.bf16.xpose.msra.mxu0 %v1652_v35 }
  0x51   : > { %969 = vmatpush1.bf16.xpose.msra.mxu1 %v1653_v36  ;;  %857 = vmatprep.subr.bf16.mxu0 %v1654_v37 }
  0x52   : > { %970 = vmatprep.subr.bf16.mxu1 %v1656_v38 }
  0x58   : > { %858 = vmatpush1.bf16.xpose.msra.mxu0 %v1658_v39 }
  0x59   : > { %971 = vmatpush1.bf16.xpose.msra.mxu1 %v1659_v40  ;;  %859 = vmatprep.subr.bf16.mxu0 %v1660_v41 }
  0x5a   : > { %972 = vmatprep.subr.bf16.mxu1 %v1662_v42 }
  0x60   : > { %860 = vmatpush1.bf16.xpose.msra.mxu0 %v1664_v43 }
  0x61   : > { %973 = vmatpush1.bf16.xpose.msra.mxu1 %v1665_v44  ;;  %861 = vmatprep.subr.bf16.mxu0 %v1666_v45 }
  0x62   : > { %974 = vmatprep.subr.bf16.mxu1 %v1668_v46 }
  0x68   : > { %862 = vmatpush1.bf16.xpose.msra.mxu0 %v1670_v47 }
  0x69   : > { %975 = vmatpush1.bf16.xpose.msra.mxu1 %v1671_v48  ;;  %863 = vmatprep.subr.bf16.mxu0 %v1672_v49 }
  0x6a   : > { %976 = vmatprep.subr.bf16.mxu1 %v1674_v50 }
  0x70   : > { %864 = vmatpush1.bf16.xpose.msra.mxu0 %v1676_v51 }
  0x71   : > { %977 = vmatpush1.bf16.xpose.msra.mxu1 %v1677_v52  ;;  %865 = vmatprep.subr.bf16.mxu0 %v1678_v53 }
  0x72   : > { %978 = vmatprep.subr.bf16.mxu1 %v1680_v54 }
  0x78   : > { %866 = vmatpush1.bf16.xpose.msra.mxu0 %v1682_v55 }
  0x79   : > { %979 = vmatpush1.bf16.xpose.msra.mxu1 %v1683_v56  ;;  %867 = vmatprep.subr.bf16.mxu0 %v1684_v57 }
  0x7a   : > { %980 = vmatprep.subr.bf16.mxu1 %v1686_v58 }
  0x80   : > { %868 = vmatpush1.bf16.xpose.msra.mxu0 %v1688_v59 }
  0x81   : > { %981 = vmatpush1.bf16.xpose.msra.mxu1 %v1689_v60  ;;  %869 = vmatprep.subr.bf16.mxu0 %v1690_v61 }
  0x82   : > { %982 = vmatprep.subr.bf16.mxu1 %v1692_v62 }
  0x88   : > { %870 = vmatpush1.bf16.xpose.msra.mxu0 %v1694_v63 }
  0x89   : > { %983 = vmatpush1.bf16.xpose.msra.mxu1 %v1695_v0 }
  0x8f   : > { %872 = vmatmul.mubr.bf16.vlgmr.msra.gmra.mrb[0].mxu0 %v1696_v1 }
  0x90   : > { %985 = vmatmul.mubr.bf16.vlgmr.msra.gmra.mrb[0].mxu1 %v1696_v1  ;;  %881 = vmatprep.mubr.bf16.mxu0 %v1699_v2 }
  0x91   : > { %994 = vmatprep.mubr.bf16.mxu1 %v1699_v2 }
  0x97   : > { %882 = vmatmul.mubr.bf16.gmra.mrb[4].mxu0 %v1701_v3 }
  0x98   : > { %995 = vmatmul.mubr.bf16.gmra.mrb[4].mxu1 %v1701_v3  ;;  %891 = vmatprep.mubr.bf16.mxu0 %v1702_v4 }
  0x99   : > { %1004 = vmatprep.mubr.bf16.mxu1 %v1702_v4 }
  0x9f   : > { %892 = vmatmul.mubr.bf16.gmra.mrb[8].mxu0 %v1704_v5 }
  0xa0   : > { %1005 = vmatmul.mubr.bf16.gmra.mrb[8].mxu1 %v1704_v5  ;;  %901 = vmatprep.mubr.bf16.mxu0 %v1705_v6 }
  0xa1   : > { %1014 = vmatprep.mubr.bf16.mxu1 %v1705_v6 }
  0xa7   : > { %902 = vmatmul.mubr.bf16.gmra.mrb[12].mxu0 %v1707_v7 }
  0xa8   : > { %1015 = vmatmul.mubr.bf16.gmra.mrb[12].mxu1 %v1707_v7  ;;  %911 = vmatprep.mubr.bf16.mxu0 %v1708_v8 }
  0xa9   : > { %1024 = vmatprep.mubr.bf16.mxu1 %v1708_v8 }
  0xaf   : > { %912 = vmatmul.mubr.bf16.gmra.mrb[16].mxu0 %v1710_v9 }
  0xb0   : > { %1025 = vmatmul.mubr.bf16.gmra.mrb[16].mxu1 %v1710_v9  ;;  %921 = vmatprep.mubr.bf16.mxu0 %v1711_v10 }
  0xb1   : > { %1034 = vmatprep.mubr.bf16.mxu1 %v1711_v10 }
  0xb7   : > { %922 = vmatmul.mubr.bf16.gmra.mrb[20].mxu0 %v1713_v11 }
  0xb8   : > { %1035 = vmatmul.mubr.bf16.gmra.mrb[20].mxu1 %v1713_v11  ;;  %931 = vmatprep.mubr.bf16.mxu0 %v1714_v12 }
  0xb9   : > { %1044 = vmatprep.mubr.bf16.mxu1 %v1714_v12 }
  0xbf   : > { %932 = vmatmul.mubr.bf16.gmra.mrb[24].mxu0 %v1716_v13 }
  0xc0   : > { %1045 = vmatmul.mubr.bf16.gmra.mrb[24].mxu1 %v1716_v13  ;;  %941 = vmatprep.mubr.bf16.mxu0 %v1717_v14 }
  0xc1   : > { %1054 = vmatprep.mubr.bf16.mxu1 %v1717_v14 }
  0xc7   : > { %942 = vmatmul.mubr.bf16.gmra.mrb[28].mxu0 %v1719_v15 }
  0xc8   : > { %1055 = vmatmul.mubr.bf16.gmra.mrb[28].mxu1 %v1719_v15 }
 0x162   : > { %v873_v16 = vpop.f32.mrb[0].mxu0 }
 0x163   : > { %v986_v17 = vpop.f32.mrb[0].mxu1  ;;  %1260 = vst [vmem:[%s2090_s8] sm:$0xff] %v873_v16  ;;  %v875_v18 = vpop.f32.mrb[1].mxu0 }
 0x164   : > { %1262 = vst [vmem:[%s2090_s8 + $0x10] sm:$0xff] %v986_v17  ;;  %v988_v19 = vpop.f32.mrb[1].mxu1  ;;  %1261 = vst [vmem:[%s2090_s8 + $0x8] sm:$0xff] %v875_v18  ;;  %v877_v20 = vpop.f32.mrb[2].mxu0 }
 0x165   : > { %1263 = vst [vmem:[%s2090_s8 + $0x18] sm:$0xff] %v988_v19  ;;  %v990_v21 = vpop.f32.mrb[2].mxu1  ;;  %1264 = vst [vmem:[%s2090_s8 + $0x20] sm:$0xff] %v877_v20  ;;  %v879_v22 = vpop.f32.mrb[3].mxu0 }
 0x166   : > { %1266 = vst [vmem:[%s2090_s8 + $0x30] sm:$0xff] %v990_v21  ;;  %v992_v23 = vpop.f32.mrb[3].mxu1  ;;  %1265 = vst [vmem:[%s2090_s8 + $0x28] sm:$0xff] %v879_v22 }
 0x167   : > { %1267 = vst [vmem:[%s2090_s8 + $0x38] sm:$0xff] %v992_v23 }
 0x16a   : > { %v883_v24 = vpop.f32.mrb[4].mxu0 }
 0x16b   : > { %v996_v25 = vpop.f32.mrb[4].mxu1  ;;  %1268 = vst [vmem:[%s2090_s8 + $0x40] sm:$0xff] %v883_v24  ;;  %v885_v26 = vpop.f32.mrb[5].mxu0 }
 0x16c   : > { %1270 = vst [vmem:[%s2090_s8 + $0x50] sm:$0xff] %v996_v25  ;;  %v998_v27 = vpop.f32.mrb[5].mxu1  ;;  %1269 = vst [vmem:[%s2090_s8 + $0x48] sm:$0xff] %v885_v26  ;;  %v887_v28 = vpop.f32.mrb[6].mxu0 }
 0x16d   : > { %1271 = vst [vmem:[%s2090_s8 + $0x58] sm:$0xff] %v998_v27  ;;  %v1000_v29 = vpop.f32.mrb[6].mxu1  ;;  %1272 = vst [vmem:[%s2090_s8 + $0x60] sm:$0xff] %v887_v28  ;;  %v889_v30 = vpop.f32.mrb[7].mxu0 }
 0x16e   : > { %1274 = vst [vmem:[%s2090_s8 + $0x70] sm:$0xff] %v1000_v29  ;;  %v1002_v31 = vpop.f32.mrb[7].mxu1  ;;  %1273 = vst [vmem:[%s2090_s8 + $0x68] sm:$0xff] %v889_v30 }
 0x16f   : > { %1275 = vst [vmem:[%s2090_s8 + $0x78] sm:$0xff] %v1002_v31 }
 0x172   : > { %v893_v32 = vpop.f32.mrb[8].mxu0 }
 0x173   : > { %v1006_v33 = vpop.f32.mrb[8].mxu1  ;;  %1276 = vst [vmem:[%s2090_s8 + $0x80] sm:$0xff] %v893_v32  ;;  %v895_v34 = vpop.f32.mrb[9].mxu0 }
 0x174   : > { %1278 = vst [vmem:[%s2090_s8 + $0x90] sm:$0xff] %v1006_v33  ;;  %v1008_v35 = vpop.f32.mrb[9].mxu1  ;;  %1277 = vst [vmem:[%s2090_s8 + $0x88] sm:$0xff] %v895_v34  ;;  %v897_v36 = vpop.f32.mrb[10].mxu0 }
 0x175   : > { %1279 = vst [vmem:[%s2090_s8 + $0x98] sm:$0xff] %v1008_v35  ;;  %v1010_v37 = vpop.f32.mrb[10].mxu1  ;;  %1280 = vst [vmem:[%s2090_s8 + $0xa0] sm:$0xff] %v897_v36  ;;  %v899_v38 = vpop.f32.mrb[11].mxu0 }
 0x176   : > { %1282 = vst [vmem:[%s2090_s8 + $0xb0] sm:$0xff] %v1010_v37  ;;  %v1012_v39 = vpop.f32.mrb[11].mxu1  ;;  %1281 = vst [vmem:[%s2090_s8 + $0xa8] sm:$0xff] %v899_v38 }
 0x177   : > { %1283 = vst [vmem:[%s2090_s8 + $0xb8] sm:$0xff] %v1012_v39 }
 0x17a   : > { %v903_v40 = vpop.f32.mrb[12].mxu0 }
 0x17b   : > { %v1016_v41 = vpop.f32.mrb[12].mxu1  ;;  %1284 = vst [vmem:[%s2090_s8 + $0xc0] sm:$0xff] %v903_v40  ;;  %v905_v42 = vpop.f32.mrb[13].mxu0 }
 0x17c   : > { %1286 = vst [vmem:[%s2090_s8 + $0xd0] sm:$0xff] %v1016_v41  ;;  %v1018_v43 = vpop.f32.mrb[13].mxu1  ;;  %1285 = vst [vmem:[%s2090_s8 + $0xc8] sm:$0xff] %v905_v42  ;;  %v907_v44 = vpop.f32.mrb[14].mxu0 }
 0x17d   : > { %1287 = vst [vmem:[%s2090_s8 + $0xd8] sm:$0xff] %v1018_v43  ;;  %v1020_v45 = vpop.f32.mrb[14].mxu1  ;;  %1288 = vst [vmem:[%s2090_s8 + $0xe0] sm:$0xff] %v907_v44  ;;  %v909_v46 = vpop.f32.mrb[15].mxu0 }
 0x17e   : > { %1290 = vst [vmem:[%s2090_s8 + $0xf0] sm:$0xff] %v1020_v45  ;;  %v1022_v47 = vpop.f32.mrb[15].mxu1  ;;  %1289 = vst [vmem:[%s2090_s8 + $0xe8] sm:$0xff] %v909_v46 }
 0x17f   : > { %1291 = vst [vmem:[%s2090_s8 + $0xf8] sm:$0xff] %v1022_v47 }
 0x182   : > { %v913_v48 = vpop.f32.mrb[16].mxu0 }
 0x183   : > { %v1026_v49 = vpop.f32.mrb[16].mxu1  ;;  %1292 = vst [vmem:[%s2090_s8 + $0x100] sm:$0xff] %v913_v48  ;;  %v915_v50 = vpop.f32.mrb[17].mxu0 }
 0x184   : > { %1294 = vst [vmem:[%s2090_s8 + $0x110] sm:$0xff] %v1026_v49  ;;  %v1028_v51 = vpop.f32.mrb[17].mxu1  ;;  %1293 = vst [vmem:[%s2090_s8 + $0x108] sm:$0xff] %v915_v50  ;;  %v917_v52 = vpop.f32.mrb[18].mxu0 }
 0x185   : > { %1295 = vst [vmem:[%s2090_s8 + $0x118] sm:$0xff] %v1028_v51  ;;  %v1030_v53 = vpop.f32.mrb[18].mxu1  ;;  %1296 = vst [vmem:[%s2090_s8 + $0x120] sm:$0xff] %v917_v52  ;;  %v919_v54 = vpop.f32.mrb[19].mxu0 }
 0x186   : > { %1298 = vst [vmem:[%s2090_s8 + $0x130] sm:$0xff] %v1030_v53  ;;  %v1032_v55 = vpop.f32.mrb[19].mxu1  ;;  %1297 = vst [vmem:[%s2090_s8 + $0x128] sm:$0xff] %v919_v54 }
 0x187   : > { %1299 = vst [vmem:[%s2090_s8 + $0x138] sm:$0xff] %v1032_v55 }
 0x18a   : > { %v923_v56 = vpop.f32.mrb[20].mxu0 }
 0x18b   : > { %v1036_v57 = vpop.f32.mrb[20].mxu1  ;;  %1300 = vst [vmem:[%s2090_s8 + $0x140] sm:$0xff] %v923_v56  ;;  %v925_v58 = vpop.f32.mrb[21].mxu0 }
 0x18c   : > { %1302 = vst [vmem:[%s2090_s8 + $0x150] sm:$0xff] %v1036_v57  ;;  %v1038_v59 = vpop.f32.mrb[21].mxu1  ;;  %1301 = vst [vmem:[%s2090_s8 + $0x148] sm:$0xff] %v925_v58  ;;  %v927_v60 = vpop.f32.mrb[22].mxu0 }
 0x18d   : > { %1303 = vst [vmem:[%s2090_s8 + $0x158] sm:$0xff] %v1038_v59  ;;  %v1040_v61 = vpop.f32.mrb[22].mxu1  ;;  %1304 = vst [vmem:[%s2090_s8 + $0x160] sm:$0xff] %v927_v60  ;;  %v929_v62 = vpop.f32.mrb[23].mxu0 }
 0x18e   : > { %1306 = vst [vmem:[%s2090_s8 + $0x170] sm:$0xff] %v1040_v61  ;;  %v1042_v63 = vpop.f32.mrb[23].mxu1  ;;  %1305 = vst [vmem:[%s2090_s8 + $0x168] sm:$0xff] %v929_v62 }
 0x18f   : > { %1307 = vst [vmem:[%s2090_s8 + $0x178] sm:$0xff] %v1042_v63 }
 0x192   : > { %v933_v0 = vpop.f32.mrb[24].mxu0 }
 0x193   : > { %v1046_v1 = vpop.f32.mrb[24].mxu1  ;;  %1308 = vst [vmem:[%s2090_s8 + $0x180] sm:$0xff] %v933_v0  ;;  %v935_v2 = vpop.f32.mrb[25].mxu0 }
 0x194   : > { %1310 = vst [vmem:[%s2090_s8 + $0x190] sm:$0xff] %v1046_v1  ;;  %v1048_v3 = vpop.f32.mrb[25].mxu1  ;;  %1309 = vst [vmem:[%s2090_s8 + $0x188] sm:$0xff] %v935_v2  ;;  %v937_v4 = vpop.f32.mrb[26].mxu0 }
 0x195   : > { %1311 = vst [vmem:[%s2090_s8 + $0x198] sm:$0xff] %v1048_v3  ;;  %v1050_v5 = vpop.f32.mrb[26].mxu1  ;;  %1312 = vst [vmem:[%s2090_s8 + $0x1a0] sm:$0xff] %v937_v4  ;;  %v939_v6 = vpop.f32.mrb[27].mxu0 }
 0x196   : > { %1314 = vst [vmem:[%s2090_s8 + $0x1b0] sm:$0xff] %v1050_v5  ;;  %v1052_v7 = vpop.f32.mrb[27].mxu1  ;;  %1313 = vst [vmem:[%s2090_s8 + $0x1a8] sm:$0xff] %v939_v6 }
 0x197   : > { %1315 = vst [vmem:[%s2090_s8 + $0x1b8] sm:$0xff] %v1052_v7 }
 0x19a   : > { %v943_v8 = vpop.f32.mrb[28].mxu0 }
 0x19b   : > { %v1056_v9 = vpop.f32.mrb[28].mxu1  ;;  %1316 = vst [vmem:[%s2090_s8 + $0x1c0] sm:$0xff] %v943_v8  ;;  %v945_v10 = vpop.f32.mrb[29].mxu0 }
 0x19c   : > { %1318 = vst [vmem:[%s2090_s8 + $0x1d0] sm:$0xff] %v1056_v9  ;;  %v1058_v11 = vpop.f32.mrb[29].mxu1  ;;  %1317 = vst [vmem:[%s2090_s8 + $0x1c8] sm:$0xff] %v945_v10  ;;  %v947_v12 = vpop.f32.mrb[30].mxu0 }
 0x19d   : > { %1319 = vst [vmem:[%s2090_s8 + $0x1d8] sm:$0xff] %v1058_v11  ;;  %v1060_v13 = vpop.f32.mrb[30].mxu1  ;;  %1320 = vst [vmem:[%s2090_s8 + $0x1e0] sm:$0xff] %v947_v12  ;;  %v949_v14 = vpop.f32.mrb[31].mxu0 }
 0x19e   : > { %1322 = vst [vmem:[%s2090_s8 + $0x1f0] sm:$0xff] %v1060_v13  ;;  %v1062_v15 = vpop.f32.mrb[31].mxu1  ;;  %1321 = vst [vmem:[%s2090_s8 + $0x1e8] sm:$0xff] %v949_v14 }
 0x19f   : > { %1323 = vst [vmem:[%s2090_s8 + $0x1f8] sm:$0xff] %v1062_v15 }
 0x1a0   : > { %1733 = shalt.err (!%p1730_p5)
}
 0x1a1   : > { %s1734_s28 = scalar_lea.hbm %s2155_s20, 8192  ;;  %s1738_s3 = scalar_lea.hbm %s2215_s2, 16384 }
 0x1a2   : > { %p1735_p6 = scmp.ne.s32.totalorder %s2155_s20, %s1734_s28  ;;  %p1739_p10 = scmp.lt.u32.totalorder %s2155_s20, %s2215_s2 }
 0x1a3   : > { %p1740_p11 = scmp.lt.u32.totalorder %s1738_s3, %s1734_s28  ;;  %p1742_p13 = scmp.lt.u32.totalorder %s1734_s28, %s2155_s20 }
 0x1a4   : > { %p1736_p7 = pnand %p1735_p6, %p1858_p4 }
 0x1a5   : > { %p1741_p12 = por %p1740_p11, %p1739_p10 }
 0x1a6   : > { %p1737_p9 = pneg %p1736_p7 }
 0x1a7   : > { %p1743_p0 = por %p1742_p13, %p1741_p12 }
 0x1a9   : > { %p1744_p1 = pnand %p1743_p0, %p1737_p9 }
 0x1ab   : > { %1747 = shalt.err (!%p1744_p1)
}
 0x1ac   : > { %s1801_s6 = smov 512   ;;  %s1802_s7 = smov 32  }
 0x1ad   : > { %1543 = dma.vmem_to_hbm [thread:$0]  (%p1858_p4), %s2157_s15, 8192, %s2155_s20, %s2167_s12, %s1801_s6, %s1801_s6, %s1802_s7  }
 0x1ae PF: > { %p1549_p2 = scmp.ge.s32.totalorder %s1798_s14, 2  ;;  %s1356_s8 = sand.u32 1, %s1778_s9  }
 0x1af   : > { %s1357_s24 = scalar_lea.sflag [#allocation4], %s1356_s8 }
 0x1b0   : > { %p1546_p3 = pnand %p1549_p2, %p1865_p8 }
 0x1b2   : > { %1773 = dma.done.wait (!%p1546_p3), %s1357_s24, 8192  }
 0x1b3   : > { %1775 = vsyncadd (!%p1546_p3), %s1357_s24, 4294959104  ;;  %s15_s14 = sadd.s32 1, %s1798_s14   ;;  %s2218_s9 = smov %s1782_s10 }
 0x1b4   : > { %p12_p5 = scmp.ge.s32.totalorder %s15_s14, 4   ;;  %s2219_s10 = smov %s1786_s11 }
 0x1b5   : > { %s2220_s11 = smov %s1871_s22  ;;  %s2221_s12 = smov %s1794_s13 }
 0x1b6   : > { %s2222_s13 = smov %s2224_s17  ;;  %14 = sbr.rel (!%p12_p5) target bundleno = 4 (0x4), region = 74 }
 0x1bd   :  { %1362 = vsyncpa [#allocation4], 1 }
 0x1be   :  { %1364 = vsyncpa [#allocation4 + $0x1], 1 }

// kernel: encoder_decoder_forward.13
= control target key start
LH: loop header
LB: loop body
LE: loop exit
PB: predicated region body
PF: predicated region fallthrough
CT: control target
= control target key end

     0   :  { %s5480_s24 = smov 0   ;;  %s8611_s0 = inlined_call_operand.vmem [shape: f32[256,256], index: 0, kind: input, shape index: {}]   ;;  %s8612_s1 = inlined_call_operand.vmem [shape: f32[1,256], index: 1, kind: input, shape index: {}]   ;;  %s8613_s2 = inlined_call_operand.vmem [shape: f32[1,256], index: 2, kind: input, shape index: {}, may-alias: {2,6}]   ;;  %s8614_s3 = inlined_call_operand.vmem [shape: bf16[256,1024], index: 3, kind: input, shape index: {}]   ;;  %s8615_s4 = inlined_call_operand.vmem [shape: f32[1,1024], index: 4, kind: input, shape index: {}]   ;;  %s8616_s5 = inlined_call_operand.vmem [shape: bf16[1024,256], index: 5, kind: input, shape index: {}]   ;;  %s8617_s6 = inlined_call_operand.vmem [shape: f32[1,256], index: 6, kind: input, shape index: {}, may-alias: {2,6}]   ;;  %s8618_s7 = inlined_call_operand.vmem [shape: f32[256,256], index: 7, kind: output, shape index: {}]  }
   0x1 LB: > { %s4512_s25 = sadd.s32 4294967295, %s5438_s24   ;;  %p4516_p0 = scmp.ge.s32.totalorder %s5438_s24, 1  ;;  %s5438_s24 = sphi %s5480_s24, %s17_s24  }
   0x2   : > { %p239_p1 = scmp.lt.s32.totalorder %s5438_s24, 3 }
   0x4   : > { %p240_p2 = pnand %p4516_p0, %p239_p1 }
   0x6   : > { %243 = sbr.rel (%p240_p2) target bundleno = 1138 (0x472), region = 48 }
   0xd   : > { %s4517_s26 = sshll.u32 %s4512_s25, 4  ;;  %v680_v48 = vld [vmem:[%s8614_s3] sm:$0xff] }
   0xe   : > { %p274_p3 = scmp.lt.s32.totalorder %s4517_s26, 31  ;;  %v684_v49 = vld [vmem:[%s8614_s3 + $0x20] sm:$0xff] }
   0xf   : > { %v688_v50 = vld [vmem:[%s8614_s3 + $0x40] sm:$0xff]  ;;  %v4524_v51 = vcombine.high %v680_v48, %v684_v49  ;;  %v4523_v52 = vcombine.low %v680_v48, %v684_v49 }
  0x10   : > { %s8684_s26 = smov (!%p274_p3, %s4517_s26), 31  ;;  %v692_v53 = vld [vmem:[%s8614_s3 + $0x60] sm:$0xff] }
  0x11   : > { %s4781_s27 = sshll.u32 %s8684_s26, 4  ;;  %v4532_v54 = vcombine.high %v688_v50, %v692_v53  ;;  %v696_v55 = vld [vmem:[%s8614_s3 + $0x80] sm:$0xff]  ;;  %1490 = vmatprep.subr.bf16.mxu1 %v4524_v51  ;;  %v4531_v57 = vcombine.low %v688_v50, %v692_v53 }
  0x12   : > { %s5496_s30 = scalar_lea.vmem %s8611_s0, %s4781_s27  ;;  %v700_v56 = vld [vmem:[%s8614_s3 + $0xa0] sm:$0xff]  ;;  %1491 = vmatpush1.bf16.msra.mxu1 %v4523_v52  ;;  %s8511_s19 = scalar_lea.vmem %s8618_s7, %s4781_s27 }
  0x13   : > { %v5499_v0 = vld [vmem:[%s5496_s30] sm:$0xff]  ;;  %v5502_v1 = vld [vmem:[%s5496_s30 + $0x8] sm:$0xff]  ;;  %v5513_v5 = vld [vmem:[%s5496_s30 + $0x10] sm:$0xff]  ;;  %1492 = vmatprep.subr.bf16.mxu1 %v4532_v54  ;;  %v4540_v58 = vcombine.high %v696_v55, %v700_v56  ;;  %v4539_v61 = vcombine.low %v696_v55, %v700_v56 }
  0x14   : > { %v5505_v2 = vld [vmem:[%s5496_s30 + $0x20] sm:$0xff]  ;;  %v319_v3 = vadd.f32 %v5502_v1, %v5499_v0  ;;  %v5510_v4 = vld [vmem:[%s5496_s30 + $0x28] sm:$0xff]  ;;  %v5516_v6 = vld [vmem:[%s5496_s30 + $0x18] sm:$0xff] }
  0x15   : > { %v325_v7 = vadd.f32 %v5510_v4, %v5505_v2  ;;  %v5521_v8 = vld [vmem:[%s5496_s30 + $0x30] sm:$0xff]  ;;  %v5524_v9 = vld [vmem:[%s5496_s30 + $0x38] sm:$0xff]  ;;  %v322_v10 = vadd.f32 %v5516_v6, %v5513_v5  ;;  %v5531_v12 = vld [vmem:[%s5496_s30 + $0x40] sm:$0xff] }
  0x16   : > { %320 = vadd.xlane.f32.xlu0 %v319_v3  ;;  %v328_v11 = vadd.f32 %v5524_v9, %v5521_v8  ;;  %v5534_v13 = vld [vmem:[%s5496_s30 + $0x48] sm:$0xff]  ;;  %v5537_v14 = vld [vmem:[%s5496_s30 + $0x50] sm:$0xff]  ;;  %v5540_v15 = vld [vmem:[%s5496_s30 + $0x58] sm:$0xff]  ;;  %1493 = vmatpush1.bf16.msra.mxu1 %v4531_v57 }
  0x17   : > { %326 = vadd.xlane.f32.xlu1 %v325_v7  ;;  %v331_v16 = vadd.f32 %v5534_v13, %v5531_v12  ;;  %v334_v17 = vadd.f32 %v5540_v15, %v5537_v14  ;;  %v5547_v18 = vld [vmem:[%s5496_s30 + $0x60] sm:$0xff]  ;;  %v5550_v19 = vld [vmem:[%s5496_s30 + $0x68] sm:$0xff]  ;;  %v5553_v20 = vld [vmem:[%s5496_s30 + $0x70] sm:$0xff]  ;;  %1494 = vmatprep.subr.bf16.mxu1 %v4540_v58 }
  0x18   : > { %v5556_v21 = vld [vmem:[%s5496_s30 + $0x78] sm:$0xff]  ;;  %v5559_v22 = vld [vmem:[%s5496_s30 + $0x80] sm:$0xff]  ;;  %v5562_v23 = vld [vmem:[%s5496_s30 + $0x88] sm:$0xff]  ;;  %v337_v24 = vadd.f32 %v5550_v19, %v5547_v18 }
  0x19   : > { %v5567_v25 = vld [vmem:[%s5496_s30 + $0x90] sm:$0xff]  ;;  %v5570_v26 = vld [vmem:[%s5496_s30 + $0x98] sm:$0xff]  ;;  %v340_v27 = vadd.f32 %v5556_v21, %v5553_v20  ;;  %v5575_v28 = vld [vmem:[%s5496_s30 + $0xa0] sm:$0xff]  ;;  %v343_v30 = vadd.f32 %v5562_v23, %v5559_v22 }
  0x1a   : > { %323 = vadd.xlane.f32.xlu0 %v322_v10  ;;  %v5578_v29 = vld [vmem:[%s5496_s30 + $0xa8] sm:$0xff]  ;;  %v5583_v31 = vld [vmem:[%s5496_s30 + $0xb0] sm:$0xff]  ;;  %v5586_v32 = vld [vmem:[%s5496_s30 + $0xb8] sm:$0xff]  ;;  %v346_v33 = vadd.f32 %v5570_v26, %v5567_v25  ;;  %1495 = vmatpush1.bf16.msra.mxu1 %v4539_v61 }
  0x1b   : > { %329 = vadd.xlane.f32.xlu1 %v328_v11  ;;  %v5591_v34 = vld [vmem:[%s5496_s30 + $0xc0] sm:$0xff]  ;;  %v5594_v35 = vld [vmem:[%s5496_s30 + $0xc8] sm:$0xff]  ;;  %v349_v36 = vadd.f32 %v5578_v29, %v5575_v28  ;;  %v5599_v37 = vld [vmem:[%s5496_s30 + $0xd0] sm:$0xff]  ;;  %v352_v39 = vadd.f32 %v5586_v32, %v5583_v31 }
  0x1c   : > { %v5602_v38 = vld [vmem:[%s5496_s30 + $0xd8] sm:$0xff]  ;;  %v5607_v40 = vld [vmem:[%s5496_s30 + $0xe0] sm:$0xff]  ;;  %v5610_v41 = vld [vmem:[%s5496_s30 + $0xe8] sm:$0xff]  ;;  %v355_v42 = vadd.f32 %v5594_v35, %v5591_v34 }
  0x1d   : > { %v5615_v43 = vld [vmem:[%s5496_s30 + $0xf0] sm:$0xff]  ;;  %v5618_v44 = vld [vmem:[%s5496_s30 + $0xf8] sm:$0xff]  ;;  %v358_v45 = vadd.f32 %v5602_v38, %v5599_v37  ;;  %v361_v46 = vadd.f32 %v5610_v41, %v5607_v40  ;;  %v704_v59 = vld [vmem:[%s8614_s3 + $0xc0] sm:$0xff] }
  0x1e   : > { %332 = vadd.xlane.f32.xlu0 %v331_v16  ;;  %v364_v47 = vadd.f32 %v5618_v44, %v5615_v43  ;;  %v708_v60 = vld [vmem:[%s8614_s3 + $0xe0] sm:$0xff] }
  0x1f   : > { %335 = vadd.xlane.f32.xlu1 %v334_v17  ;;  %v4548_v62 = vcombine.high %v704_v59, %v708_v60  ;;  %v712_v63 = vld [vmem:[%s8614_s3 + $0x100] sm:$0xff]  ;;  %v4547_v7 = vcombine.low %v704_v59, %v708_v60 }
  0x20   : > { %v716_v3 = vld [vmem:[%s8614_s3 + $0x120] sm:$0xff] }
  0x21   : > { %1496 = vmatprep.subr.bf16.mxu1 %v4548_v62  ;;  %v4556_v10 = vcombine.high %v712_v63, %v716_v3  ;;  %v720_v11 = vld [vmem:[%s8614_s3 + $0x140] sm:$0xff]  ;;  %v4555_v17 = vcombine.low %v712_v63, %v716_v3 }
  0x22   : > { %338 = vadd.xlane.f32.xlu0 %v337_v24  ;;  %v724_v16 = vld [vmem:[%s8614_s3 + $0x160] sm:$0xff]  ;;  %1497 = vmatpush1.bf16.msra.mxu1 %v4547_v7 }
  0x23   : > { %341 = vadd.xlane.f32.xlu1 %v340_v27  ;;  %1498 = vmatprep.subr.bf16.mxu1 %v4556_v10  ;;  %v4564_v24 = vcombine.high %v720_v11, %v724_v16  ;;  %v728_v27 = vld [vmem:[%s8614_s3 + $0x180] sm:$0xff] }
  0x24   : > { %v748_v48 = vld [vmem:[%s8614_s3 + $0x220] sm:$0xff] }
  0x25   : > { %v5683_v51 = vld [vmem:[%s8614_s3 + $0x240] sm:$0xff] }
  0x26   : > { %344 = vadd.xlane.f32.xlu0 %v343_v30  ;;  %v732_v30 = vld [vmem:[%s8614_s3 + $0x1a0] sm:$0xff]  ;;  %1499 = vmatpush1.bf16.msra.mxu1 %v4555_v17 }
  0x27   : > { %347 = vadd.xlane.f32.xlu1 %v346_v33  ;;  %v4563_v33 = vcombine.low %v720_v11, %v724_v16  ;;  %1500 = vmatprep.subr.bf16.mxu1 %v4564_v24  ;;  %v5688_v52 = vld [vmem:[%s8614_s3 + $0x260] sm:$0xff] }
  0x28   : > { %v4596_v54 = vcombine.high %v5683_v51, %v5688_v52 }
  0x2a   : > { %350 = vadd.xlane.f32.xlu0 %v349_v36  ;;  %v4572_v36 = vcombine.high %v728_v27, %v732_v30  ;;  %1501 = vmatpush1.bf16.msra.mxu1 %v4563_v33 }
  0x2b   : > { %353 = vadd.xlane.f32.xlu1 %v352_v39  ;;  %v736_v39 = vld [vmem:[%s8614_s3 + $0x1c0] sm:$0xff] }
  0x2c   : > { %1502 = vmatprep.subr.bf16.mxu1 %v4572_v36 }
  0x2e   : > { %356 = vadd.xlane.f32.xlu0 %v355_v42  ;;  %v740_v42 = vld [vmem:[%s8614_s3 + $0x1e0] sm:$0xff] }
  0x2f   : > { %359 = vadd.xlane.f32.xlu1 %v358_v45  ;;  %v4571_v45 = vcombine.low %v728_v27, %v732_v30  ;;  %v4579_v49 = vcombine.low %v736_v39, %v740_v42 }
  0x31   : > { %1503 = vmatpush1.bf16.msra.mxu1 %v4571_v45 }
  0x32   : > { %362 = vadd.xlane.f32.xlu0 %v361_v46  ;;  %v4580_v46 = vcombine.high %v736_v39, %v740_v42 }
  0x33   : > { %365 = vadd.xlane.f32.xlu1 %v364_v47  ;;  %v744_v47 = vld [vmem:[%s8614_s3 + $0x200] sm:$0xff] }
  0x34   : > { %1504 = vmatprep.subr.bf16.mxu1 %v4580_v46  ;;  %v4588_v50 = vcombine.high %v744_v47, %v748_v48  ;;  %v4587_v53 = vcombine.low %v744_v47, %v748_v48 }
  0x35   : > { %1505 = vmatpush1.bf16.msra.mxu1 %v4579_v49 }
  0x36   : > { %1506 = vmatprep.subr.bf16.mxu1 %v4588_v50 }
  0x39   : > { %1507 = vmatpush1.bf16.msra.mxu1 %v4587_v53 }
  0x3a   : > { %1508 = vmatprep.subr.bf16.mxu1 %v4596_v54 }
  0xa3   : > { %v321_v55 = vpop.xlane.xlu0 %320 }
  0xa4   : > { %v368_v56 = vmul.f32 0.00390625, %v321_v55  ;;  %v327_v57 = vpop.xlane.xlu1 %326 }
  0xa5   : > { %v370_v58 = vmul.f32 0.00390625, %v327_v57 }
  0xa6   : > { %v5693_v59 = vsub.f32 %v5499_v0, %v368_v56  ;;  %v5696_v60 = vsub.f32 %v5502_v1, %v368_v56 }
  0xa7   : > { %v5699_v61 = vsub.f32 %v5505_v2, %v370_v58  ;;  %v5702_v62 = vsub.f32 %v5510_v4, %v370_v58  ;;  %v324_v63 = vpop.xlane.xlu0 %323 }
  0xa8   : > { %v369_v3 = vmul.f32 0.00390625, %v324_v63  ;;  %v330_v7 = vpop.xlane.xlu1 %329  ;;  %v416_v10 = vmul.f32 %v5693_v59, %v5693_v59  ;;  %v417_v11 = vmul.f32 %v5696_v60, %v5696_v60 }
  0xa9   : > { %v371_v0 = vmul.f32 0.00390625, %v330_v7  ;;  %v420_v1 = vmul.f32 %v5699_v61, %v5699_v61  ;;  %v421_v2 = vmul.f32 %v5702_v62, %v5702_v62 }
  0xaa   : > { %v5713_v16 = vsub.f32 %v5513_v5, %v369_v3  ;;  %v5716_v4 = vsub.f32 %v5516_v6, %v369_v3  ;;  %v448_v17 = vadd.f32 %v417_v11, %v416_v10 }
  0xab   : > { %v5719_v24 = vsub.f32 %v5521_v8, %v371_v0  ;;  %v5722_v27 = vsub.f32 %v5524_v9, %v371_v0  ;;  %v333_v30 = vpop.xlane.xlu0 %332  ;;  %v454_v39 = vadd.f32 %v421_v2, %v420_v1 }
  0xac   : > { %v372_v33 = vmul.f32 0.00390625, %v333_v30  ;;  %449 = vadd.xlane.f32.xlu0 %v448_v17  ;;  %v336_v36 = vpop.xlane.xlu1 %335  ;;  %v418_v42 = vmul.f32 %v5713_v16, %v5713_v16  ;;  %v419_v5 = vmul.f32 %v5716_v4, %v5716_v4 }
  0xad   : > { %v373_v6 = vmul.f32 0.00390625, %v336_v36  ;;  %v422_v45 = vmul.f32 %v5719_v24, %v5719_v24  ;;  %v423_v8 = vmul.f32 %v5722_v27, %v5722_v27 }
  0xae   : > { %v5733_v9 = vsub.f32 %v5531_v12, %v372_v33  ;;  %v5736_v46 = vsub.f32 %v5534_v13, %v372_v33  ;;  %v451_v47 = vadd.f32 %v419_v5, %v418_v42 }
  0xaf   : > { %v5739_v48 = vsub.f32 %v5537_v14, %v373_v6  ;;  %v5742_v49 = vsub.f32 %v5540_v15, %v373_v6  ;;  %v339_v50 = vpop.xlane.xlu0 %338  ;;  %v457_v55 = vadd.f32 %v423_v8, %v422_v45 }
  0xb0   : > { %v374_v53 = vmul.f32 0.00390625, %v339_v50  ;;  %455 = vadd.xlane.f32.xlu0 %v454_v39  ;;  %452 = vadd.xlane.f32.xlu1 %v451_v47  ;;  %v342_v54 = vpop.xlane.xlu1 %341  ;;  %v424_v12 = vmul.f32 %v5733_v9, %v5733_v9  ;;  %v425_v13 = vmul.f32 %v5736_v46, %v5736_v46  ;;  %v4595_v47 = vcombine.low %v5683_v51, %v5688_v52  ;;  %v760_v51 = vld [vmem:[%s8614_s3 + $0x280] sm:$0xff] }
  0xb1   : > { %v375_v56 = vmul.f32 0.00390625, %v342_v54  ;;  %v426_v14 = vmul.f32 %v5739_v48, %v5739_v48  ;;  %v427_v15 = vmul.f32 %v5742_v49, %v5742_v49 }
  0xb2   : > { %v5753_v57 = vsub.f32 %v5547_v18, %v374_v53  ;;  %v5756_v58 = vsub.f32 %v5550_v19, %v374_v53  ;;  %v460_v63 = vadd.f32 %v425_v13, %v424_v12  ;;  %1509 = vmatpush1.bf16.msra.mxu1 %v4595_v47 }
  0xb3   : > { %v5759_v3 = vsub.f32 %v5553_v20, %v375_v56  ;;  %v5762_v7 = vsub.f32 %v5556_v21, %v375_v56  ;;  %v345_v10 = vpop.xlane.xlu0 %344  ;;  %v463_v1 = vadd.f32 %v427_v15, %v426_v14 }
  0xb4   : > { %v376_v11 = vmul.f32 0.00390625, %v345_v10  ;;  %458 = vadd.xlane.f32.xlu1 %v457_v55  ;;  %461 = vadd.xlane.f32.xlu0 %v460_v63  ;;  %v348_v0 = vpop.xlane.xlu1 %347  ;;  %v428_v18 = vmul.f32 %v5753_v57, %v5753_v57  ;;  %v429_v19 = vmul.f32 %v5756_v58, %v5756_v58 }
  0xb5   : > { %v377_v2 = vmul.f32 0.00390625, %v348_v0  ;;  %v430_v20 = vmul.f32 %v5759_v3, %v5759_v3  ;;  %v431_v21 = vmul.f32 %v5762_v7, %v5762_v7 }
  0xb6   : > { %v5773_v17 = vsub.f32 %v5559_v22, %v376_v11  ;;  %v5776_v30 = vsub.f32 %v5562_v23, %v376_v11  ;;  %v466_v33 = vadd.f32 %v429_v19, %v428_v18 }
  0xb7   : > { %v5779_v36 = vsub.f32 %v5567_v25, %v377_v2  ;;  %v5782_v39 = vsub.f32 %v5570_v26, %v377_v2  ;;  %v351_v42 = vpop.xlane.xlu0 %350  ;;  %v469_v45 = vadd.f32 %v431_v21, %v430_v20 }
  0xb8   : > { %v378_v5 = vmul.f32 0.00390625, %v351_v42  ;;  %464 = vadd.xlane.f32.xlu1 %v463_v1  ;;  %467 = vadd.xlane.f32.xlu0 %v466_v33  ;;  %v354_v6 = vpop.xlane.xlu1 %353  ;;  %v432_v22 = vmul.f32 %v5773_v17, %v5773_v17  ;;  %v433_v23 = vmul.f32 %v5776_v30, %v5776_v30 }
  0xb9   : > { %v379_v8 = vmul.f32 0.00390625, %v354_v6  ;;  %v434_v25 = vmul.f32 %v5779_v36, %v5779_v36  ;;  %v435_v26 = vmul.f32 %v5782_v39, %v5782_v39 }
  0xba   : > { %v5795_v50 = vsub.f32 %v5575_v28, %v378_v5  ;;  %v5798_v53 = vsub.f32 %v5578_v29, %v378_v5  ;;  %v472_v54 = vadd.f32 %v433_v23, %v432_v22  ;;  %v764_v28 = vld [vmem:[%s8614_s3 + $0x2a0] sm:$0xff] }
  0xbb   : > { %v5801_v55 = vsub.f32 %v5583_v31, %v379_v8  ;;  %v5804_v12 = vsub.f32 %v5586_v32, %v379_v8  ;;  %v357_v13 = vpop.xlane.xlu0 %356  ;;  %v475_v56 = vadd.f32 %v435_v26, %v434_v25  ;;  %v4604_v14 = vcombine.high %v760_v51, %v764_v28 }
  0xbc   : > { %v380_v29 = vmul.f32 0.00390625, %v357_v13  ;;  %470 = vadd.xlane.f32.xlu1 %v469_v45  ;;  %473 = vadd.xlane.f32.xlu0 %v472_v54  ;;  %v360_v52 = vpop.xlane.xlu1 %359  ;;  %v436_v31 = vmul.f32 %v5795_v50, %v5795_v50  ;;  %v437_v32 = vmul.f32 %v5798_v53, %v5798_v53  ;;  %v4603_v18 = vcombine.low %v760_v51, %v764_v28 }
  0xbd   : > { %v381_v15 = vmul.f32 0.00390625, %v360_v52  ;;  %v438_v63 = vmul.f32 %v5801_v55, %v5801_v55  ;;  %v439_v10 = vmul.f32 %v5804_v12, %v5804_v12  ;;  %1510 = vmatprep.subr.bf16.mxu1 %v4604_v14  ;;  %v788_v14 = vld [vmem:[%s8614_s3 + $0x360] sm:$0xff] }
  0xbe   : > { %v5821_v11 = vsub.f32 %v5591_v34, %v380_v29  ;;  %v5824_v0 = vsub.f32 %v5594_v35, %v380_v29  ;;  %v478_v1 = vadd.f32 %v437_v32, %v436_v31  ;;  %1511 = vmatpush1.bf16.msra.mxu1 %v4603_v18  ;;  %v784_v32 = vld [vmem:[%s8614_s3 + $0x340] sm:$0xff] }
  0xbf   : > { %v5827_v19 = vsub.f32 %v5599_v37, %v381_v15  ;;  %v5830_v2 = vsub.f32 %v5602_v38, %v381_v15  ;;  %v363_v20 = vpop.xlane.xlu0 %362  ;;  %v481_v42 = vadd.f32 %v439_v10, %v438_v63  ;;  %v768_v37 = vld [vmem:[%s8614_s3 + $0x2c0] sm:$0xff]  ;;  %v4628_v15 = vcombine.high %v784_v32, %v788_v14 }
  0xc0   : > { %v382_v21 = vmul.f32 0.00390625, %v363_v20  ;;  %476 = vadd.xlane.f32.xlu1 %v475_v56  ;;  %479 = vadd.xlane.f32.xlu0 %v478_v1  ;;  %v366_v33 = vpop.xlane.xlu1 %365  ;;  %v440_v34 = vmul.f32 %v5821_v11, %v5821_v11  ;;  %v441_v35 = vmul.f32 %v5824_v0, %v5824_v0  ;;  %v772_v38 = vld [vmem:[%s8614_s3 + $0x2e0] sm:$0xff]  ;;  %v4627_v63 = vcombine.low %v784_v32, %v788_v14 }
  0xc1   : > { %v383_v5 = vmul.f32 0.00390625, %v366_v33  ;;  %v442_v6 = vmul.f32 %v5827_v19, %v5827_v19  ;;  %v443_v45 = vmul.f32 %v5830_v2, %v5830_v2  ;;  %v4612_v22 = vcombine.high %v768_v37, %v772_v38  ;;  %v792_v10 = vld [vmem:[%s8614_s3 + $0x380] sm:$0xff] }
  0xc2   : > { %v5847_v23 = vsub.f32 %v5607_v40, %v382_v21  ;;  %v5850_v8 = vsub.f32 %v5610_v41, %v382_v21  ;;  %v484_v25 = vadd.f32 %v441_v35, %v440_v34  ;;  %v4611_v26 = vcombine.low %v768_v37, %v772_v38  ;;  %v776_v41 = vld [vmem:[%s8614_s3 + $0x300] sm:$0xff]  ;;  %v5893_v35 = vld [vmem:[%s8614_s3 + $0x8] sm:$0xff] }
  0xc3   : > { %v5853_v47 = vsub.f32 %v5615_v43, %v383_v5  ;;  %v5856_v54 = vsub.f32 %v5618_v44, %v383_v5  ;;  %1512 = vmatprep.subr.bf16.mxu1 %v4612_v22  ;;  %v487_v13 = vadd.f32 %v443_v45, %v442_v6  ;;  %v780_v43 = vld [vmem:[%s8614_s3 + $0x320] sm:$0xff]  ;;  %v5898_v37 = vld [vmem:[%s8614_s3 + $0x28] sm:$0xff] }
  0xc4   : > { %482 = vadd.xlane.f32.xlu1 %v481_v42  ;;  %485 = vadd.xlane.f32.xlu0 %v484_v25  ;;  %v444_v56 = vmul.f32 %v5847_v23, %v5847_v23  ;;  %v445_v40 = vmul.f32 %v5850_v8, %v5850_v8  ;;  %v4620_v28 = vcombine.high %v776_v41, %v780_v43  ;;  %v796_v1 = vld [vmem:[%s8614_s3 + $0x3a0] sm:$0xff] }
  0xc5   : > { %v446_v44 = vmul.f32 %v5853_v47, %v5853_v47  ;;  %v447_v51 = vmul.f32 %v5856_v54, %v5856_v54  ;;  %1513 = vmatpush1.bf16.msra.mxu1 %v4611_v26  ;;  %v4619_v52 = vcombine.low %v776_v41, %v780_v43  ;;  %v4636_v18 = vcombine.high %v792_v10, %v796_v1  ;;  %v800_v21 = vld [vmem:[%s8614_s3 + $0x3c0] sm:$0xff] }
  0xc6   : > { %v490_v29 = vadd.f32 %v445_v40, %v444_v56  ;;  %1514 = vmatprep.subr.bf16.mxu1 %v4620_v28  ;;  %v4635_v20 = vcombine.low %v792_v10, %v796_v1  ;;  %v804_v33 = vld [vmem:[%s8614_s3 + $0x3e0] sm:$0xff]  ;;  %v4526_v38 = vcombine.high %v5893_v35, %v5898_v37  ;;  %v4525_v5 = vcombine.low %v5893_v35, %v5898_v37  ;;  %v705_v35 = vld [vmem:[%s8614_s3 + $0xc8] sm:$0xff] }
  0xc7   : > { %v493_v31 = vadd.f32 %v447_v51, %v446_v44  ;;  %v4644_v42 = vcombine.high %v800_v21, %v804_v33  ;;  %v4643_v34 = vcombine.low %v800_v21, %v804_v33  ;;  %v576_v1 = vld [vmem:[%s8612_s1] sm:$0x3]  ;;  %v709_v37 = vld [vmem:[%s8614_s3 + $0xe8] sm:$0xff] }
  0xc8   : > { %488 = vadd.xlane.f32.xlu1 %v487_v13  ;;  %491 = vadd.xlane.f32.xlu0 %v490_v29  ;;  %v578_v13 = vlaneseq }
  0xc9   : > { %1515 = vmatpush1.bf16.msra.mxu1 %v4619_v52 }
  0xca   : > { %1516 = vmatprep.subr.bf16.mxu1 %v4628_v15  ;;  %v5904_v28 = vshrl.u32 %v578_v13, 7 }
  0xcc   : > { %494 = vadd.xlane.f32.xlu1 %v493_v31  ;;  %8630 = vst [vmem:[#allocation2_spill] sm:$0xff] %v5904_v28 }
  0xcd   : > { %1517 = vmatpush1.bf16.msra.mxu1 %v4627_v63  ;;  %v5907_v63 = vsub.s32 1, %v5904_v28 }
  0xce   : > { %1518 = vmatprep.subr.bf16.mxu1 %v4636_v18  ;;  %v5913_v18 = vsub.s32 0, %v5904_v28 }
  0xcf   : > { %8631 = vst [vmem:[#allocation3_spill] sm:$0xff] %v5907_v63 }
  0xd0   : > { %8632 = vst [vmem:[#allocation4_spill] sm:$0xff] %v5913_v18 }
  0xd1   : > { %1519 = vmatpush1.bf16.msra.mxu1 %v4635_v20 }
  0xd2   : > { %1520 = vmatprep.subr.bf16.mxu1 %v4644_v42 }
  0xd5   : > { %1521 = vmatpush1.bf16.msra.mxu1 %v4643_v34 }
  0xd6   : > { %1603 = vmatprep.subr.bf16.mxu1 %v4526_v38  ;;  %v5917_v38 = vrot.slane %v576_v1, %v5907_v63 }
 0x139   : > { %v450_v6 = vpop.xlane.xlu0 %449 }
 0x13a   : > { %v496_v45 = vmul.f32 0.00390625, %v450_v6  ;;  %v620_v6 = vld [vmem:[%s8613_s2] sm:$0x3] }
 0x13c   : > { %v512_v22 = vadd.f32 1e-05, %v496_v45 }
 0x13d   : > { %v453_v25 = vpop.xlane.xlu1 %452  ;;  %v456_v26 = vpop.xlane.xlu0 %455 }
 0x13e   : > { %5111 = vrsqrt.f32 %v512_v22  ;;  %v497_v56 = vmul.f32 0.00390625, %v453_v25  ;;  %v498_v40 = vmul.f32 0.00390625, %v456_v26  ;;  %v5924_v25 = vrot.slane %v576_v1, %v5913_v18 }
 0x140   : > { %v513_v41 = vadd.f32 1e-05, %v497_v56  ;;  %v514_v43 = vadd.f32 1e-05, %v498_v40 }
 0x141   : > { %v459_v44 = vpop.xlane.xlu1 %458  ;;  %v462_v51 = vpop.xlane.xlu0 %461 }
 0x142   : > { %5113 = vrsqrt.f32 %v513_v41  ;;  %v499_v29 = vmul.f32 0.00390625, %v459_v44  ;;  %v500_v52 = vmul.f32 0.00390625, %v462_v51 }
 0x143   : > { %5115 = vrsqrt.f32 %v514_v43 }
 0x144   : > { %v515_v31 = vadd.f32 1e-05, %v499_v29  ;;  %v516_v32 = vadd.f32 1e-05, %v500_v52  ;;  %v5933_v29 = vrot.slane %v620_v6, %v5913_v18 }
 0x145   : > { %v465_v14 = vpop.xlane.xlu1 %464  ;;  %v468_v15 = vpop.xlane.xlu0 %467 }
 0x146   : > { %5117 = vrsqrt.f32 %v515_v31  ;;  %v501_v10 = vmul.f32 0.00390625, %v465_v14  ;;  %v502_v20 = vmul.f32 0.00390625, %v468_v15 }
 0x147   : > { %5119 = vrsqrt.f32 %v516_v32 }
 0x148   : > { %v5112_v21 = vpop.eup %5111  ;;  %v517_v33 = vadd.f32 1e-05, %v501_v10  ;;  %v518_v26 = vadd.f32 1e-05, %v502_v20 }
 0x149   : > { %v545_v42 = vmul.f32 %v5112_v21, %v5696_v60  ;;  %v471_v34 = vpop.xlane.xlu1 %470  ;;  %v544_v45 = vmul.f32 %v5112_v21, %v5693_v59  ;;  %v474_v13 = vpop.xlane.xlu0 %473  ;;  %v5927_v60 = vrot.slane %v620_v6, %v5907_v63 }
 0x14a   : > { %5121 = vrsqrt.f32 %v517_v33  ;;  %v503_v22 = vmul.f32 0.00390625, %v471_v34  ;;  %v504_v52 = vmul.f32 0.00390625, %v474_v13  ;;  %v693_v34 = vld [vmem:[%s8614_s3 + $0x68] sm:$0xff] }
 0x14b   : > { %v589_v59 = vmul.f32 %v5917_v38, %v545_v42  ;;  %v588_v32 = vmul.f32 %v5924_v25, %v544_v45 }
 0x14c   : > { %v5114_v56 = vpop.eup %5113  ;;  %v519_v40 = vadd.f32 1e-05, %v503_v22  ;;  %v520_v6 = vadd.f32 1e-05, %v504_v52 }
 0x14d   : > { %v5116_v41 = vpop.eup %5115  ;;  %v546_v43 = vmul.f32 %v5114_v56, %v5713_v16  ;;  %v547_v44 = vmul.f32 %v5114_v56, %v5716_v4  ;;  %v477_v51 = vpop.xlane.xlu1 %476  ;;  %v633_v33 = vadd.f32 %v5927_v60, %v589_v59  ;;  %v632_v22 = vadd.f32 %v5933_v29, %v588_v32 }
 0x14e   : > { %5123 = vrsqrt.f32 %v519_v40  ;;  %v505_v31 = vmul.f32 0.00390625, %v477_v51  ;;  %v549_v14 = vmul.f32 %v5116_v41, %v5702_v62  ;;  %v689_v62 = vld [vmem:[%s8614_s3 + $0x48] sm:$0xff] }
 0x14f   : > { %5125 = vrsqrt.f32 %v518_v26  ;;  %v591_v15 = vmul.f32 %v5917_v38, %v547_v44  ;;  %v590_v16 = vmul.f32 %v5924_v25, %v546_v43  ;;  %v480_v43 = vpop.xlane.xlu0 %479  ;;  %v4534_v51 = vcombine.high %v689_v62, %v693_v34 }
 0x150   : > { %v5118_v10 = vpop.eup %5117  ;;  %v521_v4 = vadd.f32 1e-05, %v505_v31  ;;  %v593_v13 = vmul.f32 %v5917_v38, %v549_v14  ;;  %v506_v32 = vmul.f32 0.00390625, %v480_v43 }
 0x151   : > { %v5120_v1 = vpop.eup %5119  ;;  %v550_v20 = vmul.f32 %v5118_v10, %v5719_v24  ;;  %v551_v21 = vmul.f32 %v5118_v10, %v5722_v27  ;;  %v635_v42 = vadd.f32 %v5927_v60, %v591_v15  ;;  %v483_v45 = vpop.xlane.xlu1 %482  ;;  %v548_v24 = vmul.f32 %v5116_v41, %v5699_v61  ;;  %v697_v41 = vld [vmem:[%s8614_s3 + $0x88] sm:$0xff] }
 0x152   : > { %v634_v27 = vadd.f32 %v5933_v29, %v590_v16  ;;  %v553_v40 = vmul.f32 %v5120_v1, %v5736_v46  ;;  %5127 = vrsqrt.f32 %v521_v4  ;;  %v507_v52 = vmul.f32 0.00390625, %v483_v45  ;;  %v701_v46 = vld [vmem:[%s8614_s3 + $0xa8] sm:$0xff] }
 0x153   : > { %v5951_v26 = vpack.c.bf16 %v635_v42, %v633_v33  ;;  %v595_v44 = vmul.f32 %v5917_v38, %v551_v21  ;;  %v594_v31 = vmul.f32 %v5924_v25, %v550_v20  ;;  %5129 = vrsqrt.f32 %v520_v6 }
 0x154   : > { %v5122_v56 = vpop.eup %5121  ;;  %v5959_v61 = vpack.c.bf16 %v634_v27, %v632_v22  ;;  %v592_v15 = vmul.f32 %v5924_v25, %v548_v24  ;;  %v4533_v10 = vcombine.low %v689_v62, %v693_v34  ;;  %v4542_v4 = vcombine.high %v697_v41, %v701_v46 }
 0x155   : > { %v555_v59 = vmul.f32 %v5122_v56, %v5742_v49  ;;  %1522 = vmatprep.mubr.bf16.mxu1 %v5951_v26  ;;  %v637_v49 = vadd.f32 %v5927_v60, %v593_v13  ;;  %v639_v14 = vadd.f32 %v5927_v60, %v595_v44  ;;  %v597_v21 = vmul.f32 %v5917_v38, %v553_v40  ;;  %v489_v62 = vpop.xlane.xlu1 %488 }
 0x156   : > { %1523 = vmatmul.mubr.bf16.vlgmr.msra.gmra.mrb[0].mxu1 %v5959_v61  ;;  %v554_v42 = vmul.f32 %v5122_v56, %v5739_v48  ;;  %v523_v6 = vadd.f32 1e-05, %v507_v52  ;;  %v638_v22 = vadd.f32 %v5933_v29, %v594_v31  ;;  %v552_v34 = vmul.f32 %v5120_v1, %v5733_v9  ;;  %v486_v56 = vpop.xlane.xlu0 %485  ;;  %v717_v52 = vld [vmem:[%s8614_s3 + $0x128] sm:$0xff] }
 0x157   : > { %1604 = vmatpush1.bf16.msra.mxu1 %v4525_v5  ;;  %v599_v20 = vmul.f32 %v5917_v38, %v555_v59  ;;  %v5978_v45 = vpack.c.bf16 %v639_v14, %v637_v49  ;;  %v522_v48 = vadd.f32 1e-05, %v506_v32  ;;  %v636_v24 = vadd.f32 %v5933_v29, %v592_v15 }
 0x158   : > { %v5124_v16 = vpop.eup %5123  ;;  %1605 = vmatprep.subr.bf16.mxu1 %v4534_v51  ;;  %v4541_v40 = vcombine.low %v697_v41, %v701_v46  ;;  %v641_v43 = vadd.f32 %v5927_v60, %v597_v21  ;;  %v4550_v44 = vcombine.high %v705_v35, %v709_v37  ;;  %5131 = vrsqrt.f32 %v523_v6 }
 0x159   : > { %v5126_v33 = vpop.eup %5125  ;;  %v559_v5 = vmul.f32 %v5124_v16, %v5762_v7  ;;  %1532 = vmatprep.mubr.bf16.mxu1 %v5978_v45  ;;  %v643_v27 = vadd.f32 %v5927_v60, %v599_v20  ;;  %v509_v7 = vmul.f32 0.00390625, %v489_v62  ;;  %v5994_v51 = vpack.c.bf16 %v638_v22, %v636_v24  ;;  %v721_v20 = vld [vmem:[%s8614_s3 + $0x148] sm:$0xff]  ;;  %v495_v22 = vpop.xlane.xlu1 %494 }
 0x15a   : > { %v557_v13 = vmul.f32 %v5126_v33, %v5756_v58  ;;  %v598_v9 = vmul.f32 %v5924_v25, %v554_v42  ;;  %v713_v58 = vld [vmem:[%s8614_s3 + $0x108] sm:$0xff]  ;;  %5133 = vrsqrt.f32 %v522_v48  ;;  %v508_v46 = vmul.f32 0.00390625, %v486_v56  ;;  %v492_v62 = vpop.xlane.xlu0 %491 }
 0x15b   : > { %1606 = vmatpush1.bf16.msra.mxu1 %v4533_v10  ;;  %v5997_v59 = vpack.c.bf16 %v643_v27, %v641_v43  ;;  %v603_v41 = vmul.f32 %v5917_v38, %v559_v5  ;;  %v596_v31 = vmul.f32 %v5924_v25, %v552_v34  ;;  %v4549_v49 = vcombine.low %v705_v35, %v709_v37  ;;  %v725_v42 = vld [vmem:[%s8614_s3 + $0x168] sm:$0xff] }
 0x15c   : > { %1607 = vmatprep.subr.bf16.mxu1 %v4542_v4  ;;  %v5128_v1 = vpop.eup %5127  ;;  %v601_v14 = vmul.f32 %v5917_v38, %v557_v13  ;;  %v558_v15 = vmul.f32 %v5124_v16, %v5759_v3  ;;  %v525_v10 = vadd.f32 1e-05, %v509_v7  ;;  %v4558_v4 = vcombine.high %v713_v58, %v717_v52 }
 0x15d   : > { %v5130_v32 = vpop.eup %5129  ;;  %v642_v21 = vadd.f32 %v5933_v29, %v598_v9  ;;  %v563_v6 = vmul.f32 %v5128_v1, %v5782_v39  ;;  %v647_v35 = vadd.f32 %v5927_v60, %v603_v41  ;;  %v556_v3 = vmul.f32 %v5126_v33, %v5753_v57  ;;  %v729_v57 = vld [vmem:[%s8614_s3 + $0x188] sm:$0xff] }
 0x15e   : > { %1533 = vmatmul.mubr.bf16.gmra.mrb[4].mxu1 %v5994_v51  ;;  %v524_v16 = vadd.f32 1e-05, %v508_v46  ;;  %v640_v37 = vadd.f32 %v5933_v29, %v596_v31  ;;  %v561_v5 = vmul.f32 %v5130_v32, %v5776_v30  ;;  %v4557_v34 = vcombine.low %v713_v58, %v717_v52  ;;  %v733_v30 = vld [vmem:[%s8614_s3 + $0x1a8] sm:$0xff] }
 0x15f   : > { %1608 = vmatpush1.bf16.msra.mxu1 %v4541_v40  ;;  %1542 = vmatprep.mubr.bf16.mxu1 %v5997_v59  ;;  %v645_v48 = vadd.f32 %v5927_v60, %v601_v14  ;;  %v4566_v24 = vcombine.high %v721_v20, %v725_v42  ;;  %5135 = vrsqrt.f32 %v525_v10  ;;  %v511_v27 = vmul.f32 0.00390625, %v495_v22  ;;  %v741_v10 = vld [vmem:[%s8614_s3 + $0x1e8] sm:$0xff] }
 0x160   : > { %1609 = vmatprep.subr.bf16.mxu1 %v4550_v44  ;;  %v6024_v39 = vpack.c.bf16 %v642_v21, %v640_v37  ;;  %v602_v13 = vmul.f32 %v5924_v25, %v558_v15  ;;  %v607_v33 = vmul.f32 %v5917_v38, %v563_v6  ;;  %5137 = vrsqrt.f32 %v524_v16  ;;  %v737_v15 = vld [vmem:[%s8614_s3 + $0x1c8] sm:$0xff] }
 0x161   : > { %v6027_v56 = vpack.c.bf16 %v647_v35, %v645_v48  ;;  %v510_v43 = vmul.f32 0.00390625, %v492_v62  ;;  %v600_v44 = vmul.f32 %v5924_v25, %v556_v3  ;;  %v4565_v7 = vcombine.low %v721_v20, %v725_v42 }
 0x162   : > { %v5132_v40 = vpop.eup %5131  ;;  %v605_v9 = vmul.f32 %v5917_v38, %v561_v5  ;;  %v562_v52 = vmul.f32 %v5128_v1, %v5779_v36  ;;  %v527_v41 = vadd.f32 1e-05, %v511_v27  ;;  %v4574_v46 = vcombine.high %v729_v57, %v733_v30 }
 0x163   : > { %1610 = vmatpush1.bf16.msra.mxu1 %v4549_v49  ;;  %v646_v31 = vadd.f32 %v5933_v29, %v602_v13  ;;  %v567_v49 = vmul.f32 %v5132_v40, %v5804_v12  ;;  %v651_v14 = vadd.f32 %v5927_v60, %v607_v33  ;;  %v526_v36 = vadd.f32 1e-05, %v510_v43 }
 0x164   : > { %1611 = vmatprep.subr.bf16.mxu1 %v4558_v4  ;;  %v5134_v58 = vpop.eup %5133  ;;  %v560_v4 = vmul.f32 %v5130_v32, %v5773_v17  ;;  %v644_v1 = vadd.f32 %v5933_v29, %v600_v44  ;;  %v4573_v20 = vcombine.low %v729_v57, %v733_v30  ;;  %v649_v12 = vadd.f32 %v5927_v60, %v605_v9  ;;  %v745_v17 = vld [vmem:[%s8614_s3 + $0x208] sm:$0xff] }
 0x165   : > { %v565_v21 = vmul.f32 %v5134_v58, %v5798_v53  ;;  %5139 = vrsqrt.f32 %v527_v41  ;;  %v4582_v6 = vcombine.high %v737_v15, %v741_v10  ;;  %v606_v22 = vmul.f32 %v5924_v25, %v562_v52  ;;  %v749_v53 = vld [vmem:[%s8614_s3 + $0x228] sm:$0xff] }
 0x166   : > { %1543 = vmatmul.mubr.bf16.gmra.mrb[8].mxu1 %v6024_v39  ;;  %v6054_v42 = vpack.c.bf16 %v646_v31, %v644_v1  ;;  %v6057_v35 = vpack.c.bf16 %v651_v14, %v649_v12  ;;  %v611_v32 = vmul.f32 %v5917_v38, %v567_v49  ;;  %5141 = vrsqrt.f32 %v526_v36  ;;  %v753_v57 = vld [vmem:[%s8614_s3 + $0x248] sm:$0xff] }
 0x167   : > { %1612 = vmatpush1.bf16.msra.mxu1 %v4557_v34  ;;  %1552 = vmatprep.mubr.bf16.mxu1 %v6027_v56  ;;  %v604_v16 = vmul.f32 %v5924_v25, %v560_v4  ;;  %v4581_v37 = vcombine.low %v737_v15, %v741_v10  ;;  %v609_v5 = vmul.f32 %v5917_v38, %v565_v21  ;;  %v757_v30 = vld [vmem:[%s8614_s3 + $0x268] sm:$0xff] }
 0x168   : > { %1613 = vmatprep.subr.bf16.mxu1 %v4566_v24  ;;  %v566_v34 = vmul.f32 %v5132_v40, %v5801_v55  ;;  %v4590_v48 = vcombine.high %v745_v17, %v749_v53  ;;  %v650_v24 = vadd.f32 %v5933_v29, %v606_v22  ;;  %v655_v13 = vadd.f32 %v5927_v60, %v611_v32  ;;  %v769_v21 = vld [vmem:[%s8614_s3 + $0x2c8] sm:$0xff] }
 0x169   : > { %v5136_v3 = vpop.eup %5135  ;;  %v564_v33 = vmul.f32 %v5134_v58, %v5795_v50  ;;  %v648_v55 = vadd.f32 %v5933_v29, %v604_v16  ;;  %v4589_v43 = vcombine.low %v745_v17, %v749_v53  ;;  %v761_v50 = vld [vmem:[%s8614_s3 + $0x288] sm:$0xff]  ;;  %v4597_v31 = vcombine.low %v753_v57, %v757_v30 }
 0x16a   : > { %v5138_v62 = vpop.eup %5137  ;;  %v571_v27 = vmul.f32 %v5136_v3, %v5830_v2  ;;  %v653_v2 = vadd.f32 %v5927_v60, %v609_v5  ;;  %v610_v9 = vmul.f32 %v5924_v25, %v566_v34  ;;  %v570_v15 = vmul.f32 %v5136_v3, %v5827_v19 }
 0x16b   : > { %1614 = vmatpush1.bf16.msra.mxu1 %v4565_v7  ;;  %v569_v40 = vmul.f32 %v5138_v62, %v5824_v0  ;;  %v6084_v44 = vpack.c.bf16 %v650_v24, %v648_v55  ;;  %v4598_v7 = vcombine.high %v753_v57, %v757_v30  ;;  %v765_v0 = vld [vmem:[%s8614_s3 + $0x2a8] sm:$0xff]  ;;  %v568_v12 = vmul.f32 %v5138_v62, %v5821_v11 }
 0x16c   : > { %1615 = vmatprep.subr.bf16.mxu1 %v4574_v46  ;;  %v6087_v52 = vpack.c.bf16 %v655_v13, %v653_v2  ;;  %v615_v58 = vmul.f32 %v5917_v38, %v571_v27  ;;  %v608_v46 = vmul.f32 %v5924_v25, %v564_v33  ;;  %v4606_v10 = vcombine.high %v761_v50, %v765_v0  ;;  %v777_v11 = vld [vmem:[%s8614_s3 + $0x308] sm:$0xff] }
 0x16d   : > { %v613_v49 = vmul.f32 %v5917_v38, %v569_v40  ;;  %v654_v4 = vadd.f32 %v5933_v29, %v610_v9  ;;  %v4605_v22 = vcombine.low %v761_v50, %v765_v0  ;;  %v614_v32 = vmul.f32 %v5924_v25, %v570_v15  ;;  %v785_v13 = vld [vmem:[%s8614_s3 + $0x348] sm:$0xff] }
 0x16e   : > { %1553 = vmatmul.mubr.bf16.gmra.mrb[12].mxu1 %v6054_v42  ;;  %v659_v1 = vadd.f32 %v5927_v60, %v615_v58  ;;  %v652_v19 = vadd.f32 %v5933_v29, %v608_v46  ;;  %v789_v57 = vld [vmem:[%s8614_s3 + $0x368] sm:$0xff] }
 0x16f   : > { %1616 = vmatpush1.bf16.msra.mxu1 %v4573_v20  ;;  %1562 = vmatprep.mubr.bf16.mxu1 %v6057_v35  ;;  %v5140_v41 = vpop.eup %5139  ;;  %v773_v20 = vld [vmem:[%s8614_s3 + $0x2e8] sm:$0xff]  ;;  %v658_v24 = vadd.f32 %v5933_v29, %v614_v32  ;;  %v4630_v40 = vcombine.high %v785_v13, %v789_v57  ;;  %v4629_v9 = vcombine.low %v785_v13, %v789_v57  ;;  %v702_v32 = vld [vmem:[%s8614_s3 + $0xb0] sm:$0xff] }
 0x170   : > { %1617 = vmatprep.subr.bf16.mxu1 %v4582_v6  ;;  %v5142_v14 = vpop.eup %5141  ;;  %v575_v36 = vmul.f32 %v5140_v41, %v5856_v54  ;;  %v657_v54 = vadd.f32 %v5927_v60, %v613_v49  ;;  %v6114_v17 = vpack.c.bf16 %v654_v4, %v652_v19  ;;  %v4614_v53 = vcombine.high %v769_v21, %v773_v20  ;;  %v801_v58 = vld [vmem:[%s8614_s3 + $0x3c8] sm:$0xff]  ;;  %v714_v13 = vld [vmem:[%s8614_s3 + $0x110] sm:$0xff] }
 0x171   : > { %v573_v6 = vmul.f32 %v5142_v14, %v5850_v8  ;;  %v781_v8 = vld [vmem:[%s8614_s3 + $0x328] sm:$0xff]  ;;  %v4613_v5 = vcombine.low %v769_v21, %v773_v20  ;;  %v574_v34 = vmul.f32 %v5140_v41, %v5853_v47  ;;  %v572_v30 = vmul.f32 %v5142_v14, %v5847_v23  ;;  %v4924_v21 = vld [vmem:[%s8616_s5 + $0x10] ss:$8 sps:$4 sm:$0xff]  }
 0x172   : > { %v6117_v3 = vpack.c.bf16 %v659_v1, %v657_v54  ;;  %v619_v16 = vmul.f32 %v5917_v38, %v575_v36  ;;  %v4621_v47 = vcombine.low %v777_v11, %v781_v8  ;;  %v797_v23 = vld [vmem:[%s8614_s3 + $0x3a8] sm:$0xff]  ;;  %v4922_v36 = vld [vmem:[%s8616_s5 + $0x14] ss:$8 sps:$4 sm:$0xff]  }
 0x173   : > { %1618 = vmatpush1.bf16.msra.mxu1 %v4581_v37  ;;  %v612_v37 = vmul.f32 %v5924_v25, %v568_v12  ;;  %v617_v62 = vmul.f32 %v5917_v38, %v573_v6  ;;  %v805_v41 = vld [vmem:[%s8614_s3 + $0x3e8] sm:$0xff]  ;;  %v690_v20 = vld [vmem:[%s8614_s3 + $0x50] sm:$0xff] }
 0x174   : > { %1619 = vmatprep.subr.bf16.mxu1 %v4590_v48  ;;  %v4622_v48 = vcombine.high %v777_v11, %v781_v8  ;;  %v663_v27 = vadd.f32 %v5927_v60, %v619_v16  ;;  %v4646_v14 = vcombine.high %v801_v58, %v805_v41  ;;  %v4921_v15 = vld [vmem:[%s8616_s5] ss:$8 sps:$4 sm:$0xff]   ;;  %v4645_v4 = vcombine.low %v801_v58, %v805_v41  ;;  %v694_v12 = vld [vmem:[%s8614_s3 + $0x70] sm:$0xff]  ;;  %v4925_v6 = vld [vmem:[%s8616_s5 + $0x24] ss:$8 sps:$4 sm:$0xff]  }
 0x175   : > { %v656_v38 = vadd.f32 %v5933_v29, %v612_v37  ;;  %v661_v33 = vadd.f32 %v5927_v60, %v617_v62  ;;  %v616_v60 = vmul.f32 %v5924_v25, %v572_v30  ;;  %v4536_v54 = vcombine.high %v690_v20, %v694_v12  ;;  %v4928_v8 = vld [vmem:[%s8616_s5 + $0x34] ss:$8 sps:$4 sm:$0xff]   ;;  %v4930_v16 = vld [vmem:[%s8616_s5 + $0x30] ss:$8 sps:$4 sm:$0xff]   ;;  %v4931_v37 = vld [vmem:[%s8616_s5 + $0x44] ss:$8 sps:$4 sm:$0xff]  }
 0x176   : > { %1563 = vmatmul.mubr.bf16.gmra.mrb[16].mxu1 %v6084_v44  ;;  %v4535_v11 = vcombine.low %v690_v20, %v694_v12  ;;  %v706_v62 = vld [vmem:[%s8614_s3 + $0xd0] sm:$0xff] }
 0x177   : > { %1620 = vmatpush1.bf16.msra.mxu1 %v4589_v43  ;;  %1572 = vmatprep.mubr.bf16.mxu1 %v6087_v52  ;;  %v6142_v55 = vpack.c.bf16 %v658_v24, %v656_v38  ;;  %v618_v43 = vmul.f32 %v5924_v25, %v574_v34  ;;  %v6145_v2 = vpack.c.bf16 %v663_v27, %v661_v33  ;;  %v710_v34 = vld [vmem:[%s8614_s3 + $0xf0] sm:$0xff]  ;;  %v4937_v33 = vld [vmem:[%s8616_s5 + $0x64] ss:$8 sps:$4 sm:$0xff]  }
 0x178   : > { %1621 = vmatprep.subr.bf16.mxu1 %v4598_v7  ;;  %v793_v7 = vld [vmem:[%s8614_s3 + $0x388] sm:$0xff]  ;;  %v660_v46 = vadd.f32 %v5933_v29, %v616_v60  ;;  %v4552_v27 = vcombine.high %v706_v62, %v710_v34  ;;  %v718_v57 = vld [vmem:[%s8614_s3 + $0x130] sm:$0xff]  ;;  %v4551_v30 = vcombine.low %v706_v62, %v710_v34 }
 0x179   : > { %v4638_v50 = vcombine.high %v793_v7, %v797_v23  ;;  %v662_v0 = vadd.f32 %v5933_v29, %v618_v43  ;;  %v4637_v25 = vcombine.low %v793_v7, %v797_v23  ;;  %v686_v29 = vld [vmem:[%s8614_s3 + $0x30] sm:$0xff]  ;;  %v4939_v23 = vld [vmem:[%s8616_s5 + $0x60] ss:$8 sps:$4 sm:$0xff]   ;;  %v4559_v60 = vcombine.low %v714_v13, %v718_v57  ;;  %v4949_v34 = vld [vmem:[%s8616_s5 + $0xa4] ss:$8 sps:$4 sm:$0xff]  }
 0x17a   : > { %v4934_v38 = vld [vmem:[%s8616_s5 + $0x54] ss:$8 sps:$4 sm:$0xff]  }
 0x17b   : > { %1622 = vmatpush1.bf16.msra.mxu1 %v4597_v31  ;;  %v4919_v31 = vld [vmem:[%s8616_s5 + $0x4] ss:$8 sps:$4 sm:$0xff]   ;;  %v6167_v49 = vpack.c.bf16 %v662_v0, %v660_v46  ;;  %v722_v43 = vld [vmem:[%s8614_s3 + $0x150] sm:$0xff] }
 0x17c   : > { %1623 = vmatprep.subr.bf16.mxu1 %v4606_v10  ;;  %v682_v10 = vld [vmem:[%s8614_s3 + $0x10] sm:$0xff]  ;;  %3938 = vmatprep.subr.bf16.mxu0 %v4919_v31 }
 0x17d   : > { %3939 = vmatpush1.bf16.msra.mxu0 %v4921_v15  ;;  %v4528_v1 = vcombine.high %v682_v10, %v686_v29  ;;  %v4527_v19 = vcombine.low %v682_v10, %v686_v29  ;;  %v726_v7 = vld [vmem:[%s8614_s3 + $0x170] sm:$0xff] }
 0x17e   : > { %1573 = vmatmul.mubr.bf16.gmra.mrb[20].mxu1 %v6114_v17  ;;  %3940 = vmatprep.subr.bf16.mxu0 %v4922_v36  ;;  %v734_v0 = vld [vmem:[%s8614_s3 + $0x1b0] sm:$0xff]  ;;  %v4567_v58 = vcombine.low %v722_v43, %v726_v7 }
 0x17f   : > { %1624 = vmatpush1.bf16.msra.mxu1 %v4605_v22  ;;  %1582 = vmatprep.mubr.bf16.mxu1 %v6117_v3  ;;  %v4927_v22 = vld [vmem:[%s8616_s5 + $0x20] ss:$8 sps:$4 sm:$0xff]   ;;  %v4940_v41 = vld [vmem:[%s8616_s5 + $0x74] ss:$8 sps:$4 sm:$0xff]  }
 0x180   : > { %1625 = vmatprep.subr.bf16.mxu1 %v4614_v53  ;;  %v698_v53 = vld [vmem:[%s8614_s3 + $0x90] sm:$0xff] }
 0x181   : > { %3941 = vmatpush1.bf16.msra.mxu0 %v4924_v21  ;;  %v4543_v24 = vcombine.low %v698_v53, %v702_v32  ;;  %v742_v31 = vld [vmem:[%s8614_s3 + $0x1f0] sm:$0xff] }
 0x182   : > { %3942 = vmatprep.subr.bf16.mxu0 %v4925_v6  ;;  %v746_v10 = vld [vmem:[%s8614_s3 + $0x210] sm:$0xff] }
 0x183   : > { %1626 = vmatpush1.bf16.msra.mxu1 %v4613_v5  ;;  %v4544_v5 = vcombine.high %v698_v53, %v702_v32  ;;  %v750_v29 = vld [vmem:[%s8614_s3 + $0x230] sm:$0xff] }
 0x184   : > { %1627 = vmatprep.subr.bf16.mxu1 %v4622_v48  ;;  %v4933_v48 = vld [vmem:[%s8616_s5 + $0x40] ss:$8 sps:$4 sm:$0xff]   ;;  %v4592_v36 = vcombine.high %v746_v10, %v750_v29  ;;  %v754_v21 = vld [vmem:[%s8614_s3 + $0x250] sm:$0xff]  ;;  %v4591_v12 = vcombine.low %v746_v10, %v750_v29 }
 0x185   : > { %3943 = vmatpush1.bf16.msra.mxu0 %v4927_v22  ;;  %v758_v20 = vld [vmem:[%s8614_s3 + $0x270] sm:$0xff]  ;;  %v4945_v22 = vld [vmem:[%s8616_s5 + $0x80] ss:$8 sps:$4 sm:$0xff]  }
 0x186   : > { %1583 = vmatmul.mubr.bf16.gmra.mrb[24].mxu1 %v6142_v55  ;;  %3944 = vmatprep.subr.bf16.mxu0 %v4928_v8  ;;  %v4600_v6 = vcombine.high %v754_v21, %v758_v20  ;;  %v766_v53 = vld [vmem:[%s8614_s3 + $0x2b0] sm:$0xff]  ;;  %v4599_v32 = vcombine.low %v754_v21, %v758_v20  ;;  %v4963_v29 = vld [vmem:[%s8616_s5 + $0xe0] ss:$8 sps:$4 sm:$0xff]  }
 0x187   : > { %1628 = vmatpush1.bf16.msra.mxu1 %v4621_v47  ;;  %1592 = vmatprep.mubr.bf16.mxu1 %v6145_v2  ;;  %v4936_v47 = vld [vmem:[%s8616_s5 + $0x50] ss:$8 sps:$4 sm:$0xff]   ;;  %v4964_v21 = vld [vmem:[%s8616_s5 + $0xf4] ss:$8 sps:$4 sm:$0xff]  }
 0x188   : > { %1629 = vmatprep.subr.bf16.mxu1 %v4630_v40  ;;  %v4560_v40 = vcombine.high %v714_v13, %v718_v57  ;;  %v782_v13 = vld [vmem:[%s8614_s3 + $0x330] sm:$0xff] }
 0x189   : > { %3945 = vmatpush1.bf16.msra.mxu0 %v4930_v16  ;;  %v4948_v16 = vld [vmem:[%s8616_s5 + $0x90] ss:$8 sps:$4 sm:$0xff]  }
 0x18a   : > { %3946 = vmatprep.subr.bf16.mxu0 %v4931_v37  ;;  %v770_v37 = vld [vmem:[%s8614_s3 + $0x2d0] sm:$0xff] }
 0x18b   : > { %1630 = vmatpush1.bf16.msra.mxu1 %v4629_v9  ;;  %v4568_v9 = vcombine.high %v722_v43, %v726_v7  ;;  %v4955_v7 = vld [vmem:[%s8616_s5 + $0xc4] ss:$8 sps:$4 sm:$0xff]  }
 0x18c   : > { %1631 = vmatprep.subr.bf16.mxu1 %v4638_v50  ;;  %v730_v50 = vld [vmem:[%s8614_s3 + $0x190] sm:$0xff] }
 0x18d   : > { %3947 = vmatpush1.bf16.msra.mxu0 %v4933_v48  ;;  %v4576_v46 = vcombine.high %v730_v50, %v734_v0 }
 0x18e   : > { %1593 = vmatmul.mubr.bf16.gmra.mrb[28].mxu1 %v6167_v49  ;;  %3948 = vmatprep.subr.bf16.mxu0 %v4934_v38 }
 0x18f   : > { %1632 = vmatpush1.bf16.msra.mxu1 %v4637_v25  ;;  %1635 = vmatprep.mubr.bf16.mxu1 %v5951_v26  ;;  %v738_v25 = vld [vmem:[%s8614_s3 + $0x1d0] sm:$0xff] }
 0x190   : > { %1633 = vmatprep.subr.bf16.mxu1 %v4646_v14  ;;  %v4575_v14 = vcombine.low %v730_v50, %v734_v0  ;;  %v4584_v15 = vcombine.high %v738_v25, %v742_v31  ;;  %v798_v50 = vld [vmem:[%s8614_s3 + $0x3b0] sm:$0xff] }
 0x191   : > { %3949 = vmatpush1.bf16.msra.mxu0 %v4936_v47  ;;  %v4954_v47 = vld [vmem:[%s8616_s5 + $0xb0] ss:$8 sps:$4 sm:$0xff]  }
 0x192   : > { %3950 = vmatprep.subr.bf16.mxu0 %v4937_v33  ;;  %v786_v33 = vld [vmem:[%s8614_s3 + $0x350] sm:$0xff] }
 0x193   : > { %1634 = vmatpush1.bf16.msra.mxu1 %v4645_v4  ;;  %v4583_v4 = vcombine.low %v738_v25, %v742_v31  ;;  %v802_v25 = vld [vmem:[%s8614_s3 + $0x3d0] sm:$0xff] }
 0x194   : > { %1716 = vmatprep.subr.bf16.mxu1 %v4528_v1  ;;  %v4942_v1 = vld [vmem:[%s8616_s5 + $0x70] ss:$8 sps:$4 sm:$0xff]  }
 0x195   : > { %3951 = vmatpush1.bf16.msra.mxu0 %v4939_v23  ;;  %v806_v31 = vld [vmem:[%s8614_s3 + $0x3f0] sm:$0xff] }
 0x196   : > { %1636 = vmatmul.mubr.bf16.vlgmr.msra.gmra.mrb[32].mxu1 %v5959_v61  ;;  %3952 = vmatprep.subr.bf16.mxu0 %v4940_v41  ;;  %v4648_v10 = vcombine.high %v802_v25, %v806_v31 }
 0x197   : > { %1717 = vmatpush1.bf16.msra.mxu1 %v4527_v19  ;;  %1645 = vmatprep.mubr.bf16.mxu1 %v5978_v45  ;;  %v4943_v19 = vld [vmem:[%s8616_s5 + $0x84] ss:$8 sps:$4 sm:$0xff]  }
 0x198   : > { %1718 = vmatprep.subr.bf16.mxu1 %v4536_v54  ;;  %v762_v54 = vld [vmem:[%s8614_s3 + $0x290] sm:$0xff] }
 0x199   : > { %3953 = vmatpush1.bf16.msra.mxu0 %v4942_v1  ;;  %v4608_v8 = vcombine.high %v762_v54, %v766_v53  ;;  %v4607_v62 = vcombine.low %v762_v54, %v766_v53  ;;  %v4647_v1 = vcombine.low %v802_v25, %v806_v31  ;;  %v4969_v54 = vld [vmem:[%s8616_s5 + $0x104] ss:$8 sps:$4 sm:$0xff]   ;;  %v755_v25 = vld [vmem:[%s8614_s3 + $0x258] sm:$0xff] }
 0x19a   : > { %3954 = vmatprep.subr.bf16.mxu0 %v4943_v19  ;;  %v691_v19 = vld [vmem:[%s8614_s3 + $0x58] sm:$0xff] }
 0x19b   : > { %1719 = vmatpush1.bf16.msra.mxu1 %v4535_v11  ;;  %v4946_v11 = vld [vmem:[%s8616_s5 + $0x94] ss:$8 sps:$4 sm:$0xff]  }
 0x19c   : > { %1720 = vmatprep.subr.bf16.mxu1 %v4544_v5  ;;  %v774_v5 = vld [vmem:[%s8614_s3 + $0x2f0] sm:$0xff]  ;;  %v759_v31 = vld [vmem:[%s8614_s3 + $0x278] sm:$0xff] }
 0x19d   : > { %3955 = vmatpush1.bf16.msra.mxu0 %v4945_v22  ;;  %v4616_v48 = vcombine.high %v770_v37, %v774_v5  ;;  %v4615_v57 = vcombine.low %v770_v37, %v774_v5  ;;  %v707_v37 = vld [vmem:[%s8614_s3 + $0xd8] sm:$0xff] }
 0x19e   : > { %1646 = vmatmul.mubr.bf16.gmra.mrb[36].mxu1 %v5994_v51  ;;  %3956 = vmatprep.subr.bf16.mxu0 %v4946_v11  ;;  %v703_v11 = vld [vmem:[%s8614_s3 + $0xb8] sm:$0xff] }
 0x19f   : > { %1721 = vmatpush1.bf16.msra.mxu1 %v4543_v24  ;;  %1655 = vmatprep.mubr.bf16.mxu1 %v5997_v59  ;;  %v4951_v24 = vld [vmem:[%s8616_s5 + $0xa0] ss:$8 sps:$4 sm:$0xff]   ;;  %v711_v5 = vld [vmem:[%s8614_s3 + $0xf8] sm:$0xff] }
 0x1a0   : > { %1722 = vmatprep.subr.bf16.mxu1 %v4552_v27  ;;  %v778_v27 = vld [vmem:[%s8614_s3 + $0x310] sm:$0xff] }
 0x1a1   : > { %3957 = vmatpush1.bf16.msra.mxu0 %v4948_v16  ;;  %v4624_v38 = vcombine.high %v778_v27, %v782_v13  ;;  %v4623_v43 = vcombine.low %v778_v27, %v782_v13  ;;  %v4553_v27 = vcombine.low %v707_v37, %v711_v5 }
 0x1a2   : > { %3958 = vmatprep.subr.bf16.mxu0 %v4949_v34  ;;  %v4554_v34 = vcombine.high %v707_v37, %v711_v5  ;;  %v799_v37 = vld [vmem:[%s8614_s3 + $0x3b8] sm:$0xff] }
 0x1a3   : > { %1723 = vmatpush1.bf16.msra.mxu1 %v4551_v30  ;;  %v4952_v30 = vld [vmem:[%s8616_s5 + $0xb4] ss:$8 sps:$4 sm:$0xff]  }
 0x1a4   : > { %1724 = vmatprep.subr.bf16.mxu1 %v4560_v40  ;;  %v790_v40 = vld [vmem:[%s8614_s3 + $0x370] sm:$0xff] }
 0x1a5   : > { %3959 = vmatpush1.bf16.msra.mxu0 %v4951_v24  ;;  %v4632_v23 = vcombine.high %v786_v33, %v790_v40  ;;  %v4631_v0 = vcombine.low %v786_v33, %v790_v40  ;;  %v719_v24 = vld [vmem:[%s8614_s3 + $0x138] sm:$0xff] }
 0x1a6   : > { %1656 = vmatmul.mubr.bf16.gmra.mrb[40].mxu1 %v6024_v39  ;;  %3960 = vmatprep.subr.bf16.mxu0 %v4952_v30  ;;  %v727_v30 = vld [vmem:[%s8614_s3 + $0x178] sm:$0xff] }
 0x1a7   : > { %1725 = vmatpush1.bf16.msra.mxu1 %v4559_v60  ;;  %1665 = vmatprep.mubr.bf16.mxu1 %v6027_v56  ;;  %v4957_v60 = vld [vmem:[%s8616_s5 + $0xc0] ss:$8 sps:$4 sm:$0xff]   ;;  %v731_v33 = vld [vmem:[%s8614_s3 + $0x198] sm:$0xff] }
 0x1a8   : > { %1726 = vmatprep.subr.bf16.mxu1 %v4568_v9  ;;  %v794_v9 = vld [vmem:[%s8614_s3 + $0x390] sm:$0xff]  ;;  %v735_v40 = vld [vmem:[%s8614_s3 + $0x1b8] sm:$0xff] }
 0x1a9   : > { %3961 = vmatpush1.bf16.msra.mxu0 %v4954_v47  ;;  %v4640_v41 = vcombine.high %v794_v9, %v798_v50 }
 0x1aa   : > { %3962 = vmatprep.subr.bf16.mxu0 %v4955_v7  ;;  %v4578_v7 = vcombine.high %v731_v33, %v735_v40 }
 0x1ab   : > { %1727 = vmatpush1.bf16.msra.mxu1 %v4567_v58  ;;  %v4958_v58 = vld [vmem:[%s8616_s5 + $0xd4] ss:$8 sps:$4 sm:$0xff]  }
 0x1ac   : > { %1728 = vmatprep.subr.bf16.mxu1 %v4576_v46  ;;  %v4960_v46 = vld [vmem:[%s8616_s5 + $0xd0] ss:$8 sps:$4 sm:$0xff]  }
 0x1ad   : > { %3963 = vmatpush1.bf16.msra.mxu0 %v4957_v60  ;;  %v743_v60 = vld [vmem:[%s8614_s3 + $0x1f8] sm:$0xff] }
 0x1ae   : > { %1666 = vmatmul.mubr.bf16.gmra.mrb[44].mxu1 %v6054_v42  ;;  %3964 = vmatprep.subr.bf16.mxu0 %v4958_v58  ;;  %v751_v58 = vld [vmem:[%s8614_s3 + $0x238] sm:$0xff] }
 0x1af   : > { %1729 = vmatpush1.bf16.msra.mxu1 %v4575_v14  ;;  %1675 = vmatprep.mubr.bf16.mxu1 %v6057_v35  ;;  %v4639_v14 = vcombine.low %v794_v9, %v798_v50  ;;  %v4577_v9 = vcombine.low %v731_v33, %v735_v40 }
 0x1b0   : > { %1730 = vmatprep.subr.bf16.mxu1 %v4584_v15  ;;  %v4961_v15 = vld [vmem:[%s8616_s5 + $0xe4] ss:$8 sps:$4 sm:$0xff]  }
 0x1b1   : > { %3965 = vmatpush1.bf16.msra.mxu0 %v4960_v46 }
 0x1b2   : > { %3966 = vmatprep.subr.bf16.mxu0 %v4961_v15  ;;  %v4602_v15 = vcombine.high %v755_v25, %v759_v31 }
 0x1b3   : > { %1731 = vmatpush1.bf16.msra.mxu1 %v4583_v4  ;;  %v683_v4 = vld [vmem:[%s8614_s3 + $0x18] sm:$0xff] }
 0x1b4   : > { %1732 = vmatprep.subr.bf16.mxu1 %v4592_v36  ;;  %v687_v36 = vld [vmem:[%s8614_s3 + $0x38] sm:$0xff] }
 0x1b5   : > { %3967 = vmatpush1.bf16.msra.mxu0 %v4963_v29  ;;  %v4530_v20 = vcombine.high %v683_v4, %v687_v36  ;;  %v4529_v22 = vcombine.low %v683_v4, %v687_v36  ;;  %v767_v29 = vld [vmem:[%s8614_s3 + $0x2b8] sm:$0xff]  ;;  %v4601_v4 = vcombine.low %v755_v25, %v759_v31 }
 0x1b6   : > { %1676 = vmatmul.mubr.bf16.gmra.mrb[48].mxu1 %v6084_v44  ;;  %3968 = vmatprep.subr.bf16.mxu0 %v4964_v21  ;;  %v775_v21 = vld [vmem:[%s8614_s3 + $0x2f8] sm:$0xff] }
 0x1b7   : > { %1733 = vmatpush1.bf16.msra.mxu1 %v4591_v12  ;;  %1685 = vmatprep.mubr.bf16.mxu1 %v6087_v52  ;;  %v4966_v12 = vld [vmem:[%s8616_s5 + $0xf0] ss:$8 sps:$4 sm:$0xff]  }
 0x1b8   : > { %1734 = vmatprep.subr.bf16.mxu1 %v4600_v6  ;;  %v695_v6 = vld [vmem:[%s8614_s3 + $0x78] sm:$0xff] }
 0x1b9   : > { %3969 = vmatpush1.bf16.msra.mxu0 %v4966_v12  ;;  %v4538_v53 = vcombine.high %v691_v19, %v695_v6 }
 0x1ba   : > { %4051 = vmatprep.subr.bf16.mxu0 %v4969_v54 }
 0x1bb   : > { %1735 = vmatpush1.bf16.msra.mxu1 %v4599_v32  ;;  %v699_v32 = vld [vmem:[%s8614_s3 + $0x98] sm:$0xff] }
 0x1bc   : > { %1736 = vmatprep.subr.bf16.mxu1 %v4608_v8  ;;  %v4537_v8 = vcombine.low %v691_v19, %v695_v6  ;;  %v4546_v16 = vcombine.high %v699_v32, %v703_v11  ;;  %v779_v19 = vld [vmem:[%s8614_s3 + $0x318] sm:$0xff] }
 0x1bd   : > { %v783_v6 = vld [vmem:[%s8614_s3 + $0x338] sm:$0xff] }
 0x1be   : > { %1686 = vmatmul.mubr.bf16.gmra.mrb[52].mxu1 %v6114_v17  ;;  %v4626_v54 = vcombine.high %v779_v19, %v783_v6 }
 0x1bf   : > { %1737 = vmatpush1.bf16.msra.mxu1 %v4607_v62  ;;  %1695 = vmatprep.mubr.bf16.mxu1 %v6117_v3  ;;  %v4545_v62 = vcombine.low %v699_v32, %v703_v11  ;;  %v791_v32 = vld [vmem:[%s8614_s3 + $0x378] sm:$0xff]  ;;  %v4625_v11 = vcombine.low %v779_v19, %v783_v6 }
 0x1c0   : > { %1738 = vmatprep.subr.bf16.mxu1 %v4616_v48  ;;  %v715_v48 = vld [vmem:[%s8614_s3 + $0x118] sm:$0xff] }
 0x1c1   : > { %v4562_v13 = vcombine.high %v715_v48, %v719_v24 }
 0x1c3   : > { %1739 = vmatpush1.bf16.msra.mxu1 %v4615_v57  ;;  %v723_v57 = vld [vmem:[%s8614_s3 + $0x158] sm:$0xff] }
 0x1c4   : > { %1740 = vmatprep.subr.bf16.mxu1 %v4624_v38  ;;  %v4561_v38 = vcombine.low %v715_v48, %v719_v24  ;;  %v4570_v47 = vcombine.high %v723_v57, %v727_v30  ;;  %v807_v48 = vld [vmem:[%s8614_s3 + $0x3f8] sm:$0xff] }
 0x1c6   : > { %1696 = vmatmul.mubr.bf16.gmra.mrb[56].mxu1 %v6142_v55 }
 0x1c7   : > { %1741 = vmatpush1.bf16.msra.mxu1 %v4623_v43  ;;  %1705 = vmatprep.mubr.bf16.mxu1 %v6145_v2  ;;  %v4569_v43 = vcombine.low %v723_v57, %v727_v30  ;;  %v6498_v57 = vld [vmem:[%s8615_s4] sm:$0xff] }
 0x1c8   : > { %1742 = vmatprep.subr.bf16.mxu1 %v4632_v23  ;;  %v739_v23 = vld [vmem:[%s8614_s3 + $0x1d8] sm:$0xff] }
 0x1c9   : > { %v4586_v50 = vcombine.high %v739_v23, %v743_v60 }
 0x1cb   : > { %1743 = vmatpush1.bf16.msra.mxu1 %v4631_v0  ;;  %v747_v0 = vld [vmem:[%s8614_s3 + $0x218] sm:$0xff] }
 0x1cc   : > { %1744 = vmatprep.subr.bf16.mxu1 %v4640_v41  ;;  %v4585_v41 = vcombine.low %v739_v23, %v743_v60  ;;  %v4594_v46 = vcombine.high %v747_v0, %v751_v58 }
 0x1ce   : > { %1706 = vmatmul.mubr.bf16.gmra.mrb[60].mxu1 %v6167_v49 }
 0x1cf   : > { %1745 = vmatpush1.bf16.msra.mxu1 %v4639_v14  ;;  %1748 = vmatprep.mubr.bf16.mxu1 %v5951_v26  ;;  %v4593_v14 = vcombine.low %v747_v0, %v751_v58 }
 0x1d0   : > { %1746 = vmatprep.subr.bf16.mxu1 %v4648_v10  ;;  %v763_v10 = vld [vmem:[%s8614_s3 + $0x298] sm:$0xff] }
 0x1d1   : > { %v4610_v36 = vcombine.high %v763_v10, %v767_v29 }
 0x1d3   : > { %1747 = vmatpush1.bf16.msra.mxu1 %v4647_v1  ;;  %v771_v1 = vld [vmem:[%s8614_s3 + $0x2d8] sm:$0xff] }
 0x1d4   : > { %1829 = vmatprep.subr.bf16.mxu1 %v4530_v20  ;;  %v4609_v20 = vcombine.low %v763_v10, %v767_v29  ;;  %v4618_v12 = vcombine.high %v771_v1, %v775_v21  ;;  %v820_v29 = vsub.s32 2, %v5904_v28 }
 0x1d6   : > { %1749 = vmatmul.mubr.bf16.vlgmr.msra.gmra.mrb[64].mxu1 %v5959_v61 }
 0x1d7   : > { %1830 = vmatpush1.bf16.msra.mxu1 %v4529_v22  ;;  %1758 = vmatprep.mubr.bf16.mxu1 %v5978_v45  ;;  %v4617_v22 = vcombine.low %v771_v1, %v775_v21 }
 0x1d8   : > { %1831 = vmatprep.subr.bf16.mxu1 %v4538_v53  ;;  %v787_v53 = vld [vmem:[%s8614_s3 + $0x358] sm:$0xff] }
 0x1d9   : > { %v4633_v5 = vcombine.low %v787_v53, %v791_v32 }
 0x1db   : > { %1832 = vmatpush1.bf16.msra.mxu1 %v4537_v8  ;;  %v4634_v8 = vcombine.high %v787_v53, %v791_v32 }
 0x1dc   : > { %1833 = vmatprep.subr.bf16.mxu1 %v4546_v16  ;;  %v795_v16 = vld [vmem:[%s8614_s3 + $0x398] sm:$0xff] }
 0x1dd   : > { %v4641_v24 = vcombine.low %v795_v16, %v799_v37 }
 0x1de   : > { %1759 = vmatmul.mubr.bf16.gmra.mrb[68].mxu1 %v5994_v51 }
 0x1df   : > { %1834 = vmatpush1.bf16.msra.mxu1 %v4545_v62  ;;  %1768 = vmatprep.mubr.bf16.mxu1 %v5997_v59  ;;  %v4642_v62 = vcombine.high %v795_v16, %v799_v37 }
 0x1e0   : > { %1835 = vmatprep.subr.bf16.mxu1 %v4554_v34  ;;  %v803_v34 = vld [vmem:[%s8614_s3 + $0x3d8] sm:$0xff] }
 0x1e3   : > { %1836 = vmatpush1.bf16.msra.mxu1 %v4553_v27  ;;  %v4650_v27 = vcombine.high %v803_v34, %v807_v48 }
 0x1e4   : > { %1837 = vmatprep.subr.bf16.mxu1 %v4562_v13  ;;  %v4649_v13 = vcombine.low %v803_v34, %v807_v48 }
 0x1e6   : > { %1769 = vmatmul.mubr.bf16.gmra.mrb[72].mxu1 %v6024_v39 }
 0x1e7   : > { %1838 = vmatpush1.bf16.msra.mxu1 %v4561_v38  ;;  %1778 = vmatprep.mubr.bf16.mxu1 %v6027_v56 }
 0x1e8   : > { %1839 = vmatprep.subr.bf16.mxu1 %v4570_v47 }
 0x1eb   : > { %1840 = vmatpush1.bf16.msra.mxu1 %v4569_v43 }
 0x1ec   : > { %1841 = vmatprep.subr.bf16.mxu1 %v4578_v7 }
 0x1ee   : > { %1779 = vmatmul.mubr.bf16.gmra.mrb[76].mxu1 %v6054_v42 }
 0x1ef   : > { %1842 = vmatpush1.bf16.msra.mxu1 %v4577_v9  ;;  %1788 = vmatprep.mubr.bf16.mxu1 %v6057_v35 }
 0x1f0   : > { %1843 = vmatprep.subr.bf16.mxu1 %v4586_v50 }
 0x1f3   : > { %1844 = vmatpush1.bf16.msra.mxu1 %v4585_v41 }
 0x1f4   : > { %1845 = vmatprep.subr.bf16.mxu1 %v4594_v46 }
 0x1f6   : > { %1789 = vmatmul.mubr.bf16.gmra.mrb[80].mxu1 %v6084_v44 }
 0x1f7   : > { %1846 = vmatpush1.bf16.msra.mxu1 %v4593_v14  ;;  %1798 = vmatprep.mubr.bf16.mxu1 %v6087_v52 }
 0x1f8   : > { %1847 = vmatprep.subr.bf16.mxu1 %v4602_v15 }
 0x1fb   : > { %1848 = vmatpush1.bf16.msra.mxu1 %v4601_v4 }
 0x1fc   : > { %1849 = vmatprep.subr.bf16.mxu1 %v4610_v36 }
 0x1fe   : > { %1799 = vmatmul.mubr.bf16.gmra.mrb[84].mxu1 %v6114_v17 }
 0x1ff   : > { %1850 = vmatpush1.bf16.msra.mxu1 %v4609_v20  ;;  %1808 = vmatprep.mubr.bf16.mxu1 %v6117_v3 }
 0x200   : > { %1851 = vmatprep.subr.bf16.mxu1 %v4618_v12 }
 0x203   : > { %1852 = vmatpush1.bf16.msra.mxu1 %v4617_v22 }
 0x204   : > { %1853 = vmatprep.subr.bf16.mxu1 %v4626_v54 }
 0x206   : > { %1809 = vmatmul.mubr.bf16.gmra.mrb[88].mxu1 %v6142_v55 }
 0x207   : > { %1854 = vmatpush1.bf16.msra.mxu1 %v4625_v11  ;;  %1818 = vmatprep.mubr.bf16.mxu1 %v6145_v2 }
 0x208   : > { %1855 = vmatprep.subr.bf16.mxu1 %v4634_v8 }
 0x20b   : > { %1856 = vmatpush1.bf16.msra.mxu1 %v4633_v5 }
 0x20c   : > { %1857 = vmatprep.subr.bf16.mxu1 %v4642_v62 }
 0x20e   : > { %1819 = vmatmul.mubr.bf16.gmra.mrb[92].mxu1 %v6167_v49 }
 0x20f   : > { %1858 = vmatpush1.bf16.msra.mxu1 %v4641_v24  ;;  %1861 = vmatprep.mubr.bf16.mxu1 %v5951_v26  ;;  %v6503_v26 = vrot.slane %v6498_v57, %v5913_v18  ;;  %v6568_v24 = vrot.slane %v6498_v57, %v820_v29 }
 0x210   : > { %1859 = vmatprep.subr.bf16.mxu1 %v4650_v27 }
 0x213   : > { %1860 = vmatpush1.bf16.msra.mxu1 %v4649_v13 }
 0x216   : > { %1862 = vmatmul.mubr.bf16.vlgmr.msra.gmra.mrb[96].mxu1 %v5959_v61  ;;  %v6508_v61 = vrot.slane %v6498_v57, %v5907_v63 }
 0x217   : > { %1871 = vmatprep.mubr.bf16.mxu1 %v5978_v45 }
 0x21e   : > { %1872 = vmatmul.mubr.bf16.gmra.mrb[100].mxu1 %v5994_v51 }
 0x21f   : > { %1881 = vmatprep.mubr.bf16.mxu1 %v5997_v59 }
 0x226   : > { %1882 = vmatmul.mubr.bf16.gmra.mrb[104].mxu1 %v6024_v39 }
 0x227   : > { %1891 = vmatprep.mubr.bf16.mxu1 %v6027_v56 }
 0x229   : > { %v1524_v45 = vpop.f32.mrb[0].mxu1 }
 0x22a   : > { %v6511_v51 = vadd.f32 %v1524_v45, %v6503_v26  ;;  %v1526_v59 = vpop.f32.mrb[1].mxu1  ;;  %v824_v45 = vsub.s32 3, %v5904_v28 }
 0x22b   : > { %v6514_v30 = vadd.f32 %v1526_v59, %v6508_v61  ;;  %v1528_v38 = vpop.f32.mrb[2].mxu1 }
 0x22c   : > { %v1942_v39 = vmul.f32 %v6511_v51, %v6511_v51  ;;  %v6519_v47 = vadd.f32 %v1528_v38, %v6503_v26  ;;  %v1530_v56 = vpop.f32.mrb[3].mxu1 }
 0x22d   : > { %v1943_v33 = vmul.f32 %v6514_v30, %v6514_v30  ;;  %v6524_v40 = vadd.f32 %v1530_v56, %v6508_v61 }
 0x22e   : > { %v2070_v43 = vmul.f32 %v1942_v39, %v6511_v51  ;;  %v1950_v7 = vmul.f32 %v6519_v47, %v6519_v47  ;;  %1892 = vmatmul.mubr.bf16.gmra.mrb[108].mxu1 %v6054_v42 }
 0x22f   : > { %v2071_v23 = vmul.f32 %v1943_v33, %v6514_v30  ;;  %v1951_v60 = vmul.f32 %v6524_v40, %v6524_v40  ;;  %1901 = vmatprep.mubr.bf16.mxu1 %v6057_v35 }
 0x230   : > { %v2198_v9 = vmul.f32 0.044715, %v2070_v43  ;;  %v2078_v50 = vmul.f32 %v1950_v7, %v6519_v47 }
 0x231   : > { %v2199_v0 = vmul.f32 0.044715, %v2071_v23  ;;  %v2079_v58 = vmul.f32 %v1951_v60, %v6524_v40  ;;  %v1534_v41 = vpop.f32.mrb[4].mxu1 }
 0x232   : > { %v2326_v46 = vadd.f32 %v2198_v9, %v6511_v51  ;;  %v2206_v25 = vmul.f32 0.044715, %v2078_v50  ;;  %v6538_v31 = vadd.f32 %v1534_v41, %v6503_v26  ;;  %v1536_v42 = vpop.f32.mrb[5].mxu1 }
 0x233   : > { %v2207_v14 = vmul.f32 0.044715, %v2079_v58  ;;  %v6541_v15 = vadd.f32 %v1536_v42, %v6508_v61  ;;  %v1538_v10 = vpop.f32.mrb[6].mxu1  ;;  %v2327_v35 = vadd.f32 %v2199_v0, %v6514_v30 }
 0x234   : > { %v2454_v4 = vmul.f32 0.7978846, %v2326_v46  ;;  %v2334_v36 = vadd.f32 %v2206_v25, %v6519_v47  ;;  %v1958_v1 = vmul.f32 %v6538_v31, %v6538_v31  ;;  %v6549_v21 = vadd.f32 %v1538_v10, %v6503_v26  ;;  %v1540_v20 = vpop.f32.mrb[7].mxu1 }
 0x235   : > { %v1959_v12 = vmul.f32 %v6541_v15, %v6541_v15  ;;  %v6554_v19 = vadd.f32 %v1540_v20, %v6508_v61  ;;  %v2335_v6 = vadd.f32 %v2207_v14, %v6524_v40  ;;  %v2455_v22 = vmul.f32 0.7978846, %v2327_v35 }
 0x236   : > { %5143 = vtanh.f32 %v2454_v4  ;;  %v2462_v54 = vmul.f32 0.7978846, %v2334_v36  ;;  %v2086_v53 = vmul.f32 %v1958_v1, %v6538_v31  ;;  %v1966_v32 = vmul.f32 %v6549_v21, %v6549_v21  ;;  %1902 = vmatmul.mubr.bf16.gmra.mrb[112].mxu1 %v6084_v44 }
 0x237   : > { %v2087_v11 = vmul.f32 %v1959_v12, %v6541_v15  ;;  %v1967_v8 = vmul.f32 %v6554_v19, %v6554_v19  ;;  %1911 = vmatprep.mubr.bf16.mxu1 %v6087_v52  ;;  %v2463_v16 = vmul.f32 0.7978846, %v2335_v6  ;;  %5145 = vtanh.f32 %v2455_v22 }
 0x238   : > { %5147 = vtanh.f32 %v2462_v54  ;;  %v2214_v37 = vmul.f32 0.044715, %v2086_v53  ;;  %v2094_v5 = vmul.f32 %v1966_v32, %v6549_v21  ;;  %v6601_v36 = vrot.slane %v6498_v57, %v824_v45 }
 0x239   : > { %v2215_v62 = vmul.f32 0.044715, %v2087_v11  ;;  %v2095_v34 = vmul.f32 %v1967_v8, %v6554_v19  ;;  %v1544_v48 = vpop.f32.mrb[8].mxu1  ;;  %5149 = vtanh.f32 %v2463_v16 }
 0x23a   : > { %v2342_v44 = vadd.f32 %v2214_v37, %v6538_v31  ;;  %v2222_v27 = vmul.f32 0.044715, %v2094_v5  ;;  %v6572_v13 = vadd.f32 %v1544_v48, %v6503_v26  ;;  %v1546_v52 = vpop.f32.mrb[9].mxu1 }
 0x23b   : > { %v2343_v59 = vadd.f32 %v2215_v62, %v6541_v15  ;;  %v2223_v38 = vmul.f32 0.044715, %v2095_v34  ;;  %v6577_v39 = vadd.f32 %v1546_v52, %v6508_v61  ;;  %v1548_v56 = vpop.f32.mrb[10].mxu1 }
 0x23c   : > { %v2470_v33 = vmul.f32 0.7978846, %v2342_v44  ;;  %v2350_v43 = vadd.f32 %v2222_v27, %v6549_v21  ;;  %v1974_v7 = vmul.f32 %v6572_v13, %v6572_v13  ;;  %v6583_v23 = vadd.f32 %v1548_v56, %v6503_v26  ;;  %v1550_v60 = vpop.f32.mrb[11].mxu1 }
 0x23d   : > { %v2471_v9 = vmul.f32 0.7978846, %v2343_v59  ;;  %v2351_v50 = vadd.f32 %v2223_v38, %v6554_v19  ;;  %v1975_v0 = vmul.f32 %v6577_v39, %v6577_v39  ;;  %v6589_v58 = vadd.f32 %v1550_v60, %v6508_v61 }
 0x23e   : > { %5151 = vtanh.f32 %v2470_v33  ;;  %v2478_v41 = vmul.f32 0.7978846, %v2350_v43  ;;  %v2102_v46 = vmul.f32 %v1974_v7, %v6572_v13  ;;  %v1982_v25 = vmul.f32 %v6583_v23, %v6583_v23  ;;  %1912 = vmatmul.mubr.bf16.gmra.mrb[116].mxu1 %v6114_v17 }
 0x23f   : > { %5153 = vtanh.f32 %v2471_v9  ;;  %v2479_v42 = vmul.f32 0.7978846, %v2351_v50  ;;  %v2103_v14 = vmul.f32 %v1975_v0, %v6577_v39  ;;  %v1983_v10 = vmul.f32 %v6589_v58, %v6589_v58  ;;  %1921 = vmatprep.mubr.bf16.mxu1 %v6117_v3 }
 0x240   : > { %v5144_v35 = vpop.eup %5143  ;;  %5155 = vtanh.f32 %v2478_v41  ;;  %v2230_v29 = vmul.f32 0.044715, %v2102_v46  ;;  %v2110_v4 = vmul.f32 %v1982_v25, %v6583_v23 }
 0x241   : > { %v5146_v1 = vpop.eup %5145  ;;  %5157 = vtanh.f32 %v2479_v42  ;;  %v2231_v17 = vmul.f32 0.044715, %v2103_v14  ;;  %v2111_v20 = vmul.f32 %v1983_v10, %v6589_v58  ;;  %v1554_v12 = vpop.f32.mrb[12].mxu1  ;;  %v6604_v6 = vadd.f32 1.0, %v5144_v35 }
 0x242   : > { %v5148_v22 = vpop.eup %5147  ;;  %v2358_v54 = vadd.f32 %v2230_v29, %v6572_v13  ;;  %v2238_v3 = vmul.f32 0.044715, %v2110_v4  ;;  %v6608_v53 = vadd.f32 %v1554_v12, %v6503_v26  ;;  %v1556_v32 = vpop.f32.mrb[13].mxu1  ;;  %v2711_v11 = vadd.f32 1.0, %v5146_v1 }
 0x243   : > { %v2359_v57 = vadd.f32 %v2231_v17, %v6577_v39  ;;  %v2239_v8 = vmul.f32 0.044715, %v2111_v20  ;;  %v6612_v16 = vadd.f32 %v1556_v32, %v6508_v61  ;;  %v1558_v37 = vpop.f32.mrb[14].mxu1  ;;  %v6614_v5 = vadd.f32 1.0, %v5148_v22  ;;  %v5150_v52 = vpop.eup %5149 }
 0x244   : > { %v2486_v62 = vmul.f32 0.7978846, %v2358_v54  ;;  %v2366_v34 = vadd.f32 %v2238_v3, %v6583_v23  ;;  %v1990_v48 = vmul.f32 %v6608_v53, %v6608_v53  ;;  %v6620_v44 = vadd.f32 %v1558_v37, %v6503_v26  ;;  %v1560_v27 = vpop.f32.mrb[15].mxu1 }
 0x245   : > { %v2487_v45 = vmul.f32 0.7978846, %v2359_v57  ;;  %v2367_v59 = vadd.f32 %v2239_v8, %v6589_v58  ;;  %v1991_v38 = vmul.f32 %v6612_v16, %v6612_v16  ;;  %v6626_v56 = vadd.f32 %v1560_v27, %v6508_v61 }
 0x246   : > { %5159 = vtanh.f32 %v2486_v62  ;;  %v2494_v33 = vmul.f32 0.7978846, %v2366_v34  ;;  %v2118_v43 = vmul.f32 %v1990_v48, %v6608_v53  ;;  %v1998_v7 = vmul.f32 %v6620_v44, %v6620_v44  ;;  %1922 = vmatmul.mubr.bf16.gmra.mrb[120].mxu1 %v6142_v55 }
 0x247   : > { %5161 = vtanh.f32 %v2487_v45  ;;  %v2495_v60 = vmul.f32 0.7978846, %v2367_v59  ;;  %v2119_v9 = vmul.f32 %v1991_v38, %v6612_v16  ;;  %v1999_v50 = vmul.f32 %v6626_v56, %v6626_v56  ;;  %1931 = vmatprep.mubr.bf16.mxu1 %v6145_v2 }
 0x248   : > { %v6636_v0 = vpop.eup %5151  ;;  %5163 = vtanh.f32 %v2494_v33  ;;  %v2246_v41 = vmul.f32 0.044715, %v2118_v43  ;;  %v2126_v46 = vmul.f32 %v1998_v7, %v6620_v44  ;;  %v2719_v25 = vadd.f32 1.0, %v5150_v52 }
 0x249   : > { %v6639_v42 = vpop.eup %5153  ;;  %5165 = vtanh.f32 %v2495_v60  ;;  %v2247_v55 = vmul.f32 0.044715, %v2119_v9  ;;  %v2127_v14 = vmul.f32 %v1999_v50, %v6626_v56  ;;  %v1564_v10 = vpop.f32.mrb[16].mxu1  ;;  %v2839_v35 = vmul.f32 0.5, %v2711_v11 }
 0x24a   : > { %v6642_v29 = vpop.eup %5155  ;;  %v2374_v4 = vadd.f32 %v2246_v41, %v6608_v53  ;;  %v2254_v2 = vmul.f32 0.044715, %v2126_v46  ;;  %v6646_v1 = vadd.f32 %v1564_v10, %v6503_v26  ;;  %v1566_v17 = vpop.f32.mrb[17].mxu1  ;;  %v2847_v20 = vmul.f32 0.5, %v2719_v25 }
 0x24b   : > { %v6648_v12 = vpop.eup %5157  ;;  %v2375_v22 = vadd.f32 %v2247_v55, %v6612_v16  ;;  %v2255_v54 = vmul.f32 0.044715, %v2127_v14  ;;  %v6652_v3 = vadd.f32 %v1566_v17, %v6508_v61  ;;  %v1568_v32 = vpop.f32.mrb[18].mxu1  ;;  %v2967_v11 = vmul.f32 %v2839_v35, %v6514_v30 }
 0x24c   : > { %v2502_v57 = vmul.f32 0.7978846, %v2374_v4  ;;  %v2382_v8 = vadd.f32 %v2254_v2, %v6620_v44  ;;  %v2006_v37 = vmul.f32 %v6646_v1, %v6646_v1  ;;  %v6659_v62 = vadd.f32 %v1568_v32, %v6503_v26  ;;  %v1570_v34 = vpop.f32.mrb[19].mxu1 }
 0x24d   : > { %v2503_v48 = vmul.f32 0.7978846, %v2375_v22  ;;  %v2383_v27 = vadd.f32 %v2255_v54, %v6626_v56  ;;  %v2007_v52 = vmul.f32 %v6652_v3, %v6652_v3  ;;  %v6665_v45 = vadd.f32 %v1570_v34, %v6508_v61 }
 0x24e   : > { %5167 = vtanh.f32 %v2502_v57  ;;  %v2510_v30 = vmul.f32 0.7978846, %v2382_v8  ;;  %v2134_v59 = vmul.f32 %v2006_v37, %v6646_v1  ;;  %v2014_v38 = vmul.f32 %v6659_v62, %v6659_v62  ;;  %1932 = vmatmul.mubr.bf16.gmra.mrb[124].mxu1 %v6167_v49 }
 0x24f   : > { %5169 = vtanh.f32 %v2503_v48  ;;  %v2511_v33 = vmul.f32 0.7978846, %v2383_v27  ;;  %v2135_v43 = vmul.f32 %v2007_v52, %v6652_v3  ;;  %v2015_v7 = vmul.f32 %v6665_v45, %v6665_v45 }
 0x250   : > { %v6674_v60 = vpop.eup %5159  ;;  %5171 = vtanh.f32 %v2510_v30  ;;  %v2262_v9 = vmul.f32 0.044715, %v2134_v59  ;;  %v2142_v50 = vmul.f32 %v2014_v38, %v6659_v62  ;;  %v2975_v41 = vmul.f32 %v2847_v20, %v6524_v40  ;;  %v4972_v38 = vld [vmem:[%s8616_s5 + $0x114] ss:$8 sps:$4 sm:$0xff]  }
 0x251   : > { %v6678_v46 = vpop.eup %5161  ;;  %5173 = vtanh.f32 %v2511_v33  ;;  %v2263_v25 = vmul.f32 0.044715, %v2135_v43  ;;  %v2143_v49 = vmul.f32 %v2015_v7, %v6665_v45  ;;  %v2838_v55 = vmul.f32 0.5, %v6604_v6  ;;  %v1574_v14 = vpop.f32.mrb[20].mxu1 }
 0x252   : > { %v6682_v10 = vpop.eup %5163  ;;  %v2390_v35 = vadd.f32 %v2262_v9, %v6646_v1  ;;  %v2270_v4 = vmul.f32 0.044715, %v2142_v50  ;;  %v3095_v2 = vpack.c.bf16 %v2975_v41, %v2967_v11  ;;  %v2846_v17 = vmul.f32 0.5, %v6614_v5  ;;  %v1576_v22 = vpop.f32.mrb[21].mxu1  ;;  %v4970_v41 = vld [vmem:[%s8616_s5 + $0x110] ss:$8 sps:$4 sm:$0xff]  }
 0x253   : > { %v6686_v54 = vpop.eup %5165  ;;  %v2391_v40 = vadd.f32 %v2263_v25, %v6652_v3  ;;  %v2271_v20 = vmul.f32 0.044715, %v2143_v49  ;;  %v2966_v32 = vmul.f32 %v2838_v55, %v6511_v51  ;;  %v6691_v57 = vadd.f32 %v1574_v14, %v6503_v26  ;;  %v1578_v6 = vpop.f32.mrb[22].mxu1  ;;  %v4967_v51 = vld [vmem:[%s8616_s5 + $0x100] ss:$8 sps:$4 sm:$0xff]  }
 0x254   : > { %v2518_v8 = vmul.f32 0.7978846, %v2390_v35  ;;  %v2398_v37 = vadd.f32 %v2270_v4, %v6659_v62  ;;  %3970 = vmatprep.mubr.bf16.mxu0 %v3095_v2  ;;  %v2974_v11 = vmul.f32 %v2846_v17, %v6519_v47  ;;  %v6696_v5 = vadd.f32 %v1576_v22, %v6508_v61  ;;  %v1580_v34 = vpop.f32.mrb[23].mxu1  ;;  %v4975_v17 = vld [vmem:[%s8616_s5 + $0x124] ss:$8 sps:$4 sm:$0xff]  }
 0x255   : > { %v2519_v48 = vmul.f32 0.7978846, %v2391_v40  ;;  %v2399_v27 = vadd.f32 %v2271_v20, %v6665_v45  ;;  %v2022_v52 = vmul.f32 %v6691_v57, %v6691_v57  ;;  %v6705_v30 = vadd.f32 %v1578_v6, %v6503_v26 }
 0x256   : > { %5175 = vtanh.f32 %v2518_v8  ;;  %v2526_v59 = vmul.f32 0.7978846, %v2398_v37  ;;  %v3094_v47 = vpack.c.bf16 %v2974_v11, %v2966_v32  ;;  %v2023_v33 = vmul.f32 %v6696_v5, %v6696_v5 }
 0x257   : > { %5177 = vtanh.f32 %v2519_v48  ;;  %v2527_v43 = vmul.f32 0.7978846, %v2399_v27  ;;  %v2150_v7 = vmul.f32 %v2022_v52, %v6691_v57  ;;  %v2030_v9 = vmul.f32 %v6705_v30, %v6705_v30 }
 0x258   : > { %v6715_v50 = vpop.eup %5167  ;;  %5179 = vtanh.f32 %v2526_v59  ;;  %3971 = vmatmul.mubr.bf16.vlgmr.msra.gmra.mrb[0].mxu0 %v3094_v47  ;;  %v2151_v25 = vmul.f32 %v2023_v33, %v6696_v5  ;;  %v6722_v49 = vadd.f32 %v1580_v34, %v6508_v61  ;;  %v2727_v55 = vadd.f32 1.0, %v6639_v42 }
 0x259   : > { %v6725_v14 = vpop.eup %5169  ;;  %5181 = vtanh.f32 %v2527_v43  ;;  %4052 = vmatpush1.bf16.msra.mxu0 %v4967_v51  ;;  %v2278_v35 = vmul.f32 0.044715, %v2150_v7  ;;  %v2158_v4 = vmul.f32 %v2030_v9, %v6705_v30  ;;  %v2735_v2 = vadd.f32 1.0, %v6648_v12  ;;  %v1584_v22 = vpop.f32.mrb[24].mxu1  ;;  %v4973_v7 = vld [vmem:[%s8616_s5 + $0x120] ss:$8 sps:$4 sm:$0xff]  }
 0x25a   : > { %v6732_v40 = vpop.eup %5171  ;;  %4053 = vmatprep.subr.bf16.mxu0 %v4972_v38  ;;  %v2279_v20 = vmul.f32 0.044715, %v2151_v25  ;;  %v2031_v42 = vmul.f32 %v6722_v49, %v6722_v49  ;;  %v2855_v32 = vmul.f32 0.5, %v2727_v55  ;;  %v2726_v6 = vadd.f32 1.0, %v6636_v0  ;;  %v1586_v8 = vpop.f32.mrb[25].mxu1 }
 0x25b   : > { %v6737_v37 = vpop.eup %5173  ;;  %v2406_v12 = vadd.f32 %v2278_v35, %v6691_v57  ;;  %v2286_v11 = vmul.f32 0.044715, %v2158_v4  ;;  %v2863_v34 = vmul.f32 0.5, %v2735_v2  ;;  %v2734_v48 = vadd.f32 1.0, %v6642_v29  ;;  %v1588_v27 = vpop.f32.mrb[26].mxu1 }
 0x25c   : > { %v2407_v51 = vadd.f32 %v2279_v20, %v6696_v5  ;;  %v2159_v52 = vmul.f32 %v2031_v42, %v6722_v49  ;;  %v2983_v59 = vmul.f32 %v2855_v32, %v6541_v15  ;;  %v2854_v47 = vmul.f32 0.5, %v2726_v6  ;;  %v1590_v38 = vpop.f32.mrb[27].mxu1  ;;  %v4978_v15 = vld [vmem:[%s8616_s5 + $0x134] ss:$8 sps:$4 sm:$0xff]  }
 0x25d   : > { %v2534_v33 = vmul.f32 0.7978846, %v2406_v12  ;;  %4054 = vmatpush1.bf16.msra.mxu0 %v4970_v41  ;;  %v2414_v0 = vadd.f32 %v2286_v11, %v6705_v30  ;;  %v2991_v43 = vmul.f32 %v2863_v34, %v6554_v19  ;;  %v2862_v29 = vmul.f32 0.5, %v2734_v48 }
 0x25e   : > { %v2535_v9 = vmul.f32 0.7978846, %v2407_v51  ;;  %v2287_v25 = vmul.f32 0.044715, %v2159_v52  ;;  %4055 = vmatprep.subr.bf16.mxu0 %v4975_v17  ;;  %v2982_v55 = vmul.f32 %v2854_v47, %v6538_v31  ;;  %v6754_v41 = vadd.f32 %v1584_v22, %v6503_v26 }
 0x25f   : > { %5183 = vtanh.f32 %v2534_v33  ;;  %v2542_v35 = vmul.f32 0.7978846, %v2414_v0  ;;  %v3103_v19 = vpack.c.bf16 %v2991_v43, %v2983_v59  ;;  %v2990_v4 = vmul.f32 %v2862_v29, %v6549_v21  ;;  %v4976_v21 = vld [vmem:[%s8616_s5 + $0x130] ss:$8 sps:$4 sm:$0xff]  }
 0x260   : > { %v6757_v2 = vpop.eup %5175  ;;  %5185 = vtanh.f32 %v2535_v9  ;;  %v2415_v20 = vadd.f32 %v2287_v25, %v6722_v49  ;;  %v2038_v31 = vmul.f32 %v6754_v41, %v6754_v41  ;;  %v6763_v17 = vadd.f32 %v1586_v8, %v6508_v61 }
 0x261   : > { %v6765_v42 = vpop.eup %5177  ;;  %5187 = vtanh.f32 %v2542_v35  ;;  %3980 = vmatprep.mubr.bf16.mxu0 %v3103_v19  ;;  %v3102_v22 = vpack.c.bf16 %v2990_v4, %v2982_v55  ;;  %4056 = vmatpush1.bf16.msra.mxu0 %v4973_v7  ;;  %v6771_v32 = vadd.f32 %v1588_v27, %v6503_v26  ;;  %v6774_v6 = vadd.f32 %v1590_v38, %v6508_v61  ;;  %v1594_v12 = vpop.f32.mrb[28].mxu1  ;;  %v4981_v27 = vld [vmem:[%s8616_s5 + $0x144] ss:$8 sps:$4 sm:$0xff]   ;;  %v4979_v35 = vld [vmem:[%s8616_s5 + $0x140] ss:$8 sps:$4 sm:$0xff]  }
 0x262   : > { %v6776_v11 = vpop.eup %5179  ;;  %v2543_v8 = vmul.f32 0.7978846, %v2415_v20  ;;  %4057 = vmatprep.subr.bf16.mxu0 %v4978_v15  ;;  %v2166_v34 = vmul.f32 %v2038_v31, %v6754_v41  ;;  %v2039_v48 = vmul.f32 %v6763_v17, %v6763_v17  ;;  %v2743_v51 = vadd.f32 1.0, %v6678_v46  ;;  %v1596_v52 = vpop.f32.mrb[29].mxu1  ;;  %v4984_v31 = vld [vmem:[%s8616_s5 + $0x154] ss:$8 sps:$4 sm:$0xff]  }
 0x263   : > { %v6785_v59 = vpop.eup %5181  ;;  %3981 = vmatmul.mubr.bf16.gmra.mrb[4].mxu0 %v3102_v22  ;;  %v2046_v47 = vmul.f32 %v6771_v32, %v6771_v32  ;;  %v2047_v38 = vmul.f32 %v6774_v6, %v6774_v6  ;;  %v2751_v33 = vadd.f32 1.0, %v6686_v54  ;;  %v2742_v0 = vadd.f32 1.0, %v6674_v60  ;;  %v1598_v43 = vpop.f32.mrb[30].mxu1 }
 0x264   : > { %5189 = vtanh.f32 %v2543_v8  ;;  %v2294_v46 = vmul.f32 0.044715, %v2166_v34  ;;  %v2167_v7 = vmul.f32 %v2039_v48, %v6763_v17  ;;  %v2871_v29 = vmul.f32 0.5, %v2743_v51  ;;  %v1600_v9 = vpop.f32.mrb[31].mxu1 }
 0x265   : > { %4058 = vmatpush1.bf16.msra.mxu0 %v4976_v21  ;;  %v2174_v25 = vmul.f32 %v2046_v47, %v6771_v32  ;;  %v2175_v55 = vmul.f32 %v2047_v38, %v6774_v6  ;;  %v2879_v15 = vmul.f32 0.5, %v2751_v33  ;;  %v2750_v54 = vadd.f32 1.0, %v6682_v10 }
 0x266   : > { %v2422_v60 = vadd.f32 %v2294_v46, %v6754_v41  ;;  %v2295_v19 = vmul.f32 0.044715, %v2167_v7  ;;  %v2999_v4 = vmul.f32 %v2871_v29, %v6577_v39  ;;  %4059 = vmatprep.subr.bf16.mxu0 %v4981_v27  ;;  %v2870_v20 = vmul.f32 0.5, %v2742_v0 }
 0x267   : > { %v2302_v22 = vmul.f32 0.044715, %v2174_v25  ;;  %v2303_v21 = vmul.f32 0.044715, %v2175_v55  ;;  %v3007_v8 = vmul.f32 %v2879_v15, %v6589_v58  ;;  %v2878_v34 = vmul.f32 0.5, %v2750_v54 }
 0x268   : > { %v2550_v48 = vmul.f32 0.7978846, %v2422_v60  ;;  %v2423_v51 = vadd.f32 %v2295_v19, %v6763_v17  ;;  %v2998_v10 = vmul.f32 %v2870_v20, %v6572_v13  ;;  %v6809_v47 = vadd.f32 %v1594_v12, %v6503_v26  ;;  %v4982_v58 = vld [vmem:[%s8616_s5 + $0x150] ss:$8 sps:$4 sm:$0xff]  }
 0x269   : > { %v6811_v39 = vpop.eup %5183  ;;  %v2430_v27 = vadd.f32 %v2302_v22, %v6771_v32  ;;  %v2431_v38 = vadd.f32 %v2303_v21, %v6774_v6  ;;  %v3111_v33 = vpack.c.bf16 %v3007_v8, %v2999_v4  ;;  %v3006_v0 = vmul.f32 %v2878_v34, %v6583_v23  ;;  %4060 = vmatpush1.bf16.msra.mxu0 %v4979_v35  ;;  %v1637_v46 = vpop.f32.mrb[32].mxu1  ;;  %v4987_v23 = vld [vmem:[%s8616_s5 + $0x164] ss:$8 sps:$4 sm:$0xff]  }
 0x26a   : > { %v6819_v7 = vpop.eup %5185  ;;  %5191 = vtanh.f32 %v2550_v48  ;;  %v2551_v13 = vmul.f32 0.7978846, %v2423_v51  ;;  %4061 = vmatprep.subr.bf16.mxu0 %v4984_v31  ;;  %v2054_v12 = vmul.f32 %v6809_v47, %v6809_v47  ;;  %v6824_v29 = vadd.f32 %v1596_v52, %v6508_v61  ;;  %v6829_v25 = vpop.f32.mrb[33].mxu1 }
 0x26b   : > { %v6831_v55 = vpop.eup %5187  ;;  %v2558_v15 = vmul.f32 0.7978846, %v2430_v27  ;;  %v2559_v35 = vmul.f32 0.7978846, %v2431_v38  ;;  %3990 = vmatprep.mubr.bf16.mxu0 %v3111_v33  ;;  %v3110_v54 = vpack.c.bf16 %v3006_v0, %v2998_v10  ;;  %v6834_v60 = vadd.f32 %v1598_v43, %v6503_v26  ;;  %v1641_v19 = vpop.f32.mrb[34].mxu1 }
 0x26c   : > { %5193 = vtanh.f32 %v2551_v13  ;;  %v2182_v52 = vmul.f32 %v2054_v12, %v6809_v47  ;;  %v2055_v4 = vmul.f32 %v6824_v29, %v6824_v29  ;;  %v6840_v20 = vadd.f32 %v1600_v9, %v6508_v61  ;;  %v1643_v31 = vpop.f32.mrb[35].mxu1  ;;  %v4985_v9 = vld [vmem:[%s8616_s5 + $0x160] ss:$8 sps:$4 sm:$0xff]   ;;  %v4990_v10 = vld [vmem:[%s8616_s5 + $0x174] ss:$8 sps:$4 sm:$0xff]  }
 0x26d   : > { %5195 = vtanh.f32 %v2558_v15  ;;  %3991 = vmatmul.mubr.bf16.gmra.mrb[8].mxu0 %v3110_v54  ;;  %v2062_v22 = vmul.f32 %v6834_v60, %v6834_v60  ;;  %v2759_v21 = vadd.f32 1.0, %v6725_v14  ;;  %v2767_v26 = vadd.f32 1.0, %v6737_v37 }
 0x26e   : > { %v6846_v43 = vpop.eup %5189  ;;  %5197 = vtanh.f32 %v2559_v35  ;;  %v2310_v8 = vmul.f32 0.044715, %v2182_v52  ;;  %4062 = vmatpush1.bf16.msra.mxu0 %v4982_v58  ;;  %v2183_v34 = vmul.f32 %v2055_v4, %v6824_v29  ;;  %v2063_v61 = vmul.f32 %v6840_v20, %v6840_v20 }
 0x26f   : > { %v2190_v48 = vmul.f32 %v2062_v22, %v6834_v60  ;;  %v2887_v51 = vmul.f32 0.5, %v2759_v21  ;;  %v2895_v14 = vmul.f32 0.5, %v2767_v26  ;;  %4063 = vmatprep.subr.bf16.mxu0 %v4987_v23  ;;  %v2758_v37 = vadd.f32 1.0, %v6715_v50  ;;  %v4988_v50 = vld [vmem:[%s8616_s5 + $0x170] ss:$8 sps:$4 sm:$0xff]  }
 0x270   : > { %v2438_v27 = vadd.f32 %v2310_v8, %v6809_v47  ;;  %v2311_v38 = vmul.f32 0.044715, %v2183_v34  ;;  %v2191_v33 = vmul.f32 %v2063_v61, %v6840_v20  ;;  %v2766_v0 = vadd.f32 1.0, %v6732_v40  ;;  %v4993_v26 = vld [vmem:[%s8616_s5 + $0x184] ss:$8 sps:$4 sm:$0xff]  }
 0x271   : > { %v2318_v58 = vmul.f32 0.044715, %v2190_v48  ;;  %v3015_v13 = vmul.f32 %v2887_v51, %v6612_v16  ;;  %v3023_v12 = vmul.f32 %v2895_v14, %v6626_v56  ;;  %v2886_v15 = vmul.f32 0.5, %v2758_v37  ;;  %v6867_v23 = vpop.f32.mrb[36].mxu1 }
 0x272   : > { %v2566_v35 = vmul.f32 0.7978846, %v2438_v27  ;;  %v2439_v54 = vadd.f32 %v2311_v38, %v6824_v29  ;;  %v2319_v52 = vmul.f32 0.044715, %v2191_v33  ;;  %v2894_v4 = vmul.f32 0.5, %v2766_v0  ;;  %4064 = vmatpush1.bf16.msra.mxu0 %v4985_v9  ;;  %v6870_v22 = vpop.f32.mrb[37].mxu1 }
 0x273   : > { %v2446_v40 = vadd.f32 %v2318_v58, %v6834_v60  ;;  %v3119_v16 = vpack.c.bf16 %v3023_v12, %v3015_v13  ;;  %v3014_v56 = vmul.f32 %v2886_v15, %v6608_v53  ;;  %4065 = vmatprep.subr.bf16.mxu0 %v4990_v10  ;;  %v6875_v21 = vadd.f32 %v1637_v46, %v6568_v24  ;;  %v6880_v8 = vpop.f32.mrb[38].mxu1  ;;  %v4991_v33 = vld [vmem:[%s8616_s5 + $0x180] ss:$8 sps:$4 sm:$0xff]  }
 0x274   : > { %v6882_v34 = vpop.eup %5191  ;;  %5199 = vtanh.f32 %v2566_v35  ;;  %v2567_v61 = vmul.f32 0.7978846, %v2439_v54  ;;  %v2447_v9 = vadd.f32 %v2319_v52, %v6840_v20  ;;  %v3022_v48 = vmul.f32 %v2894_v4, %v6620_v44  ;;  %v6886_v51 = vpop.f32.mrb[39].mxu1 }
 0x275   : > { %v2574_v53 = vmul.f32 0.7978846, %v2446_v40  ;;  %4000 = vmatprep.mubr.bf16.mxu0 %v3119_v16  ;;  %v1944_v46 = vmul.f32 %v6875_v21, %v6875_v21  ;;  %v6892_v14 = vadd.f32 %v6829_v25, %v6601_v36  ;;  %v6895_v37 = vadd.f32 %v1641_v19, %v6568_v24  ;;  %v4994_v40 = vld [vmem:[%s8616_s5 + $0x190] ss:$8 sps:$4 sm:$0xff]  }
 0x276   : > { %v6897_v10 = vpop.eup %5193  ;;  %5201 = vtanh.f32 %v2567_v61  ;;  %v2575_v27 = vmul.f32 0.7978846, %v2447_v9  ;;  %v3118_v38 = vpack.c.bf16 %v3022_v48, %v3014_v56  ;;  %4066 = vmatpush1.bf16.msra.mxu0 %v4988_v50  ;;  %v6900_v44 = vadd.f32 %v1643_v31, %v6601_v36  ;;  %v4996_v31 = vld [vmem:[%s8616_s5 + $0x194] ss:$8 sps:$4 sm:$0xff]  }
 0x277   : > { %v6905_v0 = vpop.eup %5195  ;;  %5203 = vtanh.f32 %v2574_v53  ;;  %v2072_v25 = vmul.f32 %v1944_v46, %v6875_v21  ;;  %v1945_v19 = vmul.f32 %v6892_v14, %v6892_v14  ;;  %v1952_v58 = vmul.f32 %v6895_v37, %v6895_v37  ;;  %4067 = vmatprep.subr.bf16.mxu0 %v4993_v26 }
 0x278   : > { %v6915_v13 = vpop.eup %5197  ;;  %5205 = vtanh.f32 %v2575_v27  ;;  %4001 = vmatmul.mubr.bf16.gmra.mrb[12].mxu0 %v3118_v38  ;;  %v1953_v12 = vmul.f32 %v6900_v44, %v6900_v44  ;;  %v2775_v15 = vadd.f32 1.0, %v6765_v42  ;;  %v2783_v50 = vadd.f32 1.0, %v6785_v59  ;;  %v4999_v59 = vld [vmem:[%s8616_s5 + $0x1a4] ss:$8 sps:$4 sm:$0xff]  }
 0x279   : > { %v2200_v35 = vmul.f32 0.044715, %v2072_v25  ;;  %v2073_v54 = vmul.f32 %v1945_v19, %v6892_v14  ;;  %v2080_v52 = vmul.f32 %v1952_v58, %v6895_v37  ;;  %v2774_v4 = vadd.f32 1.0, %v6757_v2  ;;  %v6927_v16 = vpop.f32.mrb[40].mxu1 }
 0x27a   : > { %v2081_v56 = vmul.f32 %v1953_v12, %v6900_v44  ;;  %v2903_v26 = vmul.f32 0.5, %v2775_v15  ;;  %v2911_v61 = vmul.f32 0.5, %v2783_v50  ;;  %v2782_v42 = vadd.f32 1.0, %v6776_v11  ;;  %4068 = vmatpush1.bf16.msra.mxu0 %v4991_v33  ;;  %v6934_v9 = vpop.f32.mrb[41].mxu1 }
 0x27b   : > { %v2328_v2 = vadd.f32 %v2200_v35, %v6875_v21  ;;  %v2201_v48 = vmul.f32 0.044715, %v2073_v54  ;;  %v2208_v53 = vmul.f32 0.044715, %v2080_v52  ;;  %v2902_v46 = vmul.f32 0.5, %v2774_v4  ;;  %4069 = vmatprep.subr.bf16.mxu0 %v4996_v31  ;;  %v6937_v27 = vpop.f32.mrb[42].mxu1 }
 0x27c   : > { %v2209_v38 = vmul.f32 0.044715, %v2081_v56  ;;  %v3031_v25 = vmul.f32 %v2903_v26, %v6652_v3  ;;  %v3039_v11 = vmul.f32 %v2911_v61, %v6665_v45  ;;  %v2910_v33 = vmul.f32 0.5, %v2782_v42  ;;  %v6941_v19 = vpop.f32.mrb[43].mxu1 }
 0x27d   : > { %v2456_v58 = vmul.f32 0.7978846, %v2328_v2  ;;  %v2329_v12 = vadd.f32 %v2201_v48, %v6892_v14  ;;  %v2336_v15 = vadd.f32 %v2208_v53, %v6895_v37  ;;  %v3030_v50 = vmul.f32 %v2902_v46, %v6646_v1  ;;  %v4997_v1 = vld [vmem:[%s8616_s5 + $0x1a0] ss:$8 sps:$4 sm:$0xff]  }
 0x27e   : > { %v6946_v35 = vpop.eup %5199  ;;  %v2337_v31 = vadd.f32 %v2209_v38, %v6900_v44  ;;  %v3127_v54 = vpack.c.bf16 %v3039_v11, %v3031_v25  ;;  %v3038_v52 = vmul.f32 %v2910_v33, %v6659_v62  ;;  %v6952_v3 = vadd.f32 %v6867_v23, %v6568_v24  ;;  %4070 = vmatpush1.bf16.msra.mxu0 %v4994_v40 }
 0x27f   : > { %5207 = vtanh.f32 %v2456_v58  ;;  %v2457_v45 = vmul.f32 0.7978846, %v2329_v12  ;;  %v2464_v4 = vmul.f32 0.7978846, %v2336_v15  ;;  %v6956_v56 = vadd.f32 %v6870_v22, %v6601_v36  ;;  %4071 = vmatprep.subr.bf16.mxu0 %v4999_v59  ;;  %v5002_v22 = vld [vmem:[%s8616_s5 + $0x1b4] ss:$8 sps:$4 sm:$0xff]  }
 0x280   : > { %v6961_v26 = vpop.eup %5201  ;;  %v2465_v62 = vmul.f32 0.7978846, %v2337_v31  ;;  %4010 = vmatprep.mubr.bf16.mxu0 %v3127_v54  ;;  %v3126_v61 = vpack.c.bf16 %v3038_v52, %v3030_v50  ;;  %v1960_v23 = vmul.f32 %v6952_v3, %v6952_v3  ;;  %v6967_v40 = vadd.f32 %v6880_v8, %v6568_v24  ;;  %v5000_v58 = vld [vmem:[%s8616_s5 + $0x1b0] ss:$8 sps:$4 sm:$0xff]   ;;  %v5005_v12 = vld [vmem:[%s8616_s5 + $0x1c4] ss:$8 sps:$4 sm:$0xff]  }
 0x281   : > { %v6972_v42 = vpop.eup %5203  ;;  %5209 = vtanh.f32 %v2457_v45  ;;  %v1961_v59 = vmul.f32 %v6956_v56, %v6956_v56  ;;  %v6978_v2 = vadd.f32 %v6886_v51, %v6601_v36  ;;  %v2791_v48 = vadd.f32 1.0, %v6819_v7  ;;  %v6981_v53 = vpop.f32.mrb[44].mxu1 }
 0x282   : > { %v6983_v8 = vpop.eup %5205  ;;  %5211 = vtanh.f32 %v2464_v4  ;;  %4011 = vmatmul.mubr.bf16.gmra.mrb[16].mxu0 %v3126_v61  ;;  %v2088_v46 = vmul.f32 %v1960_v23, %v6952_v3  ;;  %v1968_v38 = vmul.f32 %v6967_v40, %v6967_v40  ;;  %v2799_v25 = vadd.f32 1.0, %v6846_v43  ;;  %v6989_v11 = vpop.f32.mrb[45].mxu1 }
 0x283   : > { %5213 = vtanh.f32 %v2465_v62  ;;  %v2089_v51 = vmul.f32 %v1961_v59, %v6956_v56  ;;  %v1969_v7 = vmul.f32 %v6978_v2, %v6978_v2  ;;  %v2919_v33 = vmul.f32 0.5, %v2791_v48  ;;  %4072 = vmatpush1.bf16.msra.mxu0 %v4997_v1  ;;  %v7000_v15 = vpop.f32.mrb[46].mxu1 }
 0x284   : > { %v2216_v43 = vmul.f32 0.044715, %v2088_v46  ;;  %v2096_v50 = vmul.f32 %v1968_v38, %v6967_v40  ;;  %v2927_v31 = vmul.f32 0.5, %v2799_v25  ;;  %v2790_v54 = vadd.f32 1.0, %v6811_v39  ;;  %4073 = vmatprep.subr.bf16.mxu0 %v5002_v22  ;;  %v7004_v52 = vpop.f32.mrb[47].mxu1 }
 0x285   : > { %v2217_v45 = vmul.f32 0.044715, %v2089_v51  ;;  %v2097_v4 = vmul.f32 %v1969_v7, %v6978_v2  ;;  %v3047_v1 = vmul.f32 %v2919_v33, %v6696_v5  ;;  %v2798_v62 = vadd.f32 1.0, %v6831_v55  ;;  %v5003_v5 = vld [vmem:[%s8616_s5 + $0x1c0] ss:$8 sps:$4 sm:$0xff]  }
 0x286   : > { %v2344_v61 = vadd.f32 %v2216_v43, %v6952_v3  ;;  %v2224_v23 = vmul.f32 0.044715, %v2096_v50  ;;  %v3055_v59 = vmul.f32 %v2927_v31, %v6722_v49  ;;  %v2918_v48 = vmul.f32 0.5, %v2790_v54  ;;  %v5008_v7 = vld [vmem:[%s8616_s5 + $0x1d4] ss:$8 sps:$4 sm:$0xff]  }
 0x287   : > { %v2345_v46 = vadd.f32 %v2217_v45, %v6956_v56  ;;  %v2225_v38 = vmul.f32 0.044715, %v2097_v4  ;;  %v2926_v39 = vmul.f32 0.5, %v2798_v62  ;;  %v7014_v22 = vadd.f32 %v6927_v16, %v6568_v24  ;;  %4074 = vmatpush1.bf16.msra.mxu0 %v5000_v58 }
 0x288   : > { %v2472_v55 = vmul.f32 0.7978846, %v2344_v61  ;;  %v2352_v25 = vadd.f32 %v2224_v23, %v6967_v40  ;;  %v3135_v51 = vpack.c.bf16 %v3055_v59, %v3047_v1  ;;  %v3046_v49 = vmul.f32 %v2918_v48, %v6691_v57  ;;  %4075 = vmatprep.subr.bf16.mxu0 %v5005_v12  ;;  %v5006_v61 = vld [vmem:[%s8616_s5 + $0x1d0] ss:$8 sps:$4 sm:$0xff]  }
 0x289   : > { %v5208_v33 = vpop.eup %5207  ;;  %v2473_v43 = vmul.f32 0.7978846, %v2345_v46  ;;  %v2353_v16 = vadd.f32 %v2225_v38, %v6978_v2  ;;  %v3054_v58 = vmul.f32 %v2926_v39, %v6705_v30  ;;  %v1976_v50 = vmul.f32 %v7014_v22, %v7014_v22  ;;  %v7028_v31 = vpop.f32.mrb[48].mxu1  ;;  %v5011_v38 = vld [vmem:[%s8616_s5 + $0x1e4] ss:$8 sps:$4 sm:$0xff]  }
 0x28a   : > { %v2712_v54 = vadd.f32 1.0, %v5208_v33  ;;  %5215 = vtanh.f32 %v2472_v55  ;;  %v2480_v45 = vmul.f32 0.7978846, %v2352_v25  ;;  %4020 = vmatprep.mubr.bf16.mxu0 %v3135_v51  ;;  %v7032_v57 = vadd.f32 %v6934_v9, %v6601_v36  ;;  %v7034_v12 = vpop.f32.mrb[49].mxu1 }
 0x28b   : > { %v7036_v4 = vpop.eup %5209  ;;  %5217 = vtanh.f32 %v2473_v43  ;;  %v2481_v1 = vmul.f32 0.7978846, %v2353_v16  ;;  %v3134_v30 = vpack.c.bf16 %v3054_v58, %v3046_v49  ;;  %v2104_v62 = vmul.f32 %v1976_v50, %v7014_v22  ;;  %4076 = vmatpush1.bf16.msra.mxu0 %v5003_v5  ;;  %v7042_v23 = vpop.f32.mrb[50].mxu1 }
 0x28c   : > { %v5212_v59 = vpop.eup %5211  ;;  %v2840_v48 = vmul.f32 0.5, %v2712_v54  ;;  %5219 = vtanh.f32 %v2480_v45  ;;  %v1977_v9 = vmul.f32 %v7032_v57, %v7032_v57  ;;  %v7048_v46 = vadd.f32 %v6937_v27, %v6568_v24  ;;  %4077 = vmatprep.subr.bf16.mxu0 %v5008_v7  ;;  %v7053_v39 = vpop.f32.mrb[51].mxu1 }
 0x28d   : > { %v7055_v5 = vpop.eup %5213  ;;  %v2720_v55 = vadd.f32 1.0, %v5212_v59  ;;  %5221 = vtanh.f32 %v2481_v1  ;;  %4021 = vmatmul.mubr.bf16.gmra.mrb[20].mxu0 %v3134_v30  ;;  %v2232_v25 = vmul.f32 0.044715, %v2104_v62  ;;  %v7059_v51 = vadd.f32 %v6941_v19, %v6601_v36 }
 0x28e   : > { %v7062_v27 = vmul.f32 %v2840_v48, %v6875_v21  ;;  %v2105_v49 = vmul.f32 %v1977_v9, %v7032_v57  ;;  %v1984_v7 = vmul.f32 %v7048_v46, %v7048_v46  ;;  %v2807_v33 = vadd.f32 1.0, %v6897_v10  ;;  %v5009_v21 = vld [vmem:[%s8616_s5 + $0x1e0] ss:$8 sps:$4 sm:$0xff]   ;;  %v5014_v10 = vld [vmem:[%s8616_s5 + $0x1f4] ss:$8 sps:$4 sm:$0xff]  }
 0x28f   : > { %v2848_v43 = vmul.f32 0.5, %v2720_v55  ;;  %v2360_v16 = vadd.f32 %v2232_v25, %v7014_v22  ;;  %v1985_v58 = vmul.f32 %v7059_v51, %v7059_v51  ;;  %v2815_v50 = vadd.f32 1.0, %v6915_v13  ;;  %4078 = vmatpush1.bf16.msra.mxu0 %v5006_v61 }
 0x290   : > { %v2233_v19 = vmul.f32 0.044715, %v2105_v49  ;;  %v2112_v54 = vmul.f32 %v1984_v7, %v7048_v46  ;;  %v2935_v45 = vmul.f32 0.5, %v2807_v33  ;;  %v2806_v1 = vadd.f32 1.0, %v6882_v34  ;;  %4079 = vmatprep.subr.bf16.mxu0 %v5011_v38  ;;  %v5012_v38 = vld [vmem:[%s8616_s5 + $0x1f0] ss:$8 sps:$4 sm:$0xff]  }
 0x291   : > { %v7081_v30 = vmul.f32 %v2848_v43, %v6895_v37  ;;  %v2488_v13 = vmul.f32 0.7978846, %v2360_v16  ;;  %v2113_v62 = vmul.f32 %v1985_v58, %v7059_v51  ;;  %v2943_v61 = vmul.f32 0.5, %v2815_v50  ;;  %v7084_v59 = vpop.f32.mrb[52].mxu1 }
 0x292   : > { %v2361_v48 = vadd.f32 %v2233_v19, %v7032_v57  ;;  %v2240_v9 = vmul.f32 0.044715, %v2112_v54  ;;  %v3063_v55 = vmul.f32 %v2935_v45, %v6763_v17  ;;  %v2814_v34 = vadd.f32 1.0, %v6905_v0  ;;  %v7092_v25 = vpop.f32.mrb[53].mxu1  ;;  %v5017_v17 = vld [vmem:[%s8616_s5 + $0x204] ss:$8 sps:$4 sm:$0xff]  }
 0x293   : > { %v3096_v37 = vpack.c.bf16 %v7081_v30, %v7062_v27  ;;  %5223 = vtanh.f32 %v2488_v13  ;;  %v2241_v49 = vmul.f32 0.044715, %v2113_v62  ;;  %v3071_v7 = vmul.f32 %v2943_v61, %v6774_v6  ;;  %4080 = vmatpush1.bf16.msra.mxu0 %v5009_v21  ;;  %v7100_v33 = vpop.f32.mrb[54].mxu1  ;;  %v5023_v30 = vld [vmem:[%s8616_s5 + $0x224] ss:$8 sps:$4 sm:$0xff]  }
 0x294   : > { %v7102_v0 = vpop.eup %5215  ;;  %v2489_v43 = vmul.f32 0.7978846, %v2361_v48  ;;  %v2368_v16 = vadd.f32 %v2240_v9, %v7048_v46  ;;  %v2934_v58 = vmul.f32 0.5, %v2806_v1  ;;  %v2942_v50 = vmul.f32 0.5, %v2814_v34  ;;  %4081 = vmatprep.subr.bf16.mxu0 %v5014_v10  ;;  %v7105_v19 = vpop.f32.mrb[55].mxu1 }
 0x295   : > { %v7107_v54 = vpop.eup %5217  ;;  %v2369_v6 = vadd.f32 %v2241_v49, %v7059_v51  ;;  %v3143_v21 = vpack.c.bf16 %v3071_v7, %v3063_v55  ;;  %v7112_v45 = vadd.f32 %v6981_v53, %v6568_v24  ;;  %v7116_v13 = vadd.f32 %v6989_v11, %v6601_v36 }
 0x296   : > { %v7118_v62 = vpop.eup %5219  ;;  %5225 = vtanh.f32 %v2489_v43  ;;  %v2496_v1 = vmul.f32 0.7978846, %v2368_v16  ;;  %v3062_v10 = vmul.f32 %v2934_v58, %v6754_v41  ;;  %v3070_v61 = vmul.f32 %v2942_v50, %v6771_v32 }
 0x297   : > { %v7122_v48 = vpop.eup %5221  ;;  %v2497_v9 = vmul.f32 0.7978846, %v2369_v6  ;;  %4030 = vmatprep.mubr.bf16.mxu0 %v3143_v21  ;;  %v1992_v53 = vmul.f32 %v7112_v45, %v7112_v45  ;;  %v1993_v55 = vmul.f32 %v7116_v13, %v7116_v13  ;;  %v7130_v11 = vadd.f32 %v7000_v15, %v6568_v24  ;;  %4082 = vmatpush1.bf16.msra.mxu0 %v5012_v38 }
 0x298   : > { %5227 = vtanh.f32 %v2496_v1  ;;  %v3142_v34 = vpack.c.bf16 %v3070_v61, %v3062_v10  ;;  %v7134_v41 = vadd.f32 %v7004_v52, %v6601_v36  ;;  %v2823_v32 = vadd.f32 1.0, %v6961_v26  ;;  %4164 = vmatprep.subr.bf16.mxu0 %v5017_v17 }
 0x299   : > { %5229 = vtanh.f32 %v2497_v9  ;;  %v2120_v49 = vmul.f32 %v1992_v53, %v7112_v45  ;;  %v2121_v7 = vmul.f32 %v1993_v55, %v7116_v13  ;;  %v2000_v43 = vmul.f32 %v7130_v11, %v7130_v11  ;;  %v7141_v15 = vpop.f32.mrb[56].mxu1 }
 0x29a   : > { %4031 = vmatmul.mubr.bf16.gmra.mrb[24].mxu0 %v3142_v34  ;;  %v2001_v38 = vmul.f32 %v7134_v41, %v7134_v41  ;;  %v2831_v52 = vadd.f32 1.0, %v6983_v8  ;;  %v2951_v16 = vmul.f32 0.5, %v2823_v32  ;;  %v2822_v26 = vadd.f32 1.0, %v6946_v35  ;;  %v7147_v17 = vpop.f32.mrb[57].mxu1 }
 0x29b   : > { %v2248_v58 = vmul.f32 0.044715, %v2120_v49  ;;  %v2249_v50 = vmul.f32 0.044715, %v2121_v7  ;;  %v2128_v6 = vmul.f32 %v2000_v43, %v7130_v11  ;;  %v2830_v21 = vadd.f32 1.0, %v6972_v42  ;;  %v7151_v1 = vpop.f32.mrb[58].mxu1 }
 0x29c   : > { %v2129_v10 = vmul.f32 %v2001_v38, %v7134_v41  ;;  %v2959_v61 = vmul.f32 0.5, %v2831_v52  ;;  %v3079_v9 = vmul.f32 %v2951_v16, %v6824_v29  ;;  %v2950_v53 = vmul.f32 0.5, %v2822_v26  ;;  %v7155_v8 = vpop.f32.mrb[59].mxu1 }
 0x29d   : > { %v7157_v55 = vpop.eup %5223  ;;  %v2376_v35 = vadd.f32 %v2248_v58, %v7112_v45  ;;  %v2377_v34 = vadd.f32 %v2249_v50, %v7116_v13  ;;  %v2256_v32 = vmul.f32 0.044715, %v2128_v6  ;;  %v2958_v49 = vmul.f32 0.5, %v2830_v21 }
 0x29e   : > { %v2257_v7 = vmul.f32 0.044715, %v2129_v10  ;;  %v3087_v42 = vmul.f32 %v2959_v61, %v6840_v20  ;;  %v3078_v43 = vmul.f32 %v2950_v53, %v6809_v47  ;;  %v7165_v38 = vadd.f32 %v7028_v31, %v6568_v24 }
 0x29f   : > { %v2504_v29 = vmul.f32 0.7978846, %v2376_v35  ;;  %v2505_v52 = vmul.f32 0.7978846, %v2377_v34  ;;  %v2384_v16 = vadd.f32 %v2256_v32, %v7130_v11  ;;  %v3086_v26 = vmul.f32 %v2958_v49, %v6834_v60 }
 0x2a0   : > { %v7169_v58 = vpop.eup %5225  ;;  %v2385_v50 = vadd.f32 %v2257_v7, %v7134_v41  ;;  %v3151_v6 = vpack.c.bf16 %v3087_v42, %v3079_v9  ;;  %v2008_v20 = vmul.f32 %v7165_v38, %v7165_v38  ;;  %v7176_v47 = vadd.f32 %v7034_v12, %v6601_v36 }
 0x2a1   : > { %5231 = vtanh.f32 %v2504_v29  ;;  %v2512_v31 = vmul.f32 0.7978846, %v2384_v16  ;;  %v3150_v21 = vpack.c.bf16 %v3086_v26, %v3078_v43  ;;  %v7180_v10 = vadd.f32 %v7042_v23, %v6568_v24  ;;  %v7182_v60 = vpop.f32.mrb[60].mxu1 }
 0x2a2   : > { %v7184_v61 = vpop.eup %5227  ;;  %5233 = vtanh.f32 %v2505_v52  ;;  %v2513_v9 = vmul.f32 0.7978846, %v2385_v50  ;;  %4040 = vmatprep.mubr.bf16.mxu0 %v3151_v6  ;;  %v2136_v53 = vmul.f32 %v2008_v20, %v7165_v38  ;;  %v2009_v12 = vmul.f32 %v7176_v47, %v7176_v47  ;;  %v7189_v35 = vpop.f32.mrb[61].mxu1 }
 0x2a3   : > { %v7191_v34 = vpop.eup %5229  ;;  %5235 = vtanh.f32 %v2512_v31  ;;  %4041 = vmatmul.mubr.bf16.gmra.mrb[28].mxu0 %v3150_v21  ;;  %v2016_v23 = vmul.f32 %v7180_v10, %v7180_v10  ;;  %v7197_v32 = vadd.f32 %v7053_v39, %v6601_v36  ;;  %v2713_v49 = vadd.f32 1.0, %v7036_v4  ;;  %v7200_v7 = vpop.f32.mrb[62].mxu1 }
 0x2a4   : > { %5237 = vtanh.f32 %v2513_v9  ;;  %v2264_v42 = vmul.f32 0.044715, %v2136_v53  ;;  %v2137_v43 = vmul.f32 %v2009_v12, %v7176_v47  ;;  %v2721_v29 = vadd.f32 1.0, %v7055_v5  ;;  %v7204_v52 = vpop.f32.mrb[63].mxu1 }
 0x2a5   : > { %v2144_v16 = vmul.f32 %v2016_v23, %v7180_v10  ;;  %v2017_v26 = vmul.f32 %v7197_v32, %v7197_v32  ;;  %v2841_v50 = vmul.f32 0.5, %v2713_v49  ;;  %v7211_v39 = vadd.f32 %v7084_v59, %v6568_v24 }
 0x2a6   : > { %v2392_v4 = vadd.f32 %v2264_v42, %v7165_v38  ;;  %v2265_v6 = vmul.f32 0.044715, %v2137_v43  ;;  %v2849_v20 = vmul.f32 0.5, %v2721_v29  ;;  %v7216_v31 = vadd.f32 %v7092_v25, %v6601_v36  ;;  %v5015_v43 = vld [vmem:[%s8616_s5 + $0x200] ss:$8 sps:$4 sm:$0xff]  }
 0x2a7   : > { %8633 = vst [vmem:[#allocation5_spill] sm:$0xff] %v7211_v39  ;;  %v2272_v5 = vmul.f32 0.044715, %v2144_v16  ;;  %v2145_v21 = vmul.f32 %v2017_v26, %v7197_v32  ;;  %v2969_v9 = vmul.f32 %v2841_v50, %v6892_v14  ;;  %v2024_v53 = vmul.f32 %v7211_v39, %v7211_v39  ;;  %v5020_v50 = vld [vmem:[%s8616_s5 + $0x214] ss:$8 sps:$4 sm:$0xff]  }
 0x2a8   : > { %8634 = vst [vmem:[#allocation6_spill] sm:$0xff] %v7216_v31  ;;  %v2520_v12 = vmul.f32 0.7978846, %v2392_v4  ;;  %v2393_v59 = vadd.f32 %v2265_v6, %v7176_v47  ;;  %v2977_v23 = vmul.f32 %v2849_v20, %v6900_v44  ;;  %v2025_v49 = vmul.f32 %v7216_v31, %v7216_v31 }
 0x2a9   : > { %v2400_v42 = vadd.f32 %v2272_v5, %v7180_v10  ;;  %v2273_v25 = vmul.f32 0.044715, %v2145_v21  ;;  %v2152_v14 = vmul.f32 %v2024_v53, %v7211_v39  ;;  %v7233_v29 = vadd.f32 %v7100_v33, %v6568_v24  ;;  %v7235_v16 = vpop.f32.mrb[64].mxu1 }
 0x2aa   : > { %5239 = vtanh.f32 %v2520_v12  ;;  %v2521_v44 = vmul.f32 0.7978846, %v2393_v59  ;;  %v3097_v26 = vpack.c.bf16 %v2977_v23, %v2969_v9  ;;  %v2153_v4 = vmul.f32 %v2025_v49, %v7216_v31  ;;  %v7241_v6 = vpop.f32.mrb[65].mxu1 }
 0x2ab   : > { %v7243_v20 = vpop.eup %5231  ;;  %v2528_v5 = vmul.f32 0.7978846, %v2400_v42  ;;  %v2401_v21 = vadd.f32 %v2273_v25, %v7197_v32  ;;  %v2280_v33 = vmul.f32 0.044715, %v2152_v14  ;;  %v2032_v53 = vmul.f32 %v7233_v29, %v7233_v29  ;;  %v7248_v12 = vpop.f32.mrb[66].mxu1 }
 0x2ac   : > { %v7250_v9 = vpop.eup %5233  ;;  %5241 = vtanh.f32 %v2521_v44  ;;  %4083 = vmatprep.mubr.bf16.mxu0 %v3097_v26  ;;  %v2281_v59 = vmul.f32 0.044715, %v2153_v4  ;;  %v7254_v23 = vadd.f32 %v7105_v19, %v6601_v36  ;;  %v2729_v49 = vadd.f32 1.0, %v7107_v54  ;;  %v7257_v42 = vpop.f32.mrb[67].mxu1  ;;  %v5018_v19 = vld [vmem:[%s8616_s5 + $0x210] ss:$8 sps:$4 sm:$0xff]  }
 0x2ad   : > { %v7259_v25 = vpop.eup %5235  ;;  %5243 = vtanh.f32 %v2528_v5  ;;  %v2529_v14 = vmul.f32 0.7978846, %v2401_v21  ;;  %4084 = vmatmul.mubr.bf16.vlgmr.msra.gmra.mrb[0].mxu0 %v3096_v37  ;;  %v2408_v44 = vadd.f32 %v2280_v33, %v7211_v39  ;;  %v2160_v26 = vmul.f32 %v2032_v53, %v7233_v29 }
 0x2ae   : > { %v7266_v4 = vpop.eup %5237  ;;  %4165 = vmatpush1.bf16.msra.mxu0 %v5015_v43  ;;  %v2409_v54 = vadd.f32 %v2281_v59, %v7216_v31  ;;  %v2033_v5 = vmul.f32 %v7254_v23, %v7254_v23  ;;  %v2737_v21 = vadd.f32 1.0, %v7122_v48  ;;  %v2857_v27 = vmul.f32 0.5, %v2729_v49 }
 0x2af   : > { %5245 = vtanh.f32 %v2529_v14  ;;  %4166 = vmatprep.subr.bf16.mxu0 %v5020_v50  ;;  %v2536_v37 = vmul.f32 0.7978846, %v2408_v44  ;;  %v2288_v43 = vmul.f32 0.044715, %v2160_v26  ;;  %v2728_v33 = vadd.f32 1.0, %v7102_v0 }
 0x2b0   : > { %v2537_v53 = vmul.f32 0.7978846, %v2409_v54  ;;  %v2161_v63 = vmul.f32 %v2033_v5, %v7254_v23  ;;  %v2865_v59 = vmul.f32 0.5, %v2737_v21  ;;  %v2985_v18 = vmul.f32 %v2857_v27, %v6956_v56  ;;  %v5021_v0 = vld [vmem:[%s8616_s5 + $0x220] ss:$8 sps:$4 sm:$0xff]  }
 0x2b1   : > { %5247 = vtanh.f32 %v2536_v37  ;;  %v2416_v48 = vadd.f32 %v2288_v43, %v7233_v29  ;;  %v2736_v49 = vadd.f32 1.0, %v7118_v62  ;;  %v2856_v39 = vmul.f32 0.5, %v2728_v33  ;;  %v7283_v31 = vpop.f32.mrb[68].mxu1 }
 0x2b2   : > { %4167 = vmatpush1.bf16.msra.mxu0 %v5018_v19  ;;  %5249 = vtanh.f32 %v2537_v53  ;;  %v2289_v50 = vmul.f32 0.044715, %v2161_v63  ;;  %v2993_v14 = vmul.f32 %v2865_v59, %v6978_v2  ;;  %v7291_v56 = vadd.f32 %v7141_v15, %v6568_v24  ;;  %v7293_v44 = vpop.f32.mrb[69].mxu1  ;;  %v5026_v63 = vld [vmem:[%s8616_s5 + $0x234] ss:$8 sps:$4 sm:$0xff]  }
 0x2b3   : > { %v2544_v26 = vmul.f32 0.7978846, %v2416_v48  ;;  %4168 = vmatprep.subr.bf16.mxu0 %v5023_v30  ;;  %v2864_v62 = vmul.f32 0.5, %v2736_v49  ;;  %v2984_v54 = vmul.f32 %v2856_v39, %v6952_v3  ;;  %v7301_v2 = vadd.f32 %v7147_v17, %v6601_v36  ;;  %v7303_v19 = vpop.f32.mrb[70].mxu1 }
 0x2b4   : > { %8635 = vst [vmem:[#allocation7_spill] sm:$0xff] %v7291_v56  ;;  %v7305_v5 = vpop.eup %5239  ;;  %v2417_v15 = vadd.f32 %v2289_v50, %v7254_v23  ;;  %v3105_v21 = vpack.c.bf16 %v2993_v14, %v2985_v18  ;;  %v2040_v27 = vmul.f32 %v7291_v56, %v7291_v56  ;;  %v7312_v3 = vadd.f32 %v7151_v1, %v6568_v24  ;;  %v7314_v39 = vpop.f32.mrb[71].mxu1  ;;  %v5024_v1 = vld [vmem:[%s8616_s5 + $0x230] ss:$8 sps:$4 sm:$0xff]   ;;  %v5029_v14 = vld [vmem:[%s8616_s5 + $0x244] ss:$8 sps:$4 sm:$0xff]  }
 0x2b5   : > { %5251 = vtanh.f32 %v2544_v26  ;;  %v2992_v17 = vmul.f32 %v2864_v62, %v6967_v40  ;;  %v2041_v30 = vmul.f32 %v7301_v2, %v7301_v2  ;;  %v7321_v37 = vadd.f32 %v7155_v8, %v6601_v36 }
 0x2b6   : > { %v7323_v18 = vpop.eup %5241  ;;  %v2545_v43 = vmul.f32 0.7978846, %v2417_v15  ;;  %4093 = vmatprep.mubr.bf16.mxu0 %v3105_v21  ;;  %4169 = vmatpush1.bf16.msra.mxu0 %v5021_v0  ;;  %v2168_v33 = vmul.f32 %v2040_v27, %v7291_v56  ;;  %v2048_v40 = vmul.f32 %v7312_v3, %v7312_v3  ;;  %v2745_v53 = vadd.f32 1.0, %v7169_v58 }
 0x2b7   : > { %v7332_v59 = vpop.eup %5243  ;;  %v3104_v8 = vpack.c.bf16 %v2992_v17, %v2984_v54  ;;  %4170 = vmatprep.subr.bf16.mxu0 %v5026_v63  ;;  %v2169_v48 = vmul.f32 %v2041_v30, %v7301_v2  ;;  %v2049_v49 = vmul.f32 %v7321_v37, %v7321_v37  ;;  %v2753_v50 = vadd.f32 1.0, %v7191_v34 }
 0x2b8   : > { %5253 = vtanh.f32 %v2545_v43  ;;  %v2296_v0 = vmul.f32 0.044715, %v2168_v33  ;;  %v2176_v26 = vmul.f32 %v2048_v40, %v7312_v3  ;;  %v2873_v58 = vmul.f32 0.5, %v2745_v53  ;;  %v5027_v43 = vld [vmem:[%s8616_s5 + $0x240] ss:$8 sps:$4 sm:$0xff]  }
 0x2b9   : > { %v7342_v62 = vpop.eup %5245  ;;  %4094 = vmatmul.mubr.bf16.gmra.mrb[4].mxu0 %v3104_v8  ;;  %v2297_v54 = vmul.f32 0.044715, %v2169_v48  ;;  %v2177_v63 = vmul.f32 %v2049_v49, %v7321_v37  ;;  %v2881_v15 = vmul.f32 0.5, %v2753_v50  ;;  %v2744_v21 = vadd.f32 1.0, %v7157_v55  ;;  %v7346_v27 = vpop.f32.mrb[72].mxu1 }
 0x2ba   : > { %v2424_v34 = vadd.f32 %v2296_v0, %v7291_v56  ;;  %4171 = vmatpush1.bf16.msra.mxu0 %v5024_v1  ;;  %v2304_v17 = vmul.f32 0.044715, %v2176_v26  ;;  %v3001_v30 = vmul.f32 %v2873_v58, %v7032_v57  ;;  %v2752_v33 = vadd.f32 1.0, %v7184_v61  ;;  %v7354_v40 = vpop.f32.mrb[73].mxu1  ;;  %v5032_v57 = vld [vmem:[%s8616_s5 + $0x254] ss:$8 sps:$4 sm:$0xff]  }
 0x2bb   : > { %v7356_v53 = vpop.eup %5247  ;;  %v2425_v55 = vadd.f32 %v2297_v54, %v7301_v2  ;;  %v2305_v8 = vmul.f32 0.044715, %v2177_v63  ;;  %v3009_v48 = vmul.f32 %v2881_v15, %v7059_v51  ;;  %4172 = vmatprep.subr.bf16.mxu0 %v5029_v14  ;;  %v2872_v1 = vmul.f32 0.5, %v2744_v21  ;;  %v7363_v49 = vpop.f32.mrb[74].mxu1 }
 0x2bc   : > { %v7365_v50 = vpop.eup %5249  ;;  %v2552_v61 = vmul.f32 0.7978846, %v2424_v34  ;;  %v2432_v0 = vadd.f32 %v2304_v17, %v7312_v3  ;;  %v2880_v26 = vmul.f32 0.5, %v2752_v33  ;;  %v7370_v58 = vadd.f32 %v7182_v60, %v6568_v24  ;;  %v7372_v54 = vpop.f32.mrb[75].mxu1  ;;  %v5030_v33 = vld [vmem:[%s8616_s5 + $0x250] ss:$8 sps:$4 sm:$0xff]  }
 0x2bd   : > { %v2553_v51 = vmul.f32 0.7978846, %v2425_v55  ;;  %v2433_v14 = vadd.f32 %v2305_v8, %v7321_v37  ;;  %v3113_v63 = vpack.c.bf16 %v3009_v48, %v3001_v30  ;;  %v3000_v15 = vmul.f32 %v2872_v1, %v7014_v22  ;;  %v5035_v8 = vld [vmem:[%s8616_s5 + $0x264] ss:$8 sps:$4 sm:$0xff]  }
 0x2be   : > { %5255 = vtanh.f32 %v2552_v61  ;;  %v2560_v21 = vmul.f32 0.7978846, %v2432_v0  ;;  %v3008_v56 = vmul.f32 %v2880_v26, %v7048_v46  ;;  %4173 = vmatpush1.bf16.msra.mxu0 %v5027_v43  ;;  %v2056_v34 = vmul.f32 %v7370_v58, %v7370_v58 }
 0x2bf   : > { %v7379_v17 = vpop.eup %5251  ;;  %5257 = vtanh.f32 %v2553_v51  ;;  %v2561_v60 = vmul.f32 0.7978846, %v2433_v14  ;;  %4103 = vmatprep.mubr.bf16.mxu0 %v3113_v63  ;;  %4174 = vmatprep.subr.bf16.mxu0 %v5032_v57  ;;  %v7386_v22 = vadd.f32 %v7189_v35, %v6601_v36  ;;  %v7390_v46 = vadd.f32 %v7200_v7, %v6568_v24  ;;  %v5033_v51 = vld [vmem:[%s8616_s5 + $0x260] ss:$8 sps:$4 sm:$0xff]  }
 0x2c0   : > { %5259 = vtanh.f32 %v2560_v21  ;;  %v3112_v30 = vpack.c.bf16 %v3008_v56, %v3000_v15  ;;  %v2184_v43 = vmul.f32 %v2056_v34, %v7370_v58  ;;  %v7395_v55 = vadd.f32 %v7204_v52, %v6601_v36  ;;  %v5038_v34 = vld [vmem:[%s8616_s5 + $0x274] ss:$8 sps:$4 sm:$0xff]  }
 0x2c1   : > { %5261 = vtanh.f32 %v2561_v60  ;;  %v2057_v35 = vmul.f32 %v7386_v22, %v7386_v22  ;;  %v2064_v24 = vmul.f32 %v7390_v46, %v7390_v46  ;;  %v2761_v7 = vadd.f32 1.0, %v7250_v9  ;;  %v7405_v56 = vpop.f32.mrb[76].mxu1 }
 0x2c2   : > { %v7407_v48 = vpop.eup %5253  ;;  %4104 = vmatmul.mubr.bf16.gmra.mrb[8].mxu0 %v3112_v30  ;;  %v2312_v36 = vmul.f32 0.044715, %v2184_v43  ;;  %v2065_v52 = vmul.f32 %v7395_v55, %v7395_v55  ;;  %v2769_v1 = vadd.f32 1.0, %v7266_v4  ;;  %v2760_v57 = vadd.f32 1.0, %v7243_v20  ;;  %v7413_v61 = vpop.f32.mrb[77].mxu1 }
 0x2c3   : > { %4175 = vmatpush1.bf16.msra.mxu0 %v5030_v33  ;;  %v2185_v0 = vmul.f32 %v2057_v35, %v7386_v22  ;;  %v2192_v9 = vmul.f32 %v2064_v24, %v7390_v46  ;;  %v2889_v26 = vmul.f32 0.5, %v2761_v7  ;;  %v2768_v14 = vadd.f32 1.0, %v7259_v25  ;;  %v7421_v63 = vpop.f32.mrb[78].mxu1 }
 0x2c4   : > { %v2440_v4 = vadd.f32 %v2312_v36, %v7370_v58  ;;  %v2193_v20 = vmul.f32 %v2065_v52, %v7395_v55  ;;  %v2897_v15 = vmul.f32 0.5, %v2769_v1  ;;  %4176 = vmatprep.subr.bf16.mxu0 %v5035_v8  ;;  %v2888_v21 = vmul.f32 0.5, %v2760_v57  ;;  %v7428_v60 = vpop.f32.mrb[79].mxu1 }
 0x2c5   : > { %v2313_v33 = vmul.f32 0.044715, %v2185_v0  ;;  %v2320_v30 = vmul.f32 0.044715, %v2192_v9  ;;  %v3017_v43 = vmul.f32 %v2889_v26, %v7116_v13  ;;  %v2896_v25 = vmul.f32 0.5, %v2768_v14 }
 0x2c6   : > { %v2568_v35 = vmul.f32 0.7978846, %v2440_v4  ;;  %v2321_v24 = vmul.f32 0.044715, %v2193_v20  ;;  %v3025_v7 = vmul.f32 %v2897_v15, %v7134_v41  ;;  %v3016_v36 = vmul.f32 %v2888_v21, %v7112_v45  ;;  %v5036_v41 = vld [vmem:[%s8616_s5 + $0x270] ss:$8 sps:$4 sm:$0xff]  }
 0x2c7   : > { %v2441_v8 = vadd.f32 %v2313_v33, %v7386_v22  ;;  %v2448_v52 = vadd.f32 %v2320_v30, %v7390_v46  ;;  %v3024_v1 = vmul.f32 %v2896_v25, %v7130_v11  ;;  %4177 = vmatpush1.bf16.msra.mxu0 %v5033_v51  ;;  %v828_v57 = vsub.s32 4, %v5904_v28  ;;  %v5041_v11 = vld [vmem:[%s8616_s5 + $0x284] ss:$8 sps:$4 sm:$0xff]  }
 0x2c8   : > { %v7437_v0 = vpop.eup %5255  ;;  %5263 = vtanh.f32 %v2568_v35  ;;  %v2449_v13 = vadd.f32 %v2321_v24, %v7395_v55  ;;  %v3121_v9 = vpack.c.bf16 %v3025_v7, %v3017_v43  ;;  %4178 = vmatprep.subr.bf16.mxu0 %v5038_v34  ;;  %v832_v45 = vsub.s32 5, %v5904_v28  ;;  %v7452_v20 = vld [vmem:[%s8615_s4] sm:$0xff] }
 0x2c9   : > { %v7447_v26 = vpop.eup %5257  ;;  %v2569_v51 = vmul.f32 0.7978846, %v2441_v8  ;;  %v2576_v14 = vmul.f32 0.7978846, %v2448_v52  ;;  %v3120_v4 = vpack.c.bf16 %v3024_v1, %v3016_v36  ;;  %8636 = vst [vmem:[#allocation8_spill] sm:$0xff] %v7452_v20  ;;  %v7455_v15 = vrot.slane %v7452_v20, %v828_v57  ;;  %v7457_v21 = vpop.f32.mrb[80].mxu1 }
 0x2ca   : > { %v7459_v34 = vpop.eup %5259  ;;  %v2577_v33 = vmul.f32 0.7978846, %v2449_v13  ;;  %4113 = vmatprep.mubr.bf16.mxu0 %v3121_v9  ;;  %v7462_v30 = vrot.slane %v7452_v20, %v832_v45  ;;  %v2777_v43 = vadd.f32 1.0, %v7323_v18  ;;  %v2785_v25 = vadd.f32 1.0, %v7342_v62  ;;  %v7466_v35 = vpop.f32.mrb[81].mxu1 }
 0x2cb   : > { %v7468_v24 = vpop.eup %5261  ;;  %5265 = vtanh.f32 %v2569_v51  ;;  %4114 = vmatmul.mubr.bf16.gmra.mrb[12].mxu0 %v3120_v4  ;;  %v7472_v7 = vadd.f32 %v7235_v16, %v7455_v15  ;;  %v7476_v36 = vadd.f32 %v7248_v12, %v7455_v15  ;;  %v2776_v8 = vadd.f32 1.0, %v7305_v5  ;;  %v7479_v52 = vpop.f32.mrb[82].mxu1  ;;  %v5039_v12 = vld [vmem:[%s8616_s5 + $0x280] ss:$8 sps:$4 sm:$0xff]   ;;  %v5042_v20 = vld [vmem:[%s8616_s5 + $0x290] ss:$8 sps:$4 sm:$0xff]  }
 0x2cc   : > { %5267 = vtanh.f32 %v2576_v14  ;;  %4179 = vmatpush1.bf16.msra.mxu0 %v5036_v41  ;;  %v7483_v18 = vadd.f32 %v7241_v6, %v7462_v30  ;;  %v7487_v62 = vadd.f32 %v7257_v42, %v7462_v30  ;;  %v2905_v16 = vmul.f32 0.5, %v2777_v43  ;;  %v7492_v1 = vpop.f32.mrb[83].mxu1  ;;  %v5044_v42 = vld [vmem:[%s8616_s5 + $0x294] ss:$8 sps:$4 sm:$0xff]  }
 0x2cd   : > { %5269 = vtanh.f32 %v2577_v33  ;;  %v1946_v5 = vmul.f32 %v7472_v7, %v7472_v7  ;;  %v1954_v57 = vmul.f32 %v7476_v36, %v7476_v36  ;;  %v2913_v6 = vmul.f32 0.5, %v2785_v25  ;;  %4180 = vmatprep.subr.bf16.mxu0 %v5041_v11 }
 0x2ce   : > { %v1947_v13 = vmul.f32 %v7483_v18, %v7483_v18  ;;  %v1955_v9 = vmul.f32 %v7487_v62, %v7487_v62  ;;  %v3033_v41 = vmul.f32 %v2905_v16, %v7176_v47  ;;  %v2784_v45 = vadd.f32 1.0, %v7332_v59  ;;  %v5047_v59 = vld [vmem:[%s8616_s5 + $0x2a4] ss:$8 sps:$4 sm:$0xff]  }
 0x2cf   : > { %v2074_v51 = vmul.f32 %v1946_v5, %v7472_v7  ;;  %v2082_v14 = vmul.f32 %v1954_v57, %v7476_v36  ;;  %v3041_v11 = vmul.f32 %v2913_v6, %v7197_v32  ;;  %v2904_v4 = vmul.f32 0.5, %v2776_v8 }
 0x2d0   : > { %v2075_v33 = vmul.f32 %v1947_v13, %v7483_v18  ;;  %v2083_v43 = vmul.f32 %v1955_v9, %v7487_v62  ;;  %v2912_v25 = vmul.f32 0.5, %v2784_v45  ;;  %4181 = vmatpush1.bf16.msra.mxu0 %v5039_v12  ;;  %v7517_v47 = vadd.f32 %v7283_v31, %v7455_v15 }
 0x2d1   : > { %v2202_v32 = vmul.f32 0.044715, %v2074_v51  ;;  %v2210_v8 = vmul.f32 0.044715, %v2082_v14  ;;  %v3129_v16 = vpack.c.bf16 %v3041_v11, %v3033_v41  ;;  %v3032_v5 = vmul.f32 %v2904_v4, %v7165_v38  ;;  %4182 = vmatprep.subr.bf16.mxu0 %v5044_v42  ;;  %v7523_v57 = vpop.f32.mrb[84].mxu1 }
 0x2d2   : > { %8637 = vst [vmem:[#allocation9_spill] sm:$0xff] %v7517_v47  ;;  %v7525_v12 = vpop.eup %5263  ;;  %v2203_v6 = vmul.f32 0.044715, %v2075_v33  ;;  %v2211_v13 = vmul.f32 0.044715, %v2083_v43  ;;  %v3040_v9 = vmul.f32 %v2912_v25, %v7180_v10  ;;  %v1962_v31 = vmul.f32 %v7517_v47, %v7517_v47  ;;  %v7530_v45 = vpop.f32.mrb[85].mxu1 }
 0x2d3   : > { %8638 = vst [vmem:[#allocation10_spill] sm:$0xff] %v7530_v45  ;;  %v2330_v51 = vadd.f32 %v2202_v32, %v7472_v7  ;;  %v2338_v41 = vadd.f32 %v2210_v8, %v7476_v36  ;;  %4123 = vmatprep.mubr.bf16.mxu0 %v3129_v16  ;;  %v7536_v38 = vadd.f32 %v7293_v44, %v7462_v30  ;;  %v7542_v14 = vpop.f32.mrb[86].mxu1  ;;  %v5045_v43 = vld [vmem:[%s8616_s5 + $0x2a0] ss:$8 sps:$4 sm:$0xff]   ;;  %v2793_v28 = vadd.f32 1.0, %v7365_v50 }
 0x2d4   : > { %v7540_v42 = vadd.f32 %v7303_v19, %v7455_v15  ;;  %8639 = vst [vmem:[#allocation11_spill] sm:$0xff] %v7542_v14  ;;  %v2331_v10 = vadd.f32 %v2203_v6, %v7483_v18  ;;  %v2339_v11 = vadd.f32 %v2211_v13, %v7487_v62  ;;  %v3128_v4 = vpack.c.bf16 %v3040_v9, %v3032_v5  ;;  %v7550_v44 = vpop.f32.mrb[87].mxu1  ;;  %v8641_v14 = vld [vmem:[#allocation6_spill] sm:$0xff] }
 0x2d5   : > { %v2090_v33 = vmul.f32 %v1962_v31, %v7517_v47  ;;  %4183 = vmatpush1.bf16.msra.mxu0 %v5042_v20  ;;  %8640 = vst [vmem:[#allocation12_spill] sm:$0xff] %v7550_v44  ;;  %v7552_v25 = vpop.eup %5265  ;;  %v2458_v19 = vmul.f32 0.7978846, %v2330_v51  ;;  %v2466_v32 = vmul.f32 0.7978846, %v2338_v41  ;;  %v1963_v8 = vmul.f32 %v7536_v38, %v7536_v38 }
 0x2d6   : > { %v1970_v16 = vmul.f32 %v7540_v42, %v7540_v42  ;;  %4184 = vmatprep.subr.bf16.mxu0 %v5047_v59  ;;  %v5050_v20 = vld [vmem:[%s8616_s5 + $0x2b4] ss:$8 sps:$4 sm:$0xff]   ;;  %v7561_v5 = vpop.eup %5267  ;;  %v2459_v6 = vmul.f32 0.7978846, %v2331_v10  ;;  %v2467_v13 = vmul.f32 0.7978846, %v2339_v11  ;;  %4124 = vmatmul.mubr.bf16.gmra.mrb[16].mxu0 %v3128_v4  ;;  %v7565_v31 = vadd.f32 %v7314_v39, %v7462_v30 }
 0x2d7   : > { %v2218_v9 = vmul.f32 0.044715, %v2090_v33  ;;  %v7567_v51 = vpop.eup %5269  ;;  %5271 = vtanh.f32 %v2458_v19  ;;  %v2091_v41 = vmul.f32 %v1963_v8, %v7536_v38  ;;  %v2801_v11 = vadd.f32 1.0, %v7407_v48  ;;  %v5048_v39 = vld [vmem:[%s8616_s5 + $0x2b0] ss:$8 sps:$4 sm:$0xff]  }
 0x2d8   : > { %v2098_v59 = vmul.f32 %v1970_v16, %v7540_v42  ;;  %5273 = vtanh.f32 %v2459_v6  ;;  %v1971_v10 = vmul.f32 %v7565_v31, %v7565_v31  ;;  %v5053_v4 = vld [vmem:[%s8616_s5 + $0x2c4] ss:$8 sps:$4 sm:$0xff]   ;;  %v2921_v19 = vmul.f32 0.5, %v2793_v28  ;;  %v5051_v28 = vld [vmem:[%s8616_s5 + $0x2c0] ss:$8 sps:$4 sm:$0xff]  }
 0x2d9   : > { %v2346_v44 = vadd.f32 %v2218_v9, %v7517_v47  ;;  %4185 = vmatpush1.bf16.msra.mxu0 %v5045_v43  ;;  %5275 = vtanh.f32 %v2466_v32  ;;  %v2219_v33 = vmul.f32 0.044715, %v2091_v41  ;;  %v7582_v8 = vpop.f32.mrb[88].mxu1  ;;  %v2929_v43 = vmul.f32 0.5, %v2801_v11 }
 0x2da   : > { %v2226_v50 = vmul.f32 0.044715, %v2098_v59  ;;  %4186 = vmatprep.subr.bf16.mxu0 %v5050_v20  ;;  %5277 = vtanh.f32 %v2467_v13  ;;  %v2099_v48 = vmul.f32 %v1971_v10, %v7565_v31  ;;  %v7585_v6 = vpop.f32.mrb[89].mxu1  ;;  %v3049_v45 = vmul.f32 %v2921_v19, %v8641_v14  ;;  %v5056_v59 = vld [vmem:[%s8616_s5 + $0x2d4] ss:$8 sps:$4 sm:$0xff]  }
 0x2db   : > { %v2474_v16 = vmul.f32 0.7978846, %v2346_v44  ;;  %v2347_v9 = vadd.f32 %v2219_v33, %v7536_v38  ;;  %v2792_v32 = vadd.f32 1.0, %v7356_v53  ;;  %v7594_v20 = vpop.f32.mrb[90].mxu1  ;;  %v3057_v13 = vmul.f32 %v2929_v43, %v7254_v23 }
 0x2dc   : > { %v2354_v47 = vadd.f32 %v2226_v50, %v7540_v42  ;;  %v2227_v44 = vmul.f32 0.044715, %v2099_v48  ;;  %v2800_v41 = vadd.f32 1.0, %v7379_v17  ;;  %v7601_v14 = vpop.f32.mrb[91].mxu1  ;;  %v7605_v33 = vadd.f32 %v7346_v27, %v7455_v15 }
 0x2dd   : > { %5279 = vtanh.f32 %v2474_v16  ;;  %4187 = vmatpush1.bf16.msra.mxu0 %v5048_v39  ;;  %v2475_v53 = vmul.f32 0.7978846, %v2347_v9  ;;  %v2920_v11 = vmul.f32 0.5, %v2792_v32  ;;  %v3137_v23 = vpack.c.bf16 %v3057_v13, %v3049_v45  ;;  %v8642_v39 = vld [vmem:[#allocation5_spill] sm:$0xff] }
 0x2de   : > { %v2482_v10 = vmul.f32 0.7978846, %v2354_v47  ;;  %4188 = vmatprep.subr.bf16.mxu0 %v5053_v4  ;;  %v2355_v50 = vadd.f32 %v2227_v44, %v7565_v31  ;;  %v2928_v19 = vmul.f32 0.5, %v2800_v41  ;;  %v7610_v17 = vadd.f32 %v7354_v40, %v7462_v30 }
 0x2df   : > { %5281 = vtanh.f32 %v2475_v53  ;;  %v3048_v16 = vmul.f32 %v2920_v11, %v8642_v39  ;;  %v1978_v47 = vmul.f32 %v7605_v33, %v7605_v33  ;;  %v7617_v48 = vadd.f32 %v7363_v49, %v7455_v15  ;;  %4133 = vmatprep.mubr.bf16.mxu0 %v3137_v23 }
 0x2e0   : > { %5283 = vtanh.f32 %v2482_v10  ;;  %v2483_v27 = vmul.f32 0.7978846, %v2355_v50  ;;  %v3056_v45 = vmul.f32 %v2928_v19, %v7233_v29  ;;  %v1979_v4 = vmul.f32 %v7610_v17, %v7610_v17  ;;  %v5054_v29 = vld [vmem:[%s8616_s5 + $0x2d0] ss:$8 sps:$4 sm:$0xff]  }
 0x2e1   : > { %4189 = vmatpush1.bf16.msra.mxu0 %v5051_v28  ;;  %v5272_v40 = vpop.eup %5271  ;;  %v2106_v43 = vmul.f32 %v1978_v47, %v7605_v33  ;;  %v1986_v9 = vmul.f32 %v7617_v48, %v7617_v48  ;;  %v7627_v32 = vadd.f32 %v7372_v54, %v7462_v30  ;;  %v2809_v49 = vadd.f32 1.0, %v7447_v26  ;;  %v7633_v44 = vpop.f32.mrb[92].mxu1  ;;  %v5059_v54 = vld [vmem:[%s8616_s5 + $0x2e4] ss:$8 sps:$4 sm:$0xff]  }
 0x2e2   : > { %4190 = vmatprep.subr.bf16.mxu0 %v5056_v59  ;;  %v7635_v28 = vpop.eup %5273  ;;  %v2714_v13 = vadd.f32 1.0, %v5272_v40  ;;  %5285 = vtanh.f32 %v2483_v27  ;;  %v3136_v41 = vpack.c.bf16 %v3056_v45, %v3048_v16  ;;  %v2107_v53 = vmul.f32 %v1979_v4, %v7610_v17  ;;  %v7641_v10 = vpop.f32.mrb[93].mxu1 }
 0x2e3   : > { %8643 = vst [vmem:[#allocation6_spill] sm:$0xff] %v7641_v10  ;;  %v5276_v26 = vpop.eup %5275  ;;  %v2234_v11 = vmul.f32 0.044715, %v2106_v43  ;;  %v2114_v50 = vmul.f32 %v1986_v9, %v7617_v48  ;;  %v1987_v59 = vmul.f32 %v7627_v32, %v7627_v32  ;;  %v2817_v23 = vadd.f32 1.0, %v7468_v24  ;;  %v7647_v19 = vpop.f32.mrb[94].mxu1 }
 0x2e4   : > { %8644 = vst [vmem:[#allocation5_spill] sm:$0xff] %v7647_v19  ;;  %v7649_v39 = vpop.eup %5277  ;;  %v2842_v16 = vmul.f32 0.5, %v2714_v13  ;;  %v2722_v47 = vadd.f32 1.0, %v5276_v26  ;;  %4134 = vmatmul.mubr.bf16.gmra.mrb[20].mxu0 %v3136_v41  ;;  %v2235_v27 = vmul.f32 0.044715, %v2107_v53  ;;  %v2937_v45 = vmul.f32 0.5, %v2809_v49 }
 0x2e5   : > { %v7651_v4 = vpop.f32.mrb[95].mxu1  ;;  %v2362_v40 = vadd.f32 %v2234_v11, %v7605_v33  ;;  %v2242_v43 = vmul.f32 0.044715, %v2114_v50  ;;  %v2115_v9 = vmul.f32 %v1987_v59, %v7627_v32  ;;  %v2945_v10 = vmul.f32 0.5, %v2817_v23  ;;  %4191 = vmatpush1.bf16.msra.mxu0 %v5054_v29  ;;  %v5057_v24 = vld [vmem:[%s8616_s5 + $0x2e0] ss:$8 sps:$4 sm:$0xff]  }
 0x2e6   : > { %v7661_v13 = vmul.f32 %v2842_v16, %v7472_v7  ;;  %v2850_v41 = vmul.f32 0.5, %v2722_v47  ;;  %v2363_v49 = vadd.f32 %v2235_v27, %v7610_v17  ;;  %v3065_v53 = vmul.f32 %v2937_v45, %v7301_v2  ;;  %4192 = vmatprep.subr.bf16.mxu0 %v5059_v54  ;;  %v5062_v26 = vld [vmem:[%s8616_s5 + $0x2f4] ss:$8 sps:$4 sm:$0xff]  }
 0x2e7   : > { %v7658_v19 = vpop.eup %5279  ;;  %v2490_v29 = vmul.f32 0.7978846, %v2362_v40  ;;  %v2370_v11 = vadd.f32 %v2242_v43, %v7617_v48  ;;  %v2243_v50 = vmul.f32 0.044715, %v2115_v9  ;;  %v3073_v59 = vmul.f32 %v2945_v10, %v7321_v37  ;;  %v5060_v37 = vld [vmem:[%s8616_s5 + $0x2f0] ss:$8 sps:$4 sm:$0xff]  }
 0x2e8   : > { %v7671_v23 = vmul.f32 %v2850_v41, %v7476_v36  ;;  %v2491_v7 = vmul.f32 0.7978846, %v2363_v49  ;;  %v2808_v16 = vadd.f32 1.0, %v7437_v0  ;;  %v2816_v47 = vadd.f32 1.0, %v7459_v34  ;;  %v5065_v43 = vld [vmem:[%s8616_s5 + $0x304] ss:$8 sps:$4 sm:$0xff]  }
 0x2e9   : > { %v7675_v2 = vpop.eup %5281  ;;  %5287 = vtanh.f32 %v2490_v29  ;;  %v2498_v54 = vmul.f32 0.7978846, %v2370_v11  ;;  %v2371_v27 = vadd.f32 %v2243_v50, %v7627_v32  ;;  %v3145_v45 = vpack.c.bf16 %v3073_v59, %v3065_v53  ;;  %4193 = vmatpush1.bf16.msra.mxu0 %v5057_v24  ;;  %v7681_v10 = vpop.f32.mrb[96].mxu1  ;;  %v8645_v29 = vld [vmem:[#allocation7_spill] sm:$0xff] }
 0x2ea   : > { %v7683_v36 = vpop.eup %5283  ;;  %5289 = vtanh.f32 %v2491_v7  ;;  %v2936_v34 = vmul.f32 0.5, %v2808_v16  ;;  %v2944_v40 = vmul.f32 0.5, %v2816_v47  ;;  %4194 = vmatprep.subr.bf16.mxu0 %v5062_v26  ;;  %v7690_v9 = vpop.f32.mrb[97].mxu1  ;;  %v7694_v41 = vadd.f32 %v7405_v56, %v7455_v15 }
 0x2eb   : > { %5291 = vtanh.f32 %v2498_v54  ;;  %v2499_v24 = vmul.f32 0.7978846, %v2371_v27  ;;  %4143 = vmatprep.mubr.bf16.mxu0 %v3145_v45  ;;  %v7698_v49 = vadd.f32 %v7413_v61, %v7462_v30  ;;  %v7700_v53 = vpop.f32.mrb[98].mxu1  ;;  %v7708_v59 = vadd.f32 %v7421_v63, %v7455_v15 }
 0x2ec   : > { %v7702_v26 = vpop.eup %5285  ;;  %v3064_v11 = vmul.f32 %v2936_v34, %v8645_v29  ;;  %v3072_v50 = vmul.f32 %v2944_v40, %v7312_v3  ;;  %v7712_v56 = vadd.f32 %v7428_v60, %v7462_v30  ;;  %v7714_v7 = vpop.f32.mrb[99].mxu1  ;;  %v1994_v61 = vmul.f32 %v7694_v41, %v7694_v41 }
 0x2ed   : > { %5293 = vtanh.f32 %v2499_v24  ;;  %v1995_v16 = vmul.f32 %v7698_v49, %v7698_v49  ;;  %v2825_v47 = vadd.f32 1.0, %v7552_v25  ;;  %4195 = vmatpush1.bf16.msra.mxu0 %v5060_v37  ;;  %v2002_v63 = vmul.f32 %v7708_v59, %v7708_v59 }
 0x2ee   : > { %v3144_v3 = vpack.c.bf16 %v3072_v50, %v3064_v11  ;;  %v2003_v60 = vmul.f32 %v7712_v56, %v7712_v56  ;;  %v2833_v54 = vadd.f32 1.0, %v7567_v51  ;;  %4277 = vmatprep.subr.bf16.mxu0 %v5065_v43  ;;  %v2122_v27 = vmul.f32 %v1994_v61, %v7694_v41 }
 0x2ef   : > { %v2123_v45 = vmul.f32 %v1995_v16, %v7698_v49  ;;  %v2953_v34 = vmul.f32 0.5, %v2825_v47  ;;  %v2824_v40 = vadd.f32 1.0, %v7525_v12  ;;  %v2130_v25 = vmul.f32 %v2002_v63, %v7708_v59 }
 0x2f0   : > { %4144 = vmatmul.mubr.bf16.gmra.mrb[24].mxu0 %v3144_v3  ;;  %v2131_v37 = vmul.f32 %v2003_v60, %v7712_v56  ;;  %v2961_v24 = vmul.f32 0.5, %v2833_v54  ;;  %v2832_v29 = vadd.f32 1.0, %v7561_v5  ;;  %v2250_v11 = vmul.f32 0.044715, %v2122_v27 }
 0x2f1   : > { %v2251_v50 = vmul.f32 0.044715, %v2123_v45  ;;  %v3081_v51 = vmul.f32 %v2953_v34, %v7386_v22  ;;  %v2952_v43 = vmul.f32 0.5, %v2824_v40  ;;  %v7733_v0 = vpop.f32.mrb[100].mxu1  ;;  %v2258_v61 = vmul.f32 0.044715, %v2130_v25 }
 0x2f2   : > { %v2259_v16 = vmul.f32 0.044715, %v2131_v37  ;;  %v3089_v47 = vmul.f32 %v2961_v24, %v7395_v55  ;;  %v2960_v12 = vmul.f32 0.5, %v2832_v29  ;;  %v7736_v3 = vpop.f32.mrb[101].mxu1  ;;  %v2378_v60 = vadd.f32 %v2250_v11, %v7694_v41 }
 0x2f3   : > { %v7738_v63 = vpop.eup %5287  ;;  %v2379_v5 = vadd.f32 %v2251_v50, %v7698_v49  ;;  %v3080_v54 = vmul.f32 %v2952_v43, %v7370_v58  ;;  %v7745_v22 = vadd.f32 %v7457_v21, %v7455_v15  ;;  %v7747_v27 = vpop.f32.mrb[102].mxu1  ;;  %v2386_v55 = vadd.f32 %v2258_v61, %v7708_v59 }
 0x2f4   : > { %v7749_v45 = vpop.eup %5289  ;;  %v2387_v34 = vadd.f32 %v2259_v16, %v7712_v56  ;;  %v3153_v40 = vpack.c.bf16 %v3089_v47, %v3081_v51  ;;  %v3088_v25 = vmul.f32 %v2960_v12, %v7390_v46  ;;  %v7754_v37 = vpop.f32.mrb[103].mxu1  ;;  %v2506_v58 = vmul.f32 0.7978846, %v2378_v60 }
 0x2f5   : > { %v7756_v24 = vpop.eup %5291  ;;  %v2507_v29 = vmul.f32 0.7978846, %v2379_v5  ;;  %v2010_v21 = vmul.f32 %v7745_v22, %v7745_v22  ;;  %v7762_v11 = vadd.f32 %v7466_v35, %v7462_v30  ;;  %v2514_v50 = vmul.f32 0.7978846, %v2386_v55 }
 0x2f6   : > { %v2515_v43 = vmul.f32 0.7978846, %v2387_v34  ;;  %4153 = vmatprep.mubr.bf16.mxu0 %v3153_v40  ;;  %v3152_v61 = vpack.c.bf16 %v3088_v25, %v3080_v54  ;;  %v7766_v46 = vadd.f32 %v7479_v52, %v7455_v15  ;;  %5295 = vtanh.f32 %v2506_v58 }
 0x2f7   : > { %v7768_v51 = vpop.eup %5293  ;;  %v2138_v16 = vmul.f32 %v2010_v21, %v7745_v22  ;;  %v2011_v47 = vmul.f32 %v7762_v11, %v7762_v11  ;;  %v7775_v35 = vadd.f32 %v7492_v1, %v7462_v30  ;;  %5297 = vtanh.f32 %v2507_v29 }
 0x2f8   : > { %4154 = vmatmul.mubr.bf16.gmra.mrb[28].mxu0 %v3152_v61  ;;  %v2018_v12 = vmul.f32 %v7766_v46, %v7766_v46  ;;  %v2715_v52 = vadd.f32 1.0, %v7635_v28  ;;  %v2723_v60 = vadd.f32 1.0, %v7649_v39  ;;  %5299 = vtanh.f32 %v2514_v50 }
 0x2f9   : > { %v2266_v5 = vmul.f32 0.044715, %v2138_v16  ;;  %v2139_v54 = vmul.f32 %v2011_v47, %v7762_v11  ;;  %v2019_v55 = vmul.f32 %v7775_v35, %v7775_v35  ;;  %v7784_v34 = vpop.f32.mrb[104].mxu1  ;;  %5301 = vtanh.f32 %v2515_v43  ;;  %v8649_v47 = vld [vmem:[#allocation10_spill] sm:$0xff] }
 0x2fa   : > { %v2146_v1 = vmul.f32 %v2018_v12, %v7766_v46  ;;  %v2843_v40 = vmul.f32 0.5, %v2715_v52  ;;  %v2851_v25 = vmul.f32 0.5, %v2723_v60  ;;  %v7787_v58 = vpop.f32.mrb[105].mxu1  ;;  %v7793_v21 = vadd.f32 %v7523_v57, %v7455_v15 }
 0x2fb   : > { %8646 = vst [vmem:[#allocation7_spill] sm:$0xff] %v7787_v58  ;;  %v2394_v28 = vadd.f32 %v2266_v5, %v7745_v22  ;;  %v2267_v29 = vmul.f32 0.044715, %v2139_v54  ;;  %v2147_v39 = vmul.f32 %v2019_v55, %v7775_v35  ;;  %v7795_v50 = vpop.f32.mrb[106].mxu1  ;;  %v7801_v12 = vadd.f32 %v8649_v47, %v7462_v30 }
 0x2fc   : > { %8647 = vst [vmem:[#allocation13_spill] sm:$0xff] %v7793_v21  ;;  %8648 = vst [vmem:[#allocation14_spill] sm:$0xff] %v7795_v50  ;;  %v2274_v61 = vmul.f32 0.044715, %v2146_v1  ;;  %v2971_v43 = vmul.f32 %v2843_v40, %v7483_v18  ;;  %v2979_v16 = vmul.f32 %v2851_v25, %v7487_v62  ;;  %v7803_v52 = vpop.f32.mrb[107].mxu1  ;;  %v2026_v57 = vmul.f32 %v7793_v21, %v7793_v21  ;;  %v8651_v40 = vld [vmem:[#allocation11_spill] sm:$0xff] }
 0x2fd   : > { %8650 = vst [vmem:[#allocation10_spill] sm:$0xff] %v7803_v52  ;;  %v2522_v60 = vmul.f32 0.7978846, %v2394_v28  ;;  %v2395_v5 = vadd.f32 %v2267_v29, %v7762_v11  ;;  %v2275_v54 = vmul.f32 0.044715, %v2147_v39  ;;  %v2027_v62 = vmul.f32 %v7801_v12, %v7801_v12 }
 0x2fe   : > { %v2402_v55 = vadd.f32 %v2274_v61, %v7766_v46  ;;  %v3099_v1 = vpack.c.bf16 %v2979_v16, %v2971_v43  ;;  %v5063_v18 = vld [vmem:[%s8616_s5 + $0x300] ss:$8 sps:$4 sm:$0xff]   ;;  %v7816_v25 = vadd.f32 %v8651_v40, %v7455_v15  ;;  %v5068_v39 = vld [vmem:[%s8616_s5 + $0x314] ss:$8 sps:$4 sm:$0xff]   ;;  %v2154_v61 = vmul.f32 %v2026_v57, %v7793_v21 }
 0x2ff   : > { %5303 = vtanh.f32 %v2522_v60  ;;  %v2523_v28 = vmul.f32 0.7978846, %v2395_v5  ;;  %v2403_v29 = vadd.f32 %v2275_v54, %v7775_v35  ;;  %v2155_v16 = vmul.f32 %v2027_v62, %v7801_v12  ;;  %v8652_v40 = vld [vmem:[#allocation12_spill] sm:$0xff] }
 0x300   : > { %v2530_v43 = vmul.f32 0.7978846, %v2402_v55  ;;  %4196 = vmatprep.mubr.bf16.mxu0 %v3099_v1  ;;  %v2034_v47 = vmul.f32 %v7816_v25, %v7816_v25  ;;  %v7828_v52 = vadd.f32 %v8652_v40, %v7462_v30  ;;  %v7830_v60 = vpop.eup %5295  ;;  %v8653_v54 = vpack.c.bf16 %v7671_v23, %v7661_v13  ;;  %v5066_v40 = vld [vmem:[%s8616_s5 + $0x310] ss:$8 sps:$4 sm:$0xff]  }
 0x301   : > { %5305 = vtanh.f32 %v2523_v28  ;;  %v2531_v5 = vmul.f32 0.7978846, %v2403_v29  ;;  %v2282_v57 = vmul.f32 0.044715, %v2154_v61  ;;  %v2731_v55 = vadd.f32 1.0, %v7675_v2  ;;  %v7836_v1 = vpop.f32.mrb[108].mxu1  ;;  %v7838_v62 = vpop.eup %5297 }
 0x302   : > { %4197 = vmatmul.mubr.bf16.vlgmr.msra.gmra.mrb[0].mxu0 %v8653_v54  ;;  %8654 = vst [vmem:[#allocation11_spill] sm:$0xff] %v7836_v1  ;;  %5307 = vtanh.f32 %v2530_v43  ;;  %v2283_v50 = vmul.f32 0.044715, %v2155_v16  ;;  %v2162_v28 = vmul.f32 %v2034_v47, %v7816_v25  ;;  %v2035_v13 = vmul.f32 %v7828_v52, %v7828_v52  ;;  %v7846_v23 = vpop.f32.mrb[109].mxu1  ;;  %v7848_v29 = vpop.eup %5299  ;;  %v5071_v43 = vld [vmem:[%s8616_s5 + $0x324] ss:$8 sps:$4 sm:$0xff]  }
 0x303   : > { %4278 = vmatpush1.bf16.msra.mxu0 %v5063_v18  ;;  %8655 = vst [vmem:[#allocation12_spill] sm:$0xff] %v7846_v23  ;;  %5309 = vtanh.f32 %v2531_v5  ;;  %v2410_v2 = vadd.f32 %v2282_v57, %v7793_v21  ;;  %v2739_v18 = vadd.f32 1.0, %v7702_v26  ;;  %v2859_v61 = vmul.f32 0.5, %v2731_v55  ;;  %v7855_v16 = vpop.f32.mrb[110].mxu1  ;;  %v7857_v47 = vpop.eup %5301  ;;  %v5069_v21 = vld [vmem:[%s8616_s5 + $0x320] ss:$8 sps:$4 sm:$0xff]  }
 0x304   : > { %4279 = vmatprep.subr.bf16.mxu0 %v5068_v39  ;;  %8656 = vst [vmem:[#allocation15_spill] sm:$0xff] %v7855_v16  ;;  %v2411_v54 = vadd.f32 %v2283_v50, %v7801_v12  ;;  %v2290_v23 = vmul.f32 0.044715, %v2162_v28  ;;  %v2163_v1 = vmul.f32 %v2035_v13, %v7828_v52  ;;  %v2730_v39 = vadd.f32 1.0, %v7658_v19  ;;  %v7862_v5 = vpop.f32.mrb[111].mxu1 }
 0x305   : > { %v2538_v57 = vmul.f32 0.7978846, %v2410_v2  ;;  %v2867_v26 = vmul.f32 0.5, %v2739_v18  ;;  %v2987_v55 = vmul.f32 %v2859_v61, %v7536_v38  ;;  %v2738_v16 = vadd.f32 1.0, %v7683_v36  ;;  %v5074_v38 = vld [vmem:[%s8616_s5 + $0x334] ss:$8 sps:$4 sm:$0xff]  }
 0x306   : > { %v2539_v58 = vmul.f32 0.7978846, %v2411_v54  ;;  %v2418_v50 = vadd.f32 %v2290_v23, %v7816_v25  ;;  %v2291_v28 = vmul.f32 0.044715, %v2163_v1  ;;  %v2858_v13 = vmul.f32 0.5, %v2730_v39  ;;  %v8657_v23 = vld [vmem:[#allocation9_spill] sm:$0xff] }
 0x307   : > { %4280 = vmatpush1.bf16.msra.mxu0 %v5066_v40  ;;  %5311 = vtanh.f32 %v2538_v57  ;;  %v2995_v19 = vmul.f32 %v2867_v26, %v7565_v31  ;;  %v2866_v2 = vmul.f32 0.5, %v2738_v16  ;;  %v7876_v18 = vadd.f32 %v7582_v8, %v7455_v15  ;;  %v5072_v39 = vld [vmem:[%s8616_s5 + $0x330] ss:$8 sps:$4 sm:$0xff]  }
 0x308   : > { %4281 = vmatprep.subr.bf16.mxu0 %v5071_v43  ;;  %5313 = vtanh.f32 %v2539_v58  ;;  %v2546_v36 = vmul.f32 0.7978846, %v2418_v50  ;;  %v2419_v40 = vadd.f32 %v2291_v28, %v7828_v52  ;;  %v2986_v1 = vmul.f32 %v2858_v13, %v8657_v23 }
 0x309   : > { %v7880_v61 = vpop.eup %5303  ;;  %v3107_v54 = vpack.c.bf16 %v2995_v19, %v2987_v55  ;;  %v2994_v31 = vmul.f32 %v2866_v2, %v7540_v42  ;;  %v2042_v43 = vmul.f32 %v7876_v18, %v7876_v18  ;;  %v7887_v16 = vadd.f32 %v7585_v6, %v7462_v30  ;;  %v7889_v8 = vpop.f32.mrb[112].mxu1 }
 0x30a   : > { %5315 = vtanh.f32 %v2546_v36  ;;  %v2547_v58 = vmul.f32 0.7978846, %v2419_v40  ;;  %v7896_v57 = vadd.f32 %v7594_v20, %v7455_v15  ;;  %v7900_v42 = vadd.f32 %v7601_v14, %v7462_v30  ;;  %v7902_v26 = vpop.f32.mrb[113].mxu1  ;;  %v5077_v20 = vld [vmem:[%s8616_s5 + $0x344] ss:$8 sps:$4 sm:$0xff]  }
 0x30b   : > { %4282 = vmatpush1.bf16.msra.mxu0 %v5069_v21  ;;  %8658 = vst [vmem:[#allocation9_spill] sm:$0xff] %v7902_v26  ;;  %v7904_v6 = vpop.eup %5305  ;;  %4206 = vmatprep.mubr.bf16.mxu0 %v3107_v54  ;;  %v3106_v55 = vpack.c.bf16 %v2994_v31, %v2986_v1  ;;  %v2170_v21 = vmul.f32 %v2042_v43, %v7876_v18  ;;  %v2747_v28 = vadd.f32 1.0, %v7749_v45  ;;  %v7913_v14 = vpop.f32.mrb[114].mxu1  ;;  %v2746_v54 = vadd.f32 1.0, %v7738_v63  ;;  %v5080_v63 = vld [vmem:[%s8616_s5 + $0x354] ss:$8 sps:$4 sm:$0xff]  }
 0x30c   : > { %4283 = vmatprep.subr.bf16.mxu0 %v5074_v38  ;;  %v2043_v50 = vmul.f32 %v7887_v16, %v7887_v16  ;;  %8659 = vst [vmem:[#allocation16_spill] sm:$0xff] %v7913_v14  ;;  %v7915_v13 = vpop.eup %5307  ;;  %5317 = vtanh.f32 %v2547_v58  ;;  %v2050_v19 = vmul.f32 %v7896_v57, %v7896_v57  ;;  %v2051_v2 = vmul.f32 %v7900_v42, %v7900_v42  ;;  %v7922_v36 = vpop.f32.mrb[115].mxu1 }
 0x30d   : > { %v2755_v38 = vadd.f32 1.0, %v7768_v51  ;;  %8660 = vst [vmem:[#allocation17_spill] sm:$0xff] %v7922_v36  ;;  %v7924_v45 = vpop.eup %5309  ;;  %4207 = vmatmul.mubr.bf16.gmra.mrb[4].mxu0 %v3106_v55  ;;  %v2298_v40 = vmul.f32 0.044715, %v2170_v21  ;;  %v2875_v1 = vmul.f32 0.5, %v2747_v28  ;;  %v2754_v36 = vadd.f32 1.0, %v7756_v24 }
 0x30e   : > { %v2171_v23 = vmul.f32 %v2043_v50, %v7887_v16  ;;  %v2178_v31 = vmul.f32 %v2050_v19, %v7896_v57  ;;  %v2179_v43 = vmul.f32 %v2051_v2, %v7900_v42  ;;  %v5075_v51 = vld [vmem:[%s8616_s5 + $0x340] ss:$8 sps:$4 sm:$0xff]   ;;  %v2874_v28 = vmul.f32 0.5, %v2746_v54 }
 0x30f   : > { %4284 = vmatpush1.bf16.msra.mxu0 %v5072_v39  ;;  %v2883_v58 = vmul.f32 0.5, %v2755_v38  ;;  %v2426_v55 = vadd.f32 %v2298_v40, %v7876_v18  ;;  %v3003_v50 = vmul.f32 %v2875_v1, %v7610_v17  ;;  %v2882_v38 = vmul.f32 0.5, %v2754_v36 }
 0x310   : > { %v2299_v21 = vmul.f32 0.044715, %v2171_v23  ;;  %4285 = vmatprep.subr.bf16.mxu0 %v5077_v20  ;;  %v2306_v39 = vmul.f32 0.044715, %v2178_v31  ;;  %v2307_v19 = vmul.f32 0.044715, %v2179_v43  ;;  %v3002_v40 = vmul.f32 %v2874_v28, %v7605_v33 }
 0x311   : > { %v3011_v2 = vmul.f32 %v2883_v58, %v7627_v32  ;;  %v7940_v14 = vpop.eup %5311  ;;  %v2554_v26 = vmul.f32 0.7978846, %v2426_v55  ;;  %v7946_v17 = vadd.f32 %v7633_v44, %v7455_v15  ;;  %v7948_v20 = vpop.f32.mrb[116].mxu1  ;;  %v3010_v54 = vmul.f32 %v2882_v38, %v7617_v48  ;;  %v5078_v33 = vld [vmem:[%s8616_s5 + $0x350] ss:$8 sps:$4 sm:$0xff]   ;;  %v8661_v58 = vld [vmem:[#allocation6_spill] sm:$0xff] }
 0x312   : > { %v2427_v24 = vadd.f32 %v2299_v21, %v7887_v16  ;;  %v7950_v23 = vpop.eup %5313  ;;  %v2434_v1 = vadd.f32 %v2306_v39, %v7896_v57  ;;  %v2435_v32 = vadd.f32 %v2307_v19, %v7900_v42  ;;  %v7958_v31 = vpop.f32.mrb[117].mxu1  ;;  %v7964_v55 = vadd.f32 %v8661_v58, %v7462_v30  ;;  %v5083_v48 = vld [vmem:[%s8616_s5 + $0x364] ss:$8 sps:$4 sm:$0xff]  }
 0x313   : > { %v3115_v36 = vpack.c.bf16 %v3011_v2, %v3003_v50  ;;  %4286 = vmatpush1.bf16.msra.mxu0 %v5075_v51  ;;  %5319 = vtanh.f32 %v2554_v26  ;;  %v2058_v43 = vmul.f32 %v7946_v17, %v7946_v17  ;;  %v7969_v51 = vpop.f32.mrb[118].mxu1  ;;  %v3114_v26 = vpack.c.bf16 %v3010_v54, %v3002_v40 }
 0x314   : > { %v2555_v44 = vmul.f32 0.7978846, %v2427_v24  ;;  %4287 = vmatprep.subr.bf16.mxu0 %v5080_v63  ;;  %v7971_v21 = vpop.eup %5315  ;;  %v2562_v50 = vmul.f32 0.7978846, %v2434_v1  ;;  %v2563_v28 = vmul.f32 0.7978846, %v2435_v32  ;;  %v2059_v38 = vmul.f32 %v7964_v55, %v7964_v55 }
 0x315   : > { %4216 = vmatprep.mubr.bf16.mxu0 %v3115_v36  ;;  %v8662_v63 = vld [vmem:[#allocation5_spill] sm:$0xff]  ;;  %v7977_v19 = vpop.f32.mrb[119].mxu1  ;;  %v2186_v2 = vmul.f32 %v2058_v43, %v7946_v17  ;;  %v7984_v24 = vadd.f32 %v7651_v4, %v7462_v30  ;;  %v2763_v40 = vadd.f32 1.0, %v7838_v62  ;;  %v2771_v32 = vadd.f32 1.0, %v7857_v47  ;;  %v5081_v4 = vld [vmem:[%s8616_s5 + $0x360] ss:$8 sps:$4 sm:$0xff]  }
 0x316   : > { %v7975_v39 = vadd.f32 %v8662_v63, %v7455_v15  ;;  %5321 = vtanh.f32 %v2555_v44  ;;  %v7986_v1 = vpop.eup %5317  ;;  %4217 = vmatmul.mubr.bf16.gmra.mrb[8].mxu0 %v3114_v26  ;;  %v2187_v54 = vmul.f32 %v2059_v38, %v7964_v55  ;;  %v2762_v62 = vadd.f32 1.0, %v7830_v60  ;;  %v5086_v47 = vld [vmem:[%s8616_s5 + $0x374] ss:$8 sps:$4 sm:$0xff]   ;;  %v5084_v60 = vld [vmem:[%s8616_s5 + $0x370] ss:$8 sps:$4 sm:$0xff]  }
 0x317   : > { %5323 = vtanh.f32 %v2562_v50  ;;  %v2314_v36 = vmul.f32 0.044715, %v2186_v2  ;;  %4288 = vmatpush1.bf16.msra.mxu0 %v5078_v33  ;;  %v2067_v30 = vmul.f32 %v7984_v24, %v7984_v24  ;;  %v2891_v43 = vmul.f32 0.5, %v2763_v40 }
 0x318   : > { %v2066_v15 = vmul.f32 %v7975_v39, %v7975_v39  ;;  %5325 = vtanh.f32 %v2563_v28  ;;  %v2899_v58 = vmul.f32 0.5, %v2771_v32  ;;  %4289 = vmatprep.subr.bf16.mxu0 %v5083_v48  ;;  %v2315_v50 = vmul.f32 0.044715, %v2187_v54 }
 0x319   : > { %v2442_v33 = vadd.f32 %v2314_v36, %v7946_v17  ;;  %v2195_v28 = vmul.f32 %v2067_v30, %v7984_v24  ;;  %v2770_v26 = vadd.f32 1.0, %v7848_v29  ;;  %v8006_v63 = vpop.f32.mrb[120].mxu1  ;;  %v3019_v38 = vmul.f32 %v2891_v43, %v7698_v49  ;;  %v8664_v43 = vld [vmem:[#allocation2_spill] sm:$0xff] }
 0x31a   : > { %v2194_v44 = vmul.f32 %v2066_v15, %v7975_v39  ;;  %v3027_v48 = vmul.f32 %v2899_v58, %v7712_v56  ;;  %v2890_v15 = vmul.f32 0.5, %v2762_v62  ;;  %v8013_v40 = vpop.f32.mrb[121].mxu1  ;;  %v2443_v36 = vadd.f32 %v2315_v50, %v7964_v55  ;;  %v5089_v62 = vld [vmem:[%s8616_s5 + $0x384] ss:$8 sps:$4 sm:$0xff]  }
 0x31b   : > { %v2570_v32 = vmul.f32 0.7978846, %v2442_v33  ;;  %v2323_v54 = vmul.f32 0.044715, %v2195_v28  ;;  %v2898_v30 = vmul.f32 0.5, %v2770_v26  ;;  %4290 = vmatpush1.bf16.msra.mxu0 %v5081_v4  ;;  %v8016_v29 = vpop.f32.mrb[122].mxu1 }
 0x31c   : > { %v2322_v2 = vmul.f32 0.044715, %v2194_v44  ;;  %8663 = vst [vmem:[#allocation6_spill] sm:$0xff] %v8016_v29  ;;  %v3123_v49 = vpack.c.bf16 %v3027_v48, %v3019_v38  ;;  %v3018_v56 = vmul.f32 %v2890_v15, %v7694_v41  ;;  %4291 = vmatprep.subr.bf16.mxu0 %v5086_v47  ;;  %v836_v58 = vsub.s32 6, %v8664_v43  ;;  %v8024_v33 = vpop.f32.mrb[123].mxu1  ;;  %v8666_v41 = vld [vmem:[#allocation8_spill] sm:$0xff] }
 0x31d   : > { %8665 = vst [vmem:[#allocation5_spill] sm:$0xff] %v8024_v33  ;;  %v8026_v50 = vpop.eup %5319  ;;  %5327 = vtanh.f32 %v2570_v32  ;;  %v2571_v4 = vmul.f32 0.7978846, %v2443_v36  ;;  %v2451_v28 = vadd.f32 %v2323_v54, %v7984_v24  ;;  %v3026_v26 = vmul.f32 %v2898_v30, %v7708_v59  ;;  %v5087_v59 = vld [vmem:[%s8616_s5 + $0x380] ss:$8 sps:$4 sm:$0xff]  }
 0x31e   : > { %v2450_v44 = vadd.f32 %v2322_v2, %v7975_v39  ;;  %4226 = vmatprep.mubr.bf16.mxu0 %v3123_v49  ;;  %v8031_v47 = vrot.slane %v8666_v41, %v836_v58  ;;  %v840_v38 = vsub.s32 7, %v8664_v43  ;;  %v2779_v48 = vadd.f32 1.0, %v7904_v6 }
 0x31f   : > { %5329 = vtanh.f32 %v2571_v4  ;;  %v2579_v33 = vmul.f32 0.7978846, %v2451_v28  ;;  %v3122_v29 = vpack.c.bf16 %v3026_v26, %v3018_v56  ;;  %4292 = vmatpush1.bf16.msra.mxu0 %v5084_v60  ;;  %v2787_v32 = vadd.f32 1.0, %v7924_v45  ;;  %v5092_v45 = vld [vmem:[%s8616_s5 + $0x394] ss:$8 sps:$4 sm:$0xff]  }
 0x320   : > { %v2578_v2 = vmul.f32 0.7978846, %v2450_v44  ;;  %v8035_v15 = vpop.eup %5321  ;;  %v8045_v54 = vadd.f32 %v7681_v10, %v8031_v47  ;;  %v8048_v6 = vrot.slane %v8666_v41, %v840_v38  ;;  %v8052_v30 = vadd.f32 %v7700_v53, %v8031_v47  ;;  %4293 = vmatprep.subr.bf16.mxu0 %v5089_v62 }
 0x321   : > { %v8041_v36 = vpop.eup %5323  ;;  %4227 = vmatmul.mubr.bf16.gmra.mrb[12].mxu0 %v3122_v29  ;;  %v2907_v44 = vmul.f32 0.5, %v2779_v48  ;;  %v2915_v49 = vmul.f32 0.5, %v2787_v32  ;;  %v2778_v10 = vadd.f32 1.0, %v7880_v61  ;;  %v8060_v56 = vpop.f32.mrb[124].mxu1  ;;  %v2786_v4 = vadd.f32 1.0, %v7915_v13 }
 0x322   : > { %5331 = vtanh.f32 %v2578_v2  ;;  %v8057_v60 = vpop.eup %5325  ;;  %v1948_v43 = vmul.f32 %v8045_v54, %v8045_v54  ;;  %v8066_v53 = vadd.f32 %v7690_v9, %v8048_v6  ;;  %v1956_v58 = vmul.f32 %v8052_v30, %v8052_v30  ;;  %v8074_v29 = vpop.f32.mrb[125].mxu1  ;;  %v5090_v9 = vld [vmem:[%s8616_s5 + $0x390] ss:$8 sps:$4 sm:$0xff]  }
 0x323   : > { %5333 = vtanh.f32 %v2579_v33  ;;  %v8072_v62 = vadd.f32 %v7714_v7, %v8048_v6  ;;  %v3035_v61 = vmul.f32 %v2907_v44, %v7762_v11  ;;  %v3043_v33 = vmul.f32 %v2915_v49, %v7775_v35  ;;  %4294 = vmatpush1.bf16.msra.mxu0 %v5087_v59  ;;  %v8082_v26 = vpop.f32.mrb[126].mxu1  ;;  %v5095_v35 = vld [vmem:[%s8616_s5 + $0x3a4] ss:$8 sps:$4 sm:$0xff]  }
 0x324   : > { %v2906_v28 = vmul.f32 0.5, %v2778_v10  ;;  %v2076_v2 = vmul.f32 %v1948_v43, %v8045_v54  ;;  %v1949_v7 = vmul.f32 %v8066_v53, %v8066_v53  ;;  %v2084_v41 = vmul.f32 %v1956_v58, %v8052_v30  ;;  %4295 = vmatprep.subr.bf16.mxu0 %v5092_v45  ;;  %v8093_v13 = vpop.f32.mrb[127].mxu1 }
 0x325   : > { %v1957_v11 = vmul.f32 %v8072_v62, %v8072_v62  ;;  %8667 = vst [vmem:[#allocation2_spill] sm:$0xff] %v8093_v13  ;;  %v3131_v38 = vpack.c.bf16 %v3043_v33, %v3035_v61  ;;  %v2914_v48 = vmul.f32 0.5, %v2786_v4  ;;  %v8098_v59 = vadd.f32 %v7733_v0, %v8031_v47 }
 0x326   : > { %v3034_v32 = vmul.f32 %v2906_v28, %v7745_v22  ;;  %v2204_v44 = vmul.f32 0.044715, %v2076_v2  ;;  %v2077_v49 = vmul.f32 %v1949_v7, %v8066_v53  ;;  %v2212_v10 = vmul.f32 0.044715, %v2084_v41 }
 0x327   : > { %v2085_v45 = vmul.f32 %v1957_v11, %v8072_v62  ;;  %v8102_v43 = vpop.eup %5327  ;;  %4236 = vmatprep.mubr.bf16.mxu0 %v3131_v38  ;;  %v3042_v58 = vmul.f32 %v2914_v48, %v7766_v46  ;;  %v1964_v61 = vmul.f32 %v8098_v59, %v8098_v59  ;;  %4296 = vmatpush1.bf16.msra.mxu0 %v5090_v9  ;;  %v2795_v0 = vadd.f32 1.0, %v7950_v23  ;;  %v5093_v46 = vld [vmem:[%s8616_s5 + $0x3a0] ss:$8 sps:$4 sm:$0xff]   ;;  %v5098_v11 = vld [vmem:[%s8616_s5 + $0x3b4] ss:$8 sps:$4 sm:$0xff]  }
 0x328   : > { %v8109_v22 = vadd.f32 %v7736_v3, %v8048_v6  ;;  %v2332_v33 = vadd.f32 %v2204_v44, %v8045_v54  ;;  %v2205_v4 = vmul.f32 0.044715, %v2077_v49  ;;  %v2340_v28 = vadd.f32 %v2212_v10, %v8052_v30  ;;  %4297 = vmatprep.subr.bf16.mxu0 %v5095_v35 }
 0x329   : > { %v2213_v2 = vmul.f32 0.044715, %v2085_v45  ;;  %v8117_v7 = vpop.eup %5329  ;;  %v3130_v9 = vpack.c.bf16 %v3042_v58, %v3034_v32  ;;  %v2092_v41 = vmul.f32 %v1964_v61, %v8098_v59  ;;  %v8124_v23 = vadd.f32 %v7747_v27, %v8031_v47  ;;  %v5096_v61 = vld [vmem:[%s8616_s5 + $0x3b0] ss:$8 sps:$4 sm:$0xff]  }
 0x32a   : > { %v1965_v3 = vmul.f32 %v8109_v22, %v8109_v22  ;;  %v2460_v48 = vmul.f32 0.7978846, %v2332_v33  ;;  %v2333_v35 = vadd.f32 %v2205_v4, %v8066_v53  ;;  %v2468_v44 = vmul.f32 0.7978846, %v2340_v28 }
 0x32b   : > { %v2341_v32 = vadd.f32 %v2213_v2, %v8072_v62  ;;  %4237 = vmatmul.mubr.bf16.gmra.mrb[16].mxu0 %v3130_v9  ;;  %v2220_v10 = vmul.f32 0.044715, %v2092_v41  ;;  %v1972_v27 = vmul.f32 %v8124_v23, %v8124_v23  ;;  %v8140_v58 = vadd.f32 %v7754_v37, %v8048_v6  ;;  %v5101_v37 = vld [vmem:[%s8616_s5 + $0x3c4] ss:$8 sps:$4 sm:$0xff]  }
 0x32c   : > { %v8129_v38 = vpop.eup %5331  ;;  %v2093_v45 = vmul.f32 %v1965_v3, %v8109_v22  ;;  %5335 = vtanh.f32 %v2460_v48  ;;  %v2461_v33 = vmul.f32 0.7978846, %v2333_v35  ;;  %v2803_v28 = vadd.f32 1.0, %v7986_v1  ;;  %4298 = vmatpush1.bf16.msra.mxu0 %v5093_v46 }
 0x32d   : > { %v8133_v49 = vpop.eup %5333  ;;  %v2469_v4 = vmul.f32 0.7978846, %v2341_v32  ;;  %5337 = vtanh.f32 %v2468_v44  ;;  %v2348_v2 = vadd.f32 %v2220_v10, %v8098_v59  ;;  %v2100_v41 = vmul.f32 %v1972_v27, %v8124_v23  ;;  %4299 = vmatprep.subr.bf16.mxu0 %v5098_v11 }
 0x32e   : > { %v2221_v9 = vmul.f32 0.044715, %v2093_v45  ;;  %5339 = vtanh.f32 %v2461_v33  ;;  %v1973_v3 = vmul.f32 %v8140_v58, %v8140_v58  ;;  %v2923_v48 = vmul.f32 0.5, %v2795_v0 }
 0x32f   : > { %v2931_v35 = vmul.f32 0.5, %v2803_v28  ;;  %5341 = vtanh.f32 %v2469_v4  ;;  %v2476_v1 = vmul.f32 0.7978846, %v2348_v2  ;;  %v2228_v44 = vmul.f32 0.044715, %v2100_v41 }
 0x330   : > { %v2349_v46 = vadd.f32 %v2221_v9, %v8109_v22  ;;  %v2101_v32 = vmul.f32 %v1973_v3, %v8140_v58  ;;  %v3051_v10 = vmul.f32 %v2923_v48, %v7801_v12  ;;  %v2794_v45 = vadd.f32 1.0, %v7940_v14  ;;  %4300 = vmatpush1.bf16.msra.mxu0 %v5096_v61  ;;  %v5099_v4 = vld [vmem:[%s8616_s5 + $0x3c0] ss:$8 sps:$4 sm:$0xff]   ;;  %v8669_v3 = vld [vmem:[#allocation13_spill] sm:$0xff] }
 0x331   : > { %v3059_v11 = vmul.f32 %v2931_v35, %v7828_v52  ;;  %5343 = vtanh.f32 %v2476_v1  ;;  %v2356_v33 = vadd.f32 %v2228_v44, %v8124_v23  ;;  %v2802_v0 = vadd.f32 1.0, %v7971_v21  ;;  %4301 = vmatprep.subr.bf16.mxu0 %v5101_v37  ;;  %v5104_v52 = vld [vmem:[%s8616_s5 + $0x3d4] ss:$8 sps:$4 sm:$0xff]   ;;  %v8668_v21 = vld [vmem:[#allocation7_spill] sm:$0xff]  ;;  %v8670_v35 = vld [vmem:[#allocation14_spill] sm:$0xff] }
 0x332   : > { %v2477_v27 = vmul.f32 0.7978846, %v2349_v46  ;;  %v2229_v28 = vmul.f32 0.044715, %v2101_v32  ;;  %v2922_v9 = vmul.f32 0.5, %v2794_v45  ;;  %v8165_v12 = vadd.f32 %v7784_v34, %v8031_v47  ;;  %v8671_v32 = vld [vmem:[#allocation10_spill] sm:$0xff] }
 0x333   : > { %v3139_v2 = vpack.c.bf16 %v3059_v11, %v3051_v10  ;;  %v2484_v14 = vmul.f32 0.7978846, %v2356_v33  ;;  %v2930_v61 = vmul.f32 0.5, %v2802_v0  ;;  %v8172_v41 = vadd.f32 %v8668_v21, %v8048_v6 }
 0x334   : > { %5345 = vtanh.f32 %v2477_v27  ;;  %v2357_v37 = vadd.f32 %v2229_v28, %v8140_v58  ;;  %v3050_v48 = vmul.f32 %v2922_v9, %v8669_v3  ;;  %v1980_v34 = vmul.f32 %v8165_v12, %v8165_v12  ;;  %4302 = vmatpush1.bf16.msra.mxu0 %v5099_v4 }
 0x335   : > { %4246 = vmatprep.mubr.bf16.mxu0 %v3139_v2  ;;  %v8180_v1 = vadd.f32 %v8670_v35, %v8031_v47  ;;  %5347 = vtanh.f32 %v2484_v14  ;;  %v3058_v46 = vmul.f32 %v2930_v61, %v7816_v25  ;;  %v1981_v44 = vmul.f32 %v8172_v41, %v8172_v41  ;;  %v5102_v25 = vld [vmem:[%s8616_s5 + $0x3d0] ss:$8 sps:$4 sm:$0xff]   ;;  %4303 = vmatprep.subr.bf16.mxu0 %v5104_v52  ;;  %v5107_v61 = vld [vmem:[%s8616_s5 + $0x3e4] ss:$8 sps:$4 sm:$0xff]  }
 0x336   : > { %v8187_v10 = vadd.f32 %v8671_v32, %v8048_v6  ;;  %v5336_v11 = vpop.eup %5335  ;;  %v2485_v45 = vmul.f32 0.7978846, %v2357_v37  ;;  %v2108_v27 = vmul.f32 %v1980_v34, %v8165_v12  ;;  %v2811_v0 = vadd.f32 1.0, %v8035_v15 }
 0x337   : > { %v1988_v33 = vmul.f32 %v8180_v1, %v8180_v1  ;;  %v5338_v28 = vpop.eup %5337  ;;  %v2716_v2 = vadd.f32 1.0, %v5336_v11  ;;  %v3138_v9 = vpack.c.bf16 %v3058_v46, %v3050_v48  ;;  %v2109_v14 = vmul.f32 %v1981_v44, %v8172_v41 }
 0x338   : > { %v1989_v4 = vmul.f32 %v8187_v10, %v8187_v10  ;;  %v8202_v21 = vpop.eup %5339  ;;  %v2724_v15 = vadd.f32 1.0, %v5338_v28  ;;  %5349 = vtanh.f32 %v2485_v45  ;;  %v2236_v37 = vmul.f32 0.044715, %v2108_v27  ;;  %4304 = vmatpush1.bf16.msra.mxu0 %v5102_v25  ;;  %v5105_v45 = vld [vmem:[%s8616_s5 + $0x3e0] ss:$8 sps:$4 sm:$0xff]  }
 0x339   : > { %v2116_v3 = vmul.f32 %v1988_v33, %v8180_v1  ;;  %v8205_v52 = vpop.eup %5341  ;;  %v2844_v34 = vmul.f32 0.5, %v2716_v2  ;;  %4247 = vmatmul.mubr.bf16.gmra.mrb[20].mxu0 %v3138_v9  ;;  %v2237_v48 = vmul.f32 0.044715, %v2109_v14  ;;  %v2819_v46 = vadd.f32 1.0, %v8057_v60  ;;  %4305 = vmatprep.subr.bf16.mxu0 %v5107_v61  ;;  %v5110_v60 = vld [vmem:[%s8616_s5 + $0x3f4] ss:$8 sps:$4 sm:$0xff]  }
 0x33a   : > { %v2117_v35 = vmul.f32 %v1989_v4, %v8187_v10  ;;  %v2852_v44 = vmul.f32 0.5, %v2724_v15  ;;  %v2364_v32 = vadd.f32 %v2236_v37, %v8165_v12  ;;  %v2939_v13 = vmul.f32 0.5, %v2811_v0 }
 0x33b   : > { %v2244_v11 = vmul.f32 0.044715, %v2116_v3  ;;  %v8213_v27 = vpop.eup %5343  ;;  %v8216_v33 = vmul.f32 %v2844_v34, %v8045_v54  ;;  %v2365_v28 = vadd.f32 %v2237_v48, %v8172_v41  ;;  %v2947_v9 = vmul.f32 0.5, %v2819_v46 }
 0x33c   : > { %v2245_v2 = vmul.f32 0.044715, %v2117_v35  ;;  %v8223_v0 = vmul.f32 %v2852_v44, %v8052_v30  ;;  %v2492_v25 = vmul.f32 0.7978846, %v2364_v32  ;;  %v3067_v4 = vmul.f32 %v2939_v13, %v7887_v16  ;;  %4306 = vmatpush1.bf16.msra.mxu0 %v5105_v45  ;;  %v5108_v16 = vld [vmem:[%s8616_s5 + $0x3f0] ss:$8 sps:$4 sm:$0xff]  }
 0x33d   : > { %v2372_v14 = vadd.f32 %v2244_v11, %v8180_v1  ;;  %v2493_v54 = vmul.f32 0.7978846, %v2365_v28  ;;  %v3075_v3 = vmul.f32 %v2947_v9, %v7900_v42  ;;  %v2810_v61 = vadd.f32 1.0, %v8026_v50  ;;  %4307 = vmatprep.subr.bf16.mxu0 %v5110_v60  ;;  %v8672_v44 = vld [vmem:[#allocation11_spill] sm:$0xff] }
 0x33e   : > { %v8227_v15 = vpop.eup %5345  ;;  %v2373_v37 = vadd.f32 %v2245_v2, %v8187_v10  ;;  %v3100_v34 = vpack.c.bf16 %v8223_v0, %v8216_v33  ;;  %5351 = vtanh.f32 %v2492_v25  ;;  %v2818_v48 = vadd.f32 1.0, %v8041_v36  ;;  %v8673_v36 = vld [vmem:[#allocation12_spill] sm:$0xff]  ;;  %v8674_v28 = vld [vmem:[#allocation15_spill] sm:$0xff] }
 0x33f   : > { %v2500_v30 = vmul.f32 0.7978846, %v2372_v14  ;;  %v8238_v13 = vpop.eup %5347  ;;  %5353 = vtanh.f32 %v2493_v54  ;;  %v3147_v46 = vpack.c.bf16 %v3075_v3, %v3067_v4  ;;  %v2938_v42 = vmul.f32 0.5, %v2810_v61 }
 0x340   : > { %v2501_v35 = vmul.f32 0.7978846, %v2373_v37  ;;  %v2946_v50 = vmul.f32 0.5, %v2818_v48  ;;  %v8242_v32 = vadd.f32 %v8672_v44, %v8031_v47  ;;  %v8246_v11 = vadd.f32 %v8673_v36, %v8048_v6  ;;  %4308 = vmatpush1.bf16.msra.mxu0 %v5108_v16 }
 0x341   : > { %5355 = vtanh.f32 %v2500_v30  ;;  %4256 = vmatprep.mubr.bf16.mxu0 %v3147_v46  ;;  %v3066_v45 = vmul.f32 %v2938_v42, %v7876_v18  ;;  %v8251_v2 = vadd.f32 %v8674_v28, %v8031_v47  ;;  %v8255_v9 = vadd.f32 %v7862_v5, %v8048_v6 }
 0x342   : > { %5357 = vtanh.f32 %v2501_v35  ;;  %v8257_v60 = vpop.eup %5349  ;;  %v3074_v25 = vmul.f32 %v2946_v50, %v7896_v57  ;;  %v1996_v14 = vmul.f32 %v8242_v32, %v8242_v32  ;;  %v1997_v4 = vmul.f32 %v8246_v11, %v8246_v11 }
 0x343   : > { %v2827_v18 = vadd.f32 1.0, %v8117_v7  ;;  %v2004_v54 = vmul.f32 %v8251_v2, %v8251_v2  ;;  %v2005_v5 = vmul.f32 %v8255_v9, %v8255_v9  ;;  %v2835_v37 = vadd.f32 1.0, %v8133_v49 }
 0x344   : > { %v2826_v3 = vadd.f32 1.0, %v8102_v43  ;;  %v3146_v57 = vpack.c.bf16 %v3074_v25, %v3066_v45  ;;  %v2124_v61 = vmul.f32 %v1996_v14, %v8242_v32  ;;  %v2125_v30 = vmul.f32 %v1997_v4, %v8246_v11 }
 0x345   : > { %v2955_v48 = vmul.f32 0.5, %v2827_v18  ;;  %v2132_v35 = vmul.f32 %v2004_v54, %v8251_v2  ;;  %v2133_v7 = vmul.f32 %v2005_v5, %v8255_v9  ;;  %v2963_v16 = vmul.f32 0.5, %v2835_v37 }
 0x346   : > { %v2834_v46 = vadd.f32 1.0, %v8129_v38  ;;  %4257 = vmatmul.mubr.bf16.gmra.mrb[24].mxu0 %v3146_v57  ;;  %v2252_v42 = vmul.f32 0.044715, %v2124_v61  ;;  %v2253_v50 = vmul.f32 0.044715, %v2125_v30  ;;  %v2954_v44 = vmul.f32 0.5, %v2826_v3 }
 0x347   : > { %v3083_v49 = vmul.f32 %v2955_v48, %v7964_v55  ;;  %v2260_v43 = vmul.f32 0.044715, %v2132_v35  ;;  %v2261_v36 = vmul.f32 0.044715, %v2133_v7  ;;  %v3091_v45 = vmul.f32 %v2963_v16, %v7984_v24  ;;  %v8675_v30 = vld [vmem:[#allocation9_spill] sm:$0xff] }
 0x348   : > { %v2962_v28 = vmul.f32 0.5, %v2834_v46  ;;  %v8278_v25 = vpop.eup %5351  ;;  %v2380_v14 = vadd.f32 %v2252_v42, %v8242_v32  ;;  %v2381_v4 = vadd.f32 %v2253_v50, %v8246_v11  ;;  %v3082_v18 = vmul.f32 %v2954_v44, %v7946_v17  ;;  %v8676_v46 = vld [vmem:[#allocation16_spill] sm:$0xff] }
 0x349   : > { %v8285_v38 = vadd.f32 %v7889_v8, %v8031_v47  ;;  %v8287_v54 = vpop.eup %5353  ;;  %v2388_v55 = vadd.f32 %v2260_v43, %v8251_v2  ;;  %v2389_v5 = vadd.f32 %v2261_v36, %v8255_v9  ;;  %v3155_v24 = vpack.c.bf16 %v3091_v45, %v3083_v49  ;;  %v8677_v49 = vld [vmem:[#allocation17_spill] sm:$0xff] }
 0x34a   : > { %v3090_v37 = vmul.f32 %v2962_v28, %v7975_v39  ;;  %v2508_v57 = vmul.f32 0.7978846, %v2380_v14  ;;  %v2509_v61 = vmul.f32 0.7978846, %v2381_v4  ;;  %v8298_v8 = vadd.f32 %v8675_v30, %v8048_v6 }
 0x34b   : > { %v8292_v3 = vpop.eup %5355  ;;  %v2012_v17 = vmul.f32 %v8285_v38, %v8285_v38  ;;  %v2516_v35 = vmul.f32 0.7978846, %v2388_v55  ;;  %v2517_v7 = vmul.f32 0.7978846, %v2389_v5  ;;  %4266 = vmatprep.mubr.bf16.mxu0 %v3155_v24  ;;  %v8304_v39 = vadd.f32 %v8676_v46, %v8031_v47 }
 0x34c   : > { %v8300_v48 = vpop.eup %5357  ;;  %v3154_v16 = vpack.c.bf16 %v3090_v37, %v3082_v18  ;;  %5359 = vtanh.f32 %v2508_v57  ;;  %v2013_v50 = vmul.f32 %v8298_v8, %v8298_v8  ;;  %v8311_v44 = vadd.f32 %v8677_v49, %v8048_v6 }
 0x34d   : > { %v2140_v42 = vmul.f32 %v2012_v17, %v8285_v38  ;;  %5361 = vtanh.f32 %v2509_v61  ;;  %v2020_v43 = vmul.f32 %v8304_v39, %v8304_v39  ;;  %v2717_v36 = vadd.f32 1.0, %v8202_v21 }
 0x34e   : > { %v2725_v45 = vadd.f32 1.0, %v8205_v52  ;;  %5363 = vtanh.f32 %v2516_v35  ;;  %4267 = vmatmul.mubr.bf16.gmra.mrb[28].mxu0 %v3154_v16  ;;  %v2141_v14 = vmul.f32 %v2013_v50, %v8298_v8  ;;  %v2021_v4 = vmul.f32 %v8311_v44, %v8311_v44 }
 0x34f   : > { %v2268_v28 = vmul.f32 0.044715, %v2140_v42  ;;  %5365 = vtanh.f32 %v2517_v7  ;;  %v2148_v18 = vmul.f32 %v2020_v43, %v8304_v39  ;;  %v2845_v55 = vmul.f32 0.5, %v2717_v36 }
 0x350   : > { %v2853_v5 = vmul.f32 0.5, %v2725_v45  ;;  %v2269_v37 = vmul.f32 0.044715, %v2141_v14  ;;  %v2149_v21 = vmul.f32 %v2021_v4, %v8311_v44  ;;  %v8325_v52 = vadd.f32 %v7948_v20, %v8031_v47 }
 0x351   : > { %v2396_v24 = vadd.f32 %v2268_v28, %v8285_v38  ;;  %v2276_v57 = vmul.f32 0.044715, %v2148_v18  ;;  %v2973_v61 = vmul.f32 %v2845_v55, %v8066_v53  ;;  %v8331_v30 = vadd.f32 %v7958_v31, %v8048_v6 }
 0x352   : > { %v2981_v17 = vmul.f32 %v2853_v5, %v8072_v62  ;;  %v2397_v7 = vadd.f32 %v2269_v37, %v8298_v8  ;;  %v2277_v16 = vmul.f32 0.044715, %v2149_v21  ;;  %v2028_v46 = vmul.f32 %v8325_v52, %v8325_v52 }
 0x353   : > { %v2524_v35 = vmul.f32 0.7978846, %v2396_v24  ;;  %v2404_v42 = vadd.f32 %v2276_v57, %v8304_v39  ;;  %v2029_v50 = vmul.f32 %v8331_v30, %v8331_v30  ;;  %v8341_v53 = vadd.f32 %v7969_v51, %v8031_v47 }
 0x354   : > { %v3101_v20 = vpack.c.bf16 %v2981_v17, %v2973_v61  ;;  %v2525_v31 = vmul.f32 0.7978846, %v2397_v7  ;;  %v2405_v62 = vadd.f32 %v2277_v16, %v8311_v44  ;;  %v2156_v49 = vmul.f32 %v2028_v46, %v8325_v52 }
 0x355   : > { %5367 = vtanh.f32 %v2524_v35  ;;  %v2532_v43 = vmul.f32 0.7978846, %v2404_v42  ;;  %v2157_v36 = vmul.f32 %v2029_v50, %v8331_v30  ;;  %v2036_v45 = vmul.f32 %v8341_v53, %v8341_v53 }
 0x356   : > { %4309 = vmatprep.mubr.bf16.mxu0 %v3101_v20  ;;  %v8350_v28 = vadd.f32 %v7977_v19, %v8048_v6  ;;  %v8352_v14 = vpop.eup %5359  ;;  %5369 = vtanh.f32 %v2525_v31  ;;  %v2533_v51 = vmul.f32 0.7978846, %v2405_v62  ;;  %v2284_v4 = vmul.f32 0.044715, %v2156_v49 }
 0x357   : > { %4310 = vmatmul.mubr.bf16.vlgmr.msra.gmra.mrb[0].mxu0 %v3100_v34  ;;  %v2733_v18 = vadd.f32 1.0, %v8227_v15  ;;  %v8358_v55 = vpop.eup %5361  ;;  %5371 = vtanh.f32 %v2532_v43  ;;  %v2285_v5 = vmul.f32 0.044715, %v2157_v36  ;;  %v2164_v24 = vmul.f32 %v2036_v45, %v8341_v53 }
 0x358   : > { %v2037_v19 = vmul.f32 %v8350_v28, %v8350_v28  ;;  %v8363_v37 = vpop.eup %5363  ;;  %5373 = vtanh.f32 %v2533_v51  ;;  %v2412_v21 = vadd.f32 %v2284_v4, %v8325_v52  ;;  %v2741_v33 = vadd.f32 1.0, %v8257_v60  ;;  %v8678_v4 = vld [vmem:[#allocation6_spill] sm:$0xff] }
 0x359   : > { %v2861_v0 = vmul.f32 0.5, %v2733_v18  ;;  %v8367_v34 = vpop.eup %5365  ;;  %v2413_v15 = vadd.f32 %v2285_v5, %v8331_v30  ;;  %v2292_v57 = vmul.f32 0.044715, %v2164_v24  ;;  %v2732_v17 = vadd.f32 1.0, %v8213_v27 }
 0x35a   : > { %v2165_v61 = vmul.f32 %v2037_v19, %v8350_v28  ;;  %v2540_v35 = vmul.f32 0.7978846, %v2412_v21  ;;  %v2869_v7 = vmul.f32 0.5, %v2741_v33  ;;  %v2740_v46 = vadd.f32 1.0, %v8238_v13 }
 0x35b   : > { %v2989_v16 = vmul.f32 %v2861_v0, %v8109_v22  ;;  %v2541_v42 = vmul.f32 0.7978846, %v2413_v15  ;;  %v2420_v20 = vadd.f32 %v2292_v57, %v8341_v53  ;;  %v2860_v50 = vmul.f32 0.5, %v2732_v17 }
 0x35c   : > { %v2293_v60 = vmul.f32 0.044715, %v2165_v61  ;;  %5375 = vtanh.f32 %v2540_v35  ;;  %v2997_v31 = vmul.f32 %v2869_v7, %v8140_v58  ;;  %v2868_v62 = vmul.f32 0.5, %v2740_v46 }
 0x35d   : > { %v8378_v49 = vadd.f32 %v8006_v63, %v8031_v47  ;;  %5377 = vtanh.f32 %v2541_v42  ;;  %v2548_v27 = vmul.f32 0.7978846, %v2420_v20  ;;  %v2988_v22 = vmul.f32 %v2860_v50, %v8098_v59  ;;  %v8679_v59 = vld [vmem:[#allocation5_spill] sm:$0xff] }
 0x35e   : > { %v2421_v43 = vadd.f32 %v2293_v60, %v8350_v28  ;;  %v3109_v36 = vpack.c.bf16 %v2997_v31, %v2989_v16  ;;  %v2996_v45 = vmul.f32 %v2868_v62, %v8124_v23  ;;  %v8389_v58 = vadd.f32 %v8013_v40, %v8048_v6 }
 0x35f   : > { %v8382_v13 = vpop.eup %5367  ;;  %v2044_v51 = vmul.f32 %v8378_v49, %v8378_v49  ;;  %5379 = vtanh.f32 %v2548_v27  ;;  %v8393_v18 = vadd.f32 %v8678_v4, %v8031_v47  ;;  %v8397_v5 = vadd.f32 %v8679_v59, %v8048_v6 }
 0x360   : > { %v2549_v63 = vmul.f32 0.7978846, %v2421_v43  ;;  %v8399_v24 = vpop.eup %5369  ;;  %4319 = vmatprep.mubr.bf16.mxu0 %v3109_v36  ;;  %v3108_v23 = vpack.c.bf16 %v2996_v45, %v2988_v22  ;;  %v2045_v40 = vmul.f32 %v8389_v58, %v8389_v58  ;;  %v2749_v21 = vadd.f32 1.0, %v8287_v54 }
 0x361   : > { %v2172_v19 = vmul.f32 %v2044_v51, %v8378_v49  ;;  %v8405_v33 = vpop.eup %5371  ;;  %v2052_v0 = vmul.f32 %v8393_v18, %v8393_v18  ;;  %v2053_v15 = vmul.f32 %v8397_v5, %v8397_v5  ;;  %v2757_v57 = vadd.f32 1.0, %v8300_v48 }
 0x362   : > { %5381 = vtanh.f32 %v2549_v63  ;;  %v8412_v61 = vpop.eup %5373  ;;  %4320 = vmatmul.mubr.bf16.gmra.mrb[4].mxu0 %v3108_v23  ;;  %v2173_v35 = vmul.f32 %v2045_v40, %v8389_v58  ;;  %v2877_v7 = vmul.f32 0.5, %v2749_v21  ;;  %v2748_v54 = vadd.f32 1.0, %v8278_v25 }
 0x363   : > { %v2300_v17 = vmul.f32 0.044715, %v2172_v19  ;;  %v2180_v16 = vmul.f32 %v2052_v0, %v8393_v18  ;;  %v2181_v46 = vmul.f32 %v2053_v15, %v8397_v5  ;;  %v2885_v42 = vmul.f32 0.5, %v2757_v57 }
 0x364   : > { %v2756_v20 = vadd.f32 1.0, %v8292_v3  ;;  %v2301_v50 = vmul.f32 0.044715, %v2173_v35  ;;  %v3005_v48 = vmul.f32 %v2877_v7, %v8172_v41  ;;  %v2876_v31 = vmul.f32 0.5, %v2748_v54 }
 0x365   : > { %v2428_v60 = vadd.f32 %v2300_v17, %v8378_v49  ;;  %v2308_v62 = vmul.f32 0.044715, %v2180_v16  ;;  %v2309_v27 = vmul.f32 0.044715, %v2181_v46  ;;  %v3013_v43 = vmul.f32 %v2885_v42, %v8187_v10  ;;  %v8680_v17 = vld [vmem:[#allocation2_spill] sm:$0xff] }
 0x366   : > { %v2884_v22 = vmul.f32 0.5, %v2756_v20  ;;  %v8422_v36 = vpop.eup %5375  ;;  %v2429_v45 = vadd.f32 %v2301_v50, %v8389_v58  ;;  %v3004_v51 = vmul.f32 %v2876_v31, %v8165_v12  ;;  %v8428_v3 = vadd.f32 %v8060_v56, %v8031_v47 }
 0x367   : > { %v2556_v25 = vmul.f32 0.7978846, %v2428_v60  ;;  %v8430_v63 = vpop.eup %5377  ;;  %v2436_v41 = vadd.f32 %v2308_v62, %v8393_v18  ;;  %v2437_v4 = vadd.f32 %v2309_v27, %v8397_v5  ;;  %v3117_v59 = vpack.c.bf16 %v3013_v43, %v3005_v48 }
 0x368   : > { %v3012_v10 = vmul.f32 %v2884_v22, %v8180_v1  ;;  %v2557_v23 = vmul.f32 0.7978846, %v2429_v45  ;;  %v2060_v19 = vmul.f32 %v8428_v3, %v8428_v3  ;;  %v8439_v12 = vadd.f32 %v8074_v29, %v8048_v6 }
 0x369   : > { %5383 = vtanh.f32 %v2556_v25  ;;  %v8441_v56 = vpop.eup %5379  ;;  %v2564_v40 = vmul.f32 0.7978846, %v2436_v41  ;;  %v2565_v21 = vmul.f32 0.7978846, %v2437_v4  ;;  %4329 = vmatprep.mubr.bf16.mxu0 %v3117_v59  ;;  %v8445_v15 = vadd.f32 %v8082_v26, %v8031_v47 }
 0x36a   : > { %v3116_v0 = vpack.c.bf16 %v3012_v10, %v3004_v51  ;;  %5385 = vtanh.f32 %v2557_v23  ;;  %v2188_v1 = vmul.f32 %v2060_v19, %v8428_v3  ;;  %v2061_v57 = vmul.f32 %v8439_v12, %v8439_v12 }
 0x36b   : > { %v8452_v29 = vadd.f32 %v8680_v17, %v8048_v6  ;;  %5387 = vtanh.f32 %v2564_v40  ;;  %v2068_v7 = vmul.f32 %v8445_v15, %v8445_v15  ;;  %v2765_v54 = vadd.f32 1.0, %v8358_v55 }
 0x36c   : > { %v5382_v35 = vpop.eup %5381  ;;  %4330 = vmatmul.mubr.bf16.gmra.mrb[8].mxu0 %v3116_v0  ;;  %v2773_v47 = vadd.f32 1.0, %v8367_v34  ;;  %5389 = vtanh.f32 %v2565_v21  ;;  %v2316_v26 = vmul.f32 0.044715, %v2188_v1  ;;  %v2189_v16 = vmul.f32 %v2061_v57, %v8439_v12 }
 0x36d   : > { %v2069_v46 = vmul.f32 %v8452_v29, %v8452_v29  ;;  %v2196_v6 = vmul.f32 %v2068_v7, %v8445_v15  ;;  %v2893_v42 = vmul.f32 0.5, %v2765_v54  ;;  %v2764_v60 = vadd.f32 1.0, %v8352_v14 }
 0x36e   : > { %v2901_v20 = vmul.f32 0.5, %v2773_v47  ;;  %v2444_v50 = vadd.f32 %v2316_v26, %v8428_v3  ;;  %v2317_v48 = vmul.f32 0.044715, %v2189_v16  ;;  %v2772_v34 = vadd.f32 1.0, %v8363_v37 }
 0x36f   : > { %v2197_v55 = vmul.f32 %v2069_v46, %v8452_v29  ;;  %v2324_v31 = vmul.f32 0.044715, %v2196_v6  ;;  %v3021_v62 = vmul.f32 %v2893_v42, %v8246_v11  ;;  %v2892_v43 = vmul.f32 0.5, %v2764_v60 }
 0x370   : > { %v3029_v27 = vmul.f32 %v2901_v20, %v8255_v9  ;;  %v2572_v22 = vmul.f32 0.7978846, %v2444_v50  ;;  %v2445_v25 = vadd.f32 %v2317_v48, %v8439_v12  ;;  %v2900_v51 = vmul.f32 0.5, %v2772_v34 }
 0x371   : > { %v2325_v45 = vmul.f32 0.044715, %v2197_v55  ;;  %v2452_v14 = vadd.f32 %v2324_v31, %v8445_v15  ;;  %v3020_v4 = vmul.f32 %v2892_v43, %v8242_v32  ;;  %v2781_v59 = vadd.f32 1.0, %v8399_v24 }
 0x372   : > { %v3125_v41 = vpack.c.bf16 %v3029_v27, %v3021_v62  ;;  %5391 = vtanh.f32 %v2572_v22  ;;  %v2573_v37 = vmul.f32 0.7978846, %v2445_v25  ;;  %v3028_v9 = vmul.f32 %v2900_v51, %v8251_v2 }
 0x373   : > { %v5384_v10 = vpop.eup %5383  ;;  %v2453_v11 = vadd.f32 %v2325_v45, %v8452_v29  ;;  %v2580_v23 = vmul.f32 0.7978846, %v2452_v14  ;;  %v2789_v19 = vadd.f32 1.0, %v8412_v61  ;;  %v2909_v40 = vmul.f32 0.5, %v2781_v59 }
 0x374   : > { %4339 = vmatprep.mubr.bf16.mxu0 %v3125_v41  ;;  %v2780_v21 = vadd.f32 1.0, %v8382_v13  ;;  %v5386_v0 = vpop.eup %5385  ;;  %5393 = vtanh.f32 %v2573_v37  ;;  %v3124_v32 = vpack.c.bf16 %v3028_v9, %v3020_v4  ;;  %v2788_v24 = vadd.f32 1.0, %v8405_v33 }
 0x375   : > { %v2581_v1 = vmul.f32 0.7978846, %v2453_v11  ;;  %v5388_v57 = vpop.eup %5387  ;;  %5395 = vtanh.f32 %v2580_v23  ;;  %v2917_v17 = vmul.f32 0.5, %v2789_v19  ;;  %v3037_v7 = vmul.f32 %v2909_v40, %v8298_v8 }
 0x376   : > { %v2908_v54 = vmul.f32 0.5, %v2780_v21  ;;  %v5390_v2 = vpop.eup %5389  ;;  %4340 = vmatmul.mubr.bf16.gmra.mrb[12].mxu0 %v3124_v32  ;;  %v2916_v47 = vmul.f32 0.5, %v2788_v24  ;;  %v2797_v61 = vadd.f32 1.0, %v8430_v63  ;;  %v2805_v26 = vadd.f32 1.0, %v5382_v35  ;;  %v8682_v32 = vld [vmem:[#allocation3_spill] sm:$0xff] }
 0x377   : > { %5397 = vtanh.f32 %v2581_v1  ;;  %v3045_v13 = vmul.f32 %v2917_v17, %v8311_v44  ;;  %v2796_v46 = vadd.f32 1.0, %v8422_v36  ;;  %v2804_v33 = vadd.f32 1.0, %v8441_v56  ;;  %v8681_v1 = vld [vmem:[#allocation4_spill] sm:$0xff] }
 0x378   : > { %v3036_v16 = vmul.f32 %v2908_v54, %v8285_v38  ;;  %v3044_v6 = vmul.f32 %v2916_v47, %v8304_v39  ;;  %v2925_v42 = vmul.f32 0.5, %v2797_v61  ;;  %v2933_v8 = vmul.f32 0.5, %v2805_v26  ;;  %v5400_v54 = vld [vmem:[%s5496_s30] sm:$0xff]  ;;  %v5401_v26 = vld [vmem:[%s5496_s30 + $0x8] sm:$0xff] }
 0x379   : > { %v2813_v20 = vadd.f32 1.0, %v5386_v0  ;;  %v3133_v60 = vpack.c.bf16 %v3045_v13, %v3037_v7  ;;  %v2924_v50 = vmul.f32 0.5, %v2796_v46  ;;  %v2932_v48 = vmul.f32 0.5, %v2804_v33  ;;  %v5402_v46 = vld [vmem:[%s5496_s30 + $0x10] sm:$0xff] }
 0x37a   : > { %v2821_v55 = vadd.f32 1.0, %v5390_v2  ;;  %v3132_v34 = vpack.c.bf16 %v3044_v6, %v3036_v16  ;;  %v3053_v63 = vmul.f32 %v2925_v42, %v8331_v30  ;;  %v3061_v44 = vmul.f32 %v2933_v8, %v8350_v28  ;;  %v5403_v6 = vld [vmem:[%s5496_s30 + $0x18] sm:$0xff] }
 0x37b   : > { %v2941_v35 = vmul.f32 0.5, %v2813_v20  ;;  %4349 = vmatprep.mubr.bf16.mxu0 %v3133_v60  ;;  %v3052_v38 = vmul.f32 %v2924_v50, %v8325_v52  ;;  %v3060_v36 = vmul.f32 %v2932_v48, %v8341_v53  ;;  %v2812_v39 = vadd.f32 1.0, %v5384_v10 }
 0x37c   : > { %v2949_v56 = vmul.f32 0.5, %v2821_v55  ;;  %v5392_v31 = vpop.eup %5391  ;;  %v3141_v62 = vpack.c.bf16 %v3061_v44, %v3053_v63  ;;  %v2820_v43 = vadd.f32 1.0, %v5388_v57  ;;  %v5404_v55 = vld [vmem:[%s5496_s30 + $0x20] sm:$0xff] }
 0x37d   : > { %v3069_v27 = vmul.f32 %v2941_v35, %v8389_v58  ;;  %v3140_v22 = vpack.c.bf16 %v3060_v36, %v3052_v38  ;;  %v2940_v45 = vmul.f32 0.5, %v2812_v39  ;;  %v2828_v30 = vadd.f32 1.0, %v5392_v31  ;;  %v5405_v35 = vld [vmem:[%s5496_s30 + $0x28] sm:$0xff]  ;;  %v5407_v31 = vld [vmem:[%s5496_s30 + $0x38] sm:$0xff] }
 0x37e   : > { %v3077_v25 = vmul.f32 %v2949_v56, %v8397_v5  ;;  %v5394_v51 = vpop.eup %5393  ;;  %4350 = vmatmul.mubr.bf16.gmra.mrb[16].mxu0 %v3132_v34  ;;  %v2948_v28 = vmul.f32 0.5, %v2820_v43  ;;  %v5406_v56 = vld [vmem:[%s5496_s30 + $0x30] sm:$0xff] }
 0x37f   : > { %v5396_v14 = vpop.eup %5395  ;;  %4359 = vmatprep.mubr.bf16.mxu0 %v3141_v62  ;;  %v2829_v41 = vadd.f32 1.0, %v5394_v51  ;;  %v3068_v4 = vmul.f32 %v2940_v45, %v8378_v49  ;;  %v2956_v58 = vmul.f32 0.5, %v2828_v30  ;;  %v5408_v30 = vld [vmem:[%s5496_s30 + $0x40] sm:$0xff] }
 0x380   : > { %v3149_v52 = vpack.c.bf16 %v3077_v25, %v3069_v27  ;;  %v3076_v59 = vmul.f32 %v2948_v28, %v8393_v18  ;;  %v2836_v10 = vadd.f32 1.0, %v5396_v14 }
 0x381   : > { %v5398_v53 = vpop.eup %5397  ;;  %v2957_v11 = vmul.f32 0.5, %v2829_v41  ;;  %v3084_v19 = vmul.f32 %v2956_v58, %v8428_v3  ;;  %v3286_v3 = vld [vmem:[%s8617_s6] sm:$0x3] }
 0x382   : > { %v2837_v37 = vadd.f32 1.0, %v5398_v53  ;;  %v3148_v9 = vpack.c.bf16 %v3076_v59, %v3068_v4  ;;  %v2964_v5 = vmul.f32 0.5, %v2836_v10  ;;  %v5410_v4 = vld [vmem:[%s5496_s30 + $0x50] sm:$0xff]  ;;  %v5411_v10 = vld [vmem:[%s5496_s30 + $0x58] sm:$0xff] }
 0x383   : > { %v3085_v21 = vmul.f32 %v2957_v11, %v8439_v12  ;;  %v8503_v12 = vrot.slane %v3286_v3, %v8682_v32 }
 0x384   : > { %v2965_v23 = vmul.f32 0.5, %v2837_v37  ;;  %v3092_v40 = vmul.f32 %v2964_v5, %v8445_v15  ;;  %v8500_v15 = vrot.slane %v3286_v3, %v8681_v1  ;;  %v5414_v1 = vld [vmem:[%s5496_s30 + $0x70] sm:$0xff] }
 0x386   : > { %v3093_v0 = vmul.f32 %v2965_v23, %v8452_v29  ;;  %4360 = vmatmul.mubr.bf16.gmra.mrb[20].mxu0 %v3140_v22  ;;  %v3156_v49 = vpack.c.bf16 %v3092_v40, %v3084_v19  ;;  %v5412_v19 = vld [vmem:[%s5496_s30 + $0x60] sm:$0xff] }
 0x387   : > { %4369 = vmatprep.mubr.bf16.mxu0 %v3149_v52  ;;  %v5409_v52 = vld [vmem:[%s5496_s30 + $0x48] sm:$0xff] }
 0x388   : > { %v3157_v18 = vpack.c.bf16 %v3093_v0, %v3085_v21 }
 0x38e   : > { %4370 = vmatmul.mubr.bf16.gmra.mrb[24].mxu0 %v3148_v9 }
 0x38f   : > { %4379 = vmatprep.mubr.bf16.mxu0 %v3157_v18 }
 0x396   : > { %4380 = vmatmul.mubr.bf16.gmra.mrb[28].mxu0 %v3156_v49  ;;  %v5413_v49 = vld [vmem:[%s5496_s30 + $0x68] sm:$0xff] }
 0x42a   : > { %v4311_v29 = vpop.f32.mrb[0].mxu0 }
 0x42b   : > { %v4783_v24 = vadd.f32 %v4311_v29, %v8500_v15  ;;  %v4313_v57 = vpop.f32.mrb[1].mxu0  ;;  %v5415_v29 = vld [vmem:[%s5496_s30 + $0x78] sm:$0xff] }
 0x42c   : > { %v4784_v17 = vadd.f32 %v4313_v57, %v8503_v12  ;;  %v4315_v7 = vpop.f32.mrb[2].mxu0 }
 0x42d   : > { %v4390_v2 = vadd.f32 %v5400_v54, %v4783_v24  ;;  %v4785_v47 = vadd.f32 %v4315_v7, %v8500_v15  ;;  %v4317_v61 = vpop.f32.mrb[3].mxu0 }
 0x42e   : > { %v4391_v13 = vadd.f32 %v5401_v26, %v4784_v17  ;;  %v4786_v16 = vadd.f32 %v4317_v61, %v8503_v12 }
 0x42f   : > { %4422 = vst [vmem:[%s8511_s19] sm:$0xff] %v4390_v2  ;;  %v4392_v33 = vadd.f32 %v5402_v46, %v4785_v47  ;;  %v5416_v47 = vld [vmem:[%s5496_s30 + $0x80] sm:$0xff] }
 0x430   : > { %4423 = vst [vmem:[%s8511_s19 + $0x8] sm:$0xff] %v4391_v13  ;;  %v4393_v42 = vadd.f32 %v5403_v6, %v4786_v16  ;;  %v5417_v16 = vld [vmem:[%s5496_s30 + $0x88] sm:$0xff]  ;;  %v5418_v6 = vld [vmem:[%s5496_s30 + $0x90] sm:$0xff] }
 0x431   : > { %4424 = vst [vmem:[%s8511_s19 + $0x10] sm:$0xff] %v4392_v33 }
 0x432   : > { %4425 = vst [vmem:[%s8511_s19 + $0x18] sm:$0xff] %v4393_v42 }
 0x435   : > { %v4321_v8 = vpop.f32.mrb[4].mxu0 }
 0x436   : > { %v4787_v20 = vadd.f32 %v4321_v8, %v8500_v15  ;;  %v4323_v60 = vpop.f32.mrb[5].mxu0  ;;  %v5419_v8 = vld [vmem:[%s5496_s30 + $0x98] sm:$0xff] }
 0x437   : > { %v4788_v50 = vadd.f32 %v4323_v60, %v8503_v12  ;;  %v4325_v48 = vpop.f32.mrb[6].mxu0 }
 0x438   : > { %v4394_v34 = vadd.f32 %v5404_v55, %v4787_v20  ;;  %v4789_v63 = vadd.f32 %v4325_v48, %v8500_v15  ;;  %v4327_v44 = vpop.f32.mrb[7].mxu0 }
 0x439   : > { %v4395_v38 = vadd.f32 %v5405_v35, %v4788_v50  ;;  %v4790_v36 = vadd.f32 %v4327_v44, %v8503_v12 }
 0x43a   : > { %4426 = vst [vmem:[%s8511_s19 + $0x20] sm:$0xff] %v4394_v34  ;;  %v4396_v39 = vadd.f32 %v5406_v56, %v4789_v63  ;;  %v5420_v63 = vld [vmem:[%s5496_s30 + $0xa0] sm:$0xff] }
 0x43b   : > { %4427 = vst [vmem:[%s8511_s19 + $0x28] sm:$0xff] %v4395_v38  ;;  %v4397_v62 = vadd.f32 %v5407_v31, %v4790_v36  ;;  %v5421_v36 = vld [vmem:[%s5496_s30 + $0xa8] sm:$0xff]  ;;  %v5422_v31 = vld [vmem:[%s5496_s30 + $0xb0] sm:$0xff] }
 0x43c   : > { %4428 = vst [vmem:[%s8511_s19 + $0x30] sm:$0xff] %v4396_v39 }
 0x43d   : > { %4429 = vst [vmem:[%s8511_s19 + $0x38] sm:$0xff] %v4397_v62 }
 0x43f   : > { %v4331_v27 = vpop.f32.mrb[8].mxu0 }
 0x440   : > { %v4791_v43 = vadd.f32 %v4331_v27, %v8500_v15  ;;  %v4333_v22 = vpop.f32.mrb[9].mxu0  ;;  %v5423_v27 = vld [vmem:[%s5496_s30 + $0xb8] sm:$0xff] }
 0x441   : > { %v4792_v25 = vadd.f32 %v4333_v22, %v8503_v12  ;;  %v4335_v45 = vpop.f32.mrb[10].mxu0 }
 0x442   : > { %v4398_v51 = vadd.f32 %v5408_v30, %v4791_v43  ;;  %v4793_v28 = vadd.f32 %v4335_v45, %v8500_v15  ;;  %v4337_v14 = vpop.f32.mrb[11].mxu0 }
 0x443   : > { %v4399_v41 = vadd.f32 %v5409_v52, %v4792_v25  ;;  %v4794_v53 = vadd.f32 %v4337_v14, %v8503_v12 }
 0x444   : > { %4430 = vst [vmem:[%s8511_s19 + $0x40] sm:$0xff] %v4398_v51  ;;  %v4400_v59 = vadd.f32 %v5410_v4, %v4793_v28  ;;  %v5424_v28 = vld [vmem:[%s5496_s30 + $0xc0] sm:$0xff] }
 0x445   : > { %4431 = vst [vmem:[%s8511_s19 + $0x48] sm:$0xff] %v4399_v41  ;;  %v4401_v58 = vadd.f32 %v5411_v10, %v4794_v53  ;;  %v5425_v53 = vld [vmem:[%s5496_s30 + $0xc8] sm:$0xff]  ;;  %v5426_v10 = vld [vmem:[%s5496_s30 + $0xd0] sm:$0xff] }
 0x446   : > { %4432 = vst [vmem:[%s8511_s19 + $0x50] sm:$0xff] %v4400_v59 }
 0x447   : > { %4433 = vst [vmem:[%s8511_s19 + $0x58] sm:$0xff] %v4401_v58 }
 0x449   : > { %v4341_v37 = vpop.f32.mrb[12].mxu0 }
 0x44a   : > { %v4795_v11 = vadd.f32 %v4341_v37, %v8500_v15  ;;  %v4343_v9 = vpop.f32.mrb[13].mxu0  ;;  %v5427_v37 = vld [vmem:[%s5496_s30 + $0xd8] sm:$0xff] }
 0x44b   : > { %v4796_v5 = vadd.f32 %v4343_v9, %v8503_v12  ;;  %v4345_v23 = vpop.f32.mrb[14].mxu0 }
 0x44c   : > { %v4402_v40 = vadd.f32 %v5412_v19, %v4795_v11  ;;  %v4797_v21 = vadd.f32 %v4345_v23, %v8500_v15  ;;  %v4347_v0 = vpop.f32.mrb[15].mxu0 }
 0x44d   : > { %v4403_v18 = vadd.f32 %v5413_v49, %v4796_v5  ;;  %v4798_v3 = vadd.f32 %v4347_v0, %v8503_v12 }
 0x44e   : > { %4434 = vst [vmem:[%s8511_s19 + $0x60] sm:$0xff] %v4402_v40  ;;  %v4404_v32 = vadd.f32 %v5414_v1, %v4797_v21  ;;  %v5428_v21 = vld [vmem:[%s5496_s30 + $0xe0] sm:$0xff] }
 0x44f   : > { %4435 = vst [vmem:[%s8511_s19 + $0x68] sm:$0xff] %v4403_v18  ;;  %v4405_v24 = vadd.f32 %v5415_v29, %v4798_v3  ;;  %v5429_v3 = vld [vmem:[%s5496_s30 + $0xe8] sm:$0xff]  ;;  %v5430_v29 = vld [vmem:[%s5496_s30 + $0xf0] sm:$0xff] }
 0x450   : > { %4436 = vst [vmem:[%s8511_s19 + $0x70] sm:$0xff] %v4404_v32 }
 0x451   : > { %4437 = vst [vmem:[%s8511_s19 + $0x78] sm:$0xff] %v4405_v24  ;;  %v4351_v57 = vpop.f32.mrb[16].mxu0 }
 0x452   : > { %v4799_v17 = vadd.f32 %v4351_v57, %v8500_v15  ;;  %v4353_v7 = vpop.f32.mrb[17].mxu0  ;;  %v5431_v57 = vld [vmem:[%s5496_s30 + $0xf8] sm:$0xff] }
 0x453   : > { %v4800_v54 = vadd.f32 %v4353_v7, %v8503_v12  ;;  %v4355_v2 = vpop.f32.mrb[18].mxu0 }
 0x454   : > { %v4406_v61 = vadd.f32 %v5416_v47, %v4799_v17  ;;  %v4801_v26 = vadd.f32 %v4355_v2, %v8500_v15  ;;  %v4357_v13 = vpop.f32.mrb[19].mxu0 }
 0x455   : > { %v4407_v46 = vadd.f32 %v5417_v16, %v4800_v54  ;;  %v4802_v33 = vadd.f32 %v4357_v13, %v8503_v12 }
 0x456   : > { %4438 = vst [vmem:[%s8511_s19 + $0x80] sm:$0xff] %v4406_v61  ;;  %v4408_v42 = vadd.f32 %v5418_v6, %v4801_v26 }
 0x457   : > { %4439 = vst [vmem:[%s8511_s19 + $0x88] sm:$0xff] %v4407_v46  ;;  %v4409_v20 = vadd.f32 %v5419_v8, %v4802_v33 }
 0x458   : > { %4440 = vst [vmem:[%s8511_s19 + $0x90] sm:$0xff] %v4408_v42 }
 0x459   : > { %4441 = vst [vmem:[%s8511_s19 + $0x98] sm:$0xff] %v4409_v20  ;;  %v4361_v60 = vpop.f32.mrb[20].mxu0 }
 0x45a   : > { %v4803_v50 = vadd.f32 %v4361_v60, %v8500_v15  ;;  %v4363_v48 = vpop.f32.mrb[21].mxu0 }
 0x45b   : > { %v4804_v55 = vadd.f32 %v4363_v48, %v8503_v12  ;;  %v4365_v34 = vpop.f32.mrb[22].mxu0 }
 0x45c   : > { %v4410_v44 = vadd.f32 %v5420_v63, %v4803_v50  ;;  %v4805_v35 = vadd.f32 %v4365_v34, %v8500_v15  ;;  %v4367_v38 = vpop.f32.mrb[23].mxu0 }
 0x45d   : > { %v4411_v56 = vadd.f32 %v5421_v36, %v4804_v55  ;;  %v4806_v39 = vadd.f32 %v4367_v38, %v8503_v12 }
 0x45e   : > { %4442 = vst [vmem:[%s8511_s19 + $0xa0] sm:$0xff] %v4410_v44  ;;  %v4412_v62 = vadd.f32 %v5422_v31, %v4805_v35 }
 0x45f   : > { %4443 = vst [vmem:[%s8511_s19 + $0xa8] sm:$0xff] %v4411_v56  ;;  %v4413_v43 = vadd.f32 %v5423_v27, %v4806_v39 }
 0x460   : > { %4444 = vst [vmem:[%s8511_s19 + $0xb0] sm:$0xff] %v4412_v62 }
 0x461   : > { %4445 = vst [vmem:[%s8511_s19 + $0xb8] sm:$0xff] %v4413_v43  ;;  %v4371_v22 = vpop.f32.mrb[24].mxu0 }
 0x462   : > { %v4807_v25 = vadd.f32 %v4371_v22, %v8500_v15  ;;  %v4373_v45 = vpop.f32.mrb[25].mxu0 }
 0x463   : > { %v4808_v30 = vadd.f32 %v4373_v45, %v8503_v12  ;;  %v4375_v51 = vpop.f32.mrb[26].mxu0 }
 0x464   : > { %v4414_v14 = vadd.f32 %v5424_v28, %v4807_v25  ;;  %v4809_v52 = vadd.f32 %v4375_v51, %v8500_v15  ;;  %v4377_v41 = vpop.f32.mrb[27].mxu0 }
 0x465   : > { %v4415_v4 = vadd.f32 %v5425_v53, %v4808_v30  ;;  %v4810_v59 = vadd.f32 %v4377_v41, %v8503_v12 }
 0x466   : > { %4446 = vst [vmem:[%s8511_s19 + $0xc0] sm:$0xff] %v4414_v14  ;;  %v4416_v58 = vadd.f32 %v5426_v10, %v4809_v52 }
 0x467   : > { %4447 = vst [vmem:[%s8511_s19 + $0xc8] sm:$0xff] %v4415_v4  ;;  %v4417_v11 = vadd.f32 %v5427_v37, %v4810_v59 }
 0x468   : > { %4448 = vst [vmem:[%s8511_s19 + $0xd0] sm:$0xff] %v4416_v58 }
 0x469   : > { %4449 = vst [vmem:[%s8511_s19 + $0xd8] sm:$0xff] %v4417_v11  ;;  %v4381_v9 = vpop.f32.mrb[28].mxu0 }
 0x46a   : > { %v4811_v5 = vadd.f32 %v4381_v9, %v8500_v15  ;;  %v4383_v23 = vpop.f32.mrb[29].mxu0 }
 0x46b   : > { %v4812_v19 = vadd.f32 %v4383_v23, %v8503_v12  ;;  %v4385_v40 = vpop.f32.mrb[30].mxu0 }
 0x46c   : > { %v4418_v0 = vadd.f32 %v5428_v21, %v4811_v5  ;;  %v4813_v49 = vadd.f32 %v4385_v40, %v8500_v15  ;;  %v4387_v18 = vpop.f32.mrb[31].mxu0 }
 0x46d   : > { %v4419_v1 = vadd.f32 %v5429_v3, %v4812_v19  ;;  %v4814_v32 = vadd.f32 %v4387_v18, %v8503_v12 }
 0x46e   : > { %4450 = vst [vmem:[%s8511_s19 + $0xe0] sm:$0xff] %v4418_v0  ;;  %v4420_v24 = vadd.f32 %v5430_v29, %v4813_v49 }
 0x46f   : > { %4451 = vst [vmem:[%s8511_s19 + $0xe8] sm:$0xff] %v4419_v1  ;;  %v4421_v17 = vadd.f32 %v5431_v57, %v4814_v32 }
 0x470   : > { %4452 = vst [vmem:[%s8511_s19 + $0xf0] sm:$0xff] %v4420_v24 }
 0x471   : > { %4453 = vst [vmem:[%s8511_s19 + $0xf8] sm:$0xff] %v4421_v17 }
 0x472 PF: > { %s17_s24 = sadd.s32 1, %s5438_s24  }
 0x473   : > { %p14_p4 = scmp.ge.s32.totalorder %s17_s24, 4  }
 0x475   :  { %16 = sbr.rel (!%p14_p4) target bundleno = 1 (0x1), region = 78 }

</bundles_post_ra>
